<compile_context>
chip_gen: v7x
topology: tpu7x:2x2x1
jax: 0.10.0
libtpu: 0.0.40
codegen_flags: <defaults>
</compile_context>

<pallas_src>
import functools

import jax
import jax.numpy as jnp
from jax import lax
from jax.experimental import pallas as pl
from jax.experimental.pallas import tpu as pltpu


def mha_kernel(x_ref, wqkv_ref, bqkv_ref, wp_ref, bp_ref, o_ref,
               *, n_heads, head_dim):
    # x_ref: (NB, T, C) bf16; wqkv: (C, 3C) bf16; bqkv: (1, 3C) f32
    # wp: (C, C) bf16; bp: (1, C) f32; o_ref: (NB, T, C) bf16
    NB, T, C = x_ref.shape
    H, D = n_heads, head_dim

    # (NB, T, C) -> (NB*T, C): fill the MXU M dimension for both projections.
    x = x_ref[...].reshape(NB * T, C)                                 # bf16

    # --- fused QKV projection (attention scale pre-folded into Q columns) ---
    qkv = jnp.dot(x, wqkv_ref[...], preferred_element_type=jnp.float32)
    qkv = (qkv + bqkv_ref[...]).astype(jnp.bfloat16)   # single cast, bf16 live

    q = qkv[:, 0 * C:1 * C]
    k = qkv[:, 1 * C:2 * C]
    v = qkv[:, 2 * C:3 * C]

    # --- causal mask, built once, shared across all (batch, head) pairs ---
    row = lax.broadcasted_iota(jnp.int32, (T, T), 0)
    col = lax.broadcasted_iota(jnp.int32, (T, T), 1)
    causal = col <= row
    neg_big = jnp.float32(-0.5 * jnp.finfo(jnp.float32).max)  # finite, NaN-safe

    # Q @ K^T with both last dims contracted: no explicit transpose of K.
    dn_qk = (((1,), (1,)), ((), ()))

    outs = []
    for b in range(NB):
        rows = slice(b * T, (b + 1) * T)
        heads = []
        for h in range(H):
            lanes = slice(h * D, (h + 1) * D)
            qh = q[rows, lanes]                                       # (T, D) bf16
            kh = k[rows, lanes]                                       # (T, D) bf16
            vh = v[rows, lanes]                                       # (T, D) bf16

            s = lax.dot_general(qh, kh, dn_qk,
                                preferred_element_type=jnp.float32)   # (T, T) f32
            s = jnp.where(causal, s, neg_big)
            m = jnp.max(s, axis=-1, keepdims=True)
            p = jnp.exp(s - m)                                        # unnormalized
            denom = jnp.sum(p, axis=-1, keepdims=True)                # (T, 1)

            o_h = jnp.dot(p.astype(jnp.bfloat16), vh,
                          preferred_element_type=jnp.float32)         # (T, D) f32
            # Normalize after P.V: scales (T, D) instead of (T, T); EUP recip.
            o_h = o_h * pl.reciprocal(denom, approx=True)
            heads.append(o_h.astype(jnp.bfloat16))
        outs.append(jnp.concatenate(heads, axis=1))                   # (T, C) bf16

    merged = jnp.concatenate(outs, axis=0)                            # (NB*T, C) bf16

    # --- output projection ---
    out = jnp.dot(merged, wp_ref[...], preferred_element_type=jnp.float32)
    out = out + bp_ref[...]
    o_ref[...] = out.astype(o_ref.dtype).reshape(NB, T, C)


def mha_forward(x, params, n_heads, *, batch_block=2):
    """x: (B, T, C) float32. params: transposed (C, C) weights + (C,) biases (f32).

    Returns bf16 (B, T, C) (output writeback is halved; kernel is DMA/overhead
    bound at these shapes).
    """
    B, T, C = x.shape
    head_dim = C // n_heads
    scale = head_dim ** -0.5

    batch_block = min(batch_block, B)
    assert B % batch_block == 0, "batch_block must divide B"

    # Fold the attention scale into the Q projection and fuse Q/K/V weights.
    wqkv = jnp.concatenate(
        [params['wq_t'] * scale, params['wk_t'], params['wv_t']], axis=1
    ).astype(jnp.bfloat16)                                    # (C, 3C)
    bqkv = jnp.concatenate(
        [params['bq'] * scale, params['bk'], params['bv']]
    ).reshape(1, 3 * C).astype(jnp.float32)                   # (1, 3C)
    wp = params['wp_t'].astype(jnp.bfloat16)                  # (C, C)
    bp = params['bp'].reshape(1, C).astype(jnp.float32)       # (1, C)

    x_bf16 = x.astype(jnp.bfloat16)

    kernel = functools.partial(mha_kernel, n_heads=n_heads, head_dim=head_dim)

    # Advisory cost estimate for XLA scheduling.
    flops = 2 * B * T * C * (3 * C)                      # fused QKV projection
    flops += 2 * B * n_heads * T * T * head_dim * 2      # QK^T and P.V
    flops += 2 * B * T * C * C                           # output projection
    bytes_accessed = (x_bf16.size * 2 + wqkv.size * 2 + wp.size * 2
                      + bqkv.size * 4 + bp.size * 4 + B * T * C * 2)

    return pl.pallas_call(
        kernel,
        out_shape=jax.ShapeDtypeStruct((B, T, C), jnp.bfloat16),
        grid_spec=pltpu.PrefetchScalarGridSpec(
            num_scalar_prefetch=0,
            grid=(B // batch_block,),
            in_specs=[
                pl.BlockSpec((batch_block, T, C), lambda b: (b, 0, 0)),  # x
                pl.BlockSpec((C, 3 * C), lambda b: (0, 0)),   # fused QKV weight
                pl.BlockSpec((1, 3 * C), lambda b: (0, 0)),   # fused QKV bias
                pl.BlockSpec((C, C), lambda b: (0, 0)),       # proj weight
                pl.BlockSpec((1, C), lambda b: (0, 0)),       # proj bias
            ],
            out_specs=pl.BlockSpec((batch_block, T, C), lambda b: (b, 0, 0)),
        ),
        compiler_params=pltpu.CompilerParams(
            dimension_semantics=("parallel",),  # independent batch blocks
        ),
        cost_estimate=pl.CostEstimate(
            flops=flops,
            transcendentals=B * n_heads * T * T,
            bytes_accessed=bytes_accessed,
        ),
    )(x_bf16, wqkv, bqkv, wp, bp)


def init_params(key, d_model):
    """Deterministic init matching nn.Linear: W (out,in) uniform(+-1/sqrt(in))."""
    bound = 1.0 / (d_model ** 0.5)
    keys = jax.random.split(key, 8)

    def lin(kw, kb):
        w = jax.random.uniform(kw, (d_model, d_model), jnp.float32, -bound, bound)
        b = jax.random.uniform(kb, (d_model,), jnp.float32, -bound, bound)
        return w, b

    wq, bq = lin(keys[0], keys[1])
    wk, bk = lin(keys[2], keys[3])
    wv, bv = lin(keys[4], keys[5])
    wp, bp = lin(keys[6], keys[7])
    # pre-transpose so the kernel does x @ W_t  (== x @ W.T in torch convention)
    return dict(wq_t=wq.T, bq=bq, wk_t=wk.T, bk=bk,
                wv_t=wv.T, bv=bv, wp_t=wp.T, bp=bp)


def mha_reference(x, params, n_heads):
    """Pure-JAX f32 reference mirroring the PyTorch forward exactly."""
    B, T, C = x.shape
    D = C // n_heads
    q = x @ params['wq_t'] + params['bq']
    k = x @ params['wk_t'] + params['bk']
    v = x @ params['wv_t'] + params['bv']

    def split(t):
        return jnp.transpose(t.reshape(B, T, n_heads, D), (0, 2, 1, 3))

    q, k, v = split(q), split(k), split(v)
    wei = jnp.einsum('bhtd,bhsd->bhts', q, k) * (D ** -0.5)
    mask = jnp.triu(jnp.full((T, T), -jnp.inf, jnp.float32), k=1)
    wei = wei + mask[None, None]
    wei = jax.nn.softmax(wei, axis=-1)
    attn = jnp.einsum('bhts,bhsd->bhtd', wei, v)
    merged = jnp.transpose(attn, (0, 2, 1, 3)).reshape(B, T, C)
    return merged @ params['wp_t'] + params['bp']


if __name__ == "__main__":
    # Shapes per the module instantiation: block_size (seq) = 128,
    # n_embd = 256, n_head = 4, batch = 2.
    B, T, C, H = 2, 128, 256, 4

    key = jax.random.PRNGKey(0)
    k_x, k_p = jax.random.split(key)
    x = jax.random.normal(k_x, (B, T, C), jnp.float32)
    params = init_params(k_p, C)

    out = mha_forward(x, params, H)
    out = jax.block_until_ready(out)

    ref = mha_reference(x, params, H)
    assert out.shape == (B, T, C)
    assert out.dtype == jnp.bfloat16
    # bf16 matmul operands + bf16 output (f32 accumulation): bf16 tolerance.
    assert jnp.allclose(out.astype(jnp.float32), ref, rtol=2e-2, atol=2.5e-2), \
        "mismatch vs reference"

    print("KERNEL_OK")
</pallas_src>

<mosaic_0001>
module attributes {stable_mosaic.version = 11 : i64} {
  func.func @mha_kernel(%arg0: i32, %arg1: memref<2x128x256xbf16, #tpu.memory_space<vmem>>, %arg2: memref<256x768xbf16, #tpu.memory_space<vmem>>, %arg3: memref<1x768xf32, #tpu.memory_space<vmem>>, %arg4: memref<256x256xbf16, #tpu.memory_space<vmem>>, %arg5: memref<1x256xf32, #tpu.memory_space<vmem>>, %arg6: memref<2x128x256xbf16, #tpu.memory_space<vmem>>) attributes {dimension_semantics = [#tpu.dimension_semantics<parallel>], iteration_bounds = array<i64: 1>, scalar_prefetch = 0 : i64, scratch_operands = 0 : i64, tpu.core_type = #tpu.core_type<tc>, window_params = [{transform_indices = @transform_0, window_bounds = array<i64: 2, 128, 256>}, {pipeline_mode = #tpu.pipeline_mode<synchronous>, transform_indices = @transform_1, window_bounds = array<i64: 256, 768>}, {pipeline_mode = #tpu.pipeline_mode<synchronous>, transform_indices = @transform_2, window_bounds = array<i64: 1, 768>}, {pipeline_mode = #tpu.pipeline_mode<synchronous>, transform_indices = @transform_3, window_bounds = array<i64: 256, 256>}, {pipeline_mode = #tpu.pipeline_mode<synchronous>, transform_indices = @transform_4, window_bounds = array<i64: 1, 256>}, {transform_indices = @transform_5, window_bounds = array<i64: 2, 128, 256>}]} {
    %c0 = arith.constant 0 : index
    %c0_0 = arith.constant 0 : index
    %c0_1 = arith.constant 0 : index
    %0 = vector.load %arg1[%c0, %c0_0, %c0_1] : memref<2x128x256xbf16, #tpu.memory_space<vmem>>, vector<2x128x256xbf16>
    %1 = vector.shape_cast %0 : vector<2x128x256xbf16> to vector<256x256xbf16>
    %c0_2 = arith.constant 0 : index
    %c0_3 = arith.constant 0 : index
    %2 = vector.load %arg2[%c0_2, %c0_3] : memref<256x768xbf16, #tpu.memory_space<vmem>>, vector<256x768xbf16>
    %cst = arith.constant dense<0.000000e+00> : vector<256x768xf32>
    %3 = tpu.matmul %1, %2, %cst {dimension_numbers = #tpu.dot_dimension_numbers<[1], [0], [0], [1], [0, 0, 1, 1], [], []>} : vector<256x256xbf16>, vector<256x768xbf16>, vector<256x768xf32> -> vector<256x768xf32>
    %c0_4 = arith.constant 0 : index
    %c0_5 = arith.constant 0 : index
    %4 = vector.load %arg3[%c0_4, %c0_5] : memref<1x768xf32, #tpu.memory_space<vmem>>, vector<1x768xf32>
    %5 = vector.broadcast %4 : vector<1x768xf32> to vector<256x768xf32>
    %6 = arith.addf %3, %5 : vector<256x768xf32>
    %7 = arith.truncf %6 : vector<256x768xf32> to vector<256x768xbf16>
    %8 = vector.extract_strided_slice %7 {offsets = [0, 0], sizes = [256, 256], strides = [1, 1]} : vector<256x768xbf16> to vector<256x256xbf16>
    %9 = vector.extract_strided_slice %7 {offsets = [0, 256], sizes = [256, 256], strides = [1, 1]} : vector<256x768xbf16> to vector<256x256xbf16>
    %10 = vector.extract_strided_slice %7 {offsets = [0, 512], sizes = [256, 256], strides = [1, 1]} : vector<256x768xbf16> to vector<256x256xbf16>
    %11 = tpu.iota {dimensions = array<i32: 0>} : vector<128x128xi32>
    %12 = tpu.iota {dimensions = array<i32: 1>} : vector<128x128xi32>
    %13 = arith.cmpi sle, %12, %11 : vector<128x128xi32>
    %14 = vector.extract_strided_slice %8 {offsets = [0, 0], sizes = [128, 64], strides = [1, 1]} : vector<256x256xbf16> to vector<128x64xbf16>
    %15 = vector.extract_strided_slice %9 {offsets = [0, 0], sizes = [128, 64], strides = [1, 1]} : vector<256x256xbf16> to vector<128x64xbf16>
    %16 = vector.extract_strided_slice %10 {offsets = [0, 0], sizes = [128, 64], strides = [1, 1]} : vector<256x256xbf16> to vector<128x64xbf16>
    %cst_6 = arith.constant dense<0.000000e+00> : vector<128x128xf32>
    %17 = tpu.matmul %14, %15, %cst_6 {dimension_numbers = #tpu.dot_dimension_numbers<[1], [1], [0], [0], [0, 0, 1, 0], [], []>} : vector<128x64xbf16>, vector<128x64xbf16>, vector<128x128xf32> -> vector<128x128xf32>
    %cst_7 = arith.constant -1.70141173E+38 : f32
    %18 = vector.broadcast %cst_7 : f32 to vector<128x128xf32>
    %19 = arith.select %13, %17, %18 : vector<128x128xi1>, vector<128x128xf32>
    %cst_8 = arith.constant dense<0xFF800000> : vector<128xf32>
    %20 = vector.multi_reduction <maximumf>, %19, %cst_8 [1] : vector<128x128xf32> to vector<128xf32>
    %21 = vector.shape_cast %20 : vector<128xf32> to vector<128x1xf32>
    %22 = vector.broadcast %21 : vector<128x1xf32> to vector<128x128xf32>
    %23 = arith.subf %19, %22 : vector<128x128xf32>
    %24 = math.exp %23 : vector<128x128xf32>
    %cst_9 = arith.constant dense<0.000000e+00> : vector<128xf32>
    %25 = vector.multi_reduction <add>, %24, %cst_9 [1] : vector<128x128xf32> to vector<128xf32>
    %26 = vector.shape_cast %25 : vector<128xf32> to vector<128x1xf32>
    %27 = arith.truncf %24 : vector<128x128xf32> to vector<128x128xbf16>
    %cst_10 = arith.constant dense<0.000000e+00> : vector<128x64xf32>
    %28 = tpu.matmul %27, %16, %cst_10 {dimension_numbers = #tpu.dot_dimension_numbers<[1], [0], [0], [1], [0, 0, 1, 1], [], []>} : vector<128x128xbf16>, vector<128x64xbf16>, vector<128x64xf32> -> vector<128x64xf32>
    %29 = tpu.reciprocal %26 {approx = true} : vector<128x1xf32> -> vector<128x1xf32>
    %30 = vector.broadcast %29 : vector<128x1xf32> to vector<128x64xf32>
    %31 = arith.mulf %28, %30 : vector<128x64xf32>
    %32 = arith.truncf %31 : vector<128x64xf32> to vector<128x64xbf16>
    %33 = vector.extract_strided_slice %8 {offsets = [0, 64], sizes = [128, 64], strides = [1, 1]} : vector<256x256xbf16> to vector<128x64xbf16>
    %34 = vector.extract_strided_slice %9 {offsets = [0, 64], sizes = [128, 64], strides = [1, 1]} : vector<256x256xbf16> to vector<128x64xbf16>
    %35 = vector.extract_strided_slice %10 {offsets = [0, 64], sizes = [128, 64], strides = [1, 1]} : vector<256x256xbf16> to vector<128x64xbf16>
    %cst_11 = arith.constant dense<0.000000e+00> : vector<128x128xf32>
    %36 = tpu.matmul %33, %34, %cst_11 {dimension_numbers = #tpu.dot_dimension_numbers<[1], [1], [0], [0], [0, 0, 1, 0], [], []>} : vector<128x64xbf16>, vector<128x64xbf16>, vector<128x128xf32> -> vector<128x128xf32>
    %cst_12 = arith.constant -1.70141173E+38 : f32
    %37 = vector.broadcast %cst_12 : f32 to vector<128x128xf32>
    %38 = arith.select %13, %36, %37 : vector<128x128xi1>, vector<128x128xf32>
    %cst_13 = arith.constant dense<0xFF800000> : vector<128xf32>
    %39 = vector.multi_reduction <maximumf>, %38, %cst_13 [1] : vector<128x128xf32> to vector<128xf32>
    %40 = vector.shape_cast %39 : vector<128xf32> to vector<128x1xf32>
    %41 = vector.broadcast %40 : vector<128x1xf32> to vector<128x128xf32>
    %42 = arith.subf %38, %41 : vector<128x128xf32>
    %43 = math.exp %42 : vector<128x128xf32>
    %cst_14 = arith.constant dense<0.000000e+00> : vector<128xf32>
    %44 = vector.multi_reduction <add>, %43, %cst_14 [1] : vector<128x128xf32> to vector<128xf32>
    %45 = vector.shape_cast %44 : vector<128xf32> to vector<128x1xf32>
    %46 = arith.truncf %43 : vector<128x128xf32> to vector<128x128xbf16>
    %cst_15 = arith.constant dense<0.000000e+00> : vector<128x64xf32>
    %47 = tpu.matmul %46, %35, %cst_15 {dimension_numbers = #tpu.dot_dimension_numbers<[1], [0], [0], [1], [0, 0, 1, 1], [], []>} : vector<128x128xbf16>, vector<128x64xbf16>, vector<128x64xf32> -> vector<128x64xf32>
    %48 = tpu.reciprocal %45 {approx = true} : vector<128x1xf32> -> vector<128x1xf32>
    %49 = vector.broadcast %48 : vector<128x1xf32> to vector<128x64xf32>
    %50 = arith.mulf %47, %49 : vector<128x64xf32>
    %51 = arith.truncf %50 : vector<128x64xf32> to vector<128x64xbf16>
    %52 = vector.extract_strided_slice %8 {offsets = [0, 128], sizes = [128, 64], strides = [1, 1]} : vector<256x256xbf16> to vector<128x64xbf16>
    %53 = vector.extract_strided_slice %9 {offsets = [0, 128], sizes = [128, 64], strides = [1, 1]} : vector<256x256xbf16> to vector<128x64xbf16>
    %54 = vector.extract_strided_slice %10 {offsets = [0, 128], sizes = [128, 64], strides = [1, 1]} : vector<256x256xbf16> to vector<128x64xbf16>
    %cst_16 = arith.constant dense<0.000000e+00> : vector<128x128xf32>
    %55 = tpu.matmul %52, %53, %cst_16 {dimension_numbers = #tpu.dot_dimension_numbers<[1], [1], [0], [0], [0, 0, 1, 0], [], []>} : vector<128x64xbf16>, vector<128x64xbf16>, vector<128x128xf32> -> vector<128x128xf32>
    %cst_17 = arith.constant -1.70141173E+38 : f32
    %56 = vector.broadcast %cst_17 : f32 to vector<128x128xf32>
    %57 = arith.select %13, %55, %56 : vector<128x128xi1>, vector<128x128xf32>
    %cst_18 = arith.constant dense<0xFF800000> : vector<128xf32>
    %58 = vector.multi_reduction <maximumf>, %57, %cst_18 [1] : vector<128x128xf32> to vector<128xf32>
    %59 = vector.shape_cast %58 : vector<128xf32> to vector<128x1xf32>
    %60 = vector.broadcast %59 : vector<128x1xf32> to vector<128x128xf32>
    %61 = arith.subf %57, %60 : vector<128x128xf32>
    %62 = math.exp %61 : vector<128x128xf32>
    %cst_19 = arith.constant dense<0.000000e+00> : vector<128xf32>
    %63 = vector.multi_reduction <add>, %62, %cst_19 [1] : vector<128x128xf32> to vector<128xf32>
    %64 = vector.shape_cast %63 : vector<128xf32> to vector<128x1xf32>
    %65 = arith.truncf %62 : vector<128x128xf32> to vector<128x128xbf16>
    %cst_20 = arith.constant dense<0.000000e+00> : vector<128x64xf32>
    %66 = tpu.matmul %65, %54, %cst_20 {dimension_numbers = #tpu.dot_dimension_numbers<[1], [0], [0], [1], [0, 0, 1, 1], [], []>} : vector<128x128xbf16>, vector<128x64xbf16>, vector<128x64xf32> -> vector<128x64xf32>
    %67 = tpu.reciprocal %64 {approx = true} : vector<128x1xf32> -> vector<128x1xf32>
    %68 = vector.broadcast %67 : vector<128x1xf32> to vector<128x64xf32>
    %69 = arith.mulf %66, %68 : vector<128x64xf32>
    %70 = arith.truncf %69 : vector<128x64xf32> to vector<128x64xbf16>
    %71 = vector.extract_strided_slice %8 {offsets = [0, 192], sizes = [128, 64], strides = [1, 1]} : vector<256x256xbf16> to vector<128x64xbf16>
    %72 = vector.extract_strided_slice %9 {offsets = [0, 192], sizes = [128, 64], strides = [1, 1]} : vector<256x256xbf16> to vector<128x64xbf16>
    %73 = vector.extract_strided_slice %10 {offsets = [0, 192], sizes = [128, 64], strides = [1, 1]} : vector<256x256xbf16> to vector<128x64xbf16>
    %cst_21 = arith.constant dense<0.000000e+00> : vector<128x128xf32>
    %74 = tpu.matmul %71, %72, %cst_21 {dimension_numbers = #tpu.dot_dimension_numbers<[1], [1], [0], [0], [0, 0, 1, 0], [], []>} : vector<128x64xbf16>, vector<128x64xbf16>, vector<128x128xf32> -> vector<128x128xf32>
    %cst_22 = arith.constant -1.70141173E+38 : f32
    %75 = vector.broadcast %cst_22 : f32 to vector<128x128xf32>
    %76 = arith.select %13, %74, %75 : vector<128x128xi1>, vector<128x128xf32>
    %cst_23 = arith.constant dense<0xFF800000> : vector<128xf32>
    %77 = vector.multi_reduction <maximumf>, %76, %cst_23 [1] : vector<128x128xf32> to vector<128xf32>
    %78 = vector.shape_cast %77 : vector<128xf32> to vector<128x1xf32>
    %79 = vector.broadcast %78 : vector<128x1xf32> to vector<128x128xf32>
    %80 = arith.subf %76, %79 : vector<128x128xf32>
    %81 = math.exp %80 : vector<128x128xf32>
    %cst_24 = arith.constant dense<0.000000e+00> : vector<128xf32>
    %82 = vector.multi_reduction <add>, %81, %cst_24 [1] : vector<128x128xf32> to vector<128xf32>
    %83 = vector.shape_cast %82 : vector<128xf32> to vector<128x1xf32>
    %84 = arith.truncf %81 : vector<128x128xf32> to vector<128x128xbf16>
    %cst_25 = arith.constant dense<0.000000e+00> : vector<128x64xf32>
    %85 = tpu.matmul %84, %73, %cst_25 {dimension_numbers = #tpu.dot_dimension_numbers<[1], [0], [0], [1], [0, 0, 1, 1], [], []>} : vector<128x128xbf16>, vector<128x64xbf16>, vector<128x64xf32> -> vector<128x64xf32>
    %86 = tpu.reciprocal %83 {approx = true} : vector<128x1xf32> -> vector<128x1xf32>
    %87 = vector.broadcast %86 : vector<128x1xf32> to vector<128x64xf32>
    %88 = arith.mulf %85, %87 : vector<128x64xf32>
    %89 = arith.truncf %88 : vector<128x64xf32> to vector<128x64xbf16>
    %90 = tpu.concatenate %32, %51, %70, %89 in 1 : vector<128x64xbf16>, vector<128x64xbf16>, vector<128x64xbf16>, vector<128x64xbf16> -> vector<128x256xbf16>
    %91 = vector.extract_strided_slice %8 {offsets = [128, 0], sizes = [128, 64], strides = [1, 1]} : vector<256x256xbf16> to vector<128x64xbf16>
    %92 = vector.extract_strided_slice %9 {offsets = [128, 0], sizes = [128, 64], strides = [1, 1]} : vector<256x256xbf16> to vector<128x64xbf16>
    %93 = vector.extract_strided_slice %10 {offsets = [128, 0], sizes = [128, 64], strides = [1, 1]} : vector<256x256xbf16> to vector<128x64xbf16>
    %cst_26 = arith.constant dense<0.000000e+00> : vector<128x128xf32>
    %94 = tpu.matmul %91, %92, %cst_26 {dimension_numbers = #tpu.dot_dimension_numbers<[1], [1], [0], [0], [0, 0, 1, 0], [], []>} : vector<128x64xbf16>, vector<128x64xbf16>, vector<128x128xf32> -> vector<128x128xf32>
    %cst_27 = arith.constant -1.70141173E+38 : f32
    %95 = vector.broadcast %cst_27 : f32 to vector<128x128xf32>
    %96 = arith.select %13, %94, %95 : vector<128x128xi1>, vector<128x128xf32>
    %cst_28 = arith.constant dense<0xFF800000> : vector<128xf32>
    %97 = vector.multi_reduction <maximumf>, %96, %cst_28 [1] : vector<128x128xf32> to vector<128xf32>
    %98 = vector.shape_cast %97 : vector<128xf32> to vector<128x1xf32>
    %99 = vector.broadcast %98 : vector<128x1xf32> to vector<128x128xf32>
    %100 = arith.subf %96, %99 : vector<128x128xf32>
    %101 = math.exp %100 : vector<128x128xf32>
    %cst_29 = arith.constant dense<0.000000e+00> : vector<128xf32>
    %102 = vector.multi_reduction <add>, %101, %cst_29 [1] : vector<128x128xf32> to vector<128xf32>
    %103 = vector.shape_cast %102 : vector<128xf32> to vector<128x1xf32>
    %104 = arith.truncf %101 : vector<128x128xf32> to vector<128x128xbf16>
    %cst_30 = arith.constant dense<0.000000e+00> : vector<128x64xf32>
    %105 = tpu.matmul %104, %93, %cst_30 {dimension_numbers = #tpu.dot_dimension_numbers<[1], [0], [0], [1], [0, 0, 1, 1], [], []>} : vector<128x128xbf16>, vector<128x64xbf16>, vector<128x64xf32> -> vector<128x64xf32>
    %106 = tpu.reciprocal %103 {approx = true} : vector<128x1xf32> -> vector<128x1xf32>
    %107 = vector.broadcast %106 : vector<128x1xf32> to vector<128x64xf32>
    %108 = arith.mulf %105, %107 : vector<128x64xf32>
    %109 = arith.truncf %108 : vector<128x64xf32> to vector<128x64xbf16>
    %110 = vector.extract_strided_slice %8 {offsets = [128, 64], sizes = [128, 64], strides = [1, 1]} : vector<256x256xbf16> to vector<128x64xbf16>
    %111 = vector.extract_strided_slice %9 {offsets = [128, 64], sizes = [128, 64], strides = [1, 1]} : vector<256x256xbf16> to vector<128x64xbf16>
    %112 = vector.extract_strided_slice %10 {offsets = [128, 64], sizes = [128, 64], strides = [1, 1]} : vector<256x256xbf16> to vector<128x64xbf16>
    %cst_31 = arith.constant dense<0.000000e+00> : vector<128x128xf32>
    %113 = tpu.matmul %110, %111, %cst_31 {dimension_numbers = #tpu.dot_dimension_numbers<[1], [1], [0], [0], [0, 0, 1, 0], [], []>} : vector<128x64xbf16>, vector<128x64xbf16>, vector<128x128xf32> -> vector<128x128xf32>
    %cst_32 = arith.constant -1.70141173E+38 : f32
    %114 = vector.broadcast %cst_32 : f32 to vector<128x128xf32>
    %115 = arith.select %13, %113, %114 : vector<128x128xi1>, vector<128x128xf32>
    %cst_33 = arith.constant dense<0xFF800000> : vector<128xf32>
    %116 = vector.multi_reduction <maximumf>, %115, %cst_33 [1] : vector<128x128xf32> to vector<128xf32>
    %117 = vector.shape_cast %116 : vector<128xf32> to vector<128x1xf32>
    %118 = vector.broadcast %117 : vector<128x1xf32> to vector<128x128xf32>
    %119 = arith.subf %115, %118 : vector<128x128xf32>
    %120 = math.exp %119 : vector<128x128xf32>
    %cst_34 = arith.constant dense<0.000000e+00> : vector<128xf32>
    %121 = vector.multi_reduction <add>, %120, %cst_34 [1] : vector<128x128xf32> to vector<128xf32>
    %122 = vector.shape_cast %121 : vector<128xf32> to vector<128x1xf32>
    %123 = arith.truncf %120 : vector<128x128xf32> to vector<128x128xbf16>
    %cst_35 = arith.constant dense<0.000000e+00> : vector<128x64xf32>
    %124 = tpu.matmul %123, %112, %cst_35 {dimension_numbers = #tpu.dot_dimension_numbers<[1], [0], [0], [1], [0, 0, 1, 1], [], []>} : vector<128x128xbf16>, vector<128x64xbf16>, vector<128x64xf32> -> vector<128x64xf32>
    %125 = tpu.reciprocal %122 {approx = true} : vector<128x1xf32> -> vector<128x1xf32>
    %126 = vector.broadcast %125 : vector<128x1xf32> to vector<128x64xf32>
    %127 = arith.mulf %124, %126 : vector<128x64xf32>
    %128 = arith.truncf %127 : vector<128x64xf32> to vector<128x64xbf16>
    %129 = vector.extract_strided_slice %8 {offsets = [128, 128], sizes = [128, 64], strides = [1, 1]} : vector<256x256xbf16> to vector<128x64xbf16>
    %130 = vector.extract_strided_slice %9 {offsets = [128, 128], sizes = [128, 64], strides = [1, 1]} : vector<256x256xbf16> to vector<128x64xbf16>
    %131 = vector.extract_strided_slice %10 {offsets = [128, 128], sizes = [128, 64], strides = [1, 1]} : vector<256x256xbf16> to vector<128x64xbf16>
    %cst_36 = arith.constant dense<0.000000e+00> : vector<128x128xf32>
    %132 = tpu.matmul %129, %130, %cst_36 {dimension_numbers = #tpu.dot_dimension_numbers<[1], [1], [0], [0], [0, 0, 1, 0], [], []>} : vector<128x64xbf16>, vector<128x64xbf16>, vector<128x128xf32> -> vector<128x128xf32>
    %cst_37 = arith.constant -1.70141173E+38 : f32
    %133 = vector.broadcast %cst_37 : f32 to vector<128x128xf32>
    %134 = arith.select %13, %132, %133 : vector<128x128xi1>, vector<128x128xf32>
    %cst_38 = arith.constant dense<0xFF800000> : vector<128xf32>
    %135 = vector.multi_reduction <maximumf>, %134, %cst_38 [1] : vector<128x128xf32> to vector<128xf32>
    %136 = vector.shape_cast %135 : vector<128xf32> to vector<128x1xf32>
    %137 = vector.broadcast %136 : vector<128x1xf32> to vector<128x128xf32>
    %138 = arith.subf %134, %137 : vector<128x128xf32>
    %139 = math.exp %138 : vector<128x128xf32>
    %cst_39 = arith.constant dense<0.000000e+00> : vector<128xf32>
    %140 = vector.multi_reduction <add>, %139, %cst_39 [1] : vector<128x128xf32> to vector<128xf32>
    %141 = vector.shape_cast %140 : vector<128xf32> to vector<128x1xf32>
    %142 = arith.truncf %139 : vector<128x128xf32> to vector<128x128xbf16>
    %cst_40 = arith.constant dense<0.000000e+00> : vector<128x64xf32>
    %143 = tpu.matmul %142, %131, %cst_40 {dimension_numbers = #tpu.dot_dimension_numbers<[1], [0], [0], [1], [0, 0, 1, 1], [], []>} : vector<128x128xbf16>, vector<128x64xbf16>, vector<128x64xf32> -> vector<128x64xf32>
    %144 = tpu.reciprocal %141 {approx = true} : vector<128x1xf32> -> vector<128x1xf32>
    %145 = vector.broadcast %144 : vector<128x1xf32> to vector<128x64xf32>
    %146 = arith.mulf %143, %145 : vector<128x64xf32>
    %147 = arith.truncf %146 : vector<128x64xf32> to vector<128x64xbf16>
    %148 = vector.extract_strided_slice %8 {offsets = [128, 192], sizes = [128, 64], strides = [1, 1]} : vector<256x256xbf16> to vector<128x64xbf16>
    %149 = vector.extract_strided_slice %9 {offsets = [128, 192], sizes = [128, 64], strides = [1, 1]} : vector<256x256xbf16> to vector<128x64xbf16>
    %150 = vector.extract_strided_slice %10 {offsets = [128, 192], sizes = [128, 64], strides = [1, 1]} : vector<256x256xbf16> to vector<128x64xbf16>
    %cst_41 = arith.constant dense<0.000000e+00> : vector<128x128xf32>
    %151 = tpu.matmul %148, %149, %cst_41 {dimension_numbers = #tpu.dot_dimension_numbers<[1], [1], [0], [0], [0, 0, 1, 0], [], []>} : vector<128x64xbf16>, vector<128x64xbf16>, vector<128x128xf32> -> vector<128x128xf32>
    %cst_42 = arith.constant -1.70141173E+38 : f32
    %152 = vector.broadcast %cst_42 : f32 to vector<128x128xf32>
    %153 = arith.select %13, %151, %152 : vector<128x128xi1>, vector<128x128xf32>
    %cst_43 = arith.constant dense<0xFF800000> : vector<128xf32>
    %154 = vector.multi_reduction <maximumf>, %153, %cst_43 [1] : vector<128x128xf32> to vector<128xf32>
    %155 = vector.shape_cast %154 : vector<128xf32> to vector<128x1xf32>
    %156 = vector.broadcast %155 : vector<128x1xf32> to vector<128x128xf32>
    %157 = arith.subf %153, %156 : vector<128x128xf32>
    %158 = math.exp %157 : vector<128x128xf32>
    %cst_44 = arith.constant dense<0.000000e+00> : vector<128xf32>
    %159 = vector.multi_reduction <add>, %158, %cst_44 [1] : vector<128x128xf32> to vector<128xf32>
    %160 = vector.shape_cast %159 : vector<128xf32> to vector<128x1xf32>
    %161 = arith.truncf %158 : vector<128x128xf32> to vector<128x128xbf16>
    %cst_45 = arith.constant dense<0.000000e+00> : vector<128x64xf32>
    %162 = tpu.matmul %161, %150, %cst_45 {dimension_numbers = #tpu.dot_dimension_numbers<[1], [0], [0], [1], [0, 0, 1, 1], [], []>} : vector<128x128xbf16>, vector<128x64xbf16>, vector<128x64xf32> -> vector<128x64xf32>
    %163 = tpu.reciprocal %160 {approx = true} : vector<128x1xf32> -> vector<128x1xf32>
    %164 = vector.broadcast %163 : vector<128x1xf32> to vector<128x64xf32>
    %165 = arith.mulf %162, %164 : vector<128x64xf32>
    %166 = arith.truncf %165 : vector<128x64xf32> to vector<128x64xbf16>
    %167 = tpu.concatenate %109, %128, %147, %166 in 1 : vector<128x64xbf16>, vector<128x64xbf16>, vector<128x64xbf16>, vector<128x64xbf16> -> vector<128x256xbf16>
    %168 = tpu.concatenate %90, %167 in 0 : vector<128x256xbf16>, vector<128x256xbf16> -> vector<256x256xbf16>
    %c0_46 = arith.constant 0 : index
    %c0_47 = arith.constant 0 : index
    %169 = vector.load %arg4[%c0_46, %c0_47] : memref<256x256xbf16, #tpu.memory_space<vmem>>, vector<256x256xbf16>
    %cst_48 = arith.constant dense<0.000000e+00> : vector<256x256xf32>
    %170 = tpu.matmul %168, %169, %cst_48 {dimension_numbers = #tpu.dot_dimension_numbers<[1], [0], [0], [1], [0, 0, 1, 1], [], []>} : vector<256x256xbf16>, vector<256x256xbf16>, vector<256x256xf32> -> vector<256x256xf32>
    %c0_49 = arith.constant 0 : index
    %c0_50 = arith.constant 0 : index
    %171 = vector.load %arg5[%c0_49, %c0_50] : memref<1x256xf32, #tpu.memory_space<vmem>>, vector<1x256xf32>
    %172 = vector.broadcast %171 : vector<1x256xf32> to vector<256x256xf32>
    %173 = arith.addf %170, %172 : vector<256x256xf32>
    %174 = arith.truncf %173 : vector<256x256xf32> to vector<256x256xbf16>
    %175 = vector.shape_cast %174 : vector<256x256xbf16> to vector<2x128x256xbf16>
    %c0_51 = arith.constant 0 : index
    %c0_52 = arith.constant 0 : index
    %c0_53 = arith.constant 0 : index
    %176 = vector.load %arg6[%c0_51, %c0_52, %c0_53] : memref<2x128x256xbf16, #tpu.memory_space<vmem>>, vector<2x128x256xbf16>
    tpu.vector_store %arg6[%c0_51, %c0_52, %c0_53], %175 {strides = array<i32>} : memref<2x128x256xbf16, #tpu.memory_space<vmem>>, vector<2x128x256xbf16>,
    return
  }
  func.func @transform_0(%arg0: i32) -> (i32, i32, i32) {
    %c0_i32 = arith.constant 0 : i32
    %c0_i32_0 = arith.constant 0 : i32
    %c0_i32_1 = arith.constant 0 : i32
    return %arg0, %c0_i32, %c0_i32_0 : i32, i32, i32
  }
  func.func @transform_1(%arg0: i32) -> (i32, i32) {
    %c0_i32 = arith.constant 0 : i32
    %c0_i32_0 = arith.constant 0 : i32
    %c0_i32_1 = arith.constant 0 : i32
    return %c0_i32, %c0_i32_0 : i32, i32
  }
  func.func @transform_2(%arg0: i32) -> (i32, i32) {
    %c0_i32 = arith.constant 0 : i32
    %c0_i32_0 = arith.constant 0 : i32
    %c0_i32_1 = arith.constant 0 : i32
    return %c0_i32, %c0_i32_0 : i32, i32
  }
  func.func @transform_3(%arg0: i32) -> (i32, i32) {
    %c0_i32 = arith.constant 0 : i32
    %c0_i32_0 = arith.constant 0 : i32
    %c0_i32_1 = arith.constant 0 : i32
    return %c0_i32, %c0_i32_0 : i32, i32
  }
  func.func @transform_4(%arg0: i32) -> (i32, i32) {
    %c0_i32 = arith.constant 0 : i32
    %c0_i32_0 = arith.constant 0 : i32
    %c0_i32_1 = arith.constant 0 : i32
    return %c0_i32, %c0_i32_0 : i32, i32
  }
  func.func @transform_5(%arg0: i32) -> (i32, i32, i32) {
    %c0_i32 = arith.constant 0 : i32
    %c0_i32_0 = arith.constant 0 : i32
    %c0_i32_1 = arith.constant 0 : i32
    return %arg0, %c0_i32, %c0_i32_0 : i32, i32, i32
  }
}

</mosaic_0001>

<bundles_post_ra>
// kernel: tpu_custom_call.1
= control target key start
LH: loop header
LB: loop body
LE: loop exit
PB: predicated region body
PF: predicated region fallthrough
CT: control target
= control target key end

     0   :  { %10 = vsyncpa [#allocation3], 0  ;;  %s11964_s0 = inlined_call_operand.hbm [shape: bf16[2,128,256], index: 0, kind: input, shape index: {}]   ;;  %s11965_s1 = inlined_call_operand.hbm [shape: bf16[256,768], index: 1, kind: input, shape index: {}]   ;;  %s11966_s2 = inlined_call_operand.vmem [shape: f32[1,768], index: 2, kind: input, shape index: {}]   ;;  %s11967_s3 = inlined_call_operand.hbm [shape: bf16[256,256], index: 3, kind: input, shape index: {}]   ;;  %s11968_s4 = inlined_call_operand.vmem [shape: f32[1,256], index: 4, kind: input, shape index: {}]   ;;  %s11969_s5 = inlined_call_operand.hbm [shape: bf16[2,128,256], index: 5, kind: output, shape index: {}]  }
   0x1   :  { %11 = vsyncpa [#allocation6], 0 }
   0x2   :  { %12 = vsyncpa [#allocation4], 0  ;;  %s8108_s18 = smov [#allocation5]   ;;  %s8014_s22 = scalar_lea.hbm %s11965_s1, 12288 }
   0x3   :  { %s30_s19 = sshll.u32 %s8108_s18, 4  ;;  %p8015_p0 = scmp.ne.s32.totalorder %s11965_s1, %s8014_s22  ;;  %s31_s19 = int_to_ptr.vmem [resolvable:$true] %s30_s19 }
   0x4   :  { %p8018_p1 = scmp.lt.u32.totalorder %s8014_s22, %s11965_s1 }
   0x6   :  { %p8020_p2 = pnand %p8018_p1, %p8015_p0 }
   0x8   :  { %8023 = shalt.err (!%p8020_p2)
}
   0x9   :  { %s8024_s27 = scalar_lea.vmem %s31_s19, 12288  ;;  %p8029_p4 = scmp.lt.s32.totalorder %s31_s19, %s31_s19 }
   0xa   :  { %p8025_p3 = scmp.ne.s32.totalorder %s31_s19, %s8024_s27  ;;  %p8030_p5 = scmp.lt.s32.totalorder %s8024_s27, %s8024_s27 }
   0xc   :  { %p8031_p6 = por %p8030_p5, %p8029_p4 }
   0xe   :  { %p8032_p7 = pnand %p8031_p6, %p8025_p3 }
  0x10   :  { %8035 = shalt.err (!%p8032_p7)
}
  0x11   :  { %s8109_s28 = smov 384   ;;  %s8110_s29 = smov 24  }
  0x12   :  { %36 = dma.hbm_to_vmem [thread:$0]  %s11965_s1, 12288, %s31_s19, [#allocation6], %s8109_s28, %s8109_s28, %s8110_s29  }
  0x13   :  { %s8111_s7 = smov [#allocation2]   ;;  %s8036_s11 = scalar_lea.hbm %s11964_s0, 4096 }
  0x14   :  { %s18_s8 = sshll.u32 %s8111_s7, 4  ;;  %p8037_p8 = scmp.ne.s32.totalorder %s11964_s0, %s8036_s11  ;;  %s19_s8 = int_to_ptr.vmem [resolvable:$true] %s18_s8 }
  0x15   :  { %p8040_p9 = scmp.lt.u32.totalorder %s8036_s11, %s11964_s0 }
  0x17   :  { %p8042_p10 = pnand %p8040_p9, %p8037_p8 }
  0x19   :  { %8045 = shalt.err (!%p8042_p10)
}
  0x1a   :  { %s8046_s16 = scalar_lea.vmem %s19_s8, 4096  ;;  %p8051_p12 = scmp.lt.s32.totalorder %s19_s8, %s19_s8 }
  0x1b   :  { %p8047_p11 = scmp.ne.s32.totalorder %s19_s8, %s8046_s16  ;;  %p8052_p13 = scmp.lt.s32.totalorder %s8046_s16, %s8046_s16 }
  0x1d   :  { %p8053_p0 = por %p8052_p13, %p8051_p12 }
  0x1f   :  { %p8054_p1 = pnand %p8053_p0, %p8047_p11 }
  0x21   :  { %8057 = shalt.err (!%p8054_p1)
}
  0x22   :  { %s8112_s1 = smov 128   ;;  %s8113_s17 = smov 8  }
  0x23   :  { %24 = dma.hbm_to_vmem [thread:$0]  %s11964_s0, 4096, %s19_s8, [#allocation3], %s8112_s1, %s8112_s1, %s8113_s17  }
  0x24   :  { %s8114_s20 = smov [#allocation7]   ;;  %s8058_s24 = scalar_lea.hbm %s11967_s3, 4096 }
  0x25   :  { %s44_s21 = sshll.u32 %s8114_s20, 4  ;;  %p8059_p2 = scmp.ne.s32.totalorder %s11967_s3, %s8058_s24  ;;  %s45_s21 = int_to_ptr.vmem [resolvable:$true] %s44_s21 }
  0x26   :  { %p8062_p3 = scmp.lt.u32.totalorder %s8058_s24, %s11967_s3 }
  0x28   :  { %p8064_p4 = pnand %p8062_p3, %p8059_p2 }
  0x2a   :  { %8067 = shalt.err (!%p8064_p4)
}
  0x2b   :  { %s8068_s29 = scalar_lea.vmem %s45_s21, 4096  ;;  %p8073_p6 = scmp.lt.s32.totalorder %s45_s21, %s45_s21 }
  0x2c   :  { %p8069_p5 = scmp.ne.s32.totalorder %s45_s21, %s8068_s29  ;;  %p8074_p7 = scmp.lt.s32.totalorder %s8068_s29, %s8068_s29 }
  0x2e   :  { %p8075_p8 = por %p8074_p7, %p8073_p6 }
  0x30   :  { %p8076_p9 = pnand %p8075_p8, %p8069_p5 }
  0x32   :  { %8079 = shalt.err (!%p8076_p9)
}
  0x33   :  { %50 = dma.hbm_to_vmem [thread:$0]  %s11967_s3, 4096, %s45_s21, [#allocation6], %s8112_s1, %s8112_s1, %s8113_s17  }
  0x34   :  { %8102 = dma.done.wait [#allocation3], 4096  }
  0x35   :  { %8103 = vsyncadd [#allocation3], 4294963200 }
  0x36   :  { %8104 = dma.done.wait [#allocation6], 16384  }
  0x37   :  { %8105 = vsyncadd [#allocation6], 4294950912  ;;  %v7262_v0 = vld [vmem:[#allocation5 + $0x4] ss:$24 sps:$4 sm:$0xff]   ;;  %v7264_v1 = vld [vmem:[#allocation5] ss:$24 sps:$4 sm:$0xff]  }
  0x38   :  { %863 = vmatprep.subr.bf16.mxu0 %v7262_v0  ;;  %v7265_v2 = vld [vmem:[#allocation5 + $0x34] ss:$24 sps:$4 sm:$0xff]   ;;  %v7267_v3 = vld [vmem:[#allocation5 + $0x30] ss:$24 sps:$4 sm:$0xff]   ;;  %v7268_v4 = vld [vmem:[#allocation5 + $0x64] ss:$24 sps:$4 sm:$0xff]  }
  0x39   :  { %864 = vmatpush1.bf16.msra.mxu0 %v7264_v1  ;;  %v7270_v5 = vld [vmem:[#allocation5 + $0x60] ss:$24 sps:$4 sm:$0xff]   ;;  %v7271_v6 = vld [vmem:[#allocation5 + $0x94] ss:$24 sps:$4 sm:$0xff]   ;;  %v7273_v7 = vld [vmem:[#allocation5 + $0x90] ss:$24 sps:$4 sm:$0xff]  }
  0x3a   :  { %865 = vmatprep.subr.bf16.mxu0 %v7265_v2  ;;  %v7274_v8 = vld [vmem:[#allocation5 + $0xc4] ss:$24 sps:$4 sm:$0xff]   ;;  %v7276_v9 = vld [vmem:[#allocation5 + $0xc0] ss:$24 sps:$4 sm:$0xff]   ;;  %v7277_v10 = vld [vmem:[#allocation5 + $0xf4] ss:$24 sps:$4 sm:$0xff]  }
  0x3b   :  { %v7279_v11 = vld [vmem:[#allocation5 + $0xf0] ss:$24 sps:$4 sm:$0xff]   ;;  %v7280_v12 = vld [vmem:[#allocation5 + $0x124] ss:$24 sps:$4 sm:$0xff]   ;;  %v7282_v13 = vld [vmem:[#allocation5 + $0x120] ss:$24 sps:$4 sm:$0xff]  }
  0x3c   :  { %v8189_v14 = vld [vmem:[#allocation2 + $0x4] ss:$8 sps:$4 sm:$0xff]   ;;  %v8194_v17 = vld [vmem:[#allocation5 + $0x8] ss:$24 sps:$4 sm:$0xff]   ;;  %v8197_v18 = vld [vmem:[#allocation5 + $0x3c] ss:$24 sps:$4 sm:$0xff]  }
  0x3d   :  { %866 = vmatpush1.bf16.msra.mxu0 %v7267_v3  ;;  %v7283_v15 = vld [vmem:[#allocation5 + $0x154] ss:$24 sps:$4 sm:$0xff]   ;;  %895 = vmatprep.mubr.bf16.mxu0 %v8189_v14  ;;  %v7285_v19 = vld [vmem:[#allocation5 + $0x150] ss:$24 sps:$4 sm:$0xff]   ;;  %v7286_v20 = vld [vmem:[#allocation5 + $0x184] ss:$24 sps:$4 sm:$0xff]  }
  0x3e   :  { %867 = vmatprep.subr.bf16.mxu0 %v7268_v4  ;;  %v8191_v16 = vld [vmem:[#allocation5 + $0xc] ss:$24 sps:$4 sm:$0xff]   ;;  %v8200_v21 = vld [vmem:[#allocation5 + $0x38] ss:$24 sps:$4 sm:$0xff]   ;;  %v8207_v25 = vld [vmem:[#allocation5 + $0x68] ss:$24 sps:$4 sm:$0xff]  }
  0x3f   :  { %7157 = vmatprep.subr.bf16.mxu1 %v8191_v16  ;;  %v8203_v22 = vld [vmem:[#allocation5 + $0x6c] ss:$24 sps:$4 sm:$0xff]   ;;  %v7288_v23 = vld [vmem:[#allocation5 + $0x180] ss:$24 sps:$4 sm:$0xff]   ;;  %v8209_v26 = vld [vmem:[#allocation5 + $0x9c] ss:$24 sps:$4 sm:$0xff]  }
  0x40   :  { %7173 = vmatpush1.bf16.msra.mxu1 %v8194_v17  ;;  %v7289_v24 = vld [vmem:[#allocation5 + $0x1b4] ss:$24 sps:$4 sm:$0xff]   ;;  %v7291_v27 = vld [vmem:[#allocation5 + $0x1b0] ss:$24 sps:$4 sm:$0xff]   ;;  %v7292_v28 = vld [vmem:[#allocation5 + $0x1e4] ss:$24 sps:$4 sm:$0xff]  }
  0x41   :  { %868 = vmatpush1.bf16.msra.mxu0 %v7270_v5  ;;  %7158 = vmatprep.subr.bf16.mxu1 %v8197_v18  ;;  %v8213_v29 = vld [vmem:[#allocation5 + $0x98] ss:$24 sps:$4 sm:$0xff]   ;;  %v8215_v30 = vld [vmem:[#allocation5 + $0xcc] ss:$24 sps:$4 sm:$0xff]   ;;  %v8219_v33 = vld [vmem:[#allocation5 + $0xc8] ss:$24 sps:$4 sm:$0xff]  }
  0x42   :  { %869 = vmatprep.subr.bf16.mxu0 %v7271_v6  ;;  %v7294_v31 = vld [vmem:[#allocation5 + $0x1e0] ss:$24 sps:$4 sm:$0xff]   ;;  %v7295_v32 = vld [vmem:[#allocation5 + $0x214] ss:$24 sps:$4 sm:$0xff]   ;;  %v7297_v35 = vld [vmem:[#allocation5 + $0x210] ss:$24 sps:$4 sm:$0xff]  }
  0x43   :  { %v8221_v34 = vld [vmem:[#allocation5 + $0xfc] ss:$24 sps:$4 sm:$0xff]   ;;  %v8224_v37 = vld [vmem:[#allocation2 + $0x84] ss:$8 sps:$4 sm:$0xff]   ;;  %v8227_v38 = vld [vmem:[#allocation5 + $0xf8] ss:$24 sps:$4 sm:$0xff]  }
  0x44   :  { %7174 = vmatpush1.bf16.msra.mxu1 %v8200_v21  ;;  %v7298_v36 = vld [vmem:[#allocation5 + $0x244] ss:$24 sps:$4 sm:$0xff]   ;;  %1168 = vmatprep.mubr.bf16.mxu1 %v8224_v37  ;;  %v7300_v40 = vld [vmem:[#allocation5 + $0x240] ss:$24 sps:$4 sm:$0xff]   ;;  %v7301_v41 = vld [vmem:[#allocation5 + $0x274] ss:$24 sps:$4 sm:$0xff]  }
  0x45   :  { %870 = vmatpush1.bf16.msra.mxu0 %v7273_v7  ;;  %7159 = vmatprep.subr.bf16.mxu1 %v8203_v22  ;;  %v8229_v39 = vld [vmem:[#allocation5 + $0x12c] ss:$24 sps:$4 sm:$0xff]   ;;  %v8234_v42 = vld [vmem:[#allocation5 + $0x128] ss:$24 sps:$4 sm:$0xff]   ;;  %v8236_v43 = vld [vmem:[#allocation5 + $0x15c] ss:$24 sps:$4 sm:$0xff]  }
  0x46   :  { %871 = vmatprep.subr.bf16.mxu0 %v7274_v8  ;;  %v7303_v44 = vld [vmem:[#allocation5 + $0x270] ss:$24 sps:$4 sm:$0xff]   ;;  %v7304_v45 = vld [vmem:[#allocation5 + $0x2a4] ss:$24 sps:$4 sm:$0xff]   ;;  %v7306_v48 = vld [vmem:[#allocation5 + $0x2a0] ss:$24 sps:$4 sm:$0xff]  }
  0x47   :  { %v8240_v46 = vld [vmem:[#allocation5 + $0x158] ss:$24 sps:$4 sm:$0xff]   ;;  %v8242_v47 = vld [vmem:[#allocation5 + $0x18c] ss:$24 sps:$4 sm:$0xff]   ;;  %v8246_v50 = vld [vmem:[#allocation5 + $0x188] ss:$24 sps:$4 sm:$0xff]  }
  0x48   :  { %7175 = vmatpush1.bf16.msra.mxu1 %v8207_v25  ;;  %v7307_v49 = vld [vmem:[#allocation5 + $0x2d4] ss:$24 sps:$4 sm:$0xff]   ;;  %v7309_v52 = vld [vmem:[#allocation5 + $0x2d0] ss:$24 sps:$4 sm:$0xff]   ;;  %vm12035_vm0 = vcmask 523264  }
  0x49   :  { %872 = vmatpush1.bf16.msra.mxu0 %v7276_v9  ;;  %7160 = vmatprep.subr.bf16.mxu1 %v8209_v26  ;;  %v8248_v51 = vld [vmem:[#allocation5 + $0x1bc] ss:$24 sps:$4 sm:$0xff]   ;;  %v8252_v53 = vld [vmem:[#allocation5 + $0x1b8] ss:$24 sps:$4 sm:$0xff]   ;;  %v8254_v54 = vld [vmem:[#allocation5 + $0x1ec] ss:$24 sps:$4 sm:$0xff]  }
  0x4a   :  { %873 = vmatprep.subr.bf16.mxu0 %v7277_v10  ;;  %v8256_v55 = vld [vmem:[#allocation2] ss:$8 sps:$4 sm:$0xff]   ;;  %v8259_v56 = vld [vmem:[#allocation2 + $0x14] ss:$8 sps:$4 sm:$0xff]   ;;  %v8271_v59 = vld [vmem:[#allocation5 + $0x218] ss:$24 sps:$4 sm:$0xff]  }
  0x4b   :  { %v8263_v57 = vld [vmem:[#allocation5 + $0x1e8] ss:$24 sps:$4 sm:$0xff]   ;;  %v8265_v58 = vld [vmem:[#allocation5 + $0x21c] ss:$24 sps:$4 sm:$0xff]   ;;  %v8273_v60 = vld [vmem:[#allocation5 + $0x24c] ss:$24 sps:$4 sm:$0xff]  }
  0x4c   :  { %7176 = vmatpush1.bf16.msra.mxu1 %v8213_v29  ;;  %v8275_v61 = vld [vmem:[#allocation2 + $0x10] ss:$8 sps:$4 sm:$0xff]   ;;  %v8279_v62 = vld [vmem:[#allocation2 + $0x24] ss:$8 sps:$4 sm:$0xff]   ;;  %v8285_v63 = vld [vmem:[#allocation5 + $0x248] ss:$24 sps:$4 sm:$0xff]  }
  0x4d   :  { %874 = vmatpush1.bf16.msra.mxu0 %v7279_v11  ;;  %7161 = vmatprep.subr.bf16.mxu1 %v8215_v30  ;;  %v8287_v0 = vld [vmem:[#allocation5 + $0x27c] ss:$24 sps:$4 sm:$0xff]   ;;  %v8293_v1 = vld [vmem:[#allocation5 + $0x278] ss:$24 sps:$4 sm:$0xff]   ;;  %v8295_v2 = vld [vmem:[#allocation5 + $0x2ac] ss:$24 sps:$4 sm:$0xff]  }
  0x4e   :  { %875 = vmatprep.subr.bf16.mxu0 %v7280_v12  ;;  %v8297_v3 = vld [vmem:[#allocation2 + $0x20] ss:$8 sps:$4 sm:$0xff]   ;;  %v8301_v4 = vld [vmem:[#allocation2 + $0x34] ss:$8 sps:$4 sm:$0xff]   ;;  %v8315_v7 = vld [vmem:[#allocation5 + $0x2d8] ss:$24 sps:$4 sm:$0xff]  }
  0x4f   :  { %v8307_v5 = vld [vmem:[#allocation5 + $0x2a8] ss:$24 sps:$4 sm:$0xff]   ;;  %v8309_v6 = vld [vmem:[#allocation5 + $0x2dc] ss:$24 sps:$4 sm:$0xff]   ;;  %v8317_v8 = vld [vmem:[#allocation2 + $0x30] ss:$8 sps:$4 sm:$0xff]  }
  0x50   :  { %7177 = vmatpush1.bf16.msra.mxu1 %v8219_v33  ;;  %v8321_v9 = vld [vmem:[#allocation2 + $0x44] ss:$8 sps:$4 sm:$0xff]   ;;  %v8323_v10 = vld [vmem:[#allocation2 + $0x80] ss:$8 sps:$4 sm:$0xff]   ;;  %v8328_v11 = vld [vmem:[#allocation2 + $0x94] ss:$8 sps:$4 sm:$0xff]  }
  0x51   :  { %876 = vmatpush1.bf16.msra.mxu0 %v7282_v13  ;;  %7162 = vmatprep.subr.bf16.mxu1 %v8221_v34  ;;  %v8336_v12 = vld [vmem:[#allocation2 + $0x40] ss:$8 sps:$4 sm:$0xff]   ;;  %v8338_v13 = vld [vmem:[#allocation2 + $0x54] ss:$8 sps:$4 sm:$0xff]  }
  0x52   :  { %877 = vmatprep.subr.bf16.mxu0 %v7283_v15  ;;  %v8341_v15 = vld [vmem:[#allocation2 + $0x90] ss:$8 sps:$4 sm:$0xff]  }
  0x54   :  { %7178 = vmatpush1.bf16.msra.mxu1 %v8227_v38 }
  0x55   :  { %878 = vmatpush1.bf16.msra.mxu0 %v7285_v19  ;;  %7163 = vmatprep.subr.bf16.mxu1 %v8229_v39  ;;  %v8357_v19 = vld [vmem:[#allocation2 + $0xa0] ss:$8 sps:$4 sm:$0xff]  }
  0x56   :  { %879 = vmatprep.subr.bf16.mxu0 %v7286_v20  ;;  %v8360_v20 = vld [vmem:[#allocation2 + $0xb4] ss:$8 sps:$4 sm:$0xff]  }
  0x58   :  { %7179 = vmatpush1.bf16.msra.mxu1 %v8234_v42 }
  0x59   :  { %880 = vmatpush1.bf16.msra.mxu0 %v7288_v23  ;;  %7164 = vmatprep.subr.bf16.mxu1 %v8236_v43  ;;  %v8372_v23 = vld [vmem:[#allocation2 + $0xb0] ss:$8 sps:$4 sm:$0xff]  }
  0x5a   :  { %881 = vmatprep.subr.bf16.mxu0 %v7289_v24  ;;  %v8375_v24 = vld [vmem:[#allocation2 + $0xc4] ss:$8 sps:$4 sm:$0xff]  }
  0x5c   :  { %7180 = vmatpush1.bf16.msra.mxu1 %v8240_v46 }
  0x5d   :  { %882 = vmatpush1.bf16.msra.mxu0 %v7291_v27  ;;  %7165 = vmatprep.subr.bf16.mxu1 %v8242_v47  ;;  %v8389_v27 = vld [vmem:[#allocation2 + $0xd4] ss:$8 sps:$4 sm:$0xff]  }
  0x5e   :  { %883 = vmatprep.subr.bf16.mxu0 %v7292_v28  ;;  %v7408_v28 = vld [vmem:[#allocation5 + $0x14] ss:$24 sps:$4 sm:$0xff]  }
  0x60   :  { %7181 = vmatpush1.bf16.msra.mxu1 %v8246_v50 }
  0x61   :  { %884 = vmatpush1.bf16.msra.mxu0 %v7294_v31  ;;  %7166 = vmatprep.subr.bf16.mxu1 %v8248_v51  ;;  %v8407_v31 = vld [vmem:[#allocation2 + $0xe0] ss:$8 sps:$4 sm:$0xff]  }
  0x62   :  { %885 = vmatprep.subr.bf16.mxu0 %v7295_v32  ;;  %v8409_v32 = vld [vmem:[#allocation2 + $0xf4] ss:$8 sps:$4 sm:$0xff]  }
  0x64   :  { %7182 = vmatpush1.bf16.msra.mxu1 %v8252_v53 }
  0x65   :  { %886 = vmatpush1.bf16.msra.mxu0 %v7297_v35  ;;  %7167 = vmatprep.subr.bf16.mxu1 %v8254_v54  ;;  %v7411_v35 = vld [vmem:[#allocation5 + $0x44] ss:$24 sps:$4 sm:$0xff]  }
  0x66   :  { %887 = vmatprep.subr.bf16.mxu0 %v7298_v36  ;;  %v7409_v36 = vld [vmem:[#allocation5 + $0x40] ss:$24 sps:$4 sm:$0xff]  }
  0x68   :  { %7183 = vmatpush1.bf16.msra.mxu1 %v8263_v57 }
  0x69   :  { %888 = vmatpush1.bf16.msra.mxu0 %v7300_v40  ;;  %7168 = vmatprep.subr.bf16.mxu1 %v8265_v58  ;;  %v7417_v40 = vld [vmem:[#allocation5 + $0xa4] ss:$24 sps:$4 sm:$0xff]  }
  0x6a   :  { %889 = vmatprep.subr.bf16.mxu0 %v7301_v41  ;;  %v7415_v41 = vld [vmem:[#allocation5 + $0xa0] ss:$24 sps:$4 sm:$0xff]  }
  0x6c   :  { %7184 = vmatpush1.bf16.msra.mxu1 %v8271_v59 }
  0x6d   :  { %890 = vmatpush1.bf16.msra.mxu0 %v7303_v44  ;;  %7169 = vmatprep.subr.bf16.mxu1 %v8273_v60  ;;  %v7423_v44 = vld [vmem:[#allocation5 + $0x104] ss:$24 sps:$4 sm:$0xff]  }
  0x6e   :  { %891 = vmatprep.subr.bf16.mxu0 %v7304_v45  ;;  %v7421_v45 = vld [vmem:[#allocation5 + $0x100] ss:$24 sps:$4 sm:$0xff]  }
  0x70   :  { %7185 = vmatpush1.bf16.msra.mxu1 %v8285_v63 }
  0x71   :  { %892 = vmatpush1.bf16.msra.mxu0 %v7306_v48  ;;  %7170 = vmatprep.subr.bf16.mxu1 %v8287_v0  ;;  %v7429_v48 = vld [vmem:[#allocation5 + $0x164] ss:$24 sps:$4 sm:$0xff]  }
  0x72   :  { %893 = vmatprep.subr.bf16.mxu0 %v7307_v49  ;;  %v7427_v49 = vld [vmem:[#allocation5 + $0x160] ss:$24 sps:$4 sm:$0xff]  }
  0x74   :  { %7186 = vmatpush1.bf16.msra.mxu1 %v8293_v1 }
  0x75   :  { %894 = vmatpush1.bf16.msra.mxu0 %v7309_v52  ;;  %7171 = vmatprep.subr.bf16.mxu1 %v8295_v2  ;;  %v7435_v52 = vld [vmem:[#allocation5 + $0x1c4] ss:$24 sps:$4 sm:$0xff]  }
  0x76   :  { %1056 = vmatprep.subr.bf16.mxu0 %v8191_v16  ;;  %v8344_v16 = vld [vmem:[#allocation2 + $0xa4] ss:$8 sps:$4 sm:$0xff]  }
  0x78   :  { %896 = vmatmul.mubr.bf16.vlgmr.msra.gmra.mrb[0].mxu0 %v8256_v55  ;;  %7187 = vmatpush1.bf16.msra.mxu1 %v8307_v5 }
  0x79   :  { %1057 = vmatpush1.bf16.msra.mxu0 %v8194_v17  ;;  %905 = vmatprep.mubr.bf16.mxu0 %v8259_v56  ;;  %v8352_v17 = vld [vmem:[#allocation2 + $0x50] ss:$8 sps:$4 sm:$0xff]  }
  0x7a   :  { %1058 = vmatprep.subr.bf16.mxu0 %v8197_v18  ;;  %7172 = vmatprep.subr.bf16.mxu1 %v8309_v6  ;;  %v8354_v18 = vld [vmem:[#allocation2 + $0x64] ss:$8 sps:$4 sm:$0xff]  }
  0x7c   :  { %7188 = vmatpush1.bf16.msra.mxu1 %v8315_v7 }
  0x7d   :  { %1059 = vmatpush1.bf16.msra.mxu0 %v8200_v21  ;;  %v8368_v21 = vld [vmem:[#allocation2 + $0x60] ss:$8 sps:$4 sm:$0xff]  }
  0x7e   :  { %1060 = vmatprep.subr.bf16.mxu0 %v8203_v22  ;;  %v8370_v22 = vld [vmem:[#allocation2 + $0x74] ss:$8 sps:$4 sm:$0xff]  }
  0x7f   :  { %1169 = vmatmul.mubr.bf16.vlgmr.msra.gmra.mrb[0].mxu1 %v8323_v10 }
  0x80   :  { %906 = vmatmul.mubr.bf16.gmra.mrb[4].mxu0 %v8275_v61  ;;  %1178 = vmatprep.mubr.bf16.mxu1 %v8328_v11 }
  0x81   :  { %915 = vmatprep.mubr.bf16.mxu0 %v8279_v62  ;;  %1061 = vmatpush1.bf16.msra.mxu0 %v8207_v25  ;;  %v8384_v25 = vld [vmem:[#allocation2 + $0x70] ss:$8 sps:$4 sm:$0xff]  }
  0x82   :  { %1062 = vmatprep.subr.bf16.mxu0 %v8209_v26  ;;  %v8386_v26 = vld [vmem:[#allocation2 + $0xc0] ss:$8 sps:$4 sm:$0xff]  }
  0x85   :  { %1063 = vmatpush1.bf16.msra.mxu0 %v8213_v29  ;;  %v8398_v29 = vld [vmem:[#allocation2 + $0xd0] ss:$8 sps:$4 sm:$0xff]  }
  0x86   :  { %1064 = vmatprep.subr.bf16.mxu0 %v8215_v30  ;;  %v8401_v30 = vld [vmem:[#allocation2 + $0xe4] ss:$8 sps:$4 sm:$0xff]  }
  0x87   :  { %1179 = vmatmul.mubr.bf16.gmra.mrb[4].mxu1 %v8341_v15 }
  0x88   :  { %916 = vmatmul.mubr.bf16.gmra.mrb[8].mxu0 %v8297_v3  ;;  %1188 = vmatprep.mubr.bf16.mxu1 %v8344_v16 }
  0x89   :  { %925 = vmatprep.mubr.bf16.mxu0 %v8301_v4  ;;  %1065 = vmatpush1.bf16.msra.mxu0 %v8219_v33  ;;  %v8415_v33 = vld [vmem:[#allocation2 + $0xf0] ss:$8 sps:$4 sm:$0xff]  }
  0x8a   :  { %1066 = vmatprep.subr.bf16.mxu0 %v8221_v34  ;;  %v7406_v34 = vld [vmem:[#allocation5 + $0x10] ss:$24 sps:$4 sm:$0xff]  }
  0x8d   :  { %1067 = vmatpush1.bf16.msra.mxu0 %v8227_v38  ;;  %v7414_v38 = vld [vmem:[#allocation5 + $0x74] ss:$24 sps:$4 sm:$0xff]  }
  0x8e   :  { %1068 = vmatprep.subr.bf16.mxu0 %v8229_v39  ;;  %v7412_v39 = vld [vmem:[#allocation5 + $0x70] ss:$24 sps:$4 sm:$0xff]  }
  0x8f   :  { %1189 = vmatmul.mubr.bf16.gmra.mrb[8].mxu1 %v8357_v19 }
  0x90   :  { %926 = vmatmul.mubr.bf16.gmra.mrb[12].mxu0 %v8317_v8  ;;  %1198 = vmatprep.mubr.bf16.mxu1 %v8360_v20 }
  0x91   :  { %935 = vmatprep.mubr.bf16.mxu0 %v8321_v9  ;;  %1069 = vmatpush1.bf16.msra.mxu0 %v8234_v42  ;;  %v7420_v42 = vld [vmem:[#allocation5 + $0xd4] ss:$24 sps:$4 sm:$0xff]  }
  0x92   :  { %1070 = vmatprep.subr.bf16.mxu0 %v8236_v43  ;;  %v7418_v43 = vld [vmem:[#allocation5 + $0xd0] ss:$24 sps:$4 sm:$0xff]  }
  0x95   :  { %1071 = vmatpush1.bf16.msra.mxu0 %v8240_v46  ;;  %v7426_v46 = vld [vmem:[#allocation5 + $0x134] ss:$24 sps:$4 sm:$0xff]  }
  0x96   :  { %1072 = vmatprep.subr.bf16.mxu0 %v8242_v47  ;;  %v7424_v47 = vld [vmem:[#allocation5 + $0x130] ss:$24 sps:$4 sm:$0xff]  }
  0x97   :  { %1199 = vmatmul.mubr.bf16.gmra.mrb[12].mxu1 %v8372_v23 }
  0x98   :  { %936 = vmatmul.mubr.bf16.gmra.mrb[16].mxu0 %v8336_v12  ;;  %1208 = vmatprep.mubr.bf16.mxu1 %v8375_v24 }
  0x99   :  { %945 = vmatprep.mubr.bf16.mxu0 %v8338_v13  ;;  %1073 = vmatpush1.bf16.msra.mxu0 %v8246_v50  ;;  %v7432_v50 = vld [vmem:[#allocation5 + $0x194] ss:$24 sps:$4 sm:$0xff]  }
  0x9a   :  { %1074 = vmatprep.subr.bf16.mxu0 %v8248_v51  ;;  %v7430_v51 = vld [vmem:[#allocation5 + $0x190] ss:$24 sps:$4 sm:$0xff]  }
  0x9d   :  { %1075 = vmatpush1.bf16.msra.mxu0 %v8252_v53  ;;  %v7433_v53 = vld [vmem:[#allocation5 + $0x1c0] ss:$24 sps:$4 sm:$0xff]  }
  0x9e   :  { %1076 = vmatprep.subr.bf16.mxu0 %v8254_v54  ;;  %v7438_v54 = vld [vmem:[#allocation5 + $0x1f4] ss:$24 sps:$4 sm:$0xff]  }
  0x9f   :  { %1209 = vmatmul.mubr.bf16.gmra.mrb[16].mxu1 %v8386_v26 }
  0xa0   :  { %946 = vmatmul.mubr.bf16.gmra.mrb[20].mxu0 %v8352_v17  ;;  %1218 = vmatprep.mubr.bf16.mxu1 %v8389_v27 }
  0xa1   :  { %955 = vmatprep.mubr.bf16.mxu0 %v8354_v18  ;;  %1077 = vmatpush1.bf16.msra.mxu0 %v8263_v57  ;;  %v7436_v57 = vld [vmem:[#allocation5 + $0x1f0] ss:$24 sps:$4 sm:$0xff]  }
  0xa2   :  { %1078 = vmatprep.subr.bf16.mxu0 %v8265_v58  ;;  %v7441_v58 = vld [vmem:[#allocation5 + $0x224] ss:$24 sps:$4 sm:$0xff]  }
  0xa5   :  { %1079 = vmatpush1.bf16.msra.mxu0 %v8271_v59  ;;  %v7439_v59 = vld [vmem:[#allocation5 + $0x220] ss:$24 sps:$4 sm:$0xff]  }
  0xa6   :  { %1080 = vmatprep.subr.bf16.mxu0 %v8273_v60  ;;  %v7444_v60 = vld [vmem:[#allocation5 + $0x254] ss:$24 sps:$4 sm:$0xff]  }
  0xa7   :  { %1219 = vmatmul.mubr.bf16.gmra.mrb[20].mxu1 %v8398_v29 }
  0xa8   :  { %956 = vmatmul.mubr.bf16.gmra.mrb[24].mxu0 %v8368_v21  ;;  %1228 = vmatprep.mubr.bf16.mxu1 %v8401_v30 }
  0xa9   :  { %965 = vmatprep.mubr.bf16.mxu0 %v8370_v22  ;;  %1081 = vmatpush1.bf16.msra.mxu0 %v8285_v63  ;;  %v7442_v63 = vld [vmem:[#allocation5 + $0x250] ss:$24 sps:$4 sm:$0xff]  }
  0xaa   :  { %1082 = vmatprep.subr.bf16.mxu0 %v8287_v0  ;;  %v7447_v0 = vld [vmem:[#allocation5 + $0x284] ss:$24 sps:$4 sm:$0xff]  }
  0xad   :  { %1083 = vmatpush1.bf16.msra.mxu0 %v8293_v1  ;;  %v7445_v1 = vld [vmem:[#allocation5 + $0x280] ss:$24 sps:$4 sm:$0xff]  }
  0xae   :  { %1084 = vmatprep.subr.bf16.mxu0 %v8295_v2  ;;  %v7450_v2 = vld [vmem:[#allocation5 + $0x2b4] ss:$24 sps:$4 sm:$0xff]  }
  0xaf   :  { %1229 = vmatmul.mubr.bf16.gmra.mrb[24].mxu1 %v8407_v31 }
  0xb0   :  { %966 = vmatmul.mubr.bf16.gmra.mrb[28].mxu0 %v8384_v25  ;;  %1238 = vmatprep.mubr.bf16.mxu1 %v8409_v32 }
  0xb1   :  { %975 = vmatprep.mubr.bf16.mxu0 %v8224_v37  ;;  %1085 = vmatpush1.bf16.msra.mxu0 %v8307_v5  ;;  %v7448_v5 = vld [vmem:[#allocation5 + $0x2b0] ss:$24 sps:$4 sm:$0xff]  }
  0xb2   :  { %1086 = vmatprep.subr.bf16.mxu0 %v8309_v6  ;;  %v7453_v6 = vld [vmem:[#allocation5 + $0x2e4] ss:$24 sps:$4 sm:$0xff]  }
  0xb5   :  { %1087 = vmatpush1.bf16.msra.mxu0 %v8315_v7  ;;  %v7451_v7 = vld [vmem:[#allocation5 + $0x2e0] ss:$24 sps:$4 sm:$0xff]  }
  0xb6   :  { %1249 = vmatprep.subr.bf16.mxu0 %v7408_v28  ;;  %v11972_v28 = vlaneseq }
  0xb7   :  { %1239 = vmatmul.mubr.bf16.gmra.mrb[28].mxu1 %v8415_v33 }
  0xb8   :  { %976 = vmatmul.mubr.bf16.gmra.mrb[32].mxu0 %v8323_v10 }
  0xb9   :  { %985 = vmatprep.mubr.bf16.mxu0 %v8328_v11 }
  0xc0   :  { %986 = vmatmul.mubr.bf16.gmra.mrb[36].mxu0 %v8341_v15 }
  0xc1   :  { %995 = vmatprep.mubr.bf16.mxu0 %v8344_v16 }
  0xc8   :  { %996 = vmatmul.mubr.bf16.gmra.mrb[40].mxu0 %v8357_v19 }
  0xc9   :  { %1005 = vmatprep.mubr.bf16.mxu0 %v8360_v20 }
  0xd0   :  { %1006 = vmatmul.mubr.bf16.gmra.mrb[44].mxu0 %v8372_v23 }
  0xd1   :  { %1015 = vmatprep.mubr.bf16.mxu0 %v8375_v24 }
  0xd8   :  { %1016 = vmatmul.mubr.bf16.gmra.mrb[48].mxu0 %v8386_v26 }
  0xd9   :  { %1025 = vmatprep.mubr.bf16.mxu0 %v8389_v27 }
  0xe0   :  { %1026 = vmatmul.mubr.bf16.gmra.mrb[52].mxu0 %v8398_v29 }
  0xe1   :  { %1035 = vmatprep.mubr.bf16.mxu0 %v8401_v30 }
  0xe8   :  { %1036 = vmatmul.mubr.bf16.gmra.mrb[56].mxu0 %v8407_v31 }
  0xe9   :  { %1045 = vmatprep.mubr.bf16.mxu0 %v8409_v32 }
  0xf0   :  { %1046 = vmatmul.mubr.bf16.gmra.mrb[60].mxu0 %v8415_v33 }
  0xf1   :  { %1088 = vmatprep.mubr.bf16.mxu0 %v8189_v14 }
  0xf8   :  { %1089 = vmatmul.mubr.bf16.vlgmr.msra.gmra.mrb[64].mxu0 %v8256_v55 }
  0xf9   :  { %1250 = vmatpush1.bf16.msra.mxu0 %v7406_v34  ;;  %1098 = vmatprep.mubr.bf16.mxu0 %v8259_v56  ;;  %v8451_v34 = vshrl.u32 %v11972_v28, 7 }
  0xfa   :  { %1251 = vmatprep.subr.bf16.mxu0 %v7411_v35 }
  0xfb   :  { %12240 = vst [vmem:[#allocation12_spill] sm:$0xff] %v8451_v34  ;;  %v11971_v35 = vsub.s32 0, %v8451_v34 }
  0xfd   :  { %1252 = vmatpush1.bf16.msra.mxu0 %v7409_v36  ;;  %v11970_v36 = vsub.s32 1, %v8451_v34 }
  0xfe   :  { %1253 = vmatprep.subr.bf16.mxu0 %v7414_v38 }
 0x100   :  { %1099 = vmatmul.mubr.bf16.gmra.mrb[68].mxu0 %v8275_v61 }
 0x101   :  { %1254 = vmatpush1.bf16.msra.mxu0 %v7412_v39  ;;  %1108 = vmatprep.mubr.bf16.mxu0 %v8279_v62 }
 0x102   :  { %1255 = vmatprep.subr.bf16.mxu0 %v7417_v40 }
 0x105   :  { %1256 = vmatpush1.bf16.msra.mxu0 %v7415_v41 }
 0x106   :  { %1257 = vmatprep.subr.bf16.mxu0 %v7420_v42 }
 0x108   :  { %1109 = vmatmul.mubr.bf16.gmra.mrb[72].mxu0 %v8297_v3 }
 0x109   :  { %1258 = vmatpush1.bf16.msra.mxu0 %v7418_v43  ;;  %1118 = vmatprep.mubr.bf16.mxu0 %v8301_v4 }
 0x10a   :  { %1259 = vmatprep.subr.bf16.mxu0 %v7423_v44 }
 0x10d   :  { %1260 = vmatpush1.bf16.msra.mxu0 %v7421_v45 }
 0x10e   :  { %1261 = vmatprep.subr.bf16.mxu0 %v7426_v46 }
 0x110   :  { %1119 = vmatmul.mubr.bf16.gmra.mrb[76].mxu0 %v8317_v8 }
 0x111   :  { %1262 = vmatpush1.bf16.msra.mxu0 %v7424_v47  ;;  %1128 = vmatprep.mubr.bf16.mxu0 %v8321_v9 }
 0x112   :  { %1263 = vmatprep.subr.bf16.mxu0 %v7429_v48 }
 0x115   :  { %1264 = vmatpush1.bf16.msra.mxu0 %v7427_v49 }
 0x116   :  { %1265 = vmatprep.subr.bf16.mxu0 %v7432_v50 }
 0x118   :  { %1129 = vmatmul.mubr.bf16.gmra.mrb[80].mxu0 %v8336_v12 }
 0x119   :  { %1266 = vmatpush1.bf16.msra.mxu0 %v7430_v51  ;;  %1138 = vmatprep.mubr.bf16.mxu0 %v8338_v13 }
 0x11a   :  { %1267 = vmatprep.subr.bf16.mxu0 %v7435_v52 }
 0x11d   :  { %1268 = vmatpush1.bf16.msra.mxu0 %v7433_v53 }
 0x11e   :  { %1269 = vmatprep.subr.bf16.mxu0 %v7438_v54 }
 0x120   :  { %1139 = vmatmul.mubr.bf16.gmra.mrb[84].mxu0 %v8352_v17 }
 0x121   :  { %1270 = vmatpush1.bf16.msra.mxu0 %v7436_v57  ;;  %1148 = vmatprep.mubr.bf16.mxu0 %v8354_v18 }
 0x122   :  { %1271 = vmatprep.subr.bf16.mxu0 %v7441_v58 }
 0x125   :  { %1272 = vmatpush1.bf16.msra.mxu0 %v7439_v59 }
 0x126   :  { %1273 = vmatprep.subr.bf16.mxu0 %v7444_v60 }
 0x128   :  { %1149 = vmatmul.mubr.bf16.gmra.mrb[88].mxu0 %v8368_v21 }
 0x129   :  { %1274 = vmatpush1.bf16.msra.mxu0 %v7442_v63  ;;  %1158 = vmatprep.mubr.bf16.mxu0 %v8370_v22 }
 0x12a   :  { %1275 = vmatprep.subr.bf16.mxu0 %v7447_v0 }
 0x12d   :  { %1276 = vmatpush1.bf16.msra.mxu0 %v7445_v1 }
 0x12e   :  { %1277 = vmatprep.subr.bf16.mxu0 %v7450_v2 }
 0x130   :  { %1159 = vmatmul.mubr.bf16.gmra.mrb[92].mxu0 %v8384_v25 }
 0x131   :  { %1278 = vmatpush1.bf16.msra.mxu0 %v7448_v5  ;;  %1281 = vmatprep.mubr.bf16.mxu0 %v8189_v14  ;;  %v8457_v14 = vld [vmem:[%s11966_s2] sm:$0x3f]  ;;  %s8115_s2 = smov 64  }
 0x132   :  { %1279 = vmatprep.subr.bf16.mxu0 %v7453_v6 }
 0x135   :  { %1280 = vmatpush1.bf16.msra.mxu0 %v7451_v7 }
 0x138   :  { %1282 = vmatmul.mubr.bf16.vlgmr.msra.gmra.mrb[96].mxu0 %v8256_v55  ;;  %v8465_v55 = vrot.slane %v8457_v14, %v11971_v35 }
 0x139   :  { %1291 = vmatprep.mubr.bf16.mxu0 %v8259_v56 }
 0x140   :  { %1292 = vmatmul.mubr.bf16.gmra.mrb[100].mxu0 %v8275_v61  ;;  %v8470_v61 = vrot.slane %v8457_v14, %v11970_v36 }
 0x141   :  { %1301 = vmatprep.mubr.bf16.mxu0 %v8279_v62 }
 0x148   :  { %1302 = vmatmul.mubr.bf16.gmra.mrb[104].mxu0 %v8297_v3 }
 0x149   :  { %1311 = vmatprep.mubr.bf16.mxu0 %v8301_v4 }
 0x14b   :  { %v897_v56 = vpop.f32.mrb[0].mxu0 }
 0x14c   :  { %v899_v62 = vpop.f32.mrb[1].mxu0  ;;  %v898_v39 = vadd.f32 %v897_v56, %v8465_v55 }
 0x14d   :  { %v901_v38 = vpop.f32.mrb[2].mxu0  ;;  %v900_v4 = vadd.f32 %v899_v62, %v8470_v61 }
 0x14e   :  { %v902_v40 = vadd.f32 %v901_v38, %v8465_v55  ;;  %v903_v3 = vpop.f32.mrb[3].mxu0 }
 0x14f   :  { %v904_v41 = vadd.f32 %v903_v3, %v8470_v61 }
 0x150   :  { %v8476_v42 = vpack.c.bf16 %v902_v40, %v898_v39  ;;  %1312 = vmatmul.mubr.bf16.gmra.mrb[108].mxu0 %v8317_v8 }
 0x151   :  { %v8479_v43 = vpack.c.bf16 %v904_v41, %v900_v4  ;;  %1321 = vmatprep.mubr.bf16.mxu0 %v8321_v9 }
 0x152   :  { %6661 = vmatprep.mubr.msk.bf16.mxu1 %vm12035_vm0, %v8476_v42 }
 0x153   :  { %v907_v44 = vpop.f32.mrb[4].mxu0 }
 0x154   :  { %v909_v45 = vpop.f32.mrb[5].mxu0  ;;  %v908_v47 = vadd.f32 %v907_v44, %v8465_v55 }
 0x155   :  { %v911_v46 = vpop.f32.mrb[6].mxu0  ;;  %v910_v50 = vadd.f32 %v909_v45, %v8470_v61 }
 0x156   :  { %v912_v48 = vadd.f32 %v911_v46, %v8465_v55  ;;  %v913_v49 = vpop.f32.mrb[7].mxu0 }
 0x157   :  { %v914_v51 = vadd.f32 %v913_v49, %v8470_v61 }
 0x158   :  { %v8488_v8 = vpack.c.bf16 %v912_v48, %v908_v47  ;;  %1322 = vmatmul.mubr.bf16.gmra.mrb[112].mxu0 %v8336_v12 }
 0x159   :  { %v8491_v9 = vpack.c.bf16 %v914_v51, %v910_v50  ;;  %1331 = vmatprep.mubr.bf16.mxu0 %v8338_v13 }
 0x15b   :  { %v917_v52 = vpop.f32.mrb[8].mxu0 }
 0x15c   :  { %v919_v53 = vpop.f32.mrb[9].mxu0  ;;  %v918_v57 = vadd.f32 %v917_v52, %v8465_v55 }
 0x15d   :  { %v921_v54 = vpop.f32.mrb[10].mxu0  ;;  %v920_v60 = vadd.f32 %v919_v53, %v8470_v61 }
 0x15e   :  { %v922_v58 = vadd.f32 %v921_v54, %v8465_v55  ;;  %v923_v59 = vpop.f32.mrb[11].mxu0 }
 0x15f   :  { %v924_v63 = vadd.f32 %v923_v59, %v8470_v61 }
 0x160   :  { %v8498_v0 = vpack.c.bf16 %v922_v58, %v918_v57  ;;  %1332 = vmatmul.mubr.bf16.gmra.mrb[116].mxu0 %v8352_v17 }
 0x161   :  { %v8501_v12 = vpack.c.bf16 %v924_v63, %v920_v60  ;;  %1341 = vmatprep.mubr.bf16.mxu0 %v8354_v18 }
 0x163   :  { %v927_v13 = vpop.f32.mrb[12].mxu0 }
 0x164   :  { %v929_v1 = vpop.f32.mrb[13].mxu0  ;;  %v928_v5 = vadd.f32 %v927_v13, %v8465_v55 }
 0x165   :  { %v931_v2 = vpop.f32.mrb[14].mxu0  ;;  %v930_v56 = vadd.f32 %v929_v1, %v8470_v61 }
 0x166   :  { %v932_v6 = vadd.f32 %v931_v2, %v8465_v55  ;;  %v933_v7 = vpop.f32.mrb[15].mxu0 }
 0x167   :  { %v934_v62 = vadd.f32 %v933_v7, %v8470_v61 }
 0x168   :  { %v8508_v38 = vpack.c.bf16 %v932_v6, %v928_v5  ;;  %1342 = vmatmul.mubr.bf16.gmra.mrb[120].mxu0 %v8368_v21 }
 0x169   :  { %v8511_v17 = vpack.c.bf16 %v934_v62, %v930_v56  ;;  %1351 = vmatprep.mubr.bf16.mxu0 %v8370_v22 }
 0x16b   :  { %v937_v18 = vpop.f32.mrb[16].mxu0 }
 0x16c   :  { %v939_v39 = vpop.f32.mrb[17].mxu0  ;;  %v938_v3 = vadd.f32 %v937_v18, %v8465_v55 }
 0x16d   :  { %v941_v40 = vpop.f32.mrb[18].mxu0  ;;  %v940_v44 = vadd.f32 %v939_v39, %v8470_v61 }
 0x16e   :  { %v942_v4 = vadd.f32 %v941_v40, %v8465_v55  ;;  %v943_v41 = vpop.f32.mrb[19].mxu0 }
 0x16f   :  { %v944_v45 = vadd.f32 %v943_v41, %v8470_v61 }
 0x170   :  { %v8518_v46 = vpack.c.bf16 %v942_v4, %v938_v3  ;;  %1352 = vmatmul.mubr.bf16.gmra.mrb[124].mxu0 %v8384_v25 }
 0x171   :  { %v8521_v21 = vpack.c.bf16 %v944_v45, %v940_v44  ;;  %1361 = vmatprep.mubr.bf16.mxu0 %v8224_v37 }
 0x173   :  { %v947_v22 = vpop.f32.mrb[20].mxu0 }
 0x174   :  { %v949_v47 = vpop.f32.mrb[21].mxu0  ;;  %v948_v49 = vadd.f32 %v947_v22, %v8465_v55 }
 0x175   :  { %v951_v48 = vpop.f32.mrb[22].mxu0  ;;  %v950_v52 = vadd.f32 %v949_v47, %v8470_v61 }
 0x176   :  { %v952_v50 = vadd.f32 %v951_v48, %v8465_v55  ;;  %v953_v51 = vpop.f32.mrb[23].mxu0 }
 0x177   :  { %v954_v53 = vadd.f32 %v953_v51, %v8470_v61 }
 0x178   :  { %v8528_v54 = vpack.c.bf16 %v952_v50, %v948_v49  ;;  %1362 = vmatmul.mubr.bf16.gmra.mrb[128].mxu0 %v8323_v10 }
 0x179   :  { %v8531_v25 = vpack.c.bf16 %v954_v53, %v950_v52  ;;  %1371 = vmatprep.mubr.bf16.mxu0 %v8328_v11 }
 0x17b   :  { %v957_v37 = vpop.f32.mrb[24].mxu0 }
 0x17c   :  { %v959_v57 = vpop.f32.mrb[25].mxu0  ;;  %v958_v59 = vadd.f32 %v957_v37, %v8465_v55 }
 0x17d   :  { %v961_v58 = vpop.f32.mrb[26].mxu0  ;;  %v960_v13 = vadd.f32 %v959_v57, %v8470_v61 }
 0x17e   :  { %v962_v60 = vadd.f32 %v961_v58, %v8465_v55  ;;  %v963_v63 = vpop.f32.mrb[27].mxu0 }
 0x17f   :  { %v964_v1 = vadd.f32 %v963_v63, %v8470_v61 }
 0x180   :  { %v8538_v2 = vpack.c.bf16 %v962_v60, %v958_v59  ;;  %1372 = vmatmul.mubr.bf16.gmra.mrb[132].mxu0 %v8341_v15 }
 0x181   :  { %v8541_v10 = vpack.c.bf16 %v964_v1, %v960_v13  ;;  %1381 = vmatprep.mubr.bf16.mxu0 %v8344_v16 }
 0x183   :  { %v967_v11 = vpop.f32.mrb[28].mxu0 }
 0x184   :  { %v969_v5 = vpop.f32.mrb[29].mxu0  ;;  %v968_v7 = vadd.f32 %v967_v11, %v8465_v55 }
 0x185   :  { %v971_v6 = vpop.f32.mrb[30].mxu0  ;;  %v970_v18 = vadd.f32 %v969_v5, %v8470_v61 }
 0x186   :  { %v972_v56 = vadd.f32 %v971_v6, %v8465_v55  ;;  %v973_v62 = vpop.f32.mrb[31].mxu0 }
 0x187   :  { %v974_v39 = vadd.f32 %v973_v62, %v8470_v61 }
 0x188   :  { %v8548_v40 = vpack.c.bf16 %v972_v56, %v968_v7  ;;  %1382 = vmatmul.mubr.bf16.gmra.mrb[136].mxu0 %v8357_v19 }
 0x189   :  { %v8551_v15 = vpack.c.bf16 %v974_v39, %v970_v18  ;;  %1391 = vmatprep.mubr.bf16.mxu0 %v8360_v20 }
 0x18b   :  { %12241 = vst [vmem:[#allocation13_spill] sm:$0xff] %v8551_v15  ;;  %v977_v16 = vpop.f32.mrb[32].mxu0  ;;  %v1546_v15 = vadd.s32 56, %v8451_v34 }
 0x18c   :  { %v979_v3 = vpop.f32.mrb[33].mxu0  ;;  %v978_v41 = vadd.f32 %v977_v16, %v8465_v55 }
 0x18d   :  { %v981_v4 = vpop.f32.mrb[34].mxu0  ;;  %v980_v22 = vadd.f32 %v979_v3, %v8470_v61 }
 0x18e   :  { %v982_v44 = vadd.f32 %v981_v4, %v8465_v55  ;;  %v983_v45 = vpop.f32.mrb[35].mxu0 }
 0x18f   :  { %v984_v47 = vadd.f32 %v983_v45, %v8470_v61 }
 0x190   :  { %v8558_v48 = vpack.c.bf16 %v982_v44, %v978_v41  ;;  %1392 = vmatmul.mubr.bf16.gmra.mrb[140].mxu0 %v8372_v23 }
 0x191   :  { %v8561_v19 = vpack.c.bf16 %v984_v47, %v980_v22  ;;  %1401 = vmatprep.mubr.bf16.mxu0 %v8375_v24 }
 0x192   :  { %12242 = vst [vmem:[#allocation14_spill] sm:$0xff] %v8558_v48 }
 0x193   :  { %12243 = vst [vmem:[#allocation15_spill] sm:$0xff] %v8561_v19  ;;  %v987_v20 = vpop.f32.mrb[36].mxu0 }
 0x194   :  { %v989_v49 = vpop.f32.mrb[37].mxu0  ;;  %v988_v51 = vadd.f32 %v987_v20, %v8465_v55 }
 0x195   :  { %v991_v50 = vpop.f32.mrb[38].mxu0  ;;  %v990_v37 = vadd.f32 %v989_v49, %v8470_v61 }
 0x196   :  { %v992_v52 = vadd.f32 %v991_v50, %v8465_v55  ;;  %v993_v53 = vpop.f32.mrb[39].mxu0 }
 0x197   :  { %v994_v57 = vadd.f32 %v993_v53, %v8470_v61 }
 0x198   :  { %v8568_v58 = vpack.c.bf16 %v992_v52, %v988_v51  ;;  %1402 = vmatmul.mubr.bf16.gmra.mrb[144].mxu0 %v8386_v26 }
 0x199   :  { %v8571_v23 = vpack.c.bf16 %v994_v57, %v990_v37  ;;  %1411 = vmatprep.mubr.bf16.mxu0 %v8389_v27 }
 0x19a   :  { %12244 = vst [vmem:[#allocation16_spill] sm:$0xff] %v8568_v58 }
 0x19b   :  { %12245 = vst [vmem:[#allocation17_spill] sm:$0xff] %v8571_v23  ;;  %v997_v24 = vpop.f32.mrb[40].mxu0 }
 0x19c   :  { %v999_v59 = vpop.f32.mrb[41].mxu0  ;;  %v998_v63 = vadd.f32 %v997_v24, %v8465_v55 }
 0x19d   :  { %v1001_v60 = vpop.f32.mrb[42].mxu0  ;;  %v1000_v11 = vadd.f32 %v999_v59, %v8470_v61 }
 0x19e   :  { %v1002_v13 = vadd.f32 %v1001_v60, %v8465_v55  ;;  %v1003_v1 = vpop.f32.mrb[43].mxu0 }
 0x19f   :  { %v1004_v5 = vadd.f32 %v1003_v1, %v8470_v61 }
 0x1a0   :  { %v8578_v6 = vpack.c.bf16 %v1002_v13, %v998_v63  ;;  %1412 = vmatmul.mubr.bf16.gmra.mrb[148].mxu0 %v8398_v29 }
 0x1a1   :  { %v8581_v26 = vpack.c.bf16 %v1004_v5, %v1000_v11  ;;  %1421 = vmatprep.mubr.bf16.mxu0 %v8401_v30 }
 0x1a2   :  { %12246 = vst [vmem:[#allocation18_spill] sm:$0xff] %v8578_v6 }
 0x1a3   :  { %12247 = vst [vmem:[#allocation19_spill] sm:$0xff] %v8581_v26  ;;  %v1007_v27 = vpop.f32.mrb[44].mxu0 }
 0x1a4   :  { %v1009_v7 = vpop.f32.mrb[45].mxu0  ;;  %v1008_v62 = vadd.f32 %v1007_v27, %v8465_v55 }
 0x1a5   :  { %v1011_v56 = vpop.f32.mrb[46].mxu0  ;;  %v1010_v16 = vadd.f32 %v1009_v7, %v8470_v61 }
 0x1a6   :  { %v1012_v18 = vadd.f32 %v1011_v56, %v8465_v55  ;;  %v1013_v39 = vpop.f32.mrb[47].mxu0 }
 0x1a7   :  { %v1014_v3 = vadd.f32 %v1013_v39, %v8470_v61 }
 0x1a8   :  { %v8588_v4 = vpack.c.bf16 %v1012_v18, %v1008_v62  ;;  %1422 = vmatmul.mubr.bf16.gmra.mrb[152].mxu0 %v8407_v31 }
 0x1a9   :  { %v8591_v29 = vpack.c.bf16 %v1014_v3, %v1010_v16  ;;  %1431 = vmatprep.mubr.bf16.mxu0 %v8409_v32 }
 0x1aa   :  { %12248 = vst [vmem:[#allocation20_spill] sm:$0xff] %v8588_v4 }
 0x1ab   :  { %12249 = vst [vmem:[#allocation21_spill] sm:$0xff] %v8591_v29  ;;  %v1017_v30 = vpop.f32.mrb[48].mxu0 }
 0x1ac   :  { %v1019_v41 = vpop.f32.mrb[49].mxu0  ;;  %v1018_v45 = vadd.f32 %v1017_v30, %v8465_v55 }
 0x1ad   :  { %v1021_v44 = vpop.f32.mrb[50].mxu0  ;;  %v1020_v20 = vadd.f32 %v1019_v41, %v8470_v61 }
 0x1ae   :  { %v1022_v22 = vadd.f32 %v1021_v44, %v8465_v55  ;;  %v1023_v47 = vpop.f32.mrb[51].mxu0 }
 0x1af   :  { %v1024_v49 = vadd.f32 %v1023_v47, %v8470_v61 }
 0x1b0   :  { %v8598_v50 = vpack.c.bf16 %v1022_v22, %v1018_v45  ;;  %1432 = vmatmul.mubr.bf16.gmra.mrb[156].mxu0 %v8415_v33  ;;  %v203_v45 = vsub.s32 2, %v8451_v34 }
 0x1b1   :  { %v8601_v31 = vpack.c.bf16 %v1024_v49, %v1020_v20  ;;  %v207_v20 = vsub.s32 3, %v8451_v34 }
 0x1b2   :  { %12250 = vst [vmem:[#allocation22_spill] sm:$0xff] %v8598_v50 }
 0x1b3   :  { %12251 = vst [vmem:[#allocation23_spill] sm:$0xff] %v8601_v31  ;;  %v1027_v51 = vpop.f32.mrb[52].mxu0 }
 0x1b4   :  { %v1029_v32 = vpop.f32.mrb[53].mxu0  ;;  %v1028_v53 = vadd.f32 %v1027_v51, %v8465_v55 }
 0x1b5   :  { %v1031_v52 = vpop.f32.mrb[54].mxu0  ;;  %v1030_v24 = vadd.f32 %v1029_v32, %v8470_v61  ;;  %v8630_v32 = vrot.slane %v8457_v14, %v203_v45 }
 0x1b6   :  { %v1032_v37 = vadd.f32 %v1031_v52, %v8465_v55  ;;  %v1033_v57 = vpop.f32.mrb[55].mxu0 }
 0x1b7   :  { %v1034_v59 = vadd.f32 %v1033_v57, %v8470_v61 }
 0x1b8   :  { %v8607_v60 = vpack.c.bf16 %v1032_v37, %v1028_v53  ;;  %v8633_v53 = vrot.slane %v8457_v14, %v207_v20  ;;  %v1170_v20 = vpop.f32.mrb[0].mxu1 }
 0x1b9   :  { %v8609_v63 = vpack.c.bf16 %v1034_v59, %v1030_v24 }
 0x1ba   :  { %12252 = vst [vmem:[#allocation24_spill] sm:$0xff] %v8607_v60 }
 0x1bb   :  { %12253 = vst [vmem:[#allocation25_spill] sm:$0xff] %v8609_v63  ;;  %v1037_v13 = vpop.f32.mrb[56].mxu0 }
 0x1bc   :  { %v1039_v33 = vpop.f32.mrb[57].mxu0  ;;  %v1038_v11 = vadd.f32 %v1037_v13, %v8465_v55 }
 0x1bd   :  { %v1041_v1 = vpop.f32.mrb[58].mxu0  ;;  %v1040_v7 = vadd.f32 %v1039_v33, %v8470_v61 }
 0x1be   :  { %v1042_v5 = vadd.f32 %v1041_v1, %v8465_v55  ;;  %v1043_v27 = vpop.f32.mrb[59].mxu0 }
 0x1bf   :  { %v1044_v56 = vadd.f32 %v1043_v27, %v8470_v61 }
 0x1c0   :  { %v8615_v62 = vpack.c.bf16 %v1042_v5, %v1038_v11 }
 0x1c1   :  { %v8617_v18 = vpack.c.bf16 %v1044_v56, %v1040_v7 }
 0x1c2   :  { %12254 = vst [vmem:[#allocation26_spill] sm:$0xff] %v8615_v62 }
 0x1c3   :  { %12255 = vst [vmem:[#allocation27_spill] sm:$0xff] %v8617_v18  ;;  %v1047_v39 = vpop.f32.mrb[60].mxu0 }
 0x1c4   :  { %v1049_v16 = vpop.f32.mrb[61].mxu0  ;;  %v1048_v30 = vadd.f32 %v1047_v39, %v8465_v55 }
 0x1c5   :  { %v1051_v3 = vpop.f32.mrb[62].mxu0  ;;  %v1050_v22 = vadd.f32 %v1049_v16, %v8470_v61 }
 0x1c6   :  { %v1052_v41 = vadd.f32 %v1051_v3, %v8465_v55  ;;  %v1053_v44 = vpop.f32.mrb[63].mxu0 }
 0x1c7   :  { %v1054_v47 = vadd.f32 %v1053_v44, %v8470_v61 }
 0x1c8   :  { %v8625_v49 = vpack.c.bf16 %v1052_v41, %v1048_v30 }
 0x1c9   :  { %v8627_v51 = vpack.c.bf16 %v1054_v47, %v1050_v22 }
 0x1ca   :  { %12256 = vst [vmem:[#allocation28_spill] sm:$0xff] %v8625_v49 }
 0x1cb   :  { %12257 = vst [vmem:[#allocation29_spill] sm:$0xff] %v8627_v51  ;;  %v1090_v52 = vpop.f32.mrb[64].mxu0 }
 0x1cc   :  { %v1092_v55 = vpop.f32.mrb[65].mxu0  ;;  %v1091_v57 = vadd.f32 %v1090_v52, %v8630_v32 }
 0x1cd   :  { %v1094_v37 = vpop.f32.mrb[66].mxu0  ;;  %v1093_v59 = vadd.f32 %v1092_v55, %v8633_v53  ;;  %v1171_v55 = vadd.f32 %v1170_v20, %v8630_v32 }
 0x1ce   :  { %v1095_v24 = vadd.f32 %v1094_v37, %v8630_v32  ;;  %v1096_v61 = vpop.f32.mrb[67].mxu0  ;;  %v1172_v37 = vpop.f32.mrb[1].mxu1 }
 0x1cf   :  { %v1097_v13 = vadd.f32 %v1096_v61, %v8633_v53 }
 0x1d0   :  { %v1444_v33 = vpack.c.bf16 %v1095_v24, %v1091_v57 }
 0x1d1   :  { %v8639_v1 = vpack.c.bf16 %v1097_v13, %v1093_v59  ;;  %v1173_v59 = vadd.f32 %v1172_v37, %v8633_v53  ;;  %v1174_v13 = vpop.f32.mrb[2].mxu1 }
 0x1d2   :  { %2024 = vrot.lane.b32.xlu0 %v1444_v33, %s8115_s2  ;;  %7189 = vmatprep.subr.msk.bf16.mxu1 %vm12035_vm0, %v1444_v33  ;;  %v1599_v11 = vsel %vm12035_vm0, %v1444_v33, 0 }
 0x1d3   :  { %v1100_v5 = vpop.f32.mrb[68].mxu0  ;;  %6646 = vmatpush3.bf16.xpose.msra.mxu1 %v1599_v11 }
 0x1d4   :  { %v1102_v27 = vpop.f32.mrb[69].mxu0  ;;  %v1101_v56 = vadd.f32 %v1100_v5, %v8630_v32  ;;  %v1175_v5 = vadd.f32 %v1174_v13, %v8630_v32 }
 0x1d5   :  { %v1104_v7 = vpop.f32.mrb[70].mxu0  ;;  %v1103_v3 = vadd.f32 %v1102_v27, %v8633_v53  ;;  %v1176_v27 = vpop.f32.mrb[3].mxu1 }
 0x1d6   :  { %v1105_v39 = vadd.f32 %v1104_v7, %v8630_v32  ;;  %v1106_v16 = vpop.f32.mrb[71].mxu0 }
 0x1d7   :  { %v1107_v30 = vadd.f32 %v1106_v16, %v8633_v53 }
 0x1d8   :  { %v1450_v41 = vpack.c.bf16 %v1105_v39, %v1101_v56  ;;  %v1177_v56 = vadd.f32 %v1176_v27, %v8633_v53  ;;  %v1180_v39 = vpop.f32.mrb[4].mxu1 }
 0x1d9   :  { %v8648_v44 = vpack.c.bf16 %v1107_v30, %v1103_v3  ;;  %v8663_v3 = vpack.c.bf16 %v1175_v5, %v1171_v55  ;;  %v1181_v30 = vadd.f32 %v1180_v39, %v8630_v32 }
 0x1da   :  { %2026 = vrot.lane.b32.xlu1 %v1450_v41, %s8115_s2  ;;  %7190 = vmatprep.subr.msk.bf16.mxu1 %vm12035_vm0, %v1450_v41  ;;  %v1602_v45 = vsel %vm12035_vm0, %v1450_v41, 0  ;;  %v1182_v41 = vpop.f32.mrb[5].mxu1 }
 0x1db   :  { %v1110_v22 = vpop.f32.mrb[72].mxu0  ;;  %6648 = vmatpush3.bf16.xpose.msra.mxu1 %v1602_v45  ;;  %12258 = vst [vmem:[#allocation30_spill] sm:$0xff] %v8663_v3  ;;  %v1184_v20 = vpop.f32.mrb[6].mxu1 }
 0x1dc   :  { %v1112_v47 = vpop.f32.mrb[73].mxu0  ;;  %v1111_v57 = vadd.f32 %v1110_v22, %v8630_v32  ;;  %v8669_v22 = vpack.c.bf16 %v1177_v56, %v1173_v59  ;;  %v1185_v37 = vadd.f32 %v1184_v20, %v8630_v32  ;;  %v1186_v55 = vpop.f32.mrb[7].mxu1 }
 0x1dd   :  { %v1114_v52 = vpop.f32.mrb[74].mxu0  ;;  %v1113_v33 = vadd.f32 %v1112_v47, %v8633_v53  ;;  %v1183_v47 = vadd.f32 %v1182_v41, %v8633_v53 }
 0x1de   :  { %v1115_v24 = vadd.f32 %v1114_v52, %v8630_v32  ;;  %v1116_v61 = vpop.f32.mrb[75].mxu0  ;;  %12259 = vst [vmem:[#allocation31_spill] sm:$0xff] %v8669_v22 }
 0x1df   :  { %v1117_v11 = vadd.f32 %v1116_v61, %v8633_v53  ;;  %v1190_v61 = vpop.f32.mrb[8].mxu1 }
 0x1e0   :  { %v1456_v7 = vpack.c.bf16 %v1115_v24, %v1111_v57  ;;  %v1187_v24 = vadd.f32 %v1186_v55, %v8633_v53  ;;  %v1191_v59 = vadd.f32 %v1190_v61, %v8630_v32  ;;  %v1192_v5 = vpop.f32.mrb[9].mxu1 }
 0x1e1   :  { %v8661_v16 = vpack.c.bf16 %v1117_v11, %v1113_v33  ;;  %v8675_v11 = vpack.c.bf16 %v1185_v37, %v1181_v30  ;;  %v1193_v41 = vadd.f32 %v1192_v5, %v8633_v53 }
 0x1e2   :  { %2028 = vrot.lane.b32.xlu0 %v1456_v7, %s8115_s2  ;;  %7191 = vmatprep.subr.msk.bf16.mxu1 %vm12035_vm0, %v1456_v7  ;;  %v1605_v45 = vsel %vm12035_vm0, %v1456_v7, 0  ;;  %v8680_v39 = vpack.c.bf16 %v1187_v24, %v1183_v47 }
 0x1e3   :  { %v1120_v52 = vpop.f32.mrb[76].mxu0  ;;  %6650 = vmatpush3.bf16.xpose.msra.mxu1 %v1605_v45  ;;  %12260 = vst [vmem:[#allocation32_spill] sm:$0xff] %v8675_v11  ;;  %v1194_v45 = vpop.f32.mrb[10].mxu1 }
 0x1e4   :  { %v1122_v57 = vpop.f32.mrb[77].mxu0  ;;  %v1121_v27 = vadd.f32 %v1120_v52, %v8630_v32  ;;  %12261 = vst [vmem:[#allocation33_spill] sm:$0xff] %v8680_v39  ;;  %v1195_v55 = vadd.f32 %v1194_v45, %v8630_v32 }
 0x1e5   :  { %v1123_v13 = vadd.f32 %v1122_v57, %v8633_v53  ;;  %v1124_v33 = vpop.f32.mrb[78].mxu0  ;;  %v1196_v57 = vpop.f32.mrb[11].mxu1 }
 0x1e6   :  { %v1125_v7 = vadd.f32 %v1124_v33, %v8630_v32  ;;  %v1126_v56 = vpop.f32.mrb[79].mxu0  ;;  %v1197_v37 = vadd.f32 %v1196_v57, %v8633_v53  ;;  %v1200_v61 = vpop.f32.mrb[12].mxu1  ;;  %v8688_v52 = vpack.c.bf16 %v1195_v55, %v1191_v59 }
 0x1e7   :  { %v1127_v20 = vadd.f32 %v1126_v56, %v8633_v53  ;;  %v1201_v33 = vadd.f32 %v1200_v61, %v8630_v32  ;;  %v1202_v47 = vpop.f32.mrb[13].mxu1 }
 0x1e8   :  { %v1462_v30 = vpack.c.bf16 %v1125_v7, %v1121_v27  ;;  %12262 = vst [vmem:[#allocation34_spill] sm:$0xff] %v8688_v52  ;;  %v8694_v5 = vpack.c.bf16 %v1197_v37, %v1193_v41  ;;  %v1203_v27 = vadd.f32 %v1202_v47, %v8633_v53  ;;  %v1204_v7 = vpop.f32.mrb[14].mxu1 }
 0x1e9   :  { %v8686_v36 = vpack.c.bf16 %v1127_v20, %v1123_v13  ;;  %v1205_v13 = vadd.f32 %v1204_v7, %v8630_v32  ;;  %v1206_v59 = vpop.f32.mrb[15].mxu1 }
 0x1ea   :  { %2030 = vrot.lane.b32.xlu1 %v1462_v30, %s8115_s2  ;;  %7192 = vmatprep.subr.msk.bf16.mxu1 %vm12035_vm0, %v1462_v30  ;;  %v1608_v24 = vsel %vm12035_vm0, %v1462_v30, 0  ;;  %12263 = vst [vmem:[#allocation35_spill] sm:$0xff] %v8694_v5  ;;  %v1207_v20 = vadd.f32 %v1206_v59, %v8633_v53  ;;  %v1210_v55 = vpop.f32.mrb[16].mxu1 }
 0x1eb   :  { %v1130_v56 = vpop.f32.mrb[80].mxu0  ;;  %6652 = vmatpush3.bf16.xpose.msra.mxu1 %v1608_v24  ;;  %v8700_v35 = vpack.c.bf16 %v1205_v13, %v1201_v33  ;;  %v1211_v41 = vadd.f32 %v1210_v55, %v8630_v32  ;;  %v1212_v30 = vpop.f32.mrb[17].mxu1 }
 0x1ec   :  { %v1132_v45 = vpop.f32.mrb[81].mxu0  ;;  %v1131_v37 = vadd.f32 %v1130_v56, %v8630_v32  ;;  %v8705_v28 = vpack.c.bf16 %v1207_v20, %v1203_v27  ;;  %v1213_v7 = vadd.f32 %v1212_v30, %v8633_v53  ;;  %v1214_v18 = vpop.f32.mrb[18].mxu1 }
 0x1ed   :  { %v1133_v57 = vadd.f32 %v1132_v45, %v8633_v53  ;;  %v1134_v61 = vpop.f32.mrb[82].mxu0  ;;  %12264 = vst [vmem:[#allocation36_spill] sm:$0xff] %v8700_v35  ;;  %v1215_v45 = vadd.f32 %v1214_v18, %v8630_v32  ;;  %v1216_v31 = vpop.f32.mrb[19].mxu1  ;;  %v12292_v35 = vmov 0 }
 0x1ee   :  { %v1135_v47 = vadd.f32 %v1134_v61, %v8630_v32  ;;  %v1136_v24 = vpop.f32.mrb[83].mxu0  ;;  %12265 = vst [vmem:[#allocation37_spill] sm:$0xff] %v8705_v28  ;;  %v1217_v13 = vadd.f32 %v1216_v31, %v8633_v53  ;;  %v1220_v55 = vpop.f32.mrb[20].mxu1 }
 0x1ef   :  { %v1137_v59 = vadd.f32 %v1136_v24, %v8633_v53  ;;  %v8715_v56 = vpack.c.bf16 %v1215_v45, %v1211_v41  ;;  %v1221_v27 = vadd.f32 %v1220_v55, %v8630_v32  ;;  %v1222_v20 = vpop.f32.mrb[21].mxu1 }
 0x1f0   :  { %v8710_v33 = vpack.c.bf16 %v1135_v47, %v1131_v37  ;;  %v8722_v18 = vpack.c.bf16 %v1217_v13, %v1213_v7  ;;  %v1223_v30 = vadd.f32 %v1222_v20, %v8633_v53  ;;  %v1224_v37 = vpop.f32.mrb[22].mxu1 }
 0x1f1   :  { %v8713_v26 = vpack.c.bf16 %v1137_v59, %v1133_v57  ;;  %12266 = vst [vmem:[#allocation38_spill] sm:$0xff] %v8715_v56  ;;  %v1225_v57 = vadd.f32 %v1224_v37, %v8630_v32  ;;  %v1226_v41 = vpop.f32.mrb[23].mxu1 }
 0x1f2   :  { %7193 = vmatprep.subr.msk.bf16.mxu1 %vm12035_vm0, %v8710_v33  ;;  %v1611_v61 = vsel %vm12035_vm0, %v8710_v33, 0  ;;  %12267 = vst [vmem:[#allocation39_spill] sm:$0xff] %v8722_v18  ;;  %v1227_v24 = vadd.f32 %v1226_v41, %v8633_v53  ;;  %v1230_v59 = vpop.f32.mrb[24].mxu1 }
 0x1f3   :  { %v1140_v31 = vpop.f32.mrb[84].mxu0  ;;  %6654 = vmatpush3.bf16.xpose.msra.mxu1 %v1611_v61  ;;  %v8728_v19 = vpack.c.bf16 %v1225_v57, %v1221_v27  ;;  %v1231_v7 = vadd.f32 %v1230_v59, %v8630_v32  ;;  %v1232_v13 = vpop.f32.mrb[25].mxu1 }
 0x1f4   :  { %v1142_v47 = vpop.f32.mrb[85].mxu0  ;;  %v1141_v20 = vadd.f32 %v1140_v31, %v8630_v32  ;;  %v8733_v18 = vpack.c.bf16 %v1227_v24, %v1223_v30  ;;  %v1233_v37 = vadd.f32 %v1232_v13, %v8633_v53  ;;  %v1234_v63 = vpop.f32.mrb[26].mxu1 }
 0x1f5   :  { %v1143_v45 = vadd.f32 %v1142_v47, %v8633_v53  ;;  %v1144_v55 = vpop.f32.mrb[86].mxu0  ;;  %12268 = vst [vmem:[#allocation40_spill] sm:$0xff] %v8728_v19  ;;  %v1235_v47 = vadd.f32 %v1234_v63, %v8630_v32  ;;  %v1236_v5 = vpop.f32.mrb[27].mxu1  ;;  %v12289_v19 = vmov 0 }
 0x1f6   :  { %v1145_v51 = vadd.f32 %v1144_v55, %v8630_v32  ;;  %v1146_v61 = vpop.f32.mrb[87].mxu0  ;;  %12269 = vst [vmem:[#allocation41_spill] sm:$0xff] %v8733_v18  ;;  %v1237_v57 = vadd.f32 %v1236_v5, %v8633_v53  ;;  %v1240_v59 = vpop.f32.mrb[28].mxu1 }
 0x1f7   :  { %v1147_v41 = vadd.f32 %v1146_v61, %v8633_v53  ;;  %v8743_v31 = vpack.c.bf16 %v1235_v47, %v1231_v7  ;;  %v1241_v30 = vadd.f32 %v1240_v59, %v8630_v32  ;;  %v1242_v24 = vpop.f32.mrb[29].mxu1 }
 0x1f8   :  { %v8738_v27 = vpack.c.bf16 %v1145_v51, %v1141_v20  ;;  %v8750_v63 = vpack.c.bf16 %v1237_v57, %v1233_v37  ;;  %v1243_v51 = vadd.f32 %v1242_v24, %v8633_v53  ;;  %v1244_v13 = vpop.f32.mrb[30].mxu1 }
 0x1f9   :  { %v8741_v29 = vpack.c.bf16 %v1147_v41, %v1143_v45  ;;  %12270 = vst [vmem:[#allocation42_spill] sm:$0xff] %v8743_v31  ;;  %v1245_v45 = vadd.f32 %v1244_v13, %v8630_v32  ;;  %v1246_v7 = vpop.f32.mrb[31].mxu1 }
 0x1fa   :  { %7194 = vmatprep.subr.msk.bf16.mxu1 %vm12035_vm0, %v8738_v27  ;;  %v1614_v55 = vsel %vm12035_vm0, %v8738_v27, 0  ;;  %12271 = vst [vmem:[#allocation43_spill] sm:$0xff] %v8750_v63  ;;  %v1247_v61 = vadd.f32 %v1246_v7, %v8633_v53  ;;  %v211_v7 = vsub.s32 4, %v8451_v34 }
 0x1fb   :  { %v1150_v5 = vpop.f32.mrb[88].mxu0  ;;  %6656 = vmatpush3.bf16.xpose.msra.mxu1 %v1614_v55  ;;  %v8756_v59 = vpack.c.bf16 %v1245_v45, %v1241_v30 }
 0x1fc   :  { %v1152_v20 = vpop.f32.mrb[89].mxu0  ;;  %v1151_v22 = vadd.f32 %v1150_v5, %v8630_v32  ;;  %v8760_v24 = vpack.c.bf16 %v1247_v61, %v1243_v51  ;;  %v215_v61 = vsub.s32 5, %v8451_v34 }
 0x1fd   :  { %v1153_v41 = vadd.f32 %v1152_v20, %v8633_v53  ;;  %v1154_v47 = vpop.f32.mrb[90].mxu0  ;;  %12272 = vst [vmem:[#allocation44_spill] sm:$0xff] %v8756_v59 }
 0x1fe   :  { %v1155_v37 = vadd.f32 %v1154_v47, %v8630_v32  ;;  %v1156_v57 = vpop.f32.mrb[91].mxu0  ;;  %12273 = vst [vmem:[#allocation45_spill] sm:$0xff] %v8760_v24  ;;  %v8785_v24 = vrot.slane %v8457_v14, %v215_v61 }
 0x1ff   :  { %v1157_v55 = vadd.f32 %v1156_v57, %v8633_v53 }
 0x200   :  { %v8763_v63 = vpack.c.bf16 %v1155_v37, %v1151_v22  ;;  %12275 = vst [vmem:[#allocation47_spill] sm:$0xff] %v8785_v24 }
 0x201   :  { %v8765_v13 = vpack.c.bf16 %v1157_v55, %v1153_v41  ;;  %v8780_v55 = vrot.slane %v8457_v14, %v211_v7 }
 0x202   :  { %7195 = vmatprep.subr.msk.bf16.mxu1 %vm12035_vm0, %v8763_v63  ;;  %v1617_v30 = vsel %vm12035_vm0, %v8763_v63, 0 }
 0x203   :  { %v1160_v45 = vpop.f32.mrb[92].mxu0  ;;  %6658 = vmatpush3.bf16.xpose.msra.mxu1 %v1617_v30  ;;  %12274 = vst [vmem:[#allocation46_spill] sm:$0xff] %v8780_v55 }
 0x204   :  { %v1162_v5 = vpop.f32.mrb[93].mxu0  ;;  %v1161_v22 = vadd.f32 %v1160_v45, %v8630_v32 }
 0x205   :  { %v1163_v51 = vadd.f32 %v1162_v5, %v8633_v53  ;;  %v1164_v20 = vpop.f32.mrb[94].mxu0 }
 0x206   :  { %v1165_v41 = vadd.f32 %v1164_v20, %v8630_v32  ;;  %v1166_v47 = vpop.f32.mrb[95].mxu0 }
 0x207   :  { %v1167_v37 = vadd.f32 %v1166_v47, %v8633_v53 }
 0x208   :  { %v8777_v57 = vpack.c.bf16 %v1165_v41, %v1161_v22 }
 0x209   :  { %v8782_v30 = vpack.c.bf16 %v1167_v37, %v1163_v51 }
 0x20a   :  { %7196 = vmatprep.subr.msk.bf16.mxu1 %vm12035_vm0, %v8777_v57  ;;  %v1620_v45 = vsel %vm12035_vm0, %v8777_v57, 0 }
 0x20b   :  { %6660 = vmatpush3.bf16.xpose.msra.mxu1 %v1620_v45  ;;  %v1283_v32 = vpop.f32.mrb[96].mxu0 }
 0x20c   :  { %v1284_v53 = vadd.f32 %v1283_v32, %v8780_v55  ;;  %v1285_v5 = vpop.f32.mrb[97].mxu0 }
 0x20d   :  { %v1286_v20 = vadd.f32 %v1285_v5, %v8785_v24  ;;  %v1287_v7 = vpop.f32.mrb[98].mxu0 }
 0x20e   :  { %v1288_v51 = vadd.f32 %v1287_v7, %v8780_v55  ;;  %v1289_v22 = vpop.f32.mrb[99].mxu0 }
 0x20f   :  { %v1290_v14 = vadd.f32 %v1289_v22, %v8785_v24 }
 0x210   :  { %v8795_v61 = vpack.c.bf16 %v1288_v51, %v1284_v53 }
 0x211   :  { %v8797_v41 = vpack.c.bf16 %v1290_v14, %v1286_v20 }
 0x212   :  { %6662 = vmatmul.mubr.msk.bf16.vlgmr.msra.gmra.mrb[32].mxu1 %vm12035_vm0, %v8488_v8  ;;  %6677 = vmatprep.subr.bf16.mxu1 %v8795_v61 }
 0x213   :  { %6665 = vmatprep.mubr.msk.bf16.mxu1 %vm12035_vm0, %v8498_v0  ;;  %v1293_v47 = vpop.f32.mrb[100].mxu0  ;;  %6678 = vmatpush3.bf16.msra.mxu1 %v8795_v61 }
 0x214   :  { %v1294_v37 = vadd.f32 %v1293_v47, %v8780_v55  ;;  %v1295_v45 = vpop.f32.mrb[101].mxu0 }
 0x215   :  { %v1296_v32 = vadd.f32 %v1295_v45, %v8785_v24  ;;  %v1297_v53 = vpop.f32.mrb[102].mxu0 }
 0x216   :  { %v1298_v5 = vadd.f32 %v1297_v53, %v8780_v55  ;;  %v1299_v20 = vpop.f32.mrb[103].mxu0 }
 0x217   :  { %v1300_v7 = vadd.f32 %v1299_v20, %v8785_v24 }
 0x218   :  { %v8809_v51 = vpack.c.bf16 %v1298_v5, %v1294_v37 }
 0x219   :  { %v8811_v22 = vpack.c.bf16 %v1300_v7, %v1296_v32 }
 0x21a   :  { %6666 = vmatmul.mubr.msk.bf16.gmra.mrb[36].mxu1 %vm12035_vm0, %v8508_v38  ;;  %6679 = vmatprep.subr.bf16.mxu1 %v8809_v51 }
 0x21b   :  { %12276 = vst [vmem:[#allocation48_spill] sm:$0xff] %v8811_v22  ;;  %6669 = vmatprep.mubr.msk.bf16.mxu1 %vm12035_vm0, %v8518_v46  ;;  %v1303_v14 = vpop.f32.mrb[104].mxu0  ;;  %6680 = vmatpush3.bf16.msra.mxu1 %v8809_v51 }
 0x21c   :  { %v1304_v47 = vadd.f32 %v1303_v14, %v8780_v55  ;;  %v1305_v45 = vpop.f32.mrb[105].mxu0 }
 0x21d   :  { %v1306_v53 = vadd.f32 %v1305_v45, %v8785_v24  ;;  %v1307_v37 = vpop.f32.mrb[106].mxu0 }
 0x21e   :  { %v1308_v32 = vadd.f32 %v1307_v37, %v8780_v55  ;;  %v1309_v5 = vpop.f32.mrb[107].mxu0 }
 0x21f   :  { %v1310_v20 = vadd.f32 %v1309_v5, %v8785_v24 }
 0x220   :  { %v8823_v7 = vpack.c.bf16 %v1308_v32, %v1304_v47 }
 0x221   :  { %v8825_v23 = vpack.c.bf16 %v1310_v20, %v1306_v53 }
 0x222   :  { %6670 = vmatmul.mubr.msk.bf16.gmra.mrb[40].mxu1 %vm12035_vm0, %v8528_v54  ;;  %6681 = vmatprep.subr.bf16.mxu1 %v8823_v7 }
 0x223   :  { %12277 = vst [vmem:[#allocation49_spill] sm:$0xff] %v8825_v23  ;;  %6673 = vmatprep.mubr.msk.bf16.mxu1 %vm12035_vm0, %v8538_v2  ;;  %v1313_v14 = vpop.f32.mrb[108].mxu0  ;;  %6682 = vmatpush3.bf16.msra.mxu1 %v8823_v7 }
 0x224   :  { %v1314_v45 = vadd.f32 %v1313_v14, %v8780_v55  ;;  %v1315_v37 = vpop.f32.mrb[109].mxu0 }
 0x225   :  { %v1316_v5 = vadd.f32 %v1315_v37, %v8785_v24  ;;  %v1317_v47 = vpop.f32.mrb[110].mxu0 }
 0x226   :  { %v1318_v53 = vadd.f32 %v1317_v47, %v8780_v55  ;;  %v1319_v32 = vpop.f32.mrb[111].mxu0 }
 0x227   :  { %v1320_v20 = vadd.f32 %v1319_v32, %v8785_v24 }
 0x228   :  { %v8837_v18 = vpack.c.bf16 %v1318_v53, %v1314_v45 }
 0x229   :  { %v8839_v28 = vpack.c.bf16 %v1320_v20, %v1316_v5 }
 0x22a   :  { %6674 = vmatmul.mubr.msk.bf16.gmra.mrb[44].mxu1 %vm12035_vm0, %v8548_v40  ;;  %6683 = vmatprep.subr.bf16.mxu1 %v8837_v18 }
 0x22b   :  { %12278 = vst [vmem:[#allocation50_spill] sm:$0xff] %v8839_v28  ;;  %v1323_v39 = vpop.f32.mrb[112].mxu0  ;;  %6684 = vmatpush3.bf16.msra.mxu1 %v8837_v18 }
 0x22c   :  { %v1324_v14 = vadd.f32 %v1323_v39, %v8780_v55  ;;  %v1325_v37 = vpop.f32.mrb[113].mxu0 }
 0x22d   :  { %v1326_v47 = vadd.f32 %v1325_v37, %v8785_v24  ;;  %v1327_v49 = vpop.f32.mrb[114].mxu0 }
 0x22e   :  { %v1328_v32 = vadd.f32 %v1327_v49, %v8780_v55  ;;  %v1329_v45 = vpop.f32.mrb[115].mxu0 }
 0x22f   :  { %v1330_v5 = vadd.f32 %v1329_v45, %v8785_v24 }
 0x230   :  { %v8849_v53 = vpack.c.bf16 %v1328_v32, %v1324_v14 }
 0x231   :  { %v8851_v20 = vpack.c.bf16 %v1330_v5, %v1326_v47 }
 0x232   :  { %6685 = vmatprep.subr.bf16.mxu1 %v8849_v53 }
 0x233   :  { %12279 = vst [vmem:[#allocation51_spill] sm:$0xff] %v8851_v20  ;;  %v1333_v62 = vpop.f32.mrb[116].mxu0  ;;  %6686 = vmatpush3.bf16.msra.mxu1 %v8849_v53 }
 0x234   :  { %v1334_v39 = vadd.f32 %v1333_v62, %v8780_v55  ;;  %v1335_v60 = vpop.f32.mrb[117].mxu0 }
 0x235   :  { %v1336_v37 = vadd.f32 %v1335_v60, %v8785_v24  ;;  %v1337_v50 = vpop.f32.mrb[118].mxu0 }
 0x236   :  { %v1338_v49 = vadd.f32 %v1337_v50, %v8780_v55  ;;  %v1339_v4 = vpop.f32.mrb[119].mxu0 }
 0x237   :  { %v1340_v45 = vadd.f32 %v1339_v4, %v8785_v24 }
 0x238   :  { %v8859_v14 = vpack.c.bf16 %v1338_v49, %v1334_v39 }
 0x239   :  { %v8861_v47 = vpack.c.bf16 %v1340_v45, %v1336_v37 }
 0x23a   :  { %6687 = vmatprep.subr.bf16.mxu1 %v8859_v14 }
 0x23b   :  { %12280 = vst [vmem:[#allocation52_spill] sm:$0xff] %v8861_v47  ;;  %v1343_v32 = vpop.f32.mrb[120].mxu0  ;;  %6688 = vmatpush3.bf16.msra.mxu1 %v8859_v14 }
 0x23c   :  { %v1344_v62 = vadd.f32 %v1343_v32, %v8780_v55  ;;  %v1345_v5 = vpop.f32.mrb[121].mxu0 }
 0x23d   :  { %v1346_v60 = vadd.f32 %v1345_v5, %v8785_v24  ;;  %v1347_v6 = vpop.f32.mrb[122].mxu0 }
 0x23e   :  { %v1348_v50 = vadd.f32 %v1347_v6, %v8780_v55  ;;  %v1349_v58 = vpop.f32.mrb[123].mxu0  ;;  %v1541_v6 = vadd.s32 16, %v8451_v34 }
 0x23f   :  { %v1350_v4 = vadd.f32 %v1349_v58, %v8785_v24 }
 0x240   :  { %v8869_v39 = vpack.c.bf16 %v1348_v50, %v1344_v62  ;;  %v12282_v62 = vlaneseq  ;;  %v12283_v50 = vmov 0 }
 0x241   :  { %v8871_v37 = vpack.c.bf16 %v1350_v4, %v1346_v60  ;;  %v12286_v4 = vmov 0 }
 0x242   :  { %6689 = vmatprep.subr.bf16.mxu1 %v8869_v39  ;;  %v8887_v60 = vand.u32 127, %v12282_v62 }
 0x243   :  { %12281 = vst [vmem:[#allocation53_spill] sm:$0xff] %v8871_v37  ;;  %v1353_v49 = vpop.f32.mrb[124].mxu0  ;;  %6690 = vmatpush3.bf16.msra.mxu1 %v8869_v39 }
 0x244   :  { %v1354_v45 = vadd.f32 %v1353_v49, %v8780_v55  ;;  %v1355_v32 = vpop.f32.mrb[125].mxu0  ;;  %v8880_v58 = vpop.permute.xlu0 %2024  ;;  %vm8890_vm1 = vcmp.le.s32.totalorder %v8887_v60, %v1541_v6  ;;  %vm8897_vm2 = vcmp.le.s32.totalorder %v8887_v60, %v8451_v34  ;;  %v1540_v49 = vadd.s32 8, %v8451_v34 }
 0x245   :  { %v1357_v48 = vpop.f32.mrb[126].mxu0  ;;  %v12284_v50 = vsel %vm8890_vm1, 4294967295, %v12283_v50  ;;  %v12287_v4 = vsel %vm8897_vm2, 4294967295, %v12286_v4  ;;  %vm8964_vm7 = vcmp.le.s32.totalorder %v8887_v60, %v1546_v15 }
 0x246   :  { %v1358_v5 = vadd.f32 %v1357_v48, %v8780_v55  ;;  %12285 = vst [vmem:[#allocation54_spill] sm:$0xff] %v12284_v50  ;;  %v1542_v48 = vadd.s32 24, %v8451_v34  ;;  %12288 = vst [vmem:[#allocation55_spill] sm:$0xff] %v12287_v4  ;;  %vm8918_vm4 = vcmp.le.s32.totalorder %v8887_v60, %v1540_v49  ;;  %v1359_v22 = vpop.f32.mrb[127].mxu0  ;;  %v1543_v4 = vadd.s32 32, %v8451_v34 }
 0x247   :  { %v12293_v35 = vsel %vm8918_vm4, 4294967295, %v12292_v35  ;;  %v1545_v50 = vadd.s32 48, %v8451_v34 }
 0x248   :  { %v8877_v59 = vpack.c.bf16 %v1358_v5, %v1354_v45  ;;  %vm8912_vm3 = vcmp.le.s32.totalorder %v8887_v60, %v1542_v48  ;;  %12294 = vst [vmem:[#allocation57_spill] sm:$0xff] %v12293_v35  ;;  %v1360_v35 = vadd.f32 %v1359_v22, %v8785_v24  ;;  %vm8943_vm5 = vcmp.le.s32.totalorder %v8887_v60, %v1543_v4 }
 0x249   :  { %v12290_v19 = vsel %vm8912_vm3, 4294967295, %v12289_v19  ;;  %vm8949_vm6 = vcmp.le.s32.totalorder %v8887_v60, %v1545_v50  ;;  %v1544_v22 = vadd.s32 40, %v8451_v34  ;;  %v12302_v4 = vmov 0 }
 0x24a   :  { %6691 = vmatprep.subr.bf16.mxu1 %v8877_v59  ;;  %12291 = vst [vmem:[#allocation56_spill] sm:$0xff] %v12290_v19  ;;  %v12303_v4 = vsel %vm8964_vm7, 4294967295, %v12302_v4  ;;  %v1549_v50 = vadd.s32 80, %v8451_v34 }
 0x24b   :  { %6692 = vmatpush3.bf16.msra.mxu1 %v8877_v59  ;;  %12304 = vst [vmem:[#allocation61_spill] sm:$0xff] %v12303_v4  ;;  %vm8971_vm8 = vcmp.le.s32.totalorder %v8887_v60, %v1544_v22  ;;  %v1547_v22 = vadd.s32 64, %v8451_v34 }
 0x24c   :  { %7197 = vmatprep.subr.msk.bf16.mxu1 %vm12035_vm0, %v8880_v58  ;;  %vm8986_vm9 = vcmp.le.s32.totalorder %v8887_v60, %v1549_v50 }
 0x24d   :  { %vm9008_vm11 = vcmp.le.s32.totalorder %v8887_v60, %v1547_v22 }
 0x2e5   :  { %v6663_v45 = vpop.f32.mrb[32].mxu1 }
 0x2e6   :  { %v1656_v5 = vpop.f32.mrb[33].mxu1  ;;  %v8904_v62 = vsel %vm8890_vm1, %v6663_v45, -1.7014117e+38 }
 0x2e7   :  { %1739 = vmax.xlane.f32.xlu1 %v8904_v62  ;;  %v6664_v6 = vpop.f32.mrb[34].mxu1  ;;  %v8909_v31 = vsel %vm8897_vm2, %v1656_v5, -1.7014117e+38 }
 0x2e8   :  { %1735 = vmax.xlane.f32.xlu0 %v8909_v31  ;;  %v1659_v56 = vpop.f32.mrb[35].mxu1  ;;  %v8924_v45 = vsel %vm8912_vm3, %v6664_v6, -1.7014117e+38 }
 0x2e9   :  { %v8929_v48 = vsel %vm8918_vm4, %v1659_v56, -1.7014117e+38  ;;  %v1356_v56 = vadd.f32 %v1355_v32, %v8785_v24  ;;  %v12308_v24 = vmov 0 }
 0x2ea   :  { %v12309_v24 = vsel %vm8986_vm9, 4294967295, %v12308_v24 }
 0x2eb   :  { %1741 = vmax.xlane.f32.xlu1 %v8924_v45  ;;  %v8938_v19 = vpack.c.bf16 %v1360_v35, %v1356_v56  ;;  %v12305_v56 = vmov 0  ;;  %12310 = vst [vmem:[#allocation63_spill] sm:$0xff] %v12309_v24  ;;  %v12317_v24 = vmov 0 }
 0x2ec   :  { %1737 = vmax.xlane.f32.xlu0 %v8929_v48  ;;  %v12306_v56 = vsel %vm8971_vm8, 4294967295, %v12305_v56 }
 0x2ed   :  { %v6667_v5 = vpop.f32.mrb[36].mxu1  ;;  %12295 = vst [vmem:[#allocation58_spill] sm:$0xff] %v8938_v19  ;;  %12307 = vst [vmem:[#allocation62_spill] sm:$0xff] %v12306_v56  ;;  %v12311_v19 = vmov 0  ;;  %v12314_v56 = vmov 0 }
 0x2ee   :  { %v1672_v52 = vpop.f32.mrb[37].mxu1  ;;  %v8961_v32 = vsel %vm8949_vm6, %v6667_v5, -1.7014117e+38  ;;  %v12315_v56 = vsel %vm9008_vm11, 4294967295, %v12314_v56 }
 0x2ef   :  { %v6668_v3 = vpop.f32.mrb[38].mxu1  ;;  %v8956_v35 = vsel %vm8943_vm5, %v1672_v52, -1.7014117e+38  ;;  %v1553_v52 = vadd.s32 112, %v8451_v34  ;;  %12316 = vst [vmem:[#allocation65_spill] sm:$0xff] %v12315_v56  ;;  %v12323_v56 = vmov 0 }
 0x2f0   :  { %v1675_v11 = vpop.f32.mrb[39].mxu1  ;;  %v8978_v5 = vsel %vm8964_vm7, %v6668_v3, -1.7014117e+38  ;;  %v1551_v3 = vadd.s32 96, %v8451_v34 }
 0x2f1   :  { %v8983_v15 = vsel %vm8971_vm8, %v1675_v11, -1.7014117e+38  ;;  %vm8993_vm10 = vcmp.le.s32.totalorder %v8887_v60, %v1553_v52  ;;  %v1550_v52 = vadd.s32 88, %v8451_v34 }
 0x2f2   :  { %v12312_v19 = vsel %vm8993_vm10, 4294967295, %v12311_v19  ;;  %vm9015_vm12 = vcmp.le.s32.totalorder %v8887_v60, %v1551_v3  ;;  %v1548_v3 = vadd.s32 72, %v8451_v34 }
 0x2f3   :  { %12313 = vst [vmem:[#allocation64_spill] sm:$0xff] %v12312_v19  ;;  %v12318_v24 = vsel %vm9015_vm12, 4294967295, %v12317_v24  ;;  %vm9030_vm13 = vcmp.le.s32.totalorder %v8887_v60, %v1550_v52  ;;  %v12320_v19 = vmov 0  ;;  %v12326_v52 = vmov 0 }
 0x2f4   :  { %12319 = vst [vmem:[#allocation66_spill] sm:$0xff] %v12318_v24  ;;  %v12321_v19 = vsel %vm9030_vm13, 4294967295, %v12320_v19  ;;  %vm9051_vm15 = vcmp.le.s32.totalorder %v8887_v60, %v1548_v3 }
 0x2f5   :  { %v6671_v49 = vpop.f32.mrb[40].mxu1  ;;  %12322 = vst [vmem:[#allocation67_spill] sm:$0xff] %v12321_v19  ;;  %v12327_v52 = vsel %vm9051_vm15, 4294967295, %v12326_v52 }
 0x2f6   :  { %v1688_v55 = vpop.f32.mrb[41].mxu1  ;;  %v9000_v11 = vsel %vm8986_vm9, %v6671_v49, -1.7014117e+38  ;;  %v1554_v49 = vadd.s32 120, %v8451_v34  ;;  %12328 = vst [vmem:[#allocation69_spill] sm:$0xff] %v12327_v52 }
 0x2f7   :  { %v6672_v37 = vpop.f32.mrb[42].mxu1 }
 0x2f8   :  { %v1691_v47 = vpop.f32.mrb[43].mxu1  ;;  %vm9037_vm14 = vcmp.le.s32.totalorder %v8887_v60, %v1554_v49  ;;  %v1552_v49 = vadd.s32 104, %v8451_v34 }
 0x2f9   :  { %v12324_v56 = vsel %vm9037_vm14, 4294967295, %v12323_v56  ;;  %v9059_v24 = vsel %vm9051_vm15, %v1691_v47, -1.7014117e+38 }
 0x2fa   :  { %12325 = vst [vmem:[#allocation68_spill] sm:$0xff] %v12324_v56  ;;  %vm9063_vm0 = vcmp.le.s32.totalorder %v8887_v60, %v1552_v49 }
 0x2fc   :  { %2034 = vrot.lane.b32.xlu1 %v8738_v27, %s8115_s2  ;;  %v12296_v27 = vmov 0 }
 0x2fd   :  { %v6675_v6 = vpop.f32.mrb[44].mxu1  ;;  %v12297_v27 = vsel %vm8943_vm5, 4294967295, %v12296_v27 }
 0x2fe   :  { %v1704_v20 = vpop.f32.mrb[45].mxu1  ;;  %12298 = vst [vmem:[#allocation59_spill] sm:$0xff] %v12297_v27  ;;  %v9005_v50 = vsel %vm8993_vm10, %v6675_v6, -1.7014117e+38  ;;  %v9022_v6 = vsel %vm9008_vm11, %v1688_v55, -1.7014117e+38 }
 0x2ff   :  { %v6676_v28 = vpop.f32.mrb[46].mxu1  ;;  %v9027_v22 = vsel %vm9015_vm12, %v1704_v20, -1.7014117e+38  ;;  %v9043_v55 = vsel %vm9030_vm13, %v6672_v37, -1.7014117e+38  ;;  %v12329_v37 = vmov 0 }
 0x300   :  { %v1707_v23 = vpop.f32.mrb[47].mxu1  ;;  %v9048_v20 = vsel %vm9037_vm14, %v6676_v28, -1.7014117e+38  ;;  %v12330_v37 = vsel %vm9063_vm0, 4294967295, %v12329_v37 }
 0x301   :  { %12331 = vst [vmem:[#allocation70_spill] sm:$0xff] %v12330_v37  ;;  %v9069_v28 = vsel %vm9063_vm0, %v1707_v23, -1.7014117e+38  ;;  %vm12336_vm0 = vcmask 523264  }
 0x302   :  { %2032 = vrot.lane.b32.xlu0 %v8710_v33, %s8115_s2  ;;  %v12299_v33 = vmov 0  ;;  %v2065_v60 = vsel %vm12336_vm0, %v8880_v58, 0  ;;  %vm12337_vm14 = vmmov %vm12336_vm0 }
 0x303   :  { %v12300_v33 = vsel %vm8949_vm6, 4294967295, %v12299_v33  ;;  %vm12338_vm10 = vmmov %vm12336_vm0 }
 0x304   :  { %12301 = vst [vmem:[#allocation60_spill] sm:$0xff] %v12300_v33  ;;  %vm12339_vm12 = vmmov %vm12336_vm0 }
 0x305   :  { %vm12340_vm15 = vmmov %vm12336_vm0 }
 0x306   :  { %vm12341_vm13 = vmmov %vm12336_vm0 }
 0x307   :  { %vm12342_vm9 = vmmov %vm12336_vm0 }
 0x308   :  { %vm12343_vm11 = vmmov %vm12336_vm0 }
 0x320   :  { %1743 = vmax.xlane.f32.xlu1 %v8956_v35 }
 0x321   :  { %1747 = vmax.xlane.f32.xlu0 %v8961_v32 }
 0x324   :  { %1749 = vmax.xlane.f32.xlu1 %v8978_v5 }
 0x325   :  { %1745 = vmax.xlane.f32.xlu0 %v8983_v15 }
 0x328   :  { %1755 = vmax.xlane.f32.xlu1 %v9000_v11 }
 0x329   :  { %1763 = vmax.xlane.f32.xlu0 %v9005_v50 }
 0x32c   :  { %1751 = vmax.xlane.f32.xlu1 %v9022_v6 }
 0x32d   :  { %1759 = vmax.xlane.f32.xlu0 %v9027_v22 }
 0x330   :  { %1757 = vmax.xlane.f32.xlu1 %v9043_v55 }
 0x331   :  { %1765 = vmax.xlane.f32.xlu0 %v9048_v20 }
 0x334   :  { %1753 = vmax.xlane.f32.xlu1 %v9059_v24 }
 0x338   :  { %1761 = vmax.xlane.f32.xlu1 %v9069_v28 }
 0x347   :  { %2036 = vrot.lane.b32.xlu0 %v8763_v63, %s8115_s2 }
 0x349   :  { %2038 = vrot.lane.b32.xlu1 %v8777_v57, %s8115_s2 }
 0x34b   :  { %2000 = vrot.lane.b32.xlu0 %v8476_v42, %s8115_s2  ;;  %v2027_v42 = vpop.permute.xlu1 %2026 }
 0x34d   :  { %2002 = vrot.lane.b32.xlu1 %v8488_v8, %s8115_s2 }
 0x34f   :  { %2004 = vrot.lane.b32.xlu0 %v8498_v0, %s8115_s2  ;;  %v2031_v8 = vpop.permute.xlu1 %2030  ;;  %v2029_v0 = vpop.permute.xlu0 %2028 }
 0x351   :  { %2006 = vrot.lane.b32.xlu1 %v8508_v38, %s8115_s2 }
 0x353   :  { %2008 = vrot.lane.b32.xlu0 %v8518_v46, %s8115_s2 }
 0x355   :  { %2010 = vrot.lane.b32.xlu1 %v8528_v54, %s8115_s2 }
 0x357   :  { %2012 = vrot.lane.b32.xlu0 %v8538_v2, %s8115_s2 }
 0x359   :  { %2014 = vrot.lane.b32.xlu1 %v8548_v40, %s8115_s2 }
 0x35b   :  { %2329 = vrot.lane.b32.xlu0 %v8795_v61, %s8115_s2 }
 0x35d   :  { %2331 = vrot.lane.b32.xlu1 %v8809_v51, %s8115_s2 }
 0x35f   :  { %2333 = vrot.lane.b32.xlu0 %v8823_v7, %s8115_s2 }
 0x361   :  { %2335 = vrot.lane.b32.xlu1 %v8837_v18, %s8115_s2 }
 0x363   :  { %2337 = vrot.lane.b32.xlu0 %v8849_v53, %s8115_s2 }
 0x365   :  { %2339 = vrot.lane.b32.xlu1 %v8859_v14, %s8115_s2 }
 0x367   :  { %2341 = vrot.lane.b32.xlu0 %v8869_v39, %s8115_s2 }
 0x369   :  { %2343 = vrot.lane.b32.xlu1 %v8877_v59, %s8115_s2 }
 0x36b   :  { %2940 = vrot.lane.b32.xlu0 %v8639_v1, %s8115_s2 }
 0x36d   :  { %2942 = vrot.lane.b32.xlu1 %v8648_v44, %s8115_s2 }
 0x36f   :  { %2944 = vrot.lane.b32.xlu0 %v8661_v16, %s8115_s2 }
 0x374   :  { %v1740_v38 = vpop.xlane.xlu1 %1739 }
 0x375   :  { %v1736_v46 = vpop.xlane.xlu0 %1735  ;;  %v1769_v2 = vsub.f32 %v8904_v62, %v1740_v38  ;;  %v2068_v62 = vsel %vm12338_vm10, %v2027_v42, 0  ;;  %vm12344_vm10 = vmmov %vm12336_vm0 }
 0x376   :  { %v1767_v54 = vsub.f32 %v8909_v31, %v1736_v46 }
 0x377   :  { %v1787_v57 = vmul.f32 1.442695, %v1769_v2 }
 0x378   :  { %v1783_v40 = vmul.f32 1.442695, %v1767_v54  ;;  %v1742_v23 = vpop.xlane.xlu1 %1741 }
 0x379   :  { %v1770_v18 = vsub.f32 %v8924_v45, %v1742_v23  ;;  %v1738_v63 = vpop.xlane.xlu0 %1737  ;;  %v2071_v45 = vsel %vm12340_vm15, %v2029_v0, 0  ;;  %vm12354_vm15 = vmmov %vm12336_vm0 }
 0x37a   :  { %v1768_v59 = vsub.f32 %v8929_v48, %v1738_v63  ;;  %7502 = vpow2.f32 %v1783_v40  ;;  %v2074_v48 = vsel %vm12342_vm9, %v2031_v8, 0  ;;  %vm12345_vm9 = vmmov %vm12336_vm0 }
 0x37b   :  { %v1789_v61 = vmul.f32 1.442695, %v1770_v18 }
 0x37c   :  { %v1785_v51 = vmul.f32 1.442695, %v1768_v59  ;;  %v2035_v58 = vpop.permute.xlu1 %2034 }
 0x37d   :  { %7504 = vpow2.f32 %v1789_v61  ;;  %v2033_v3 = vpop.permute.xlu0 %2032  ;;  %v2080_v59 = vsel %vm12345_vm9, %v2035_v58, 0  ;;  %vm12364_vm9 = vmmov %vm12336_vm0 }
 0x37e   :  { %7506 = vpow2.f32 %v1785_v51  ;;  %v2077_v49 = vsel %vm12336_vm0, %v2033_v3, 0 }
 0x37f   :  { %7508 = vpow2.f32 %v1787_v57 }
 0x384   :  { %v9118_v7 = vpop.eup %7502 }
 0x385   :  { %12332 = vst [vmem:[#allocation71_spill] sm:$0xff] %v9118_v7 }
 0x387   :  { %v9120_v53 = vpop.eup %7504 }
 0x388   :  { %12333 = vst [vmem:[#allocation72_spill] sm:$0xff] %v9120_v53  ;;  %v9122_v31 = vpop.eup %7506 }
 0x389   :  { %12334 = vst [vmem:[#allocation73_spill] sm:$0xff] %v9122_v31  ;;  %v9124_v14 = vpop.eup %7508  ;;  %v1847_v47 = vpack.c.bf16 %v9122_v31, %v9118_v7 }
 0x38a   :  { %12335 = vst [vmem:[#allocation74_spill] sm:$0xff] %v9124_v14  ;;  %v1848_v39 = vpack.c.bf16 %v9120_v53, %v9124_v14 }
 0x38b   :  { %6693 = vmatprep.mubr.bf16.mxu1 %v1847_v47 }
 0x38c   :  { %6694 = vmatmul.mubr.bf16.vlgmr.msra.gmra.mrb[48].mxu1 %v1848_v39 }
 0x38d   :  { %6710 = vmatpush3.bf16.xpose.msra.mxu1 %v2065_v60 }
 0x38e   :  { %7198 = vmatprep.subr.msk.bf16.mxu1 %vm12337_vm14, %v2027_v42  ;;  %vm12353_vm14 = vmmov %vm12336_vm0 }
 0x395   :  { %6712 = vmatpush3.bf16.xpose.msra.mxu1 %v2068_v62 }
 0x396   :  { %7199 = vmatprep.subr.msk.bf16.mxu1 %vm12339_vm12, %v2029_v0  ;;  %vm12351_vm12 = vmmov %vm12336_vm0 }
 0x39d   :  { %6714 = vmatpush3.bf16.xpose.msra.mxu1 %v2071_v45 }
 0x39e   :  { %7200 = vmatprep.subr.msk.bf16.mxu1 %vm12341_vm13, %v2031_v8  ;;  %vm12352_vm13 = vmmov %vm12336_vm0 }
 0x3a5   :  { %6716 = vmatpush3.bf16.xpose.msra.mxu1 %v2074_v48 }
 0x3a6   :  { %7201 = vmatprep.subr.msk.bf16.mxu1 %vm12343_vm11, %v2033_v3  ;;  %vm12350_vm11 = vmmov %vm12336_vm0 }
 0x3ad   :  { %6718 = vmatpush3.bf16.xpose.msra.mxu1 %v2077_v49  ;;  %v1744_v38 = vpop.xlane.xlu1 %1743 }
 0x3ae   :  { %7202 = vmatprep.subr.msk.bf16.mxu1 %vm12344_vm10, %v2035_v58  ;;  %v1771_v42 = vsub.f32 %v8956_v35, %v1744_v38  ;;  %v1748_v46 = vpop.xlane.xlu0 %1747  ;;  %vm12363_vm10 = vmmov %vm12336_vm0 }
 0x3af   :  { %v1773_v0 = vsub.f32 %v8961_v32, %v1748_v46 }
 0x3b0   :  { %v1791_v54 = vmul.f32 1.442695, %v1771_v42 }
 0x3b1   :  { %v1750_v2 = vpop.xlane.xlu1 %1749  ;;  %v1795_v18 = vmul.f32 1.442695, %v1773_v0 }
 0x3b2   :  { %v1774_v8 = vsub.f32 %v8978_v5, %v1750_v2  ;;  %v1746_v40 = vpop.xlane.xlu0 %1745  ;;  %7510 = vpow2.f32 %v1791_v54 }
 0x3b3   :  { %v1772_v23 = vsub.f32 %v8983_v15, %v1746_v40 }
 0x3b4   :  { %v1797_v63 = vmul.f32 1.442695, %v1774_v8 }
 0x3b5   :  { %v1793_v57 = vmul.f32 1.442695, %v1772_v23  ;;  %6720 = vmatpush3.bf16.xpose.msra.mxu1 %v2080_v59  ;;  %v1756_v61 = vpop.xlane.xlu1 %1755 }
 0x3b6   :  { %7512 = vpow2.f32 %v1797_v63  ;;  %v1764_v35 = vpop.xlane.xlu0 %1763  ;;  %v1777_v62 = vsub.f32 %v9000_v11, %v1756_v61 }
 0x3b7   :  { %7514 = vpow2.f32 %v1793_v57 }
 0x3b8   :  { %7516 = vpow2.f32 %v1795_v18  ;;  %v1803_v0 = vmul.f32 1.442695, %v1777_v62  ;;  %v1781_v18 = vsub.f32 %v9005_v50, %v1764_v35 }
 0x3b9   :  { %v1752_v32 = vpop.xlane.xlu1 %1751 }
 0x3ba   :  { %v1760_v51 = vpop.xlane.xlu0 %1759  ;;  %v1775_v47 = vsub.f32 %v9022_v6, %v1752_v32 }
 0x3bb   :  { %v1779_v58 = vsub.f32 %v9027_v22, %v1760_v51 }
 0x3bc   :  { %v9148_v60 = vpop.eup %7510  ;;  %v1799_v48 = vmul.f32 1.442695, %v1775_v47 }
 0x3bd   :  { %v1758_v5 = vpop.xlane.xlu1 %1757  ;;  %12346 = vst [vmem:[#allocation75_spill] sm:$0xff] %v9148_v60  ;;  %v1807_v2 = vmul.f32 1.442695, %v1779_v58 }
 0x3be   :  { %v1778_v39 = vsub.f32 %v9043_v55, %v1758_v5  ;;  %v1766_v15 = vpop.xlane.xlu0 %1765  ;;  %7518 = vpow2.f32 %v1799_v48 }
 0x3c0   :  { %v9151_v45 = vpop.eup %7512  ;;  %v1805_v49 = vmul.f32 1.442695, %v1778_v39 }
 0x3c1   :  { %12347 = vst [vmem:[#allocation76_spill] sm:$0xff] %v9151_v45  ;;  %v9153_v3 = vpop.eup %7514  ;;  %v1754_v38 = vpop.xlane.xlu1 %1753 }
 0x3c2   :  { %12348 = vst [vmem:[#allocation77_spill] sm:$0xff] %v9153_v3  ;;  %v9156_v42 = vpop.eup %7516  ;;  %v1776_v6 = vsub.f32 %v9059_v24, %v1754_v38  ;;  %v2037_v46 = vpop.permute.xlu0 %2036  ;;  %v1849_v55 = vpack.c.bf16 %v9153_v3, %v9148_v60  ;;  %7520 = vpow2.f32 %v1805_v49  ;;  %v1782_v24 = vsub.f32 %v9048_v20, %v1766_v15 }
 0x3c3   :  { %12349 = vst [vmem:[#allocation78_spill] sm:$0xff] %v9156_v42  ;;  %7203 = vmatprep.subr.msk.bf16.mxu1 %vm12350_vm11, %v2037_v46  ;;  %v2083_v11 = vsel %vm12351_vm12, %v2037_v46, 0  ;;  %v1850_v54 = vpack.c.bf16 %v9151_v45, %v9156_v42  ;;  %v1811_v20 = vmul.f32 1.442695, %v1781_v18  ;;  %vm12365_vm11 = vmmov %vm12336_vm0 }
 0x3c4   :  { %v1801_v22 = vmul.f32 1.442695, %v1776_v6  ;;  %6697 = vmatprep.mubr.bf16.mxu1 %v1849_v55  ;;  %6722 = vmatpush3.bf16.xpose.msra.mxu1 %v2083_v11  ;;  %v1813_v59 = vmul.f32 1.442695, %v1782_v24  ;;  %vm12366_vm12 = vmmov %vm12336_vm0 }
 0x3c5   :  { %6698 = vmatmul.mubr.bf16.gmra.mrb[52].mxu1 %v1850_v54  ;;  %v1762_v8 = vpop.xlane.xlu1 %1761 }
 0x3c6   :  { %7522 = vpow2.f32 %v1801_v22  ;;  %v1780_v40 = vsub.f32 %v9069_v28, %v1762_v8  ;;  %v2001_v23 = vpop.permute.xlu0 %2000  ;;  %v2515_v8 = vsel %vm12364_vm9, %v8639_v1, 0  ;;  %vm12371_vm9 = vmmov %vm12336_vm0 }
 0x3c7   :  { %7524 = vpow2.f32 %v1803_v0 }
 0x3c8   :  { %v1809_v63 = vmul.f32 1.442695, %v1780_v40  ;;  %7526 = vpow2.f32 %v1807_v2  ;;  %v9172_v51 = vpop.eup %7518 }
 0x3c9   :  { %v2039_v57 = vpop.permute.xlu1 %2038  ;;  %12355 = vst [vmem:[#allocation79_spill] sm:$0xff] %v9172_v51 }
 0x3ca   :  { %7528 = vpow2.f32 %v1809_v63  ;;  %v2005_v61 = vpop.permute.xlu0 %2004  ;;  %7204 = vmatprep.subr.msk.bf16.mxu1 %vm12352_vm13, %v2039_v57  ;;  %v2086_v32 = vsel %vm12353_vm14, %v2039_v57, 0  ;;  %vm12367_vm13 = vmmov %vm12336_vm0 }
 0x3cb   :  { %7530 = vpow2.f32 %v1813_v59  ;;  %vm12368_vm14 = vmmov %vm12336_vm0  ;;  %v2521_v59 = vsel %vm12371_vm9, %v8661_v16, 0 }
 0x3cc   :  { %6724 = vmatpush3.bf16.xpose.msra.mxu1 %v2086_v32  ;;  %v9174_v35 = vpop.eup %7520  ;;  %7532 = vpow2.f32 %v1811_v20  ;;  %v2518_v18 = vsel %vm12368_vm14, %v8648_v44, 0  ;;  %vm12375_vm14 = vmmov %vm12336_vm0  ;;  %v12389_v20 = vld [vmem:[#allocation13_spill] sm:$0xff] }
 0x3cd   :  { %7205 = vmatprep.subr.msk.bf16.mxu1 %vm12354_vm15, %v8639_v1  ;;  %v2003_v28 = vpop.permute.xlu1 %2002  ;;  %12356 = vst [vmem:[#allocation80_spill] sm:$0xff] %v9174_v35  ;;  %vm12369_vm15 = vmmov %vm12336_vm0 }
 0x3ce   :  { %v2009_v50 = vpop.permute.xlu0 %2008  ;;  %vm12378_vm9 = vmmov %vm12336_vm0 }
 0x3d0   :  { %v9176_v47 = vpop.eup %7522 }
 0x3d1   :  { %12357 = vst [vmem:[#allocation81_spill] sm:$0xff] %v9176_v47  ;;  %v9178_v5 = vpop.eup %7524  ;;  %v2007_v39 = vpop.permute.xlu1 %2006  ;;  %v1851_v15 = vpack.c.bf16 %v9176_v47, %v9172_v51 }
 0x3d2   :  { %12358 = vst [vmem:[#allocation82_spill] sm:$0xff] %v9178_v5  ;;  %v2013_v62 = vpop.permute.xlu0 %2012  ;;  %v1852_v48 = vpack.c.bf16 %v9174_v35, %v9178_v5  ;;  %v9184_v58 = vpop.eup %7526 }
 0x3d3   :  { %12359 = vst [vmem:[#allocation83_spill] sm:$0xff] %v9184_v58  ;;  %6701 = vmatprep.mubr.bf16.mxu1 %v1851_v15 }
 0x3d4   :  { %v9186_v49 = vpop.eup %7528  ;;  %6702 = vmatmul.mubr.bf16.gmra.mrb[56].mxu1 %v1852_v48 }
 0x3d5   :  { %12360 = vst [vmem:[#allocation84_spill] sm:$0xff] %v9186_v49  ;;  %v2011_v38 = vpop.permute.xlu1 %2010  ;;  %v1853_v6 = vpack.c.bf16 %v9186_v49, %v9184_v58  ;;  %v9190_v55 = vpop.eup %7530 }
 0x3d6   :  { %v2330_v46 = vpop.permute.xlu0 %2329  ;;  %12361 = vst [vmem:[#allocation85_spill] sm:$0xff] %v9190_v55  ;;  %v9192_v0 = vpop.eup %7532 }
 0x3d7   :  { %6705 = vmatprep.mubr.bf16.mxu1 %v1853_v6  ;;  %6741 = vmatprep.subr.bf16.mxu0 %v2330_v46  ;;  %12362 = vst [vmem:[#allocation86_spill] sm:$0xff] %v9192_v0  ;;  %v1854_v54 = vpack.c.bf16 %v9190_v55, %v9192_v0 }
 0x3d8   :  { %6742 = vmatpush3.bf16.msra.mxu0 %v2330_v46 }
 0x3d9   :  { %v2015_v11 = vpop.permute.xlu1 %2014 }
 0x3da   :  { %v2334_v2 = vpop.permute.xlu0 %2333 }
 0x3dc   :  { %6706 = vmatmul.mubr.bf16.gmra.mrb[60].mxu1 %v1854_v54 }
 0x3dd   :  { %6725 = vmatprep.mubr.msk.bf16.mxu1 %vm12336_vm0, %v2001_v23  ;;  %v2332_v22 = vpop.permute.xlu1 %2331 }
 0x3de   :  { %6743 = vmatprep.subr.bf16.mxu0 %v2332_v22  ;;  %v2338_v40 = vpop.permute.xlu0 %2337 }
 0x3df   :  { %6744 = vmatpush3.bf16.msra.mxu0 %v2332_v22 }
 0x3e0   :  { %6745 = vmatprep.subr.bf16.mxu0 %v2334_v2 }
 0x3e1   :  { %v2336_v24 = vpop.permute.xlu1 %2335 }
 0x3e2   :  { %v2342_v1 = vpop.permute.xlu0 %2341 }
 0x3e3   :  { %6746 = vmatpush3.bf16.msra.mxu0 %v2334_v2 }
 0x3e4   :  { %6726 = vmatmul.mubr.msk.bf16.vlgmr.msra.gmra.mrb[64].mxu1 %vm12363_vm10, %v2003_v28  ;;  %6747 = vmatprep.subr.bf16.mxu0 %v2336_v24  ;;  %vm12370_vm10 = vmmov %vm12336_vm0 }
 0x3e5   :  { %6774 = vmatpush3.bf16.xpose.msra.mxu1 %v2515_v8  ;;  %6729 = vmatprep.mubr.msk.bf16.mxu1 %vm12365_vm11, %v2005_v61  ;;  %v2340_v23 = vpop.permute.xlu1 %2339  ;;  %vm12372_vm11 = vmmov %vm12336_vm0 }
 0x3e6   :  { %7206 = vmatprep.subr.msk.bf16.mxu1 %vm12366_vm12, %v8648_v44  ;;  %vm12373_vm12 = vmmov %vm12336_vm0  ;;  %v2524_v44 = vsel %vm12375_vm14, %v8686_v36, 0 }
 0x3e7   :  { %6748 = vmatpush3.bf16.msra.mxu0 %v2336_v24  ;;  %vm12382_vm14 = vmmov %vm12336_vm0 }
 0x3e8   :  { %6749 = vmatprep.subr.bf16.mxu0 %v2338_v40 }
 0x3e9   :  { %v2344_v63 = vpop.permute.xlu1 %2343 }
 0x3eb   :  { %6750 = vmatpush3.bf16.msra.mxu0 %v2338_v40 }
 0x3ec   :  { %6730 = vmatmul.mubr.msk.bf16.gmra.mrb[68].mxu1 %vm12367_vm13, %v2007_v39  ;;  %6751 = vmatprep.subr.bf16.mxu0 %v2340_v23  ;;  %vm12374_vm13 = vmmov %vm12336_vm0 }
 0x3ed   :  { %6776 = vmatpush3.bf16.xpose.msra.mxu1 %v2518_v18  ;;  %6733 = vmatprep.mubr.msk.bf16.mxu1 %vm12369_vm15, %v2009_v50  ;;  %vm12376_vm15 = vmmov %vm12336_vm0 }
 0x3ee   :  { %7207 = vmatprep.subr.msk.bf16.mxu1 %vm12336_vm0, %v8661_v16 }
 0x3ef   :  { %6752 = vmatpush3.bf16.msra.mxu0 %v2340_v23 }
 0x3f0   :  { %6753 = vmatprep.subr.bf16.mxu0 %v2342_v1 }
 0x3f3   :  { %6754 = vmatpush3.bf16.msra.mxu0 %v2342_v1 }
 0x3f4   :  { %6734 = vmatmul.mubr.msk.bf16.gmra.mrb[72].mxu1 %vm12370_vm10, %v2011_v38  ;;  %6755 = vmatprep.subr.bf16.mxu0 %v2344_v63  ;;  %vm12377_vm10 = vmmov %vm12336_vm0 }
 0x3f5   :  { %6778 = vmatpush3.bf16.xpose.msra.mxu1 %v2521_v59  ;;  %6737 = vmatprep.mubr.msk.bf16.mxu1 %vm12372_vm11, %v2013_v62  ;;  %v2527_v16 = vsel %vm12377_vm10, %v8713_v26, 0  ;;  %vm12379_vm11 = vmmov %vm12336_vm0 }
 0x3f6   :  { %7208 = vmatprep.subr.msk.bf16.mxu1 %vm12373_vm12, %v8686_v36  ;;  %v2530_v57 = vsel %vm12379_vm11, %v8741_v29, 0  ;;  %vm12380_vm12 = vmmov %vm12336_vm0 }
 0x3f7   :  { %6756 = vmatpush3.bf16.msra.mxu0 %v2344_v63  ;;  %vm12384_vm10 = vmmov %vm12336_vm0 }
 0x3f8   :  { %6805 = vmatprep.subr.bf16.mxu0 %v8797_v41  ;;  %vm12386_vm11 = vmmov %vm12336_vm0 }
 0x3fc   :  { %6738 = vmatmul.mubr.msk.bf16.gmra.mrb[76].mxu1 %vm12374_vm13, %v2015_v11  ;;  %vm12381_vm13 = vmmov %vm12336_vm0 }
 0x3fd   :  { %6780 = vmatpush3.bf16.xpose.msra.mxu1 %v2524_v44  ;;  %6789 = vmatprep.mubr.msk.bf16.mxu1 %vm12376_vm15, %v8479_v43  ;;  %v2533_v61 = vsel %vm12381_vm13, %v8765_v13, 0  ;;  %vm12383_vm15 = vmmov %vm12336_vm0 }
 0x3fe   :  { %7209 = vmatprep.subr.msk.bf16.mxu1 %vm12336_vm0, %v8713_v26  ;;  %v2536_v32 = vsel %vm12383_vm15, %v8782_v30, 0  ;;  %vm12388_vm13 = vmmov %vm12336_vm0 }
 0x405   :  { %6782 = vmatpush3.bf16.xpose.msra.mxu1 %v2527_v16 }
 0x406   :  { %7210 = vmatprep.subr.msk.bf16.mxu1 %vm12378_vm9, %v8741_v29  ;;  %vm12385_vm9 = vmmov %vm12336_vm0 }
 0x40d   :  { %6784 = vmatpush3.bf16.xpose.msra.mxu1 %v2530_v57 }
 0x40e   :  { %7211 = vmatprep.subr.msk.bf16.mxu1 %vm12380_vm12, %v8765_v13  ;;  %vm12387_vm12 = vmmov %vm12336_vm0 }
 0x415   :  { %6786 = vmatpush3.bf16.xpose.msra.mxu1 %v2533_v61 }
 0x416   :  { %7212 = vmatprep.subr.msk.bf16.mxu1 %vm12382_vm14, %v8782_v30  ;;  %vm12390_vm14 = vmmov %vm12336_vm0 }
 0x41d   :  { %6788 = vmatpush3.bf16.xpose.msra.mxu1 %v2536_v32 }
 0x424   :  { %6790 = vmatmul.mubr.msk.bf16.vlgmr.msra.gmra.mrb[80].mxu1 %vm12336_vm0, %v8491_v9 }
 0x425   :  { %6793 = vmatprep.mubr.msk.bf16.mxu1 %vm12384_vm10, %v8501_v12  ;;  %vm12416_vm10 = vnez %v12321_v19 }
 0x42c   :  { %6794 = vmatmul.mubr.msk.bf16.gmra.mrb[84].mxu1 %vm12385_vm9, %v8511_v17  ;;  %vm12417_vm9 = vnez %v12327_v52 }
 0x42d   :  { %6797 = vmatprep.mubr.msk.bf16.mxu1 %vm12386_vm11, %v8521_v21 }
 0x434   :  { %6798 = vmatmul.mubr.msk.bf16.gmra.mrb[88].mxu1 %vm12387_vm12, %v8531_v25 }
 0x435   :  { %6801 = vmatprep.mubr.msk.bf16.mxu1 %vm12388_vm13, %v8541_v10  ;;  %vm12422_vm13 = vnez %v12324_v56 }
 0x43c   :  { %6802 = vmatmul.mubr.msk.bf16.gmra.mrb[92].mxu1 %vm12390_vm14, %v12389_v20  ;;  %vm12423_vm14 = vnez %v12330_v37 }
 0x45f   :  { %v9251_v28 = vpop.f32.mrb[48].mxu1 }
 0x460   :  { %12391 = vst [vmem:[#allocation13_spill] sm:$0xff] %v9251_v28  ;;  %v9253_v50 = vpop.f32.mrb[49].mxu1 }
 0x461   :  { %12392 = vst [vmem:[#allocation87_spill] sm:$0xff] %v9253_v50  ;;  %v9255_v39 = vpop.f32.mrb[50].mxu1 }
 0x462   :  { %12393 = vst [vmem:[#allocation88_spill] sm:$0xff] %v9255_v39  ;;  %v9257_v15 = vpop.f32.mrb[51].mxu1 }
 0x463   :  { %12394 = vst [vmem:[#allocation89_spill] sm:$0xff] %v9257_v15 }
 0x498   :  { %v9259_v62 = vpop.f32.mrb[52].mxu1 }
 0x499   :  { %12395 = vst [vmem:[#allocation90_spill] sm:$0xff] %v9259_v62  ;;  %v9261_v48 = vpop.f32.mrb[53].mxu1 }
 0x49a   :  { %12396 = vst [vmem:[#allocation91_spill] sm:$0xff] %v9261_v48  ;;  %v9263_v38 = vpop.f32.mrb[54].mxu1 }
 0x49b   :  { %12397 = vst [vmem:[#allocation92_spill] sm:$0xff] %v9263_v38  ;;  %v9265_v6 = vpop.f32.mrb[55].mxu1 }
 0x49c   :  { %12398 = vst [vmem:[#allocation93_spill] sm:$0xff] %v9265_v6  ;;  %v12418_v6 = vld [vmem:[#allocation66_spill] sm:$0xff] }
 0x49d   :  { %vm12419_vm11 = vnez %v12418_v6 }
 0x4a7   :  { %v9267_v46 = vpop.f32.mrb[56].mxu1 }
 0x4a8   :  { %12399 = vst [vmem:[#allocation94_spill] sm:$0xff] %v9267_v46  ;;  %v9269_v11 = vpop.f32.mrb[57].mxu1 }
 0x4a9   :  { %12400 = vst [vmem:[#allocation95_spill] sm:$0xff] %v9269_v11  ;;  %v9271_v54 = vpop.f32.mrb[58].mxu1 }
 0x4aa   :  { %12401 = vst [vmem:[#allocation96_spill] sm:$0xff] %v9271_v54  ;;  %v9273_v22 = vpop.f32.mrb[59].mxu1 }
 0x4ab   :  { %12402 = vst [vmem:[#allocation97_spill] sm:$0xff] %v9273_v22  ;;  %v12412_v22 = vld [vmem:[#allocation65_spill] sm:$0xff] }
 0x4ac   :  { %vm12413_vm15 = vnez %v12412_v22 }
 0x4af   :  { %v9275_v2 = vpop.f32.mrb[60].mxu1 }
 0x4b0   :  { %12403 = vst [vmem:[#allocation98_spill] sm:$0xff] %v9275_v2  ;;  %v9277_v24 = vpop.f32.mrb[61].mxu1 }
 0x4b1   :  { %12404 = vst [vmem:[#allocation99_spill] sm:$0xff] %v9277_v24  ;;  %v9279_v8 = vpop.f32.mrb[62].mxu1 }
 0x4b2   :  { %12405 = vst [vmem:[#allocation100_spill] sm:$0xff] %v9279_v8  ;;  %v9281_v40 = vpop.f32.mrb[63].mxu1 }
 0x4b3   :  { %12406 = vst [vmem:[#allocation101_spill] sm:$0xff] %v9281_v40 }
 0x4b7   :  { %v6727_v23 = vpop.f32.mrb[64].mxu1 }
 0x4b8   :  { %v2122_v18 = vpop.f32.mrb[65].mxu1  ;;  %v9285_v63 = vsel %vm8890_vm1, %v6727_v23, -1.7014117e+38 }
 0x4b9   :  { %2205 = vmax.xlane.f32.xlu0 %v9285_v63  ;;  %v6728_v59 = vpop.f32.mrb[66].mxu1  ;;  %v9290_v16 = vsel %vm8897_vm2, %v2122_v18, -1.7014117e+38 }
 0x4ba   :  { %2201 = vmax.xlane.f32.xlu1 %v9290_v16  ;;  %v2125_v57 = vpop.f32.mrb[67].mxu1  ;;  %v9295_v32 = vsel %vm8912_vm3, %v6728_v59, -1.7014117e+38 }
 0x4bb   :  { %v9300_v8 = vsel %vm8918_vm4, %v2125_v57, -1.7014117e+38 }
 0x4bd   :  { %2207 = vmax.xlane.f32.xlu0 %v9295_v32 }
 0x4bf   :  { %v6731_v34 = vpop.f32.mrb[68].mxu1 }
 0x4c0   :  { %v2138_v2 = vpop.f32.mrb[69].mxu1  ;;  %v9310_v59 = vsel %vm8949_vm6, %v6731_v34, -1.7014117e+38 }
 0x4c1   :  { %2203 = vmax.xlane.f32.xlu0 %v9300_v8  ;;  %v6732_v40 = vpop.f32.mrb[70].mxu1  ;;  %v9305_v18 = vsel %vm8943_vm5, %v2138_v2, -1.7014117e+38 }
 0x4c2   :  { %2209 = vmax.xlane.f32.xlu1 %v9305_v18  ;;  %v2141_v24 = vpop.f32.mrb[71].mxu1  ;;  %v9315_v57 = vsel %vm8964_vm7, %v6732_v40, -1.7014117e+38  ;;  %v12414_v40 = vld [vmem:[#allocation63_spill] sm:$0xff] }
 0x4c3   :  { %v9320_v2 = vsel %vm8971_vm8, %v2141_v24, -1.7014117e+38  ;;  %vm12415_vm0 = vnez %v12414_v40 }
 0x4c5   :  { %2213 = vmax.xlane.f32.xlu0 %v9310_v59 }
 0x4c6   :  { %2215 = vmax.xlane.f32.xlu1 %v9315_v57 }
 0x4c7   :  { %v6735_v54 = vpop.f32.mrb[72].mxu1 }
 0x4c8   :  { %v2154_v46 = vpop.f32.mrb[73].mxu1  ;;  %v9330_v58 = vsel %vm12415_vm0, %v6735_v54, -1.7014117e+38 }
 0x4c9   :  { %2211 = vmax.xlane.f32.xlu0 %v9320_v2  ;;  %v6736_v55 = vpop.f32.mrb[74].mxu1  ;;  %v9325_v34 = vsel %vm12413_vm15, %v2154_v46, -1.7014117e+38 }
 0x4ca   :  { %2217 = vmax.xlane.f32.xlu1 %v9325_v34  ;;  %v2157_v11 = vpop.f32.mrb[75].mxu1  ;;  %v9335_v24 = vsel %vm12416_vm10, %v6736_v55, -1.7014117e+38  ;;  %v12420_v55 = vld [vmem:[#allocation64_spill] sm:$0xff] }
 0x4cb   :  { %v9340_v46 = vsel %vm12417_vm9, %v2157_v11, -1.7014117e+38  ;;  %vm12421_vm12 = vnez %v12420_v55 }
 0x4cd   :  { %2221 = vmax.xlane.f32.xlu0 %v9330_v58 }
 0x4ce   :  { %2223 = vmax.xlane.f32.xlu1 %v9335_v24 }
 0x4cf   :  { %v6739_v49 = vpop.f32.mrb[76].mxu1 }
 0x4d0   :  { %v2170_v38 = vpop.f32.mrb[77].mxu1  ;;  %v9350_v5 = vsel %vm12421_vm12, %v6739_v49, -1.7014117e+38 }
 0x4d1   :  { %2219 = vmax.xlane.f32.xlu0 %v9340_v46  ;;  %v6740_v62 = vpop.f32.mrb[78].mxu1  ;;  %v9345_v54 = vsel %vm12419_vm11, %v2170_v38, -1.7014117e+38 }
 0x4d2   :  { %2225 = vmax.xlane.f32.xlu1 %v9345_v54  ;;  %v2173_v48 = vpop.f32.mrb[79].mxu1  ;;  %v9355_v11 = vsel %vm12422_vm13, %v6740_v62, -1.7014117e+38 }
 0x4d3   :  { %v9360_v39 = vsel %vm12423_vm14, %v2173_v48, -1.7014117e+38 }
 0x4d5   :  { %2229 = vmax.xlane.f32.xlu0 %v9350_v5 }
 0x4d6   :  { %2231 = vmax.xlane.f32.xlu1 %v9355_v11 }
 0x4d9   :  { %2227 = vmax.xlane.f32.xlu0 %v9360_v39 }
 0x4f7   :  { %v6791_v38 = vpop.f32.mrb[80].mxu1 }
 0x4f8   :  { %v2572_v28 = vpop.f32.mrb[81].mxu1  ;;  %v9365_v49 = vsel %vm8890_vm1, %v6791_v38, -1.7014117e+38 }
 0x4f9   :  { %v6792_v35 = vpop.f32.mrb[82].mxu1  ;;  %2655 = vmax.xlane.f32.xlu0 %v9365_v49  ;;  %v9375_v48 = vsel %vm8897_vm2, %v2572_v28, -1.7014117e+38 }
 0x4fa   :  { %v2575_v51 = vpop.f32.mrb[83].mxu1  ;;  %v9370_v62 = vsel %vm8912_vm3, %v6792_v35, -1.7014117e+38 }
 0x4fb   :  { %2657 = vmax.xlane.f32.xlu1 %v9370_v62  ;;  %v9380_v38 = vsel %vm8918_vm4, %v2575_v51, -1.7014117e+38 }
 0x4fd   :  { %2651 = vmax.xlane.f32.xlu0 %v9375_v48 }
 0x4ff   :  { %2653 = vmax.xlane.f32.xlu1 %v9380_v38  ;;  %v6795_v47 = vpop.f32.mrb[84].mxu1 }
 0x500   :  { %v2588_v42 = vpop.f32.mrb[85].mxu1  ;;  %v9389_v51 = vsel %vm8949_vm6, %v6795_v47, -1.7014117e+38 }
 0x501   :  { %v6796_v60 = vpop.f32.mrb[86].mxu1  ;;  %v9394_v31 = vsel %vm8943_vm5, %v2588_v42, -1.7014117e+38 }
 0x502   :  { %v2591_v14 = vpop.f32.mrb[87].mxu1 }
 0x503   :  { %v9414_v42 = vsel %vm8971_vm8, %v2591_v14, -1.7014117e+38  ;;  %v9431_v14 = vpop.permute.xlu1 %2942 }
 0x507   :  { %v6799_v35 = vpop.f32.mrb[88].mxu1 }
 0x508   :  { %v2604_v15 = vpop.f32.mrb[89].mxu1 }
 0x509   :  { %v6800_v50 = vpop.f32.mrb[90].mxu1 }
 0x50a   :  { %v2607_v45 = vpop.f32.mrb[91].mxu1  ;;  %v9435_v4 = vsel %vm12416_vm10, %v6800_v50, -1.7014117e+38 }
 0x50b   :  { %v9409_v47 = vsel %vm12417_vm9, %v2607_v45, -1.7014117e+38  ;;  %v9426_v45 = vsel %vm12415_vm0, %v6799_v35, -1.7014117e+38 }
 0x50f   :  { %v6803_v7 = vpop.f32.mrb[92].mxu1 }
 0x510   :  { %2946 = vrot.lane.b32.xlu1 %v8686_v36, %s8115_s2  ;;  %v2620_v28 = vpop.f32.mrb[93].mxu1  ;;  %v9399_v36 = vsel %vm12413_vm15, %v2604_v15, -1.7014117e+38  ;;  %v9416_v15 = vpop.permute.xlu0 %2940 }
 0x511   :  { %v6804_v3 = vpop.f32.mrb[94].mxu1  ;;  %v9440_v55 = vsel %vm12419_vm11, %v2620_v28, -1.7014117e+38 }
 0x512   :  { %v2623_v53 = vpop.f32.mrb[95].mxu1  ;;  %v9447_v19 = vsel %vm12422_vm13, %v6804_v3, -1.7014117e+38 }
 0x513   :  { %2948 = vrot.lane.b32.xlu0 %v8713_v26, %s8115_s2  ;;  %v9404_v26 = vsel %vm8964_vm7, %v6796_v60, -1.7014117e+38  ;;  %v9421_v60 = vsel %vm12421_vm12, %v6803_v7, -1.7014117e+38  ;;  %v9454_v61 = vsel %vm12423_vm14, %v2623_v53, -1.7014117e+38 }
 0x514   :  { %v9429_v22 = vpop.permute.xlu0 %2944  ;;  %vm12447_vm12 = vcmask 523264  }
 0x515   :  { %vm12454_vm11 = vmmov %vm12447_vm12 }
 0x516   :  { %vm12459_vm0 = vmmov %vm12454_vm11 }
 0x517   :  { %vm12460_vm15 = vmmov %vm12459_vm0 }
 0x532   :  { %2663 = vmax.xlane.f32.xlu0 %v9389_v51 }
 0x534   :  { %2659 = vmax.xlane.f32.xlu1 %v9394_v31 }
 0x536   :  { %2667 = vmax.xlane.f32.xlu0 %v9399_v36 }
 0x538   :  { %2665 = vmax.xlane.f32.xlu1 %v9404_v26 }
 0x53a   :  { %2669 = vmax.xlane.f32.xlu0 %v9409_v47 }
 0x53c   :  { %2661 = vmax.xlane.f32.xlu1 %v9414_v42 }
 0x53e   :  { %2679 = vmax.xlane.f32.xlu0 %v9421_v60 }
 0x540   :  { %2671 = vmax.xlane.f32.xlu1 %v9426_v45 }
 0x544   :  { %2673 = vmax.xlane.f32.xlu1 %v9435_v4 }
 0x546   :  { %v2206_v7 = vpop.xlane.xlu0 %2205 }
 0x547   :  { %v2202_v40 = vpop.xlane.xlu1 %2201  ;;  %v2235_v50 = vsub.f32 %v9285_v63, %v2206_v7 }
 0x548   :  { %2675 = vmax.xlane.f32.xlu1 %v9440_v55  ;;  %v2233_v35 = vsub.f32 %v9290_v16, %v2202_v40 }
 0x549   :  { %v2253_v40 = vmul.f32 1.442695, %v2235_v50 }
 0x54a   :  { %v2208_v33 = vpop.xlane.xlu0 %2207  ;;  %v2249_v52 = vmul.f32 1.442695, %v2233_v35 }
 0x54b   :  { %v2236_v27 = vsub.f32 %v9295_v32, %v2208_v33 }
 0x54c   :  { %2681 = vmax.xlane.f32.xlu1 %v9447_v19  ;;  %7534 = vpow2.f32 %v2249_v52 }
 0x54d   :  { %v2255_v6 = vmul.f32 1.442695, %v2236_v27 }
 0x54e   :  { %v2204_v28 = vpop.xlane.xlu0 %2203 }
 0x54f   :  { %v2234_v0 = vsub.f32 %v9300_v8, %v2204_v28  ;;  %v2210_v16 = vpop.xlane.xlu1 %2209  ;;  %7536 = vpow2.f32 %v2255_v6 }
 0x550   :  { %2677 = vmax.xlane.f32.xlu1 %v9454_v61  ;;  %v2237_v33 = vsub.f32 %v9305_v18, %v2210_v16 }
 0x551   :  { %v2251_v3 = vmul.f32 1.442695, %v2234_v0 }
 0x552   :  { %v2214_v63 = vpop.xlane.xlu0 %2213  ;;  %v2257_v8 = vmul.f32 1.442695, %v2237_v33 }
 0x553   :  { %7538 = vpow2.f32 %v2251_v3  ;;  %v2239_v27 = vsub.f32 %v9310_v59, %v2214_v63  ;;  %v2216_v32 = vpop.xlane.xlu1 %2215 }
 0x554   :  { %7540 = vpow2.f32 %v2253_v40  ;;  %2952 = vrot.lane.b32.xlu0 %v8765_v13, %s8115_s2  ;;  %v2240_v53 = vsub.f32 %v9315_v57, %v2216_v32 }
 0x555   :  { %v2261_v7 = vmul.f32 1.442695, %v2239_v27  ;;  %7542 = vpow2.f32 %v2257_v8 }
 0x556   :  { %v2263_v35 = vmul.f32 1.442695, %v2240_v53  ;;  %v2212_v50 = vpop.xlane.xlu0 %2211  ;;  %v9466_v28 = vpop.eup %7534 }
 0x557   :  { %v2238_v18 = vsub.f32 %v9320_v2, %v2212_v50  ;;  %v2218_v52 = vpop.xlane.xlu1 %2217  ;;  %7544 = vpow2.f32 %v2261_v7  ;;  %12424 = vst [vmem:[#allocation102_spill] sm:$0xff] %v9466_v28 }
 0x558   :  { %2954 = vrot.lane.b32.xlu0 %v8782_v30, %s8115_s2  ;;  %v2241_v0 = vsub.f32 %v9325_v34, %v2218_v52  ;;  %7546 = vpow2.f32 %v2263_v35  ;;  %v12430_v35 = vld [vmem:[#allocation48_spill] sm:$0xff] }
 0x559   :  { %v2259_v6 = vmul.f32 1.442695, %v2238_v18  ;;  %v9469_v16 = vpop.eup %7536 }
 0x55a   :  { %v2222_v59 = vpop.xlane.xlu0 %2221  ;;  %12425 = vst [vmem:[#allocation103_spill] sm:$0xff] %v9469_v16  ;;  %v2265_v2 = vmul.f32 1.442695, %v2241_v0 }
 0x55b   :  { %7548 = vpow2.f32 %v2259_v6  ;;  %v2243_v13 = vsub.f32 %v9330_v58, %v2222_v59  ;;  %v2224_v57 = vpop.xlane.xlu1 %2223 }
 0x55c   :  { %2916 = vrot.lane.b32.xlu0 %v8479_v43, %s8115_s2  ;;  %v2244_v30 = vsub.f32 %v9335_v24, %v2224_v57  ;;  %7550 = vpow2.f32 %v2265_v2  ;;  %v12433_v57 = vld [vmem:[#allocation49_spill] sm:$0xff]  ;;  %v12436_v2 = vld [vmem:[#allocation50_spill] sm:$0xff] }
 0x55d   :  { %v9474_v40 = vpop.eup %7538  ;;  %v2269_v34 = vmul.f32 1.442695, %v2243_v13 }
 0x55e   :  { %12426 = vst [vmem:[#allocation104_spill] sm:$0xff] %v9474_v40  ;;  %v9476_v33 = vpop.eup %7540  ;;  %v2271_v3 = vmul.f32 1.442695, %v2244_v30  ;;  %v2220_v63 = vpop.xlane.xlu0 %2219  ;;  %v2313_v27 = vpack.c.bf16 %v9474_v40, %v9466_v28 }
 0x55f   :  { %12427 = vst [vmem:[#allocation105_spill] sm:$0xff] %v9476_v33  ;;  %v2242_v58 = vsub.f32 %v9340_v46, %v2220_v63  ;;  %v2226_v32 = vpop.xlane.xlu1 %2225  ;;  %v2314_v8 = vpack.c.bf16 %v9469_v16, %v9476_v33  ;;  %7552 = vpow2.f32 %v2269_v34  ;;  %v9488_v53 = vpop.eup %7542  ;;  %v12439_v34 = vld [vmem:[#allocation51_spill] sm:$0xff]  ;;  %v12442_v63 = vld [vmem:[#allocation52_spill] sm:$0xff] }
 0x560   :  { %2920 = vrot.lane.b32.xlu0 %v8501_v12, %s8115_s2  ;;  %v2245_v43 = vsub.f32 %v9345_v54, %v2226_v32  ;;  %6757 = vmatprep.mubr.bf16.mxu0 %v2313_v27  ;;  %12428 = vst [vmem:[#allocation106_spill] sm:$0xff] %v9488_v53  ;;  %7554 = vpow2.f32 %v2271_v3  ;;  %v12445_v32 = vld [vmem:[#allocation53_spill] sm:$0xff] }
 0x561   :  { %v2267_v24 = vmul.f32 1.442695, %v2242_v58  ;;  %2950 = vrot.lane.b32.xlu1 %v8741_v29, %s8115_s2  ;;  %6758 = vmatmul.mubr.bf16.vlgmr.msra.gmra.mrb[160].mxu0 %v2314_v8  ;;  %v9491_v7 = vpop.eup %7544 }
 0x562   :  { %6806 = vmatpush3.bf16.msra.mxu0 %v8797_v41  ;;  %v2230_v46 = vpop.xlane.xlu0 %2229  ;;  %12429 = vst [vmem:[#allocation107_spill] sm:$0xff] %v9491_v7  ;;  %v9495_v50 = vpop.eup %7546  ;;  %v2273_v18 = vmul.f32 1.442695, %v2245_v43  ;;  %v12446_v43 = vld [vmem:[#allocation58_spill] sm:$0xff] }
 0x563   :  { %7556 = vpow2.f32 %v2267_v24  ;;  %v2247_v12 = vsub.f32 %v9350_v5, %v2230_v46  ;;  %6807 = vmatprep.subr.bf16.mxu0 %v12430_v35  ;;  %v2232_v54 = vpop.xlane.xlu1 %2231  ;;  %12431 = vst [vmem:[#allocation48_spill] sm:$0xff] %v9495_v50 }
 0x564   :  { %2924 = vrot.lane.b32.xlu0 %v8521_v21, %s8115_s2  ;;  %v2248_v29 = vsub.f32 %v9355_v11, %v2232_v54  ;;  %v2316_v21 = vpack.c.bf16 %v9495_v50, %v9491_v7  ;;  %7558 = vpow2.f32 %v2273_v18  ;;  %v12532_v7 = vld [vmem:[#allocation34_spill] sm:$0xff] }
 0x565   :  { %v9500_v52 = vpop.eup %7548  ;;  %v2277_v0 = vmul.f32 1.442695, %v2247_v12  ;;  %2918 = vrot.lane.b32.xlu1 %v8491_v9, %s8115_s2 }
 0x566   :  { %12432 = vst [vmem:[#allocation108_spill] sm:$0xff] %v9500_v52  ;;  %v2279_v6 = vmul.f32 1.442695, %v2248_v29  ;;  %6808 = vmatpush3.bf16.msra.mxu0 %v12430_v35  ;;  %v2228_v5 = vpop.xlane.xlu0 %2227  ;;  %v2315_v59 = vpack.c.bf16 %v9500_v52, %v9488_v53  ;;  %v9515_v11 = vpop.eup %7550 }
 0x567   :  { %v2246_v13 = vsub.f32 %v9360_v39, %v2228_v5  ;;  %6809 = vmatprep.subr.bf16.mxu0 %v12433_v57  ;;  %7560 = vpow2.f32 %v2277_v0  ;;  %12434 = vst [vmem:[#allocation49_spill] sm:$0xff] %v9515_v11 }
 0x568   :  { %2928 = vrot.lane.b32.xlu0 %v8541_v10, %s8115_s2  ;;  %6761 = vmatprep.mubr.bf16.mxu0 %v2315_v59  ;;  %7562 = vpow2.f32 %v2279_v6 }
 0x569   :  { %v2275_v9 = vmul.f32 1.442695, %v2246_v13  ;;  %2922 = vrot.lane.b32.xlu1 %v8511_v17, %s8115_s2  ;;  %6762 = vmatmul.mubr.bf16.gmra.mrb[164].mxu0 %v2316_v21  ;;  %v9518_v39 = vpop.eup %7552  ;;  %v12448_v21 = vld [vmem:[#allocation46_spill] sm:$0xff] }
 0x56a   :  { %6810 = vmatpush3.bf16.msra.mxu0 %v12433_v57  ;;  %12435 = vst [vmem:[#allocation109_spill] sm:$0xff] %v9518_v39  ;;  %v9521_v30 = vpop.eup %7554 }
 0x56b   :  { %7564 = vpow2.f32 %v2275_v9  ;;  %6811 = vmatprep.subr.bf16.mxu0 %v12436_v2  ;;  %12437 = vst [vmem:[#allocation50_spill] sm:$0xff] %v9521_v30  ;;  %v2318_v3 = vpack.c.bf16 %v9521_v30, %v9518_v39 }
 0x56c   :  { %3245 = vrot.lane.b32.xlu0 %v8797_v41, %s8115_s2 }
 0x56d   :  { %v9525_v10 = vpop.eup %7556  ;;  %2926 = vrot.lane.b32.xlu1 %v8531_v25, %s8115_s2 }
 0x56e   :  { %12438 = vst [vmem:[#allocation110_spill] sm:$0xff] %v9525_v10  ;;  %6812 = vmatpush3.bf16.msra.mxu0 %v12436_v2  ;;  %v2317_v17 = vpack.c.bf16 %v9525_v10, %v9515_v11  ;;  %v9539_v41 = vpop.eup %7558 }
 0x56f   :  { %6813 = vmatprep.subr.bf16.mxu0 %v12439_v34  ;;  %12440 = vst [vmem:[#allocation51_spill] sm:$0xff] %v9539_v41 }
 0x570   :  { %3249 = vrot.lane.b32.xlu0 %v12433_v57, %s8115_s2  ;;  %6765 = vmatprep.mubr.bf16.mxu0 %v2317_v17  ;;  %v1363_v57 = vpop.f32.mrb[128].mxu0 }
 0x571   :  { %2930 = vrot.lane.b32.xlu1 %v12389_v20, %s8115_s2  ;;  %6766 = vmatmul.mubr.bf16.gmra.mrb[168].mxu0 %v2318_v3  ;;  %v9542_v25 = vpop.eup %7560  ;;  %v1364_v9 = vadd.f32 %v1363_v57, %v12448_v21 }
 0x572   :  { %6814 = vmatpush3.bf16.msra.mxu0 %v12439_v34  ;;  %12441 = vst [vmem:[#allocation111_spill] sm:$0xff] %v9542_v25  ;;  %v9545_v27 = vpop.eup %7562 }
 0x573   :  { %6815 = vmatprep.subr.bf16.mxu0 %v12442_v63  ;;  %12443 = vst [vmem:[#allocation52_spill] sm:$0xff] %v9545_v27  ;;  %v2320_v8 = vpack.c.bf16 %v9545_v27, %v9542_v25 }
 0x575   :  { %v9547_v58 = vpop.eup %7564  ;;  %3247 = vrot.lane.b32.xlu1 %v12430_v35, %s8115_s2 }
 0x576   :  { %12444 = vst [vmem:[#allocation112_spill] sm:$0xff] %v9547_v58  ;;  %6816 = vmatpush3.bf16.msra.mxu0 %v12442_v63  ;;  %v2319_v20 = vpack.c.bf16 %v9547_v58, %v9539_v41 }
 0x577   :  { %6817 = vmatprep.subr.bf16.mxu0 %v12445_v32 }
 0x578   :  { %6769 = vmatprep.mubr.bf16.mxu0 %v2319_v20 }
 0x579   :  { %3251 = vrot.lane.b32.xlu1 %v12436_v2, %s8115_s2  ;;  %6770 = vmatmul.mubr.bf16.gmra.mrb[172].mxu0 %v2320_v8  ;;  %v12449_v2 = vld [vmem:[#allocation47_spill] sm:$0xff] }
 0x57a   :  { %6818 = vmatpush3.bf16.msra.mxu0 %v12445_v32 }
 0x57b   :  { %6819 = vmatprep.subr.bf16.mxu0 %v12446_v43 }
 0x57d   :  { %3253 = vrot.lane.b32.xlu1 %v12439_v34, %s8115_s2 }
 0x57e   :  { %6820 = vmatpush3.bf16.msra.mxu0 %v12446_v43 }
 0x57f   :  { %7213 = vmatprep.subr.msk.bf16.mxu0 %vm12447_vm12, %v9416_v15 }
 0x581   :  { %3255 = vrot.lane.b32.xlu1 %v12442_v63, %s8115_s2 }
 0x586   :  { %v2656_v24 = vpop.xlane.xlu0 %2655 }
 0x587   :  { %v2685_v35 = vsub.f32 %v9365_v49, %v2656_v24 }
 0x588   :  { %v2658_v46 = vpop.xlane.xlu1 %2657 }
 0x589   :  { %v2686_v12 = vsub.f32 %v9370_v62, %v2658_v46  ;;  %v2703_v59 = vmul.f32 1.442695, %v2685_v35  ;;  %v1365_v62 = vpop.f32.mrb[129].mxu0 }
 0x58a   :  { %v2652_v54 = vpop.xlane.xlu0 %2651  ;;  %v1366_v49 = vadd.f32 %v1365_v62, %v12449_v2  ;;  %v1367_v17 = vpop.f32.mrb[130].mxu0 }
 0x58b   :  { %v2705_v18 = vmul.f32 1.442695, %v2686_v12  ;;  %v2683_v29 = vsub.f32 %v9375_v48, %v2652_v54  ;;  %v1368_v34 = vadd.f32 %v1367_v17, %v12448_v21  ;;  %v1369_v48 = vpop.f32.mrb[131].mxu0 }
 0x58c   :  { %v2654_v0 = vpop.xlane.xlu1 %2653  ;;  %v1370_v3 = vadd.f32 %v1369_v48, %v12449_v2  ;;  %v1373_v63 = vpop.f32.mrb[132].mxu0 }
 0x58d   :  { %v2699_v6 = vmul.f32 1.442695, %v2683_v29  ;;  %v2684_v5 = vsub.f32 %v9380_v38, %v2654_v0  ;;  %7566 = vpow2.f32 %v2705_v18  ;;  %v9576_v38 = vpack.c.bf16 %v1368_v34, %v1364_v9  ;;  %v1375_v8 = vpop.f32.mrb[133].mxu0 }
 0x58e   :  { %v1374_v20 = vadd.f32 %v1373_v63, %v12448_v21  ;;  %v9579_v24 = vpack.c.bf16 %v1370_v3, %v1366_v49  ;;  %v1376_v46 = vadd.f32 %v1375_v8, %v12449_v2  ;;  %v1377_v12 = vpop.f32.mrb[134].mxu0 }
 0x58f   :  { %v2701_v13 = vmul.f32 1.442695, %v2684_v5  ;;  %7568 = vpow2.f32 %v2699_v6  ;;  %v1378_v54 = vadd.f32 %v1377_v12, %v12448_v21  ;;  %v1379_v18 = vpop.f32.mrb[135].mxu0  ;;  %v2981_v12 = vsel %vm12447_vm12, %v9416_v15, 0  ;;  %vm12455_vm12 = vmmov %vm12454_vm11 }
 0x590   :  { %v1380_v0 = vadd.f32 %v1379_v18, %v12449_v2  ;;  %v1383_v6 = vpop.f32.mrb[136].mxu0 }
 0x591   :  { %7570 = vpow2.f32 %v2701_v13  ;;  %v1384_v13 = vadd.f32 %v1383_v6, %v12448_v21  ;;  %v1385_v57 = vpop.f32.mrb[137].mxu0 }
 0x592   :  { %7572 = vpow2.f32 %v2703_v59  ;;  %v9590_v59 = vpack.c.bf16 %v1378_v54, %v1374_v20  ;;  %v9597_v49 = vpack.c.bf16 %v1380_v0, %v1376_v46  ;;  %v1386_v17 = vadd.f32 %v1385_v57, %v12449_v2  ;;  %v1387_v34 = vpop.f32.mrb[138].mxu0 }
 0x593   :  { %v1388_v3 = vadd.f32 %v1387_v34, %v12448_v21  ;;  %v1389_v63 = vpop.f32.mrb[139].mxu0 }
 0x594   :  { %v1390_v20 = vadd.f32 %v1389_v63, %v12449_v2  ;;  %v1393_v8 = vpop.f32.mrb[140].mxu0 }
 0x595   :  { %v9606_v54 = vpack.c.bf16 %v1388_v3, %v1384_v13  ;;  %v1394_v46 = vadd.f32 %v1393_v8, %v12448_v21  ;;  %v1395_v18 = vpop.f32.mrb[141].mxu0 }
 0x596   :  { %v9609_v0 = vpack.c.bf16 %v1390_v20, %v1386_v17  ;;  %v1396_v6 = vadd.f32 %v1395_v18, %v12449_v2  ;;  %v1397_v57 = vpop.f32.mrb[142].mxu0 }
 0x597   :  { %v9582_v35 = vpop.eup %7566  ;;  %v1399_v34 = vpop.f32.mrb[143].mxu0 }
 0x598   :  { %12450 = vst [vmem:[#allocation53_spill] sm:$0xff] %v9582_v35  ;;  %v1403_v15 = vpop.f32.mrb[144].mxu0 }
 0x599   :  { %v9585_v29 = vpop.eup %7568  ;;  %v1404_v3 = vadd.f32 %v1403_v15, %v12448_v21  ;;  %v1405_v63 = vpop.f32.mrb[145].mxu0 }
 0x59a   :  { %12451 = vst [vmem:[#allocation58_spill] sm:$0xff] %v9585_v29  ;;  %v1406_v17 = vadd.f32 %v1405_v63, %v12449_v2  ;;  %v1407_v20 = vpop.f32.mrb[146].mxu0 }
 0x59b   :  { %v9588_v5 = vpop.eup %7570  ;;  %v1409_v18 = vpop.f32.mrb[147].mxu0 }
 0x59c   :  { %12452 = vst [vmem:[#allocation46_spill] sm:$0xff] %v9588_v5  ;;  %v9593_v9 = vpop.eup %7572  ;;  %v2763_v62 = vpack.c.bf16 %v9588_v5, %v9585_v29 }
 0x59d   :  { %12453 = vst [vmem:[#allocation47_spill] sm:$0xff] %v9593_v9  ;;  %v2764_v48 = vpack.c.bf16 %v9582_v35, %v9593_v9  ;;  %v1410_v9 = vadd.f32 %v1409_v18, %v12449_v2 }
 0x59e   :  { %6821 = vmatprep.mubr.bf16.mxu0 %v2763_v62  ;;  %v1398_v62 = vadd.f32 %v1397_v57, %v12448_v21  ;;  %v1413_v57 = vpop.f32.mrb[148].mxu0 }
 0x59f   :  { %6822 = vmatmul.mubr.bf16.vlgmr.msra.gmra.mrb[176].mxu0 %v2764_v48  ;;  %v1400_v48 = vadd.f32 %v1399_v34, %v12449_v2  ;;  %v2984_v34 = vsel %vm12454_vm11, %v9431_v14, 0 }
 0x5a0   :  { %6838 = vmatpush3.bf16.xpose.msra.mxu0 %v2981_v12  ;;  %v9616_v13 = vpack.c.bf16 %v1398_v62, %v1394_v46  ;;  %v1408_v12 = vadd.f32 %v1407_v20, %v12448_v21  ;;  %v1414_v46 = vadd.f32 %v1413_v57, %v12448_v21  ;;  %v1415_v62 = vpop.f32.mrb[149].mxu0 }
 0x5a1   :  { %7214 = vmatprep.subr.msk.bf16.mxu0 %vm12454_vm11, %v9431_v14  ;;  %v9619_v8 = vpack.c.bf16 %v1400_v48, %v1396_v6  ;;  %v9629_v6 = vpack.c.bf16 %v1410_v9, %v1406_v17  ;;  %v1416_v48 = vadd.f32 %v1415_v62, %v12449_v2  ;;  %v1417_v15 = vpop.f32.mrb[150].mxu0 }
 0x5a2   :  { %v9626_v29 = vpack.c.bf16 %v1408_v12, %v1404_v3  ;;  %v1418_v63 = vadd.f32 %v1417_v15, %v12448_v21  ;;  %v1419_v20 = vpop.f32.mrb[151].mxu0 }
 0x5a3   :  { %v1420_v18 = vadd.f32 %v1419_v20, %v12449_v2  ;;  %v1423_v14 = vpop.f32.mrb[152].mxu0  ;;  %v2987_v20 = vsel %vm12454_vm11, %v9429_v22, 0 }
 0x5a4   :  { %v9636_v3 = vpack.c.bf16 %v1418_v63, %v1414_v46  ;;  %v1424_v12 = vadd.f32 %v1423_v14, %v12448_v21  ;;  %v1425_v57 = vpop.f32.mrb[153].mxu0  ;;  %v2947_v14 = vpop.permute.xlu1 %2946 }
 0x5a5   :  { %v1426_v9 = vadd.f32 %v1425_v57, %v12449_v2  ;;  %v1427_v17 = vpop.f32.mrb[154].mxu0 }
 0x5a6   :  { %v1428_v62 = vadd.f32 %v1427_v17, %v12448_v21  ;;  %v1429_v25 = vpop.f32.mrb[155].mxu0 }
 0x5a7   :  { %v1430_v41 = vadd.f32 %v1429_v25, %v12449_v2  ;;  %v1433_v15 = vpop.f32.mrb[156].mxu0 }
 0x5a8   :  { %6840 = vmatpush3.bf16.xpose.msra.mxu0 %v2984_v34  ;;  %v9639_v34 = vpack.c.bf16 %v1420_v18, %v1416_v48  ;;  %v9646_v39 = vpack.c.bf16 %v1428_v62, %v1424_v12  ;;  %v1434_v46 = vadd.f32 %v1433_v15, %v12448_v21  ;;  %v1435_v63 = vpop.f32.mrb[157].mxu0  ;;  %v2990_v62 = vsel %vm12454_vm11, %v2947_v14, 0  ;;  %v2949_v15 = vpop.permute.xlu0 %2948 }
 0x5a9   :  { %7215 = vmatprep.subr.msk.bf16.mxu0 %vm12455_vm12, %v9429_v22  ;;  %v9649_v48 = vpack.c.bf16 %v1430_v41, %v1426_v9  ;;  %v1436_v18 = vadd.f32 %v1435_v63, %v12449_v2  ;;  %v1437_v57 = vpop.f32.mrb[158].mxu0  ;;  %vm12457_vm12 = vmmov %vm12454_vm11  ;;  %v2993_v9 = vsel %vm12460_vm15, %v2949_v15, 0 }
 0x5aa   :  { %12456 = vst [vmem:[#allocation113_spill] sm:$0xff] %v9646_v39  ;;  %v1438_v25 = vadd.f32 %v1437_v57, %v12448_v21  ;;  %v1439_v17 = vpop.f32.mrb[159].mxu0  ;;  %vm12469_vm15 = vmmov %vm12459_vm0 }
 0x5ab   :  { %v1440_v35 = vadd.f32 %v1439_v17, %v12449_v2  ;;  %vm12472_vm11 = vmmov %vm12459_vm0 }
 0x5ac   :  { %v9655_v22 = vpack.c.bf16 %v1438_v25, %v1434_v46 }
 0x5ad   :  { %v9657_v12 = vpack.c.bf16 %v1440_v35, %v1436_v18 }
 0x5af   :  { %12458 = vst [vmem:[#allocation114_spill] sm:$0xff] %v9657_v12 }
 0x5b0   :  { %6842 = vmatpush3.bf16.xpose.msra.mxu0 %v2987_v20 }
 0x5b1   :  { %7216 = vmatprep.subr.msk.bf16.mxu0 %vm12457_vm12, %v2947_v14  ;;  %vm12470_vm12 = vmmov %vm12459_vm0 }
 0x5b8   :  { %6844 = vmatpush3.bf16.xpose.msra.mxu0 %v2990_v62 }
 0x5b9   :  { %7217 = vmatprep.subr.msk.bf16.mxu0 %vm12459_vm0, %v2949_v15 }
 0x5bf   :  { %v2664_v41 = vpop.xlane.xlu0 %2663 }
 0x5c0   :  { %6846 = vmatpush3.bf16.xpose.msra.mxu0 %v2993_v9  ;;  %v2689_v35 = vsub.f32 %v9389_v51, %v2664_v41 }
 0x5c1   :  { %v2660_v20 = vpop.xlane.xlu1 %2659 }
 0x5c2   :  { %v2687_v21 = vsub.f32 %v9394_v31, %v2660_v20  ;;  %v2711_v9 = vmul.f32 1.442695, %v2689_v35 }
 0x5c3   :  { %v2668_v63 = vpop.xlane.xlu0 %2667 }
 0x5c4   :  { %v2707_v46 = vmul.f32 1.442695, %v2687_v21  ;;  %v2691_v14 = vsub.f32 %v9399_v36, %v2668_v63 }
 0x5c5   :  { %v2666_v57 = vpop.xlane.xlu1 %2665 }
 0x5c6   :  { %v2690_v2 = vsub.f32 %v9404_v26, %v2666_v57  ;;  %7574 = vpow2.f32 %v2707_v46  ;;  %v2715_v20 = vmul.f32 1.442695, %v2691_v14 }
 0x5c7   :  { %v2670_v18 = vpop.xlane.xlu0 %2669 }
 0x5c8   :  { %v2713_v25 = vmul.f32 1.442695, %v2690_v2  ;;  %v2692_v17 = vsub.f32 %v9409_v47, %v2670_v18 }
 0x5c9   :  { %v2662_v62 = vpop.xlane.xlu1 %2661 }
 0x5ca   :  { %v2717_v11 = vmul.f32 1.442695, %v2692_v17  ;;  %v2688_v15 = vsub.f32 %v9414_v42, %v2662_v62  ;;  %7576 = vpow2.f32 %v2713_v25 }
 0x5cb   :  { %v2680_v31 = vpop.xlane.xlu0 %2679 }
 0x5cc   :  { %v2709_v5 = vmul.f32 1.442695, %v2688_v15  ;;  %7578 = vpow2.f32 %v2717_v11  ;;  %v2697_v15 = vsub.f32 %v9421_v60, %v2680_v31 }
 0x5cd   :  { %v2672_v26 = vpop.xlane.xlu1 %2671 }
 0x5ce   :  { %7580 = vpow2.f32 %v2709_v5  ;;  %v2693_v51 = vsub.f32 %v9426_v45, %v2672_v26 }
 0x5cf   :  { %7582 = vpow2.f32 %v2711_v9  ;;  %v2953_v36 = vpop.permute.xlu0 %2952 }
 0x5d0   :  { %7584 = vpow2.f32 %v2715_v20  ;;  %v2719_v41 = vmul.f32 1.442695, %v2693_v51  ;;  %v9672_v57 = vpop.eup %7574 }
 0x5d1   :  { %v2674_v47 = vpop.xlane.xlu1 %2673  ;;  %12461 = vst [vmem:[#allocation115_spill] sm:$0xff] %v9672_v57 }
 0x5d2   :  { %v2694_v21 = vsub.f32 %v9435_v4, %v2674_v47  ;;  %7586 = vpow2.f32 %v2719_v41 }
 0x5d3   :  { %v9670_v63 = vpop.permute.xlu0 %2954 }
 0x5d4   :  { %v2721_v42 = vmul.f32 1.442695, %v2694_v21  ;;  %v9674_v35 = vpop.eup %7576 }
 0x5d5   :  { %v2676_v2 = vpop.xlane.xlu1 %2675  ;;  %12462 = vst [vmem:[#allocation116_spill] sm:$0xff] %v9674_v35 }
 0x5d6   :  { %7588 = vpow2.f32 %v2721_v42  ;;  %v9676_v11 = vpop.eup %7578  ;;  %v2695_v46 = vsub.f32 %v9440_v55, %v2676_v2 }
 0x5d7   :  { %12463 = vst [vmem:[#allocation117_spill] sm:$0xff] %v9676_v11  ;;  %v2917_v45 = vpop.permute.xlu0 %2916 }
 0x5d8   :  { %v9678_v5 = vpop.eup %7580  ;;  %v2723_v20 = vmul.f32 1.442695, %v2695_v46 }
 0x5d9   :  { %12464 = vst [vmem:[#allocation118_spill] sm:$0xff] %v9678_v5  ;;  %v9681_v18 = vpop.eup %7582  ;;  %v2682_v4 = vpop.xlane.xlu1 %2681  ;;  %v2765_v14 = vpack.c.bf16 %v9678_v5, %v9672_v57  ;;  %v12530_v5 = vld [vmem:[#allocation32_spill] sm:$0xff] }
 0x5da   :  { %12465 = vst [vmem:[#allocation119_spill] sm:$0xff] %v9681_v18  ;;  %v9685_v25 = vpop.eup %7584  ;;  %v2698_v17 = vsub.f32 %v9447_v19, %v2682_v4  ;;  %v2766_v62 = vpack.c.bf16 %v9674_v35, %v9681_v18  ;;  %v2727_v19 = vmul.f32 1.442695, %v2697_v15  ;;  %7590 = vpow2.f32 %v2723_v20 }
 0x5db   :  { %12466 = vst [vmem:[#allocation120_spill] sm:$0xff] %v9685_v25  ;;  %v2921_v9 = vpop.permute.xlu0 %2920  ;;  %6825 = vmatprep.mubr.bf16.mxu0 %v2765_v14  ;;  %v2767_v55 = vpack.c.bf16 %v9676_v11, %v9685_v25  ;;  %v2999_v15 = vsel %vm12472_vm11, %v2953_v36, 0  ;;  %vm12478_vm11 = vmmov %vm12459_vm0 }
 0x5dc   :  { %6826 = vmatmul.mubr.bf16.gmra.mrb[180].mxu0 %v2766_v62  ;;  %v2729_v26 = vmul.f32 1.442695, %v2698_v17  ;;  %v9694_v47 = vpop.eup %7586 }
 0x5dd   :  { %6829 = vmatprep.mubr.bf16.mxu0 %v2767_v55  ;;  %v2678_v51 = vpop.xlane.xlu1 %2677  ;;  %12467 = vst [vmem:[#allocation121_spill] sm:$0xff] %v9694_v47 }
 0x5de   :  { %v2696_v41 = vsub.f32 %v9454_v61, %v2678_v51  ;;  %7592 = vpow2.f32 %v2729_v26 }
 0x5df   :  { %v2925_v21 = vpop.permute.xlu0 %2924 }
 0x5e0   :  { %v9696_v42 = vpop.eup %7588  ;;  %v2725_v60 = vmul.f32 1.442695, %v2696_v41 }
 0x5e1   :  { %12468 = vst [vmem:[#allocation122_spill] sm:$0xff] %v9696_v42  ;;  %v2951_v31 = vpop.permute.xlu1 %2950  ;;  %v2768_v2 = vpack.c.bf16 %v9696_v42, %v9694_v47 }
 0x5e2   :  { %7594 = vpow2.f32 %v2725_v60  ;;  %7218 = vmatprep.subr.msk.bf16.mxu0 %vm12469_vm15, %v2951_v31  ;;  %v2996_v46 = vsel %vm12459_vm0, %v2951_v31, 0  ;;  %vm12475_vm15 = vmmov %vm12459_vm0 }
 0x5e3   :  { %7596 = vpow2.f32 %v2727_v19  ;;  %v2929_v61 = vpop.permute.xlu0 %2928  ;;  %6848 = vmatpush3.bf16.xpose.msra.mxu0 %v2996_v46 }
 0x5e4   :  { %6830 = vmatmul.mubr.bf16.gmra.mrb[184].mxu0 %v2768_v2  ;;  %7219 = vmatprep.subr.msk.bf16.mxu0 %vm12470_vm12, %v2953_v36  ;;  %v9703_v62 = vpop.eup %7590  ;;  %vm12477_vm12 = vmmov %vm12459_vm0 }
 0x5e5   :  { %v2919_v4 = vpop.permute.xlu1 %2918  ;;  %12471 = vst [vmem:[#allocation123_spill] sm:$0xff] %v9703_v62  ;;  %v3002_v60 = vsel %vm12477_vm12, %v9670_v63, 0  ;;  %vm12480_vm12 = vmmov %vm12459_vm0 }
 0x5e7   :  { %v3246_v14 = vpop.permute.xlu0 %3245 }
 0x5e8   :  { %6869 = vmatprep.subr.bf16.mxu1 %v3246_v14  ;;  %v9706_v55 = vpop.eup %7592 }
 0x5e9   :  { %6870 = vmatpush3.bf16.msra.mxu1 %v3246_v14  ;;  %v2923_v17 = vpop.permute.xlu1 %2922  ;;  %12473 = vst [vmem:[#allocation124_spill] sm:$0xff] %v9706_v55 }
 0x5eb   :  { %6850 = vmatpush3.bf16.xpose.msra.mxu0 %v2999_v15  ;;  %v3250_v2 = vpop.permute.xlu0 %3249 }
 0x5ec   :  { %v9708_v20 = vpop.eup %7594  ;;  %7220 = vmatprep.subr.msk.bf16.mxu0 %vm12475_vm15, %v9670_v63  ;;  %vm12479_vm15 = vmmov %vm12459_vm0 }
 0x5ed   :  { %12474 = vst [vmem:[#allocation125_spill] sm:$0xff] %v9708_v20  ;;  %v9712_v26 = vpop.eup %7596  ;;  %v2927_v51 = vpop.permute.xlu1 %2926  ;;  %v2769_v41 = vpack.c.bf16 %v9708_v20, %v9703_v62 }
 0x5ee   :  { %12476 = vst [vmem:[#allocation126_spill] sm:$0xff] %v9712_v26  ;;  %v2770_v19 = vpack.c.bf16 %v9706_v55, %v9712_v26 }
 0x5ef   :  { %6833 = vmatprep.mubr.bf16.mxu0 %v2769_v41 }
 0x5f0   :  { %6834 = vmatmul.mubr.bf16.gmra.mrb[188].mxu0 %v2770_v19 }
 0x5f1   :  { %6853 = vmatprep.mubr.msk.bf16.mxu0 %vm12459_vm0, %v2917_v45  ;;  %v2931_v36 = vpop.permute.xlu1 %2930 }
 0x5f3   :  { %6852 = vmatpush3.bf16.xpose.msra.mxu0 %v3002_v60 }
 0x5f4   :  { %6933 = vmatprep.subr.bf16.mxu0 %v9576_v38 }
 0x5f5   :  { %v3248_v31 = vpop.permute.xlu1 %3247 }
 0x5f6   :  { %6871 = vmatprep.subr.bf16.mxu1 %v3248_v31 }
 0x5f7   :  { %6872 = vmatpush3.bf16.msra.mxu1 %v3248_v31 }
 0x5f8   :  { %6873 = vmatprep.subr.bf16.mxu1 %v3250_v2 }
 0x5f9   :  { %v3252_v46 = vpop.permute.xlu1 %3251 }
 0x5fa   :  { %6854 = vmatmul.mubr.msk.bf16.vlgmr.msra.gmra.mrb[192].mxu0 %vm12478_vm11, %v2919_v4  ;;  %vm12481_vm11 = vmmov %vm12459_vm0 }
 0x5fb   :  { %6857 = vmatprep.mubr.msk.bf16.mxu0 %vm12479_vm15, %v2921_v9  ;;  %6874 = vmatpush3.bf16.msra.mxu1 %v3250_v2  ;;  %vm12482_vm15 = vmmov %vm12459_vm0 }
 0x5fc   :  { %6875 = vmatprep.subr.bf16.mxu1 %v3252_v46  ;;  %6934 = vmatpush3.bf16.msra.mxu0 %v9576_v38 }
 0x5fd   :  { %v3254_v45 = vpop.permute.xlu1 %3253  ;;  %6935 = vmatprep.subr.bf16.mxu0 %v9590_v59 }
 0x5ff   :  { %6876 = vmatpush3.bf16.msra.mxu1 %v3252_v46 }
 0x600   :  { %6877 = vmatprep.subr.bf16.mxu1 %v3254_v45  ;;  %6936 = vmatpush3.bf16.msra.mxu0 %v9590_v59 }
 0x601   :  { %6937 = vmatprep.subr.bf16.mxu0 %v9606_v54  ;;  %v3256_v63 = vpop.permute.xlu1 %3255 }
 0x602   :  { %6858 = vmatmul.mubr.msk.bf16.gmra.mrb[196].mxu0 %vm12459_vm0, %v2923_v17 }
 0x603   :  { %6861 = vmatprep.mubr.msk.bf16.mxu0 %vm12480_vm12, %v2925_v21  ;;  %6878 = vmatpush3.bf16.msra.mxu1 %v3254_v45 }
 0x604   :  { %6879 = vmatprep.subr.bf16.mxu1 %v3256_v63  ;;  %6938 = vmatpush3.bf16.msra.mxu0 %v9606_v54 }
 0x605   :  { %6939 = vmatprep.subr.bf16.mxu0 %v9616_v13 }
 0x607   :  { %6880 = vmatpush3.bf16.msra.mxu1 %v3256_v63 }
 0x608   :  { %6940 = vmatpush3.bf16.msra.mxu0 %v9616_v13 }
 0x609   :  { %6941 = vmatprep.subr.bf16.mxu0 %v9626_v29 }
 0x60a   :  { %6862 = vmatmul.mubr.msk.bf16.gmra.mrb[200].mxu0 %vm12481_vm11, %v2927_v51 }
 0x60b   :  { %6865 = vmatprep.mubr.msk.bf16.mxu0 %vm12482_vm15, %v2929_v61 }
 0x60c   :  { %6942 = vmatpush3.bf16.msra.mxu0 %v9626_v29 }
 0x60d   :  { %6943 = vmatprep.subr.bf16.mxu0 %v9636_v3 }
 0x610   :  { %6944 = vmatpush3.bf16.msra.mxu0 %v9636_v3 }
 0x611   :  { %6945 = vmatprep.subr.bf16.mxu0 %v9646_v39 }
 0x612   :  { %6866 = vmatmul.mubr.msk.bf16.gmra.mrb[204].mxu0 %vm12459_vm0, %v2931_v36 }
 0x614   :  { %6946 = vmatpush3.bf16.msra.mxu0 %v9646_v39 }
 0x615   :  { %6947 = vmatprep.subr.bf16.mxu0 %v9655_v22 }
 0x618   :  { %6948 = vmatpush3.bf16.msra.mxu0 %v9655_v22 }
 0x634   :  { %v9744_v9 = vpop.f32.mrb[160].mxu0 }
 0x635   :  { %12483 = vst [vmem:[#allocation127_spill] sm:$0xff] %v9744_v9  ;;  %v9746_v21 = vpop.f32.mrb[161].mxu0 }
 0x636   :  { %12484 = vst [vmem:[#allocation128_spill] sm:$0xff] %v9746_v21  ;;  %v9748_v61 = vpop.f32.mrb[162].mxu0  ;;  %v12526_v21 = vld [vmem:[#allocation66_spill] sm:$0xff] }
 0x637   :  { %12485 = vst [vmem:[#allocation129_spill] sm:$0xff] %v9748_v61  ;;  %v9750_v4 = vpop.f32.mrb[163].mxu0  ;;  %vm12527_vm15 = vnez %v12526_v21 }
 0x638   :  { %12486 = vst [vmem:[#allocation130_spill] sm:$0xff] %v9750_v4 }
 0x63c   :  { %v9752_v14 = vpop.f32.mrb[164].mxu0 }
 0x63d   :  { %12487 = vst [vmem:[#allocation131_spill] sm:$0xff] %v9752_v14  ;;  %v9754_v17 = vpop.f32.mrb[165].mxu0 }
 0x63e   :  { %12488 = vst [vmem:[#allocation132_spill] sm:$0xff] %v9754_v17  ;;  %v9756_v15 = vpop.f32.mrb[166].mxu0  ;;  %v12519_v17 = vld [vmem:[#allocation67_spill] sm:$0xff] }
 0x63f   :  { %12489 = vst [vmem:[#allocation133_spill] sm:$0xff] %v9756_v15  ;;  %v9758_v51 = vpop.f32.mrb[167].mxu0  ;;  %v12836_v15 = vld [vmem:[#allocation120_spill] sm:$0xff] }
 0x640   :  { %12490 = vst [vmem:[#allocation134_spill] sm:$0xff] %v9758_v51  ;;  %v12518_v51 = vld [vmem:[#allocation59_spill] sm:$0xff] }
 0x644   :  { %v9760_v41 = vpop.f32.mrb[168].mxu0 }
 0x645   :  { %12491 = vst [vmem:[#allocation135_spill] sm:$0xff] %v9760_v41  ;;  %v9762_v19 = vpop.f32.mrb[169].mxu0 }
 0x646   :  { %12492 = vst [vmem:[#allocation136_spill] sm:$0xff] %v9762_v19  ;;  %v9764_v36 = vpop.f32.mrb[170].mxu0  ;;  %v12516_v19 = vld [vmem:[#allocation62_spill] sm:$0xff] }
 0x647   :  { %12493 = vst [vmem:[#allocation137_spill] sm:$0xff] %v9764_v36  ;;  %v9766_v60 = vpop.f32.mrb[171].mxu0 }
 0x648   :  { %12494 = vst [vmem:[#allocation138_spill] sm:$0xff] %v9766_v60 }
 0x64c   :  { %v9768_v31 = vpop.f32.mrb[172].mxu0 }
 0x64d   :  { %12495 = vst [vmem:[#allocation139_spill] sm:$0xff] %v9768_v31  ;;  %v9770_v2 = vpop.f32.mrb[173].mxu0 }
 0x64e   :  { %12496 = vst [vmem:[#allocation140_spill] sm:$0xff] %v9770_v2  ;;  %v9772_v46 = vpop.f32.mrb[174].mxu0 }
 0x64f   :  { %12497 = vst [vmem:[#allocation141_spill] sm:$0xff] %v9772_v46  ;;  %v9774_v45 = vpop.f32.mrb[175].mxu0 }
 0x650   :  { %12498 = vst [vmem:[#allocation142_spill] sm:$0xff] %v9774_v45 }
 0x672   :  { %v9776_v63 = vpop.f32.mrb[176].mxu0 }
 0x673   :  { %12499 = vst [vmem:[#allocation143_spill] sm:$0xff] %v9776_v63  ;;  %v9778_v26 = vpop.f32.mrb[177].mxu0 }
 0x674   :  { %12500 = vst [vmem:[#allocation144_spill] sm:$0xff] %v9778_v26  ;;  %v9780_v55 = vpop.f32.mrb[178].mxu0 }
 0x675   :  { %12501 = vst [vmem:[#allocation145_spill] sm:$0xff] %v9780_v55  ;;  %v9782_v62 = vpop.f32.mrb[179].mxu0 }
 0x676   :  { %12502 = vst [vmem:[#allocation146_spill] sm:$0xff] %v9782_v62 }
 0x6af   :  { %v9784_v20 = vpop.f32.mrb[180].mxu0 }
 0x6b0   :  { %12503 = vst [vmem:[#allocation147_spill] sm:$0xff] %v9784_v20  ;;  %v9786_v47 = vpop.f32.mrb[181].mxu0 }
 0x6b1   :  { %12504 = vst [vmem:[#allocation148_spill] sm:$0xff] %v9786_v47  ;;  %v9788_v42 = vpop.f32.mrb[182].mxu0 }
 0x6b2   :  { %12505 = vst [vmem:[#allocation149_spill] sm:$0xff] %v9788_v42  ;;  %v9790_v25 = vpop.f32.mrb[183].mxu0 }
 0x6b3   :  { %12506 = vst [vmem:[#allocation150_spill] sm:$0xff] %v9790_v25 }
 0x6b7   :  { %v9792_v11 = vpop.f32.mrb[184].mxu0 }
 0x6b8   :  { %12507 = vst [vmem:[#allocation151_spill] sm:$0xff] %v9792_v11  ;;  %v9794_v18 = vpop.f32.mrb[185].mxu0 }
 0x6b9   :  { %12508 = vst [vmem:[#allocation152_spill] sm:$0xff] %v9794_v18  ;;  %v9796_v57 = vpop.f32.mrb[186].mxu0 }
 0x6ba   :  { %12509 = vst [vmem:[#allocation153_spill] sm:$0xff] %v9796_v57  ;;  %v9798_v63 = vpop.f32.mrb[187].mxu0 }
 0x6bb   :  { %12510 = vst [vmem:[#allocation154_spill] sm:$0xff] %v9798_v63 }
 0x6c3   :  { %v9800_v26 = vpop.f32.mrb[188].mxu0 }
 0x6c4   :  { %12511 = vst [vmem:[#allocation155_spill] sm:$0xff] %v9800_v26  ;;  %v9802_v55 = vpop.f32.mrb[189].mxu0 }
 0x6c5   :  { %12512 = vst [vmem:[#allocation156_spill] sm:$0xff] %v9802_v55  ;;  %v9804_v62 = vpop.f32.mrb[190].mxu0 }
 0x6c6   :  { %12513 = vst [vmem:[#allocation157_spill] sm:$0xff] %v9804_v62  ;;  %v9806_v20 = vpop.f32.mrb[191].mxu0 }
 0x6c7   :  { %12514 = vst [vmem:[#allocation158_spill] sm:$0xff] %v9806_v20 }
 0x6cd   :  { %v6855_v47 = vpop.f32.mrb[192].mxu0 }
 0x6ce   :  { %v3038_v42 = vpop.f32.mrb[193].mxu0  ;;  %v3103_v25 = vsel %vm8890_vm1, %v6855_v47, -1.7014117e+38 }
 0x6cf   :  { %3121 = vmax.xlane.f32.xlu0 %v3103_v25  ;;  %v6856_v11 = vpop.f32.mrb[194].mxu0  ;;  %v3101_v26 = vsel %vm8897_vm2, %v3038_v42, -1.7014117e+38 }
 0x6d0   :  { %v3041_v18 = vpop.f32.mrb[195].mxu0  ;;  %v3104_v20 = vsel %vm8912_vm3, %v6856_v11, -1.7014117e+38 }
 0x6d1   :  { %v3102_v57 = vsel %vm8918_vm4, %v3041_v18, -1.7014117e+38 }
 0x6d2   :  { %3119 = vmax.xlane.f32.xlu1 %v3102_v57 }
 0x6d3   :  { %3117 = vmax.xlane.f32.xlu0 %v3101_v26 }
 0x6d5   :  { %v6859_v55 = vpop.f32.mrb[196].mxu0 }
 0x6d6   :  { %v3054_v62 = vpop.f32.mrb[197].mxu0  ;;  %v9841_v61 = vsel %vm8949_vm6, %v6859_v55, -1.7014117e+38 }
 0x6d7   :  { %3123 = vmax.xlane.f32.xlu0 %v3104_v20  ;;  %v6860_v46 = vpop.f32.mrb[198].mxu0 }
 0x6d8   :  { %v3057_v31 = vpop.f32.mrb[199].mxu0  ;;  %v9851_v9 = vsel %vm8964_vm7, %v6860_v46, -1.7014117e+38 }
 0x6d9   :  { %v9822_v11 = vsel %vm8971_vm8, %v3057_v31, -1.7014117e+38 }
 0x6dd   :  { %v6863_v47 = vpop.f32.mrb[200].mxu0 }
 0x6de   :  { %v3070_v45 = vpop.f32.mrb[201].mxu0 }
 0x6df   :  { %v6864_v2 = vpop.f32.mrb[202].mxu0 }
 0x6e0   :  { %v3073_v36 = vpop.f32.mrb[203].mxu0 }
 0x6e1   :  { %v9827_v14 = vsel %vm12417_vm9, %v3073_v36, -1.7014117e+38  ;;  %v12521_v36 = vld [vmem:[#allocation61_spill] sm:$0xff] }
 0x6e3   :  { %3259 = vrot.lane.b32.xlu1 %v12446_v43, %s8115_s2  ;;  %v9831_v43 = vsel %vm8943_vm5, %v3054_v62, -1.7014117e+38 }
 0x6e5   :  { %v6867_v18 = vpop.f32.mrb[204].mxu0 }
 0x6e6   :  { %v3086_v41 = vpop.f32.mrb[205].mxu0 }
 0x6e7   :  { %v6868_v60 = vpop.f32.mrb[206].mxu0  ;;  %v9872_v35 = vsel %vm12527_vm15, %v3086_v41, -1.7014117e+38 }
 0x6e8   :  { %v3089_v42 = vpop.f32.mrb[207].mxu0  ;;  %v9857_v55 = vsel %vm12422_vm13, %v6868_v60, -1.7014117e+38  ;;  %v12528_v60 = vld [vmem:[#allocation64_spill] sm:$0xff] }
 0x6e9   :  { %v9847_v62 = vsel %vm12423_vm14, %v3089_v42, -1.7014117e+38  ;;  %v12524_v42 = vld [vmem:[#allocation63_spill] sm:$0xff]  ;;  %vm12529_vm0 = vnez %v12528_v60  ;;  %vm12534_vm14 = vcmask 523264  }
 0x6ea   :  { %vm12525_vm11 = vnez %v12524_v42  ;;  %vm12536_vm13 = vmmov %vm12534_vm14 }
 0x6eb   :  { %v9867_v46 = vsel %vm12525_vm11, %v6863_v47, -1.7014117e+38  ;;  %v12531_v47 = vld [vmem:[#allocation30_spill] sm:$0xff]  ;;  %vm12537_vm15 = vmmov %vm12536_vm13 }
 0x6ed   :  { %3257 = vrot.lane.b32.xlu0 %v12445_v32, %s8115_s2  ;;  %v9837_v32 = vsel %vm12416_vm10, %v6864_v2, -1.7014117e+38  ;;  %v12522_v2 = vld [vmem:[#allocation65_spill] sm:$0xff]  ;;  %vm12539_vm10 = vmmov %vm12536_vm13 }
 0x6ee   :  { %vm12523_vm12 = vnez %v12522_v2  ;;  %vm12540_vm11 = vmmov %vm12539_vm10 }
 0x6ef   :  { %v9861_v4 = vsel %vm12523_vm12, %v3070_v45, -1.7014117e+38  ;;  %v9877_v45 = vsel %vm12529_vm0, %v6867_v18, -1.7014117e+38  ;;  %vm12542_vm0 = vmmov %vm12539_vm10 }
 0x6f0   :  { %vm12580_vm8 = vmmov %vm12542_vm0 }
 0x707   :  { %3127 = vmax.xlane.f32.xlu1 %v9822_v11 }
 0x70b   :  { %3135 = vmax.xlane.f32.xlu1 %v9827_v14 }
 0x70c   :  { %3125 = vmax.xlane.f32.xlu0 %v9831_v43 }
 0x70f   :  { %3139 = vmax.xlane.f32.xlu1 %v9837_v32 }
 0x710   :  { %3129 = vmax.xlane.f32.xlu0 %v9841_v61 }
 0x713   :  { %3143 = vmax.xlane.f32.xlu1 %v9847_v62 }
 0x714   :  { %3131 = vmax.xlane.f32.xlu0 %v9851_v9 }
 0x717   :  { %3147 = vmax.xlane.f32.xlu1 %v9857_v55 }
 0x718   :  { %3133 = vmax.xlane.f32.xlu0 %v9861_v4 }
 0x71c   :  { %3137 = vmax.xlane.f32.xlu0 %v9867_v46 }
 0x720   :  { %3141 = vmax.xlane.f32.xlu0 %v9872_v35 }
 0x724   :  { %3145 = vmax.xlane.f32.xlu0 %v9877_v45 }
 0x728   :  { %3970 = vrot.lane.b32.xlu1 %v12530_v5, %s8115_s2 }
 0x73a   :  { %3968 = vrot.lane.b32.xlu0 %v12531_v47, %s8115_s2 }
 0x73e   :  { %3972 = vrot.lane.b32.xlu0 %v12532_v7, %s8115_s2 }
 0x75c   :  { %v3122_v27 = vpop.xlane.xlu0 %3121 }
 0x75d   :  { %v3151_v53 = vsub.f32 %v3103_v25, %v3122_v27  ;;  %v12547_v25 = vld [vmem:[#allocation40_spill] sm:$0xff] }
 0x75f   :  { %v3120_v41 = vpop.xlane.xlu1 %3119  ;;  %v3169_v10 = vmul.f32 1.442695, %v3151_v53 }
 0x760   :  { %v3150_v58 = vsub.f32 %v3102_v57, %v3120_v41  ;;  %v3118_v33 = vpop.xlane.xlu0 %3117 }
 0x761   :  { %v3149_v30 = vsub.f32 %v3101_v26, %v3118_v33 }
 0x762   :  { %v3167_v28 = vmul.f32 1.442695, %v3150_v58 }
 0x763   :  { %v3165_v18 = vmul.f32 1.442695, %v3149_v30  ;;  %v3260_v39 = vpop.permute.xlu1 %3259 }
 0x764   :  { %7598 = vpow2.f32 %v3167_v28  ;;  %v3124_v50 = vpop.xlane.xlu0 %3123 }
 0x765   :  { %7600 = vpow2.f32 %v3165_v18  ;;  %v3152_v52 = vsub.f32 %v3104_v20, %v3124_v50 }
 0x766   :  { %7602 = vpow2.f32 %v3169_v10  ;;  %v12544_v10 = vld [vmem:[#allocation38_spill] sm:$0xff] }
 0x767   :  { %v3171_v16 = vmul.f32 1.442695, %v3152_v52  ;;  %v3549_v52 = vsel %vm12540_vm11, %v12532_v7, 0  ;;  %vm12549_vm11 = vmmov %vm12542_vm0 }
 0x768   :  { %v3258_v40 = vpop.permute.xlu0 %3257 }
 0x769   :  { %7604 = vpow2.f32 %v3171_v16  ;;  %6881 = vmatprep.subr.bf16.mxu1 %v3258_v40 }
 0x76a   :  { %6882 = vmatpush3.bf16.msra.mxu1 %v3258_v40  ;;  %v3543_v40 = vsel %vm12536_vm13, %v12531_v47, 0 }
 0x76b   :  { %6883 = vmatprep.subr.bf16.mxu1 %v3260_v39 }
 0x76e   :  { %v9886_v12 = vpop.eup %7598  ;;  %6884 = vmatpush3.bf16.msra.mxu1 %v3260_v39  ;;  %v12541_v39 = vld [vmem:[#allocation36_spill] sm:$0xff] }
 0x76f   :  { %v9888_v27 = vpop.eup %7600  ;;  %7221 = vmatprep.subr.msk.bf16.mxu1 %vm12534_vm14, %v12531_v47  ;;  %vm12538_vm14 = vmmov %vm12536_vm13 }
 0x770   :  { %12533 = vst [vmem:[#allocation32_spill] sm:$0xff] %v9888_v27  ;;  %v3229_v28 = vpack.c.bf16 %v9886_v12, %v9888_v27  ;;  %v9894_v33 = vpop.eup %7602  ;;  %v3546_v50 = vsel %vm12538_vm14, %v12530_v5, 0  ;;  %vm12543_vm13 = vmmov %vm12542_vm0 }
 0x771   :  { %12535 = vst [vmem:[#allocation30_spill] sm:$0xff] %v9894_v33  ;;  %v3552_v30 = vsel %vm12543_vm13, %v12541_v39, 0  ;;  %vm12546_vm14 = vmmov %vm12542_vm0 }
 0x772   :  { %6885 = vmatprep.mubr.bf16.mxu1 %v3229_v28  ;;  %vm12551_vm13 = vmmov %vm12542_vm0 }
 0x773   :  { %v9896_v53 = vpop.eup %7604 }
 0x774   :  { %v3230_v16 = vpack.c.bf16 %v9896_v53, %v9894_v33 }
 0x776   :  { %6886 = vmatmul.mubr.bf16.vlgmr.msra.gmra.mrb[96].mxu1 %v3230_v16 }
 0x777   :  { %6902 = vmatpush3.bf16.xpose.msra.mxu1 %v3543_v40  ;;  %v12550_v40 = vld [vmem:[#allocation42_spill] sm:$0xff] }
 0x778   :  { %7222 = vmatprep.subr.msk.bf16.mxu1 %vm12537_vm15, %v12530_v5  ;;  %vm12545_vm15 = vmmov %vm12542_vm0  ;;  %v3555_v5 = vsel %vm12546_vm14, %v12544_v10, 0 }
 0x779   :  { %vm12556_vm14 = vmmov %vm12542_vm0 }
 0x77f   :  { %6904 = vmatpush3.bf16.xpose.msra.mxu1 %v3546_v50 }
 0x780   :  { %7223 = vmatprep.subr.msk.bf16.mxu1 %vm12539_vm10, %v12532_v7  ;;  %vm12548_vm10 = vmmov %vm12542_vm0 }
 0x787   :  { %6906 = vmatpush3.bf16.xpose.msra.mxu1 %v3549_v52 }
 0x788   :  { %7224 = vmatprep.subr.msk.bf16.mxu1 %vm12542_vm0, %v12541_v39 }
 0x78f   :  { %6908 = vmatpush3.bf16.xpose.msra.mxu1 %v3552_v30 }
 0x790   :  { %7225 = vmatprep.subr.msk.bf16.mxu1 %vm12545_vm15, %v12544_v10  ;;  %vm12555_vm15 = vmmov %vm12542_vm0 }
 0x794   :  { %v3128_v58 = vpop.xlane.xlu1 %3127 }
 0x795   :  { %v3154_v57 = vsub.f32 %v9822_v11, %v3128_v58  ;;  %v3558_v11 = vsel %vm12549_vm11, %v12547_v25, 0  ;;  %vm12569_vm11 = vmmov %vm12542_vm0 }
 0x797   :  { %6910 = vmatpush3.bf16.xpose.msra.mxu1 %v3555_v5  ;;  %v3175_v20 = vmul.f32 1.442695, %v3154_v57 }
 0x798   :  { %7226 = vmatprep.subr.msk.bf16.mxu1 %vm12548_vm10, %v12547_v25  ;;  %v3136_v7 = vpop.xlane.xlu1 %3135  ;;  %vm12561_vm10 = vmmov %vm12542_vm0 }
 0x799   :  { %v3126_v26 = vpop.xlane.xlu0 %3125  ;;  %7606 = vpow2.f32 %v3175_v20  ;;  %v3158_v50 = vsub.f32 %v9827_v14, %v3136_v7 }
 0x79a   :  { %v3153_v47 = vsub.f32 %v9831_v43, %v3126_v26 }
 0x79b   :  { %v3183_v5 = vmul.f32 1.442695, %v3158_v50 }
 0x79c   :  { %v3173_v41 = vmul.f32 1.442695, %v3153_v47  ;;  %v3140_v28 = vpop.xlane.xlu1 %3139  ;;  %v3561_v47 = vsel %vm12551_vm13, %v12550_v40, 0  ;;  %vm12572_vm13 = vmmov %vm12542_vm0 }
 0x79d   :  { %v3130_v18 = vpop.xlane.xlu0 %3129  ;;  %v3160_v20 = vsub.f32 %v9837_v32, %v3140_v28 }
 0x79e   :  { %7608 = vpow2.f32 %v3173_v41  ;;  %v3155_v16 = vsub.f32 %v9841_v61, %v3130_v18 }
 0x79f   :  { %6912 = vmatpush3.bf16.xpose.msra.mxu1 %v3558_v11  ;;  %v3187_v18 = vmul.f32 1.442695, %v3160_v20 }
 0x7a0   :  { %7227 = vmatprep.subr.msk.bf16.mxu1 %vm12542_vm0, %v12550_v40  ;;  %v3177_v52 = vmul.f32 1.442695, %v3155_v16  ;;  %v3144_v58 = vpop.xlane.xlu1 %3143 }
 0x7a1   :  { %v3132_v30 = vpop.xlane.xlu0 %3131  ;;  %v3162_v32 = vsub.f32 %v9847_v62, %v3144_v58 }
 0x7a2   :  { %v3156_v43 = vsub.f32 %v9851_v9, %v3132_v30  ;;  %7610 = vpow2.f32 %v3177_v52  ;;  %v12554_v9 = vld [vmem:[#allocation44_spill] sm:$0xff] }
 0x7a3   :  { %v9933_v41 = vpop.eup %7606  ;;  %v3191_v52 = vmul.f32 1.442695, %v3162_v32  ;;  %v3564_v62 = vsel %vm12556_vm14, %v12554_v9, 0  ;;  %vm12576_vm14 = vmmov %vm12542_vm0 }
 0x7a4   :  { %v3179_v57 = vmul.f32 1.442695, %v3156_v43  ;;  %12552 = vst [vmem:[#allocation34_spill] sm:$0xff] %v9933_v41  ;;  %v3148_v16 = vpop.xlane.xlu1 %3147 }
 0x7a5   :  { %v3134_v61 = vpop.xlane.xlu0 %3133  ;;  %v3164_v30 = vsub.f32 %v9857_v55, %v3148_v16 }
 0x7a6   :  { %7612 = vpow2.f32 %v3179_v57  ;;  %v3157_v26 = vsub.f32 %v9861_v4, %v3134_v61 }
 0x7a7   :  { %6914 = vmatpush3.bf16.xpose.msra.mxu1 %v3561_v47  ;;  %7614 = vpow2.f32 %v3183_v5 }
 0x7a8   :  { %v9935_v14 = vpop.eup %7608  ;;  %v3181_v7 = vmul.f32 1.442695, %v3157_v26  ;;  %7228 = vmatprep.subr.msk.bf16.mxu1 %vm12555_vm15, %v12554_v9  ;;  %vm12574_vm15 = vmmov %vm12542_vm0 }
 0x7a9   :  { %12553 = vst [vmem:[#allocation36_spill] sm:$0xff] %v9935_v14  ;;  %v3138_v28 = vpop.xlane.xlu0 %3137  ;;  %v3231_v4 = vpack.c.bf16 %v9933_v41, %v9935_v14 }
 0x7aa   :  { %7616 = vpow2.f32 %v3181_v7  ;;  %v3159_v11 = vsub.f32 %v9867_v46, %v3138_v28  ;;  %v3195_v46 = vmul.f32 1.442695, %v3164_v30 }
 0x7ab   :  { %6889 = vmatprep.mubr.bf16.mxu1 %v3231_v4  ;;  %7618 = vpow2.f32 %v3187_v18 }
 0x7ac   :  { %v3185_v50 = vmul.f32 1.442695, %v3159_v11  ;;  %v9947_v58 = vpop.eup %7610 }
 0x7ad   :  { %v3142_v43 = vpop.xlane.xlu0 %3141  ;;  %12557 = vst [vmem:[#allocation38_spill] sm:$0xff] %v9947_v58 }
 0x7ae   :  { %7620 = vpow2.f32 %v3185_v50  ;;  %v3161_v57 = vsub.f32 %v9872_v35, %v3142_v43 }
 0x7af   :  { %6916 = vmatpush3.bf16.xpose.msra.mxu1 %v3564_v62  ;;  %7622 = vpow2.f32 %v3191_v52  ;;  %v12570_v62 = vld [vmem:[#allocation16_spill] sm:$0xff] }
 0x7b0   :  { %v9949_v5 = vpop.eup %7612  ;;  %v3189_v20 = vmul.f32 1.442695, %v3161_v57  ;;  %v12568_v57 = vld [vmem:[#allocation14_spill] sm:$0xff] }
 0x7b1   :  { %12558 = vst [vmem:[#allocation40_spill] sm:$0xff] %v9949_v5  ;;  %v3146_v61 = vpop.xlane.xlu0 %3145  ;;  %v3232_v26 = vpack.c.bf16 %v9949_v5, %v9947_v58  ;;  %v9954_v47 = vpop.eup %7614 }
 0x7b2   :  { %7624 = vpow2.f32 %v3189_v20  ;;  %v3163_v55 = vsub.f32 %v9877_v45, %v3146_v61  ;;  %12559 = vst [vmem:[#allocation42_spill] sm:$0xff] %v9954_v47  ;;  %v12571_v20 = vld [vmem:[#allocation18_spill] sm:$0xff] }
 0x7b3   :  { %6890 = vmatmul.mubr.bf16.gmra.mrb[100].mxu1 %v3232_v26  ;;  %7626 = vpow2.f32 %v3195_v46  ;;  %v12573_v46 = vld [vmem:[#allocation20_spill] sm:$0xff]  ;;  %v12575_v61 = vld [vmem:[#allocation22_spill] sm:$0xff] }
 0x7b4   :  { %v9956_v35 = vpop.eup %7616  ;;  %v3193_v7 = vmul.f32 1.442695, %v3163_v55  ;;  %v12577_v26 = vld [vmem:[#allocation24_spill] sm:$0xff]  ;;  %v12579_v55 = vld [vmem:[#allocation26_spill] sm:$0xff] }
 0x7b5   :  { %12560 = vst [vmem:[#allocation44_spill] sm:$0xff] %v9956_v35  ;;  %v9958_v18 = vpop.permute.xlu0 %3968  ;;  %v3233_v32 = vpack.c.bf16 %v9954_v47, %v9956_v35  ;;  %v9964_v28 = vpop.eup %7618 }
 0x7b6   :  { %7628 = vpow2.f32 %v3193_v7  ;;  %7229 = vmatprep.subr.msk.bf16.mxu0 %vm12561_vm10, %v9958_v18  ;;  %12562 = vst [vmem:[#allocation159_spill] sm:$0xff] %v9964_v28  ;;  %vm12578_vm10 = vmmov %vm12542_vm0  ;;  %v12581_v7 = vld [vmem:[#allocation28_spill] sm:$0xff] }
 0x7b7   :  { %6893 = vmatprep.mubr.bf16.mxu1 %v3233_v32 }
 0x7b8   :  { %v9966_v45 = vpop.eup %7620 }
 0x7b9   :  { %12563 = vst [vmem:[#allocation160_spill] sm:$0xff] %v9966_v45  ;;  %v3234_v4 = vpack.c.bf16 %v9964_v28, %v9966_v45  ;;  %v9970_v16 = vpop.eup %7622 }
 0x7ba   :  { %12564 = vst [vmem:[#allocation161_spill] sm:$0xff] %v9970_v16 }
 0x7bb   :  { %6894 = vmatmul.mubr.bf16.gmra.mrb[104].mxu1 %v3234_v4 }
 0x7bc   :  { %v9972_v11 = vpop.eup %7624 }
 0x7bd   :  { %12565 = vst [vmem:[#allocation162_spill] sm:$0xff] %v9972_v11  ;;  %v3235_v50 = vpack.c.bf16 %v9970_v16, %v9972_v11  ;;  %v9976_v52 = vpop.eup %7626 }
 0x7be   :  { %12566 = vst [vmem:[#allocation163_spill] sm:$0xff] %v9976_v52 }
 0x7bf   :  { %6897 = vmatprep.mubr.bf16.mxu1 %v3235_v50 }
 0x7c0   :  { %v9978_v30 = vpop.eup %7628 }
 0x7c1   :  { %12567 = vst [vmem:[#allocation164_spill] sm:$0xff] %v9978_v30  ;;  %v3236_v43 = vpack.c.bf16 %v9976_v52, %v9978_v30 }
 0x7c3   :  { %6898 = vmatmul.mubr.bf16.gmra.mrb[108].mxu1 %v3236_v43 }
 0x7c4   :  { %6917 = vmatprep.mubr.msk.bf16.mxu1 %vm12569_vm11, %v12568_v57  ;;  %vm12582_vm11 = vmmov %vm12542_vm0 }
 0x7cb   :  { %6918 = vmatmul.mubr.msk.bf16.vlgmr.msra.gmra.mrb[112].mxu1 %vm12542_vm0, %v12570_v62  ;;  %vm12600_vm0 = vnez %v12528_v60 }
 0x7cc   :  { %6921 = vmatprep.mubr.msk.bf16.mxu1 %vm12572_vm13, %v12571_v20  ;;  %vm12601_vm13 = vnez %v12524_v42 }
 0x7d3   :  { %6922 = vmatmul.mubr.msk.bf16.gmra.mrb[116].mxu1 %vm12574_vm15, %v12573_v46  ;;  %vm12602_vm15 = vnez %v12519_v17 }
 0x7d4   :  { %6925 = vmatprep.mubr.msk.bf16.mxu1 %vm12576_vm14, %v12575_v61  ;;  %vm12603_vm14 = vnez %v12526_v21 }
 0x7db   :  { %6926 = vmatmul.mubr.msk.bf16.gmra.mrb[120].mxu1 %vm12578_vm10, %v12577_v26  ;;  %vm12604_vm10 = vnez %v12324_v56 }
 0x7dc   :  { %6929 = vmatprep.mubr.msk.bf16.mxu1 %vm12580_vm8, %v12579_v55  ;;  %vm12599_vm8 = vnez %v12516_v19 }
 0x7e3   :  { %6930 = vmatmul.mubr.msk.bf16.gmra.mrb[124].mxu1 %vm12582_vm11, %v12581_v7  ;;  %vm12605_vm11 = vnez %v12330_v37 }
 0x849   :  { %v9998_v32 = vpop.f32.mrb[96].mxu1 }
 0x84a   :  { %12583 = vst [vmem:[#allocation14_spill] sm:$0xff] %v9998_v32  ;;  %v10000_v4 = vpop.f32.mrb[97].mxu1 }
 0x84b   :  { %12584 = vst [vmem:[#allocation16_spill] sm:$0xff] %v10000_v4  ;;  %v10002_v50 = vpop.f32.mrb[98].mxu1 }
 0x84c   :  { %12585 = vst [vmem:[#allocation18_spill] sm:$0xff] %v10002_v50  ;;  %v10004_v43 = vpop.f32.mrb[99].mxu1 }
 0x84d   :  { %12586 = vst [vmem:[#allocation20_spill] sm:$0xff] %v10004_v43 }
 0x886   :  { %v10006_v30 = vpop.f32.mrb[100].mxu1 }
 0x887   :  { %12587 = vst [vmem:[#allocation22_spill] sm:$0xff] %v10006_v30  ;;  %v10008_v11 = vpop.f32.mrb[101].mxu1 }
 0x888   :  { %12588 = vst [vmem:[#allocation24_spill] sm:$0xff] %v10008_v11  ;;  %v10010_v45 = vpop.f32.mrb[102].mxu1 }
 0x889   :  { %12589 = vst [vmem:[#allocation26_spill] sm:$0xff] %v10010_v45  ;;  %v10012_v35 = vpop.f32.mrb[103].mxu1 }
 0x88a   :  { %12590 = vst [vmem:[#allocation28_spill] sm:$0xff] %v10012_v35 }
 0x88e   :  { %v10014_v58 = vpop.f32.mrb[104].mxu1 }
 0x88f   :  { %12591 = vst [vmem:[#allocation165_spill] sm:$0xff] %v10014_v58  ;;  %v10016_v52 = vpop.f32.mrb[105].mxu1 }
 0x890   :  { %12592 = vst [vmem:[#allocation166_spill] sm:$0xff] %v10016_v52  ;;  %v10018_v14 = vpop.f32.mrb[106].mxu1 }
 0x891   :  { %12593 = vst [vmem:[#allocation167_spill] sm:$0xff] %v10018_v14  ;;  %v10020_v32 = vpop.f32.mrb[107].mxu1 }
 0x892   :  { %12594 = vst [vmem:[#allocation168_spill] sm:$0xff] %v10020_v32 }
 0x896   :  { %v10022_v4 = vpop.f32.mrb[108].mxu1 }
 0x897   :  { %12595 = vst [vmem:[#allocation169_spill] sm:$0xff] %v10022_v4  ;;  %v10024_v50 = vpop.f32.mrb[109].mxu1 }
 0x898   :  { %12596 = vst [vmem:[#allocation170_spill] sm:$0xff] %v10024_v50  ;;  %v10026_v43 = vpop.f32.mrb[110].mxu1 }
 0x899   :  { %12597 = vst [vmem:[#allocation171_spill] sm:$0xff] %v10026_v43  ;;  %v10028_v30 = vpop.f32.mrb[111].mxu1 }
 0x89a   :  { %12598 = vst [vmem:[#allocation172_spill] sm:$0xff] %v10028_v30 }
 0x89e   :  { %v6919_v11 = vpop.f32.mrb[112].mxu1 }
 0x89f   :  { %v10032_v45 = vsel %vm8890_vm1, %v6919_v11, -1.7014117e+38  ;;  %v3600_v58 = vpop.f32.mrb[113].mxu1 }
 0x8a0   :  { %3683 = vmax.xlane.f32.xlu0 %v10032_v45  ;;  %v6920_v52 = vpop.f32.mrb[114].mxu1  ;;  %v10042_v43 = vsel %vm8897_vm2, %v3600_v58, -1.7014117e+38 }
 0x8a1   :  { %v10037_v14 = vsel %vm8912_vm3, %v6920_v52, -1.7014117e+38  ;;  %v3603_v4 = vpop.f32.mrb[115].mxu1 }
 0x8a2   :  { %3685 = vmax.xlane.f32.xlu1 %v10037_v14  ;;  %v10047_v11 = vsel %vm8918_vm4, %v3603_v4, -1.7014117e+38 }
 0x8a4   :  { %3679 = vmax.xlane.f32.xlu0 %v10042_v43 }
 0x8a6   :  { %3681 = vmax.xlane.f32.xlu1 %v10047_v11  ;;  %v6923_v30 = vpop.f32.mrb[116].mxu1 }
 0x8a7   :  { %v3616_v50 = vpop.f32.mrb[117].mxu1  ;;  %v10056_v4 = vsel %vm8949_vm6, %v6923_v30, -1.7014117e+38 }
 0x8a8   :  { %v6924_v32 = vpop.f32.mrb[118].mxu1  ;;  %v10061_v41 = vsel %vm8943_vm5, %v3616_v50, -1.7014117e+38 }
 0x8a9   :  { %v3619_v52 = vpop.f32.mrb[119].mxu1 }
 0x8aa   :  { %v10081_v50 = vsel %vm12599_vm8, %v3619_v52, -1.7014117e+38 }
 0x8ae   :  { %v6927_v35 = vpop.f32.mrb[120].mxu1 }
 0x8af   :  { %v3632_v16 = vpop.f32.mrb[121].mxu1 }
 0x8b0   :  { %v6928_v33 = vpop.f32.mrb[122].mxu1 }
 0x8b1   :  { %v3635_v28 = vpop.f32.mrb[123].mxu1 }
 0x8b2   :  { %v10076_v30 = vsel %vm12417_vm9, %v3635_v28, -1.7014117e+38  ;;  %v10096_v28 = vsel %vm12602_vm15, %v6928_v33, -1.7014117e+38  ;;  %v3971_v33 = vpop.permute.xlu1 %3970 }
 0x8b6   :  { %v6931_v27 = vpop.f32.mrb[124].mxu1 }
 0x8b7   :  { %3974 = vrot.lane.b32.xlu1 %v12541_v39, %s8115_s2  ;;  %v3648_v58 = vpop.f32.mrb[125].mxu1  ;;  %v10066_v39 = vsel %vm12523_vm12, %v3632_v16, -1.7014117e+38  ;;  %v10086_v16 = vsel %vm12600_vm0, %v6931_v27, -1.7014117e+38 }
 0x8b8   :  { %v6932_v47 = vpop.f32.mrb[126].mxu1  ;;  %v10101_v52 = vsel %vm12603_vm14, %v3648_v58, -1.7014117e+38 }
 0x8b9   :  { %v3651_v5 = vpop.f32.mrb[127].mxu1  ;;  %v10106_v27 = vsel %vm12604_vm10, %v6932_v47, -1.7014117e+38 }
 0x8ba   :  { %3976 = vrot.lane.b32.xlu0 %v12544_v10, %s8115_s2  ;;  %v10071_v10 = vsel %vm8964_vm7, %v6924_v32, -1.7014117e+38  ;;  %v10091_v32 = vsel %vm12601_vm13, %v6927_v35, -1.7014117e+38  ;;  %v10111_v35 = vsel %vm12605_vm11, %v3651_v5, -1.7014117e+38 }
 0x8bb   :  { %vm12610_vm11 = vcmask 523264  }
 0x8bc   :  { %vm12611_vm0 = vmmov %vm12610_vm11 }
 0x8bd   :  { %vm12612_vm10 = vmmov %vm12611_vm0 }
 0x8be   :  { %vm12613_vm14 = vmmov %vm12611_vm0 }
 0x8bf   :  { %vm12614_vm13 = vmmov %vm12611_vm0 }
 0x8c0   :  { %vm12615_vm12 = vmmov %vm12611_vm0 }
 0x8c1   :  { %vm12616_vm7 = vmmov %vm12611_vm0 }
 0x8c2   :  { %vm12617_vm5 = vmmov %vm12611_vm0 }
 0x8d9   :  { %3691 = vmax.xlane.f32.xlu0 %v10056_v4 }
 0x8db   :  { %3687 = vmax.xlane.f32.xlu1 %v10061_v41 }
 0x8dd   :  { %3695 = vmax.xlane.f32.xlu0 %v10066_v39 }
 0x8df   :  { %3693 = vmax.xlane.f32.xlu1 %v10071_v10 }
 0x8e1   :  { %3697 = vmax.xlane.f32.xlu0 %v10076_v30 }
 0x8e3   :  { %3689 = vmax.xlane.f32.xlu1 %v10081_v50 }
 0x8e5   :  { %3707 = vmax.xlane.f32.xlu0 %v10086_v16 }
 0x8e7   :  { %3699 = vmax.xlane.f32.xlu1 %v10091_v32 }
 0x8eb   :  { %3701 = vmax.xlane.f32.xlu1 %v10096_v28 }
 0x8ef   :  { %3703 = vmax.xlane.f32.xlu1 %v10101_v52 }
 0x8f3   :  { %3709 = vmax.xlane.f32.xlu1 %v10106_v27 }
 0x8f7   :  { %3705 = vmax.xlane.f32.xlu1 %v10111_v35 }
 0x8fb   :  { %3980 = vrot.lane.b32.xlu0 %v12550_v40, %s8115_s2 }
 0x8ff   :  { %3982 = vrot.lane.b32.xlu0 %v12554_v9, %s8115_s2 }
 0x903   :  { %3944 = vrot.lane.b32.xlu0 %v12568_v57, %s8115_s2 }
 0x907   :  { %3948 = vrot.lane.b32.xlu0 %v12571_v20, %s8115_s2 }
 0x908   :  { %3978 = vrot.lane.b32.xlu1 %v12547_v25, %s8115_s2 }
 0x90b   :  { %3952 = vrot.lane.b32.xlu0 %v12575_v61, %s8115_s2 }
 0x90c   :  { %3946 = vrot.lane.b32.xlu1 %v12570_v62, %s8115_s2 }
 0x90f   :  { %3956 = vrot.lane.b32.xlu0 %v12579_v55, %s8115_s2  ;;  %v4012_v55 = vsel %vm12612_vm10, %v3971_v33, 0  ;;  %vm12636_vm10 = vmmov %vm12611_vm0 }
 0x910   :  { %3950 = vrot.lane.b32.xlu1 %v12573_v46, %s8115_s2 }
 0x913   :  { %4273 = vrot.lane.b32.xlu0 %v9576_v38, %s8115_s2  ;;  %v3973_v38 = vpop.permute.xlu0 %3972 }
 0x914   :  { %3954 = vrot.lane.b32.xlu1 %v12577_v26, %s8115_s2  ;;  %v4009_v26 = vsel %vm12610_vm11, %v9958_v18, 0  ;;  %vm12618_vm11 = vmmov %vm12611_vm0 }
 0x917   :  { %4277 = vrot.lane.b32.xlu0 %v9606_v54, %s8115_s2 }
 0x918   :  { %3958 = vrot.lane.b32.xlu1 %v12581_v7, %s8115_s2  ;;  %v4015_v7 = vsel %vm12614_vm13, %v3973_v38, 0  ;;  %vm12633_vm13 = vmmov %vm12611_vm0 }
 0x91c   :  { %4275 = vrot.lane.b32.xlu1 %v9590_v59, %s8115_s2 }
 0x920   :  { %4279 = vrot.lane.b32.xlu1 %v9616_v13, %s8115_s2 }
 0x924   :  { %4281 = vrot.lane.b32.xlu1 %v9626_v29, %s8115_s2 }
 0x928   :  { %4283 = vrot.lane.b32.xlu1 %v9636_v3, %s8115_s2 }
 0x92c   :  { %4287 = vrot.lane.b32.xlu1 %v9655_v22, %s8115_s2 }
 0x92d   :  { %v3684_v54 = vpop.xlane.xlu0 %3683 }
 0x92e   :  { %v3713_v59 = vsub.f32 %v10032_v45, %v3684_v54 }
 0x92f   :  { %v3686_v25 = vpop.xlane.xlu1 %3685 }
 0x930   :  { %v3714_v40 = vsub.f32 %v10037_v14, %v3686_v25  ;;  %v3731_v3 = vmul.f32 1.442695, %v3713_v59 }
 0x931   :  { %v3680_v9 = vpop.xlane.xlu0 %3679 }
 0x932   :  { %v3733_v5 = vmul.f32 1.442695, %v3714_v40  ;;  %v3711_v13 = vsub.f32 %v10042_v43, %v3680_v9 }
 0x933   :  { %v3682_v47 = vpop.xlane.xlu1 %3681 }
 0x934   :  { %v3727_v29 = vmul.f32 1.442695, %v3711_v13  ;;  %v3712_v57 = vsub.f32 %v10047_v11, %v3682_v47  ;;  %7630 = vpow2.f32 %v3733_v5 }
 0x935   :  { %v3977_v58 = vpop.permute.xlu0 %3976 }
 0x936   :  { %v3729_v62 = vmul.f32 1.442695, %v3712_v57  ;;  %7632 = vpow2.f32 %v3727_v29  ;;  %v4021_v54 = vsel %vm12618_vm11, %v3977_v58, 0  ;;  %vm12637_vm11 = vmmov %vm12611_vm0 }
 0x937   :  { %v3975_v43 = vpop.permute.xlu1 %3974 }
 0x938   :  { %7634 = vpow2.f32 %v3729_v62  ;;  %v4018_v11 = vsel %vm12616_vm7, %v3975_v43, 0  ;;  %vm12628_vm7 = vmmov %vm12611_vm0 }
 0x939   :  { %7636 = vpow2.f32 %v3731_v3 }
 0x93e   :  { %v10154_v22 = vpop.eup %7630 }
 0x93f   :  { %12606 = vst [vmem:[#allocation173_spill] sm:$0xff] %v10154_v22 }
 0x940   :  { %v10156_v20 = vpop.eup %7632 }
 0x941   :  { %12607 = vst [vmem:[#allocation174_spill] sm:$0xff] %v10156_v20 }
 0x942   :  { %v10158_v14 = vpop.eup %7634 }
 0x943   :  { %12608 = vst [vmem:[#allocation175_spill] sm:$0xff] %v10158_v14  ;;  %v10160_v45 = vpop.eup %7636  ;;  %v3791_v46 = vpack.c.bf16 %v10158_v14, %v10156_v20 }
 0x944   :  { %12609 = vst [vmem:[#allocation176_spill] sm:$0xff] %v10160_v45  ;;  %v3792_v61 = vpack.c.bf16 %v10154_v22, %v10160_v45 }
 0x945   :  { %6949 = vmatprep.mubr.bf16.mxu0 %v3791_v46 }
 0x946   :  { %6950 = vmatmul.mubr.bf16.vlgmr.msra.gmra.mrb[208].mxu0 %v3792_v61 }
 0x947   :  { %6966 = vmatpush3.bf16.xpose.msra.mxu0 %v4009_v26 }
 0x948   :  { %7230 = vmatprep.subr.msk.bf16.mxu0 %vm12611_vm0, %v3971_v33 }
 0x94f   :  { %6968 = vmatpush3.bf16.xpose.msra.mxu0 %v4012_v55 }
 0x950   :  { %7231 = vmatprep.subr.msk.bf16.mxu0 %vm12613_vm14, %v3973_v38  ;;  %vm12635_vm14 = vmmov %vm12611_vm0 }
 0x957   :  { %6970 = vmatpush3.bf16.xpose.msra.mxu0 %v4015_v7 }
 0x958   :  { %7232 = vmatprep.subr.msk.bf16.mxu0 %vm12615_vm12, %v3975_v43  ;;  %vm12629_vm12 = vmmov %vm12611_vm0 }
 0x95f   :  { %6972 = vmatpush3.bf16.xpose.msra.mxu0 %v4018_v11 }
 0x960   :  { %7233 = vmatprep.subr.msk.bf16.mxu0 %vm12617_vm5, %v3977_v58  ;;  %vm12627_vm5 = vmmov %vm12611_vm0 }
 0x966   :  { %v3692_v18 = vpop.xlane.xlu0 %3691 }
 0x967   :  { %6974 = vmatpush3.bf16.xpose.msra.mxu0 %v4021_v54  ;;  %v3717_v9 = vsub.f32 %v10056_v4, %v3692_v18 }
 0x968   :  { %v3688_v33 = vpop.xlane.xlu1 %3687 }
 0x969   :  { %v3715_v25 = vsub.f32 %v10061_v41, %v3688_v33  ;;  %v3739_v61 = vmul.f32 1.442695, %v3717_v9 }
 0x96a   :  { %v3696_v40 = vpop.xlane.xlu0 %3695 }
 0x96b   :  { %v3735_v5 = vmul.f32 1.442695, %v3715_v25  ;;  %v3719_v47 = vsub.f32 %v10066_v39, %v3696_v40 }
 0x96c   :  { %v3694_v59 = vpop.xlane.xlu1 %3693 }
 0x96d   :  { %v3718_v38 = vsub.f32 %v10071_v10, %v3694_v59  ;;  %7638 = vpow2.f32 %v3735_v5  ;;  %v3743_v26 = vmul.f32 1.442695, %v3719_v47 }
 0x96e   :  { %v3698_v13 = vpop.xlane.xlu0 %3697 }
 0x96f   :  { %v3741_v29 = vmul.f32 1.442695, %v3718_v38  ;;  %v3720_v57 = vsub.f32 %v10076_v30, %v3698_v13 }
 0x970   :  { %v3690_v3 = vpop.xlane.xlu1 %3689 }
 0x971   :  { %v3745_v62 = vmul.f32 1.442695, %v3720_v57  ;;  %v3716_v46 = vsub.f32 %v10081_v50, %v3690_v3  ;;  %7640 = vpow2.f32 %v3741_v29 }
 0x972   :  { %v3708_v41 = vpop.xlane.xlu0 %3707 }
 0x973   :  { %v3737_v55 = vmul.f32 1.442695, %v3716_v46  ;;  %7642 = vpow2.f32 %v3745_v62  ;;  %v3725_v47 = vsub.f32 %v10086_v16, %v3708_v41 }
 0x974   :  { %v3700_v10 = vpop.xlane.xlu1 %3699 }
 0x975   :  { %7644 = vpow2.f32 %v3737_v55  ;;  %v3721_v4 = vsub.f32 %v10091_v32, %v3700_v10 }
 0x976   :  { %7646 = vpow2.f32 %v3739_v61  ;;  %v3981_v39 = vpop.permute.xlu0 %3980 }
 0x977   :  { %7648 = vpow2.f32 %v3743_v26  ;;  %v3747_v7 = vmul.f32 1.442695, %v3721_v4  ;;  %v10186_v58 = vpop.eup %7638 }
 0x978   :  { %v3702_v30 = vpop.xlane.xlu1 %3701  ;;  %12619 = vst [vmem:[#allocation177_spill] sm:$0xff] %v10186_v58 }
 0x979   :  { %v3722_v43 = vsub.f32 %v10096_v28, %v3702_v30  ;;  %7650 = vpow2.f32 %v3747_v7 }
 0x97a   :  { %v10184_v11 = vpop.permute.xlu0 %3982 }
 0x97b   :  { %v3749_v50 = vmul.f32 1.442695, %v3722_v43  ;;  %v10188_v54 = vpop.eup %7640 }
 0x97c   :  { %v3704_v18 = vpop.xlane.xlu1 %3703  ;;  %12620 = vst [vmem:[#allocation178_spill] sm:$0xff] %v10188_v54 }
 0x97d   :  { %7652 = vpow2.f32 %v3749_v50  ;;  %v10190_v33 = vpop.eup %7642  ;;  %v3723_v40 = vsub.f32 %v10101_v52, %v3704_v18  ;;  %v4027_v18 = vsel %vm12611_vm0, %v3981_v39, 0 }
 0x97e   :  { %12621 = vst [vmem:[#allocation179_spill] sm:$0xff] %v10190_v33  ;;  %v3945_v32 = vpop.permute.xlu0 %3944 }
 0x97f   :  { %v10192_v25 = vpop.eup %7644  ;;  %v3751_v57 = vmul.f32 1.442695, %v3723_v40 }
 0x980   :  { %12622 = vst [vmem:[#allocation180_spill] sm:$0xff] %v10192_v25  ;;  %v10195_v59 = vpop.eup %7646  ;;  %v3710_v28 = vpop.xlane.xlu1 %3709  ;;  %v3793_v38 = vpack.c.bf16 %v10192_v25, %v10186_v58  ;;  %v12683_v58 = vld [vmem:[#allocation23_spill] sm:$0xff] }
 0x981   :  { %12623 = vst [vmem:[#allocation181_spill] sm:$0xff] %v10195_v59  ;;  %v10199_v9 = vpop.eup %7648  ;;  %v3726_v5 = vsub.f32 %v10106_v27, %v3710_v28  ;;  %v3794_v13 = vpack.c.bf16 %v10188_v54, %v10195_v59  ;;  %v3755_v27 = vmul.f32 1.442695, %v3725_v47  ;;  %7654 = vpow2.f32 %v3751_v57  ;;  %v12681_v59 = vld [vmem:[#allocation15_spill] sm:$0xff] }
 0x982   :  { %12624 = vst [vmem:[#allocation182_spill] sm:$0xff] %v10199_v9  ;;  %v3949_v29 = vpop.permute.xlu0 %3948  ;;  %6953 = vmatprep.mubr.bf16.mxu0 %v3793_v38  ;;  %v3795_v52 = vpack.c.bf16 %v10190_v33, %v10199_v9  ;;  %v12680_v9 = vld [vmem:[#allocation45_spill] sm:$0xff]  ;;  %v12682_v54 = vld [vmem:[#allocation19_spill] sm:$0xff] }
 0x983   :  { %6954 = vmatmul.mubr.bf16.gmra.mrb[212].mxu0 %v3794_v13  ;;  %v3757_v3 = vmul.f32 1.442695, %v3726_v5  ;;  %v10208_v61 = vpop.eup %7650  ;;  %v12684_v25 = vld [vmem:[#allocation27_spill] sm:$0xff] }
 0x984   :  { %6957 = vmatprep.mubr.bf16.mxu0 %v3795_v52  ;;  %v3706_v62 = vpop.xlane.xlu1 %3705  ;;  %12625 = vst [vmem:[#allocation183_spill] sm:$0xff] %v10208_v61  ;;  %v4030_v52 = vsel %vm12636_vm10, %v10184_v11, 0  ;;  %vm12664_vm10 = vnez %v12518_v51 }
 0x985   :  { %v3724_v46 = vsub.f32 %v10111_v35, %v3706_v62  ;;  %7656 = vpow2.f32 %v3757_v3 }
 0x986   :  { %v3953_v26 = vpop.permute.xlu0 %3952 }
 0x987   :  { %v10210_v55 = vpop.eup %7652  ;;  %v3753_v16 = vmul.f32 1.442695, %v3724_v46 }
 0x988   :  { %12626 = vst [vmem:[#allocation184_spill] sm:$0xff] %v10210_v55  ;;  %v3979_v41 = vpop.permute.xlu1 %3978  ;;  %v3796_v10 = vpack.c.bf16 %v10210_v55, %v10208_v61  ;;  %v12661_v55 = vld [vmem:[#allocation33_spill] sm:$0xff]  ;;  %v12679_v61 = vld [vmem:[#allocation43_spill] sm:$0xff] }
 0x989   :  { %7658 = vpow2.f32 %v3753_v16  ;;  %7234 = vmatprep.subr.msk.bf16.mxu0 %vm12627_vm5, %v3979_v41  ;;  %v4024_v4 = vsel %vm12628_vm7, %v3979_v41, 0  ;;  %vm12638_vm5 = vmmov %vm12611_vm0 }
 0x98a   :  { %7660 = vpow2.f32 %v3755_v27  ;;  %v3957_v35 = vpop.permute.xlu0 %3956  ;;  %6976 = vmatpush3.bf16.xpose.msra.mxu0 %v4024_v4  ;;  %vm12639_vm7 = vmmov %vm12611_vm0 }
 0x98b   :  { %6958 = vmatmul.mubr.bf16.gmra.mrb[216].mxu0 %v3796_v10  ;;  %7235 = vmatprep.subr.msk.bf16.mxu0 %vm12629_vm12, %v3981_v39  ;;  %v10217_v50 = vpop.eup %7654  ;;  %vm12640_vm12 = vmmov %vm12611_vm0 }
 0x98c   :  { %v3947_v7 = vpop.permute.xlu1 %3946  ;;  %12630 = vst [vmem:[#allocation185_spill] sm:$0xff] %v10217_v50 }
 0x98e   :  { %v4274_v30 = vpop.permute.xlu0 %4273 }
 0x98f   :  { %6997 = vmatprep.subr.bf16.mxu1 %v4274_v30  ;;  %v10220_v40 = vpop.eup %7656 }
 0x990   :  { %6998 = vmatpush3.bf16.msra.mxu1 %v4274_v30  ;;  %v3951_v43 = vpop.permute.xlu1 %3950  ;;  %12631 = vst [vmem:[#allocation186_spill] sm:$0xff] %v10220_v40 }
 0x992   :  { %6978 = vmatpush3.bf16.xpose.msra.mxu0 %v4027_v18  ;;  %v4278_v3 = vpop.permute.xlu0 %4277 }
 0x993   :  { %v10222_v28 = vpop.eup %7658  ;;  %7236 = vmatprep.subr.msk.bf16.mxu0 %vm12633_vm13, %v10184_v11  ;;  %vm12641_vm13 = vmmov %vm12611_vm0 }
 0x994   :  { %12632 = vst [vmem:[#allocation187_spill] sm:$0xff] %v10222_v28  ;;  %v10226_v38 = vpop.eup %7660  ;;  %v3955_v5 = vpop.permute.xlu1 %3954  ;;  %v3797_v13 = vpack.c.bf16 %v10222_v28, %v10217_v50  ;;  %v12678_v50 = vld [vmem:[#allocation29_spill] sm:$0xff] }
 0x995   :  { %12634 = vst [vmem:[#allocation188_spill] sm:$0xff] %v10226_v38  ;;  %v3798_v47 = vpack.c.bf16 %v10220_v40, %v10226_v38 }
 0x996   :  { %6961 = vmatprep.mubr.bf16.mxu0 %v3797_v13 }
 0x997   :  { %6962 = vmatmul.mubr.bf16.gmra.mrb[220].mxu0 %v3798_v47 }
 0x998   :  { %6981 = vmatprep.mubr.msk.bf16.mxu0 %vm12635_vm14, %v3945_v32  ;;  %v3959_v39 = vpop.permute.xlu1 %3958  ;;  %vm12642_vm14 = vmmov %vm12611_vm0 }
 0x99a   :  { %6980 = vmatpush3.bf16.xpose.msra.mxu0 %v4030_v52 }
 0x99b   :  { %7061 = vmatprep.subr.bf16.mxu0 %v9579_v24 }
 0x99c   :  { %v4276_v57 = vpop.permute.xlu1 %4275 }
 0x99d   :  { %6999 = vmatprep.subr.bf16.mxu1 %v4276_v57 }
 0x99e   :  { %7000 = vmatpush3.bf16.msra.mxu1 %v4276_v57 }
 0x99f   :  { %7001 = vmatprep.subr.bf16.mxu1 %v4278_v3 }
 0x9a0   :  { %v4280_v62 = vpop.permute.xlu1 %4279 }
 0x9a1   :  { %6982 = vmatmul.mubr.msk.bf16.vlgmr.msra.gmra.mrb[224].mxu0 %vm12637_vm11, %v3947_v7  ;;  %vm12665_vm11 = vnez %v12521_v36 }
 0x9a2   :  { %6985 = vmatprep.mubr.msk.bf16.mxu0 %vm12638_vm5, %v3949_v29  ;;  %7002 = vmatpush3.bf16.msra.mxu1 %v4278_v3  ;;  %v12643_v29 = vld [vmem:[#allocation114_spill] sm:$0xff]  ;;  %vm12666_vm5 = vnez %v12522_v2 }
 0x9a3   :  { %7062 = vmatpush3.bf16.msra.mxu0 %v9579_v24  ;;  %7003 = vmatprep.subr.bf16.mxu1 %v4280_v62 }
 0x9a4   :  { %7063 = vmatprep.subr.bf16.mxu0 %v9597_v49  ;;  %v4282_v11 = vpop.permute.xlu1 %4281 }
 0x9a6   :  { %7004 = vmatpush3.bf16.msra.mxu1 %v4280_v62 }
 0x9a7   :  { %7064 = vmatpush3.bf16.msra.mxu0 %v9597_v49  ;;  %7005 = vmatprep.subr.bf16.mxu1 %v4282_v11 }
 0x9a8   :  { %7065 = vmatprep.subr.bf16.mxu0 %v9609_v0  ;;  %v4284_v32 = vpop.permute.xlu1 %4283 }
 0x9a9   :  { %6986 = vmatmul.mubr.msk.bf16.gmra.mrb[228].mxu0 %vm12639_vm7, %v3951_v43  ;;  %vm12667_vm7 = vnez %v12524_v42  ;;  %v12828_v42 = vld [vmem:[#allocation78_spill] sm:$0xff] }
 0x9aa   :  { %6989 = vmatprep.mubr.msk.bf16.mxu0 %vm12640_vm12, %v3953_v26  ;;  %7006 = vmatpush3.bf16.msra.mxu1 %v4282_v11  ;;  %vm12668_vm12 = vnez %v12526_v21 }
 0x9ab   :  { %7066 = vmatpush3.bf16.msra.mxu0 %v9609_v0  ;;  %7007 = vmatprep.subr.bf16.mxu1 %v4284_v32 }
 0x9ac   :  { %7067 = vmatprep.subr.bf16.mxu0 %v9619_v8  ;;  %v4288_v45 = vpop.permute.xlu1 %4287 }
 0x9ae   :  { %7008 = vmatpush3.bf16.msra.mxu1 %v4284_v32 }
 0x9af   :  { %7068 = vmatpush3.bf16.msra.mxu0 %v9619_v8 }
 0x9b0   :  { %7069 = vmatprep.subr.bf16.mxu0 %v9629_v6 }
 0x9b1   :  { %6990 = vmatmul.mubr.msk.bf16.gmra.mrb[232].mxu0 %vm12611_vm0, %v3955_v5  ;;  %vm12669_vm0 = vnez %v12324_v56 }
 0x9b2   :  { %6993 = vmatprep.mubr.msk.bf16.mxu0 %vm12641_vm13, %v3957_v35  ;;  %vm12670_vm13 = vnez %v12528_v60 }
 0x9b3   :  { %7070 = vmatpush3.bf16.msra.mxu0 %v9629_v6 }
 0x9b4   :  { %7071 = vmatprep.subr.bf16.mxu0 %v9639_v34 }
 0x9b7   :  { %7072 = vmatpush3.bf16.msra.mxu0 %v9639_v34 }
 0x9b8   :  { %7073 = vmatprep.subr.bf16.mxu0 %v9649_v48 }
 0x9b9   :  { %6994 = vmatmul.mubr.msk.bf16.gmra.mrb[236].mxu0 %vm12642_vm14, %v3959_v39  ;;  %vm12671_vm14 = vnez %v12330_v37 }
 0x9bb   :  { %7074 = vmatpush3.bf16.msra.mxu0 %v9649_v48 }
 0x9bc   :  { %7075 = vmatprep.subr.bf16.mxu0 %v12643_v29 }
 0x9bf   :  { %7076 = vmatpush3.bf16.msra.mxu0 %v12643_v29 }
 0xa19   :  { %v10258_v46 = vpop.f32.mrb[208].mxu0 }
 0xa1a   :  { %12644 = vst [vmem:[#allocation114_spill] sm:$0xff] %v10258_v46  ;;  %v10260_v27 = vpop.f32.mrb[209].mxu0  ;;  %v12674_v46 = vld [vmem:[#allocation21_spill] sm:$0xff] }
 0xa1b   :  { %12645 = vst [vmem:[#allocation189_spill] sm:$0xff] %v10260_v27  ;;  %v10262_v26 = vpop.f32.mrb[210].mxu0 }
 0xa1c   :  { %12646 = vst [vmem:[#allocation190_spill] sm:$0xff] %v10262_v26  ;;  %v10264_v16 = vpop.f32.mrb[211].mxu0  ;;  %v12676_v26 = vld [vmem:[#allocation25_spill] sm:$0xff] }
 0xa1d   :  { %12647 = vst [vmem:[#allocation191_spill] sm:$0xff] %v10264_v16 }
 0xa56   :  { %v10266_v41 = vpop.f32.mrb[212].mxu0 }
 0xa57   :  { %12648 = vst [vmem:[#allocation192_spill] sm:$0xff] %v10266_v41  ;;  %v10268_v10 = vpop.f32.mrb[213].mxu0 }
 0xa58   :  { %12649 = vst [vmem:[#allocation193_spill] sm:$0xff] %v10268_v10  ;;  %v10270_v4 = vpop.f32.mrb[214].mxu0  ;;  %v12663_v10 = vld [vmem:[#allocation41_spill] sm:$0xff] }
 0xa59   :  { %12650 = vst [vmem:[#allocation194_spill] sm:$0xff] %v10270_v4  ;;  %v10272_v35 = vpop.f32.mrb[215].mxu0  ;;  %v12660_v4 = vld [vmem:[#allocation113_spill] sm:$0xff] }
 0xa5a   :  { %12651 = vst [vmem:[#allocation195_spill] sm:$0xff] %v10272_v35 }
 0xa5e   :  { %v10274_v7 = vpop.f32.mrb[216].mxu0 }
 0xa5f   :  { %12652 = vst [vmem:[#allocation196_spill] sm:$0xff] %v10274_v7  ;;  %v10276_v30 = vpop.f32.mrb[217].mxu0 }
 0xa60   :  { %12653 = vst [vmem:[#allocation197_spill] sm:$0xff] %v10276_v30  ;;  %v10278_v43 = vpop.f32.mrb[218].mxu0 }
 0xa61   :  { %12654 = vst [vmem:[#allocation198_spill] sm:$0xff] %v10278_v43  ;;  %v10280_v18 = vpop.f32.mrb[219].mxu0 }
 0xa62   :  { %12655 = vst [vmem:[#allocation199_spill] sm:$0xff] %v10280_v18 }
 0xa6a   :  { %v10282_v5 = vpop.f32.mrb[220].mxu0 }
 0xa6b   :  { %12656 = vst [vmem:[#allocation200_spill] sm:$0xff] %v10282_v5  ;;  %v10284_v13 = vpop.f32.mrb[221].mxu0 }
 0xa6c   :  { %12657 = vst [vmem:[#allocation201_spill] sm:$0xff] %v10284_v13  ;;  %v10286_v47 = vpop.f32.mrb[222].mxu0 }
 0xa6d   :  { %12658 = vst [vmem:[#allocation202_spill] sm:$0xff] %v10286_v47  ;;  %v10288_v39 = vpop.f32.mrb[223].mxu0 }
 0xa6e   :  { %12659 = vst [vmem:[#allocation203_spill] sm:$0xff] %v10288_v39 }
 0xa74   :  { %v6983_v52 = vpop.f32.mrb[224].mxu0 }
 0xa75   :  { %v10292_v57 = vsel %vm8890_vm1, %v6983_v52, -1.7014117e+38  ;;  %v4066_v3 = vpop.f32.mrb[225].mxu0 }
 0xa76   :  { %4149 = vmax.xlane.f32.xlu0 %v10292_v57  ;;  %v6984_v62 = vpop.f32.mrb[226].mxu0  ;;  %v10301_v5 = vsel %vm8897_vm2, %v4066_v3, -1.7014117e+38 }
 0xa77   :  { %v4069_v11 = vpop.f32.mrb[227].mxu0  ;;  %v10307_v52 = vsel %vm8912_vm3, %v6984_v62, -1.7014117e+38 }
 0xa78   :  { %v10297_v32 = vsel %vm8918_vm4, %v4069_v11, -1.7014117e+38 }
 0xa79   :  { %4147 = vmax.xlane.f32.xlu1 %v10297_v32 }
 0xa7a   :  { %4145 = vmax.xlane.f32.xlu0 %v10301_v5 }
 0xa7c   :  { %v6987_v47 = vpop.f32.mrb[228].mxu0 }
 0xa7d   :  { %v4082_v38 = vpop.f32.mrb[229].mxu0 }
 0xa7e   :  { %4151 = vmax.xlane.f32.xlu0 %v10307_v52  ;;  %v6988_v39 = vpop.f32.mrb[230].mxu0  ;;  %v10340_v35 = vsel %vm12664_vm10, %v4082_v38, -1.7014117e+38 }
 0xa7f   :  { %v4085_v43 = vpop.f32.mrb[231].mxu0 }
 0xa80   :  { %v10312_v11 = vsel %vm12599_vm8, %v4085_v43, -1.7014117e+38 }
 0xa81   :  { %4155 = vmax.xlane.f32.xlu1 %v10312_v11 }
 0xa84   :  { %v6991_v3 = vpop.f32.mrb[232].mxu0 }
 0xa85   :  { %v4098_v40 = vpop.f32.mrb[233].mxu0 }
 0xa86   :  { %v6992_v18 = vpop.f32.mrb[234].mxu0  ;;  %v10350_v33 = vsel %vm12666_vm5, %v4098_v40, -1.7014117e+38 }
 0xa87   :  { %v10317_v28 = vsel %vm12602_vm15, %v6992_v18, -1.7014117e+38  ;;  %v4101_v62 = vpop.f32.mrb[235].mxu0  ;;  %v12662_v18 = vld [vmem:[#allocation37_spill] sm:$0xff] }
 0xa88   :  { %4167 = vmax.xlane.f32.xlu1 %v10317_v28  ;;  %v10322_v13 = vsel %vm12417_vm9, %v4101_v62, -1.7014117e+38  ;;  %v10335_v62 = vsel %vm8949_vm6, %v6987_v47, -1.7014117e+38  ;;  %v10355_v47 = vsel %vm12667_vm7, %v6991_v3, -1.7014117e+38 }
 0xa8c   :  { %4163 = vmax.xlane.f32.xlu1 %v10322_v13  ;;  %v6995_v43 = vpop.f32.mrb[236].mxu0 }
 0xa8d   :  { %v4114_v7 = vpop.f32.mrb[237].mxu0  ;;  %v10370_v40 = vsel %vm12670_vm13, %v6995_v43, -1.7014117e+38  ;;  %v12675_v43 = vld [vmem:[#allocation35_spill] sm:$0xff] }
 0xa8e   :  { %v6996_v30 = vpop.f32.mrb[238].mxu0  ;;  %v10360_v38 = vsel %vm12668_vm12, %v4114_v7, -1.7014117e+38  ;;  %v12672_v7 = vld [vmem:[#allocation17_spill] sm:$0xff] }
 0xa8f   :  { %v4117_v41 = vpop.f32.mrb[239].mxu0 }
 0xa90   :  { %v10375_v3 = vsel %vm12671_vm14, %v4117_v41, -1.7014117e+38  ;;  %v12677_v41 = vld [vmem:[#allocation39_spill] sm:$0xff]  ;;  %vm12685_vm14 = vcmask 523264  }
 0xa94   :  { %4285 = vrot.lane.b32.xlu0 %v12660_v4, %s8115_s2  ;;  %v10345_v4 = vsel %vm12665_vm11, %v6988_v39, -1.7014117e+38  ;;  %v10365_v39 = vsel %vm12669_vm0, %v6996_v30, -1.7014117e+38  ;;  %v12673_v30 = vld [vmem:[#allocation31_spill] sm:$0xff]  ;;  %vm12687_vm0 = vmmov %vm12685_vm14 }
 0xa95   :  { %vm12690_vm12 = vmmov %vm12687_vm0 }
 0xa96   :  { %vm12692_vm13 = vmmov %vm12687_vm0 }
 0xa9d   :  { %4886 = vrot.lane.b32.xlu1 %v12661_v55, %s8115_s2 }
 0xaa1   :  { %4890 = vrot.lane.b32.xlu1 %v12662_v18, %s8115_s2 }
 0xaa5   :  { %4894 = vrot.lane.b32.xlu1 %v12663_v10, %s8115_s2 }
 0xab3   :  { %4157 = vmax.xlane.f32.xlu0 %v10335_v62 }
 0xab7   :  { %4153 = vmax.xlane.f32.xlu0 %v10340_v35 }
 0xabb   :  { %4159 = vmax.xlane.f32.xlu0 %v10345_v4 }
 0xabf   :  { %4161 = vmax.xlane.f32.xlu0 %v10350_v33 }
 0xac3   :  { %4165 = vmax.xlane.f32.xlu0 %v10355_v47 }
 0xac7   :  { %4169 = vmax.xlane.f32.xlu0 %v10360_v38 }
 0xac9   :  { %4175 = vmax.xlane.f32.xlu1 %v10365_v39 }
 0xacb   :  { %4173 = vmax.xlane.f32.xlu0 %v10370_v40 }
 0xacd   :  { %4171 = vmax.xlane.f32.xlu1 %v10375_v3 }
 0xade   :  { %4862 = vrot.lane.b32.xlu1 %v12672_v7, %s8115_s2 }
 0xae1   :  { %4884 = vrot.lane.b32.xlu0 %v12673_v30, %s8115_s2 }
 0xae2   :  { %4866 = vrot.lane.b32.xlu1 %v12674_v46, %s8115_s2 }
 0xae5   :  { %4888 = vrot.lane.b32.xlu0 %v12675_v43, %s8115_s2 }
 0xae6   :  { %4870 = vrot.lane.b32.xlu1 %v12676_v26, %s8115_s2 }
 0xae9   :  { %4892 = vrot.lane.b32.xlu0 %v12677_v41, %s8115_s2 }
 0xaea   :  { %4874 = vrot.lane.b32.xlu1 %v12678_v50, %s8115_s2 }
 0xaed   :  { %4896 = vrot.lane.b32.xlu0 %v12679_v61, %s8115_s2 }
 0xaee   :  { %5191 = vrot.lane.b32.xlu1 %v9597_v49, %s8115_s2 }
 0xaf1   :  { %4898 = vrot.lane.b32.xlu0 %v12680_v9, %s8115_s2 }
 0xaf2   :  { %5199 = vrot.lane.b32.xlu1 %v9639_v34, %s8115_s2 }
 0xaf5   :  { %4860 = vrot.lane.b32.xlu0 %v12681_v59, %s8115_s2 }
 0xaf9   :  { %4864 = vrot.lane.b32.xlu0 %v12682_v54, %s8115_s2 }
 0xafd   :  { %4868 = vrot.lane.b32.xlu0 %v12683_v58, %s8115_s2 }
 0xb01   :  { %4872 = vrot.lane.b32.xlu0 %v12684_v25, %s8115_s2 }
 0xb03   :  { %v4150_v49 = vpop.xlane.xlu0 %4149 }
 0xb04   :  { %v4179_v34 = vsub.f32 %v10292_v57, %v4150_v49  ;;  %v12700_v57 = vld [vmem:[#allocation32_spill] sm:$0xff]  ;;  %v12703_v49 = vld [vmem:[#allocation159_spill] sm:$0xff] }
 0xb05   :  { %5189 = vrot.lane.b32.xlu0 %v9579_v24, %s8115_s2 }
 0xb06   :  { %v4148_v22 = vpop.xlane.xlu1 %4147  ;;  %v4197_v56 = vmul.f32 1.442695, %v4179_v34 }
 0xb07   :  { %v4178_v27 = vsub.f32 %v10297_v32, %v4148_v22  ;;  %v4146_v16 = vpop.xlane.xlu0 %4145 }
 0xb08   :  { %v4177_v20 = vsub.f32 %v10301_v5, %v4146_v16  ;;  %v12698_v5 = vld [vmem:[#allocation42_spill] sm:$0xff] }
 0xb09   :  { %v4195_v14 = vmul.f32 1.442695, %v4178_v27  ;;  %5193 = vrot.lane.b32.xlu0 %v9609_v0, %s8115_s2  ;;  %v12696_v27 = vld [vmem:[#allocation48_spill] sm:$0xff] }
 0xb0a   :  { %v4193_v37 = vmul.f32 1.442695, %v4177_v20  ;;  %v4462_v20 = vsel %vm12690_vm12, %v12661_v55, 0  ;;  %vm12697_vm12 = vmmov %vm12687_vm0 }
 0xb0b   :  { %7662 = vpow2.f32 %v4195_v14  ;;  %v4152_v21 = vpop.xlane.xlu0 %4151  ;;  %v12691_v14 = vld [vmem:[#allocation34_spill] sm:$0xff] }
 0xb0c   :  { %7664 = vpow2.f32 %v4193_v37  ;;  %v4180_v60 = vsub.f32 %v10307_v52, %v4152_v21  ;;  %v12701_v52 = vld [vmem:[#allocation110_spill] sm:$0xff] }
 0xb0d   :  { %5195 = vrot.lane.b32.xlu0 %v9619_v8, %s8115_s2  ;;  %7666 = vpow2.f32 %v4197_v56 }
 0xb0e   :  { %v4199_v24 = vmul.f32 1.442695, %v4180_v60  ;;  %v12689_v60 = vld [vmem:[#allocation103_spill] sm:$0xff]  ;;  %v4156_v16 = vpop.xlane.xlu1 %4155 }
 0xb0f   :  { %v4286_v22 = vpop.permute.xlu0 %4285 }
 0xb10   :  { %7668 = vpow2.f32 %v4199_v24  ;;  %7009 = vmatprep.subr.bf16.mxu1 %v4286_v22 }
 0xb11   :  { %5197 = vrot.lane.b32.xlu0 %v9629_v6, %s8115_s2  ;;  %7010 = vmatpush3.bf16.msra.mxu1 %v4286_v22  ;;  %v12705_v22 = vld [vmem:[#allocation30_spill] sm:$0xff] }
 0xb12   :  { %7011 = vmatprep.subr.bf16.mxu1 %v4288_v45 }
 0xb15   :  { %v10420_v0 = vpop.eup %7662  ;;  %5201 = vrot.lane.b32.xlu0 %v9649_v48, %s8115_s2  ;;  %7012 = vmatpush3.bf16.msra.mxu1 %v4288_v45  ;;  %v12686_v48 = vld [vmem:[#allocation104_spill] sm:$0xff]  ;;  %v4168_v32 = vpop.xlane.xlu1 %4167 }
 0xb16   :  { %v10424_v37 = vpop.eup %7664  ;;  %3199 = vadd.xlane.f32.xlu1 %v9886_v12  ;;  %7237 = vmatprep.subr.msk.bf16.mxu1 %vm12685_vm14, %v12673_v30  ;;  %v4459_v12 = vsel %vm12687_vm0, %v12673_v30, 0  ;;  %vm12688_vm14 = vmmov %vm12687_vm0  ;;  %v12693_v45 = vld [vmem:[#allocation108_spill] sm:$0xff]  ;;  %v12702_v30 = vld [vmem:[#allocation102_spill] sm:$0xff] }
 0xb17   :  { %v4257_v56 = vpack.c.bf16 %v10420_v0, %v10424_v37  ;;  %v10431_v8 = vpop.eup %7666 }
 0xb19   :  { %5203 = vrot.lane.b32.xlu0 %v12643_v29, %s8115_s2  ;;  %7013 = vmatprep.mubr.bf16.mxu1 %v4257_v56  ;;  %v12694_v29 = vld [vmem:[#allocation40_spill] sm:$0xff]  ;;  %v4164_v34 = vpop.xlane.xlu1 %4163  ;;  %v12706_v56 = vld [vmem:[#allocation50_spill] sm:$0xff] }
 0xb1a   :  { %v10435_v6 = vpop.eup %7668  ;;  %2283 = vadd.xlane.f32.xlu1 %v12686_v48 }
 0xb1b   :  { %v4258_v21 = vpack.c.bf16 %v10435_v6, %v10431_v8 }
 0xb1d   :  { %7014 = vmatmul.mubr.bf16.vlgmr.msra.gmra.mrb[128].mxu1 %v4258_v21 }
 0xb1e   :  { %3203 = vadd.xlane.f32.xlu1 %v9896_v53  ;;  %7030 = vmatpush3.bf16.xpose.msra.mxu1 %v4459_v12  ;;  %v4465_v53 = vsel %vm12687_vm0, %v12675_v43, 0 }
 0xb1f   :  { %7238 = vmatprep.subr.msk.bf16.mxu1 %vm12688_vm14, %v12661_v55  ;;  %vm12695_vm14 = vmmov %vm12687_vm0  ;;  %v4468_v55 = vsel %vm12697_vm12, %v12662_v18, 0 }
 0xb20   :  { %vm12708_vm12 = vmmov %vm12687_vm0 }
 0xb22   :  { %2287 = vadd.xlane.f32.xlu1 %v12689_v60  ;;  %v12707_v60 = vld [vmem:[#allocation105_spill] sm:$0xff] }
 0xb26   :  { %3207 = vadd.xlane.f32.xlu1 %v12691_v14  ;;  %7032 = vmatpush3.bf16.xpose.msra.mxu1 %v4462_v20  ;;  %v4474_v20 = vsel %vm12708_vm12, %v12663_v10, 0  ;;  %v10479_v14 = vpop.permute.xlu1 %4886  ;;  %vm12720_vm12 = vmmov %vm12687_vm0 }
 0xb27   :  { %7239 = vmatprep.subr.msk.bf16.mxu1 %vm12692_vm13, %v12675_v43  ;;  %vm12699_vm13 = vmmov %vm12687_vm0  ;;  %v4471_v43 = vsel %vm12687_vm0, %v12677_v41, 0 }
 0xb2a   :  { %2291 = vadd.xlane.f32.xlu1 %v12693_v45 }
 0xb2e   :  { %3211 = vadd.xlane.f32.xlu1 %v12694_v29  ;;  %7034 = vmatpush3.bf16.xpose.msra.mxu1 %v4465_v53 }
 0xb2f   :  { %7240 = vmatprep.subr.msk.bf16.mxu1 %vm12695_vm14, %v12662_v18  ;;  %vm12704_vm14 = vmmov %vm12687_vm0  ;;  %v4182_v18 = vsub.f32 %v10312_v11, %v4156_v16  ;;  %v12709_v11 = vld [vmem:[#allocation161_spill] sm:$0xff]  ;;  %v4188_v16 = vsub.f32 %v10317_v28, %v4168_v32 }
 0xb31   :  { %v4203_v48 = vmul.f32 1.442695, %v4182_v18  ;;  %v4215_v28 = vmul.f32 1.442695, %v4188_v16  ;;  %v12716_v18 = vld [vmem:[#allocation38_spill] sm:$0xff] }
 0xb32   :  { %2295 = vadd.xlane.f32.xlu1 %v12696_v27  ;;  %v12711_v27 = vld [vmem:[#allocation36_spill] sm:$0xff] }
 0xb33   :  { %7670 = vpow2.f32 %v4203_v48  ;;  %v12718_v48 = vld [vmem:[#allocation107_spill] sm:$0xff] }
 0xb36   :  { %3215 = vadd.xlane.f32.xlu1 %v12698_v5  ;;  %7036 = vmatpush3.bf16.xpose.msra.mxu1 %v4468_v55 }
 0xb37   :  { %7241 = vmatprep.subr.msk.bf16.mxu1 %vm12699_vm13, %v12677_v41  ;;  %vm12710_vm13 = vmmov %vm12687_vm0 }
 0xb38   :  { %3197 = vadd.xlane.f32.xlu0 %v12700_v57  ;;  %v10489_v57 = vpop.permute.xlu1 %4890 }
 0xb3a   :  { %2299 = vadd.xlane.f32.xlu1 %v12701_v52 }
 0xb3c   :  { %2281 = vadd.xlane.f32.xlu0 %v12702_v30  ;;  %v12713_v30 = vld [vmem:[#allocation106_spill] sm:$0xff] }
 0xb3e   :  { %3219 = vadd.xlane.f32.xlu1 %v12703_v49  ;;  %7038 = vmatpush3.bf16.xpose.msra.mxu1 %v4471_v43  ;;  %v4477_v43 = vsel %vm12687_vm0, %v12679_v61, 0  ;;  %v12714_v49 = vld [vmem:[#allocation163_spill] sm:$0xff] }
 0xb3f   :  { %7242 = vmatprep.subr.msk.bf16.mxu1 %vm12704_vm14, %v12663_v10  ;;  %v12712_v10 = vld [vmem:[#allocation112_spill] sm:$0xff]  ;;  %vm12715_vm14 = vmmov %vm12687_vm0 }
 0xb40   :  { %v4158_v24 = vpop.xlane.xlu0 %4157  ;;  %3201 = vadd.xlane.f32.xlu0 %v12705_v22 }
 0xb41   :  { %v4183_v21 = vsub.f32 %v10335_v62, %v4158_v24  ;;  %v4186_v62 = vsub.f32 %v10322_v13, %v4164_v34  ;;  %v10500_v24 = vpop.eup %7670 }
 0xb42   :  { %2303 = vadd.xlane.f32.xlu1 %v12706_v56 }
 0xb43   :  { %v4205_v53 = vmul.f32 1.442695, %v4183_v21  ;;  %v4211_v5 = vmul.f32 1.442695, %v4186_v62 }
 0xb44   :  { %v4154_v12 = vpop.xlane.xlu0 %4153  ;;  %2285 = vadd.xlane.f32.xlu0 %v12707_v60 }
 0xb45   :  { %v4181_v41 = vsub.f32 %v10340_v35, %v4154_v12 }
 0xb46   :  { %3223 = vadd.xlane.f32.xlu1 %v12709_v11  ;;  %7040 = vmatpush3.bf16.xpose.msra.mxu1 %v4474_v20  ;;  %v4480_v20 = vsel %vm12720_vm12, %v12680_v9, 0  ;;  %vm12745_vm12 = vmmov %vm12687_vm0 }
 0xb47   :  { %v4201_v45 = vmul.f32 1.442695, %v4181_v41  ;;  %7243 = vmatprep.subr.msk.bf16.mxu1 %vm12710_vm13, %v12679_v61  ;;  %v12717_v61 = vld [vmem:[#allocation52_spill] sm:$0xff]  ;;  %v12719_v41 = vld [vmem:[#allocation46_spill] sm:$0xff]  ;;  %vm12724_vm13 = vmmov %vm12687_vm0 }
 0xb48   :  { %v4160_v29 = vpop.xlane.xlu0 %4159  ;;  %3205 = vadd.xlane.f32.xlu0 %v12711_v27 }
 0xb49   :  { %7672 = vpow2.f32 %v4201_v45  ;;  %v4184_v35 = vsub.f32 %v10345_v4, %v4160_v29 }
 0xb4a   :  { %2307 = vadd.xlane.f32.xlu1 %v12712_v10  ;;  %7674 = vpow2.f32 %v4205_v53  ;;  %v12721_v53 = vld [vmem:[#allocation44_spill] sm:$0xff] }
 0xb4b   :  { %v4207_v55 = vmul.f32 1.442695, %v4184_v35 }
 0xb4c   :  { %v4162_v52 = vpop.xlane.xlu0 %4161  ;;  %2289 = vadd.xlane.f32.xlu0 %v12713_v30  ;;  %v12723_v30 = vld [vmem:[#allocation49_spill] sm:$0xff] }
 0xb4d   :  { %7676 = vpow2.f32 %v4207_v55  ;;  %v4185_v13 = vsub.f32 %v10350_v33, %v4162_v52  ;;  %v10502_v33 = vpop.permute.xlu1 %4894  ;;  %v12722_v55 = vld [vmem:[#allocation73_spill] sm:$0xff] }
 0xb4e   :  { %3227 = vadd.xlane.f32.xlu1 %v12714_v49  ;;  %7042 = vmatpush3.bf16.xpose.msra.mxu1 %v4477_v43  ;;  %7678 = vpow2.f32 %v4211_v5 }
 0xb4f   :  { %v4209_v4 = vmul.f32 1.442695, %v4185_v13  ;;  %7244 = vmatprep.subr.msk.bf16.mxu1 %vm12715_vm14, %v12680_v9  ;;  %vm12743_vm14 = vmmov %vm12687_vm0 }
 0xb50   :  { %v4166_v32 = vpop.xlane.xlu0 %4165  ;;  %3209 = vadd.xlane.f32.xlu0 %v12716_v18  ;;  %v12726_v18 = vld [vmem:[#allocation53_spill] sm:$0xff] }
 0xb51   :  { %7680 = vpow2.f32 %v4209_v4  ;;  %v4187_v34 = vsub.f32 %v10355_v47, %v4166_v32  ;;  %v12725_v4 = vld [vmem:[#allocation160_spill] sm:$0xff] }
 0xb52   :  { %2311 = vadd.xlane.f32.xlu1 %v12717_v61  ;;  %7682 = vpow2.f32 %v4215_v28 }
 0xb53   :  { %v10505_v22 = vpop.eup %7672  ;;  %v4213_v56 = vmul.f32 1.442695, %v4187_v34  ;;  %v12727_v34 = vld [vmem:[#allocation109_spill] sm:$0xff] }
 0xb54   :  { %2293 = vadd.xlane.f32.xlu0 %v12718_v48  ;;  %v4170_v21 = vpop.xlane.xlu0 %4169  ;;  %v4259_v12 = vpack.c.bf16 %v10500_v24, %v10505_v22  ;;  %v10511_v47 = vpop.eup %7674 }
 0xb55   :  { %7684 = vpow2.f32 %v4213_v56  ;;  %v4189_v60 = vsub.f32 %v10360_v38, %v4170_v21  ;;  %v12731_v21 = vld [vmem:[#allocation162_spill] sm:$0xff] }
 0xb56   :  { %2733 = vadd.xlane.f32.xlu1 %v12719_v41  ;;  %7017 = vmatprep.mubr.bf16.mxu1 %v4259_v12  ;;  %v4176_v11 = vpop.xlane.xlu1 %4175 }
 0xb57   :  { %v10516_v45 = vpop.eup %7676  ;;  %7044 = vmatpush3.bf16.xpose.msra.mxu1 %v4480_v20  ;;  %v4192_v62 = vsub.f32 %v10365_v39, %v4176_v11  ;;  %v4217_v27 = vmul.f32 1.442695, %v4189_v60 }
 0xb58   :  { %3213 = vadd.xlane.f32.xlu0 %v12721_v53  ;;  %v4174_v29 = vpop.xlane.xlu0 %4173  ;;  %v4260_v38 = vpack.c.bf16 %v10516_v45, %v10511_v47  ;;  %v10523_v10 = vpop.eup %7678  ;;  %v12735_v53 = vld [vmem:[#allocation51_spill] sm:$0xff] }
 0xb59   :  { %v4191_v35 = vsub.f32 %v10370_v40, %v4174_v29  ;;  %v4223_v52 = vmul.f32 1.442695, %v4192_v62  ;;  %7686 = vpow2.f32 %v4217_v27 }
 0xb5a   :  { %1817 = vadd.xlane.f32.xlu1 %v12722_v55  ;;  %7018 = vmatmul.mubr.bf16.gmra.mrb[132].mxu1 %v4260_v38  ;;  %v4172_v9 = vpop.xlane.xlu1 %4171  ;;  %v12736_v38 = vld [vmem:[#allocation118_spill] sm:$0xff]  ;;  %v12740_v55 = vld [vmem:[#allocation77_spill] sm:$0xff] }
 0xb5b   :  { %v10526_v16 = vpop.eup %7680  ;;  %v4221_v5 = vmul.f32 1.442695, %v4191_v35  ;;  %v4190_v39 = vsub.f32 %v10375_v3, %v4172_v9  ;;  %v12741_v9 = vld [vmem:[#allocation111_spill] sm:$0xff] }
 0xb5c   :  { %2297 = vadd.xlane.f32.xlu0 %v12723_v30  ;;  %v10530_v13 = vpop.permute.xlu0 %4884  ;;  %v4261_v43 = vpack.c.bf16 %v10523_v10, %v10526_v16  ;;  %v10536_v49 = vpop.eup %7682  ;;  %v12748_v30 = vld [vmem:[#allocation116_spill] sm:$0xff] }
 0xb5d   :  { %v4219_v40 = vmul.f32 1.442695, %v4190_v39  ;;  %7245 = vmatprep.subr.msk.bf16.mxu0 %vm12724_vm13, %v10530_v13  ;;  %7688 = vpow2.f32 %v4221_v5  ;;  %vm12752_vm13 = vmmov %vm12687_vm0 }
 0xb5e   :  { %4227 = vadd.xlane.f32.xlu1 %v10420_v0  ;;  %7021 = vmatprep.mubr.bf16.mxu1 %v4261_v43  ;;  %v12728_v0 = vld [vmem:[#allocation72_spill] sm:$0xff]  ;;  %v10562_v20 = vpop.permute.xlu1 %4862 }
 0xb5f   :  { %v10539_v3 = vpop.eup %7684  ;;  %7690 = vpow2.f32 %v4219_v40  ;;  %12734 = vst [vmem:[#allocation17_spill] sm:$0xff] %v10562_v20  ;;  %v12750_v40 = vld [vmem:[#allocation71_spill] sm:$0xff] }
 0xb60   :  { %7692 = vpow2.f32 %v4223_v52  ;;  %3217 = vadd.xlane.f32.xlu0 %v12725_v4  ;;  %v10542_v28 = vpop.permute.xlu0 %4888  ;;  %v4262_v32 = vpack.c.bf16 %v10536_v49, %v10539_v3 }
 0xb62   :  { %2737 = vadd.xlane.f32.xlu1 %v12726_v18  ;;  %7022 = vmatmul.mubr.bf16.gmra.mrb[136].mxu1 %v4262_v32  ;;  %v10575_v27 = vpop.permute.xlu1 %4866 }
 0xb63   :  { %v10551_v56 = vpop.eup %7686  ;;  %12737 = vst [vmem:[#allocation31_spill] sm:$0xff] %v10575_v27 }
 0xb64   :  { %2301 = vadd.xlane.f32.xlu0 %v12727_v34  ;;  %v10548_v61 = vpop.permute.xlu0 %4892  ;;  %12729 = vst [vmem:[#allocation113_spill] sm:$0xff] %v10551_v56 }
 0xb66   :  { %1821 = vadd.xlane.f32.xlu1 %v12728_v0  ;;  %v10586_v39 = vpop.permute.xlu1 %4870 }
 0xb67   :  { %v10553_v48 = vpop.eup %7688  ;;  %12744 = vst [vmem:[#allocation25_spill] sm:$0xff] %v10586_v39 }
 0xb68   :  { %12730 = vst [vmem:[#allocation33_spill] sm:$0xff] %v10553_v48  ;;  %3221 = vadd.xlane.f32.xlu0 %v12731_v21  ;;  %v10556_v12 = vpop.permute.xlu0 %4896 }
 0xb69   :  { %v10558_v60 = vpop.eup %7690 }
 0xb6a   :  { %12732 = vst [vmem:[#allocation37_spill] sm:$0xff] %v10558_v60  ;;  %v10560_v41 = vpop.eup %7692  ;;  %4231 = vadd.xlane.f32.xlu1 %v10435_v6  ;;  %v4263_v11 = vpack.c.bf16 %v10558_v60, %v10551_v56  ;;  %v12738_v6 = vld [vmem:[#allocation164_spill] sm:$0xff]  ;;  %v10595_v43 = vpop.permute.xlu1 %4874 }
 0xb6b   :  { %12733 = vst [vmem:[#allocation41_spill] sm:$0xff] %v10560_v41  ;;  %v4264_v62 = vpack.c.bf16 %v10560_v41, %v10553_v48  ;;  %12749 = vst [vmem:[#allocation29_spill] sm:$0xff] %v10595_v43  ;;  %v12765_v43 = vld [vmem:[#allocation24_spill] sm:$0xff]  ;;  %v12773_v41 = vld [vmem:[#allocation131_spill] sm:$0xff] }
 0xb6c   :  { %2305 = vadd.xlane.f32.xlu0 %v12735_v53  ;;  %v10570_v29 = vpop.permute.xlu0 %4898  ;;  %7025 = vmatprep.mubr.bf16.mxu1 %v4263_v11  ;;  %v12781_v60 = vld [vmem:[#allocation136_spill] sm:$0xff] }
 0xb6d   :  { %7026 = vmatmul.mubr.bf16.gmra.mrb[140].mxu1 %v4264_v62 }
 0xb6e   :  { %2741 = vadd.xlane.f32.xlu1 %v12736_v38  ;;  %7045 = vmatprep.mubr.msk.bf16.mxu1 %vm12687_vm0, %v12681_v59  ;;  %v12746_v59 = vld [vmem:[#allocation58_spill] sm:$0xff] }
 0xb70   :  { %3225 = vadd.xlane.f32.xlu0 %v12738_v6  ;;  %v10578_v35 = vpop.permute.xlu0 %4860 }
 0xb71   :  { %12739 = vst [vmem:[#allocation21_spill] sm:$0xff] %v10578_v35 }
 0xb72   :  { %1825 = vadd.xlane.f32.xlu1 %v12740_v55 }
 0xb74   :  { %2309 = vadd.xlane.f32.xlu0 %v12741_v9  ;;  %v10582_v5 = vpop.permute.xlu0 %4864 }
 0xb75   :  { %12742 = vst [vmem:[#allocation35_spill] sm:$0xff] %v10582_v5  ;;  %7046 = vmatmul.mubr.msk.bf16.vlgmr.msra.gmra.mrb[144].mxu1 %vm12743_vm14, %v12672_v7  ;;  %v12753_v7 = vld [vmem:[#allocation76_spill] sm:$0xff]  ;;  %vm12754_vm14 = vmmov %vm12687_vm0 }
 0xb76   :  { %4235 = vadd.xlane.f32.xlu1 %v10500_v24  ;;  %7049 = vmatprep.mubr.msk.bf16.mxu1 %vm12745_vm12, %v12682_v54  ;;  %v5192_v24 = vpop.permute.xlu1 %5191  ;;  %vm12755_vm12 = vmmov %vm12687_vm0 }
 0xb78   :  { %2731 = vadd.xlane.f32.xlu0 %v12746_v59  ;;  %v10592_v52 = vpop.permute.xlu0 %4868 }
 0xb79   :  { %12747 = vst [vmem:[#allocation39_spill] sm:$0xff] %v10592_v52 }
 0xb7a   :  { %2745 = vadd.xlane.f32.xlu1 %v12748_v30  ;;  %v5200_v18 = vpop.permute.xlu1 %5199 }
 0xb7c   :  { %1815 = vadd.xlane.f32.xlu0 %v12750_v40  ;;  %v10598_v4 = vpop.permute.xlu0 %4872 }
 0xb7d   :  { %12751 = vst [vmem:[#allocation43_spill] sm:$0xff] %v10598_v4  ;;  %7050 = vmatmul.mubr.msk.bf16.gmra.mrb[148].mxu1 %vm12752_vm13, %v12674_v46  ;;  %vm12756_vm13 = vmmov %vm12687_vm0 }
 0xb7e   :  { %1829 = vadd.xlane.f32.xlu1 %v12753_v7  ;;  %7053 = vmatprep.mubr.msk.bf16.mxu1 %vm12687_vm0, %v12683_v58 }
 0xb80   :  { %v5190_v54 = vpop.permute.xlu0 %5189 }
 0xb81   :  { %7125 = vmatprep.subr.bf16.mxu1 %v5190_v54 }
 0xb82   :  { %7126 = vmatpush3.bf16.msra.mxu1 %v5190_v54  ;;  %v12757_v54 = vld [vmem:[#allocation16_spill] sm:$0xff] }
 0xb83   :  { %7127 = vmatprep.subr.bf16.mxu1 %v5192_v24 }
 0xb84   :  { %v5194_v32 = vpop.permute.xlu0 %5193 }
 0xb85   :  { %7054 = vmatmul.mubr.msk.bf16.gmra.mrb[152].mxu1 %vm12754_vm14, %v12676_v26 }
 0xb86   :  { %7057 = vmatprep.mubr.msk.bf16.mxu1 %vm12755_vm12, %v12684_v25  ;;  %7128 = vmatpush3.bf16.msra.mxu1 %v5192_v24 }
 0xb87   :  { %7129 = vmatprep.subr.bf16.mxu1 %v5194_v32 }
 0xb88   :  { %v5196_v46 = vpop.permute.xlu0 %5195 }
 0xb8a   :  { %7130 = vmatpush3.bf16.msra.mxu1 %v5194_v32  ;;  %v12758_v32 = vld [vmem:[#allocation20_spill] sm:$0xff] }
 0xb8b   :  { %7131 = vmatprep.subr.bf16.mxu1 %v5196_v46 }
 0xb8c   :  { %v5198_v58 = vpop.permute.xlu0 %5197 }
 0xb8d   :  { %7058 = vmatmul.mubr.msk.bf16.gmra.mrb[156].mxu1 %vm12756_vm13, %v12678_v50 }
 0xb8e   :  { %7132 = vmatpush3.bf16.msra.mxu1 %v5196_v46 }
 0xb8f   :  { %7133 = vmatprep.subr.bf16.mxu1 %v5198_v58 }
 0xb90   :  { %v5202_v34 = vpop.permute.xlu0 %5201 }
 0xb92   :  { %7134 = vmatpush3.bf16.msra.mxu1 %v5198_v58 }
 0xb93   :  { %7135 = vmatprep.subr.bf16.mxu1 %v5200_v18 }
 0xb94   :  { %v5204_v26 = vpop.permute.xlu0 %5203 }
 0xb96   :  { %7136 = vmatpush3.bf16.msra.mxu1 %v5200_v18 }
 0xb97   :  { %7137 = vmatprep.subr.bf16.mxu1 %v5202_v34 }
 0xb9a   :  { %7138 = vmatpush3.bf16.msra.mxu1 %v5202_v34 }
 0xb9b   :  { %7139 = vmatprep.subr.bf16.mxu1 %v5204_v26 }
 0xb9e   :  { %7140 = vmatpush3.bf16.msra.mxu1 %v5204_v26 }
 0xba3   :  { %v3200_v25 = vpop.xlane.xlu1 %3199 }
 0xba4   :  { %7694 = vrcp.f32 %v3200_v25 }
 0xba7   :  { %v2284_v0 = vpop.xlane.xlu1 %2283 }
 0xbab   :  { %v3204_v21 = vpop.xlane.xlu1 %3203 }
 0xbae   :  { %v7695_v59 = vpop.eup %7694 }
 0xbaf   :  { %v2288_v11 = vpop.xlane.xlu1 %2287  ;;  %v10615_v46 = vmul.f32 %v7695_v59, %v12758_v32 }
 0xbb3   :  { %v3208_v62 = vpop.xlane.xlu1 %3207 }
 0xbb7   :  { %v2292_v53 = vpop.xlane.xlu1 %2291 }
 0xbbb   :  { %v3212_v50 = vpop.xlane.xlu1 %3211 }
 0xbbf   :  { %v2296_v6 = vpop.xlane.xlu1 %2295 }
 0xbc3   :  { %v3216_v30 = vpop.xlane.xlu1 %3215 }
 0xbc5   :  { %v3198_v38 = vpop.xlane.xlu0 %3197 }
 0xbc6   :  { %7696 = vrcp.f32 %v3198_v38 }
 0xbc7   :  { %7698 = vrcp.f32 %v2284_v0  ;;  %v2300_v26 = vpop.xlane.xlu1 %2299  ;;  %v12759_v0 = vld [vmem:[#allocation128_spill] sm:$0xff] }
 0xbc9   :  { %v2282_v55 = vpop.xlane.xlu0 %2281 }
 0xbca   :  { %7700 = vrcp.f32 %v2282_v55 }
 0xbcb   :  { %7702 = vrcp.f32 %v3204_v21 }
 0xbcd   :  { %v3202_v9 = vpop.xlane.xlu0 %3201 }
 0xbce   :  { %7704 = vrcp.f32 %v3202_v9 }
 0xbcf   :  { %7706 = vrcp.f32 %v2288_v11  ;;  %v12760_v11 = vld [vmem:[#allocation130_spill] sm:$0xff] }
 0xbd0   :  { %v7697_v40 = vpop.eup %7696 }
 0xbd1   :  { %v2286_v7 = vpop.xlane.xlu0 %2285  ;;  %v10612_v24 = vmul.f32 %v7697_v40, %v12757_v54  ;;  %v7699_v58 = vpop.eup %7698 }
 0xbd2   :  { %7708 = vrcp.f32 %v2286_v7  ;;  %v10623_v38 = vmul.f32 %v7699_v58, %v12760_v11  ;;  %v12761_v7 = vld [vmem:[#allocation14_spill] sm:$0xff]  ;;  %v12763_v11 = vld [vmem:[#allocation127_spill] sm:$0xff] }
 0xbd3   :  { %7710 = vrcp.f32 %v3208_v62  ;;  %v12762_v62 = vld [vmem:[#allocation18_spill] sm:$0xff] }
 0xbd4   :  { %v7701_v34 = vpop.eup %7700 }
 0xbd5   :  { %v3206_v25 = vpop.xlane.xlu0 %3205  ;;  %v10620_v21 = vmul.f32 %v7701_v34, %v12759_v0  ;;  %v7703_v55 = vpop.eup %7702 }
 0xbd6   :  { %7712 = vrcp.f32 %v3206_v25  ;;  %v10631_v32 = vmul.f32 %v7703_v55, %v12762_v62  ;;  %v3220_v34 = vpop.xlane.xlu1 %3219 }
 0xbd7   :  { %7714 = vrcp.f32 %v2292_v53  ;;  %v12764_v53 = vld [vmem:[#allocation129_spill] sm:$0xff] }
 0xbd8   :  { %v7705_v59 = vpop.eup %7704 }
 0xbd9   :  { %v2290_v40 = vpop.xlane.xlu0 %2289  ;;  %v10628_v54 = vmul.f32 %v7705_v59, %v12761_v7  ;;  %v7707_v18 = vpop.eup %7706 }
 0xbda   :  { %7716 = vrcp.f32 %v2290_v40  ;;  %v10639_v48 = vmul.f32 %v7707_v18, %v12764_v53  ;;  %v2304_v40 = vpop.xlane.xlu1 %2303  ;;  %v12767_v53 = vld [vmem:[#allocation132_spill] sm:$0xff] }
 0xbdb   :  { %7718 = vrcp.f32 %v3212_v50  ;;  %v12766_v50 = vld [vmem:[#allocation28_spill] sm:$0xff] }
 0xbdc   :  { %v7709_v0 = vpop.eup %7708 }
 0xbdd   :  { %v3210_v25 = vpop.xlane.xlu0 %3209  ;;  %v10636_v9 = vmul.f32 %v7709_v0, %v12763_v11  ;;  %v7711_v59 = vpop.eup %7710 }
 0xbde   :  { %7720 = vrcp.f32 %v3210_v25  ;;  %v10647_v4 = vmul.f32 %v7711_v59, %v12766_v50  ;;  %v12769_v50 = vld [vmem:[#allocation22_spill] sm:$0xff] }
 0xbdf   :  { %7722 = vrcp.f32 %v2296_v6  ;;  %v12768_v6 = vld [vmem:[#allocation134_spill] sm:$0xff] }
 0xbe0   :  { %v7713_v7 = vpop.eup %7712 }
 0xbe1   :  { %v2294_v62 = vpop.xlane.xlu0 %2293  ;;  %v10644_v58 = vmul.f32 %v7713_v7, %v12765_v43  ;;  %v7715_v0 = vpop.eup %7714 }
 0xbe2   :  { %7724 = vrcp.f32 %v2294_v62  ;;  %v10655_v39 = vmul.f32 %v7715_v0, %v12768_v6  ;;  %v3224_v43 = vpop.xlane.xlu1 %3223 }
 0xbe3   :  { %7726 = vrcp.f32 %v3216_v30  ;;  %v12771_v30 = vld [vmem:[#allocation26_spill] sm:$0xff] }
 0xbe4   :  { %v7717_v11 = vpop.eup %7716 }
 0xbe5   :  { %v3214_v25 = vpop.xlane.xlu0 %3213  ;;  %v10652_v55 = vmul.f32 %v7717_v11, %v12767_v53  ;;  %v7719_v52 = vpop.eup %7718 }
 0xbe6   :  { %7728 = vrcp.f32 %v3214_v25  ;;  %v10663_v27 = vmul.f32 %v7719_v52, %v12771_v30  ;;  %v2308_v25 = vpop.xlane.xlu1 %2307 }
 0xbe7   :  { %7730 = vrcp.f32 %v2300_v26  ;;  %v12775_v26 = vld [vmem:[#allocation133_spill] sm:$0xff] }
 0xbe8   :  { %v7721_v7 = vpop.eup %7720  ;;  %12772 = vst [vmem:[#allocation15_spill] sm:$0xff] %v10663_v27 }
 0xbe9   :  { %v2298_v62 = vpop.xlane.xlu0 %2297  ;;  %v10660_v18 = vmul.f32 %v7721_v7, %v12769_v50  ;;  %v7723_v11 = vpop.eup %7722 }
 0xbea   :  { %7732 = vrcp.f32 %v2298_v62  ;;  %v10671_v5 = vmul.f32 %v7723_v11, %v12775_v26 }
 0xbeb   :  { %12770 = vst [vmem:[#allocation45_spill] sm:$0xff] %v10660_v18  ;;  %7734 = vrcp.f32 %v3220_v34  ;;  %v12777_v34 = vld [vmem:[#allocation166_spill] sm:$0xff] }
 0xbec   :  { %v7725_v53 = vpop.eup %7724  ;;  %12776 = vst [vmem:[#allocation23_spill] sm:$0xff] %v10671_v5  ;;  %v12784_v5 = vld [vmem:[#allocation165_spill] sm:$0xff] }
 0xbed   :  { %v3218_v6 = vpop.xlane.xlu0 %3217  ;;  %v10668_v59 = vmul.f32 %v7725_v53, %v12773_v41  ;;  %v7727_v7 = vpop.eup %7726  ;;  %v12779_v41 = vld [vmem:[#allocation168_spill] sm:$0xff] }
 0xbee   :  { %7736 = vrcp.f32 %v3218_v6  ;;  %v10683_v53 = vmul.f32 %v7727_v7, %v12779_v41  ;;  %v3228_v6 = vpop.xlane.xlu1 %3227 }
 0xbef   :  { %12774 = vst [vmem:[#allocation19_spill] sm:$0xff] %v10668_v59  ;;  %7738 = vrcp.f32 %v2304_v40 }
 0xbf0   :  { %v7729_v50 = vpop.eup %7728  ;;  %v10675_v62 = vpop.f32.mrb[128].mxu1  ;;  %12780 = vst [vmem:[#allocation104_spill] sm:$0xff] %v10683_v53 }
 0xbf1   :  { %v2302_v30 = vpop.xlane.xlu0 %2301  ;;  %v10677_v0 = vpop.f32.mrb[129].mxu1  ;;  %v10680_v20 = vmul.f32 %v7729_v50, %v12777_v34  ;;  %v12783_v50 = vld [vmem:[#allocation138_spill] sm:$0xff] }
 0xbf2   :  { %v7731_v11 = vpop.eup %7730  ;;  %7740 = vrcp.f32 %v2302_v30  ;;  %v10685_v26 = vpop.f32.mrb[130].mxu1 }
 0xbf3   :  { %12778 = vst [vmem:[#allocation27_spill] sm:$0xff] %v10680_v20  ;;  %v10687_v35 = vpop.f32.mrb[131].mxu1  ;;  %7742 = vrcp.f32 %v3224_v43  ;;  %v10695_v34 = vmul.f32 %v7731_v11, %v12783_v50  ;;  %v2312_v27 = vpop.xlane.xlu1 %2311  ;;  %v12786_v43 = vld [vmem:[#allocation167_spill] sm:$0xff] }
 0xbf4   :  { %v7733_v52 = vpop.eup %7732  ;;  %v12788_v50 = vld [vmem:[#allocation135_spill] sm:$0xff] }
 0xbf5   :  { %v3222_v56 = vpop.xlane.xlu0 %3221  ;;  %v10692_v18 = vmul.f32 %v7733_v52, %v12781_v60  ;;  %v7735_v7 = vpop.eup %7734 }
 0xbf6   :  { %7744 = vrcp.f32 %v3222_v56  ;;  %v10703_v20 = vmul.f32 %v7735_v7, %v12786_v43  ;;  %v12792_v43 = vld [vmem:[#allocation170_spill] sm:$0xff] }
 0xbf7   :  { %12782 = vst [vmem:[#allocation103_spill] sm:$0xff] %v10692_v18  ;;  %7746 = vrcp.f32 %v2308_v25  ;;  %v12790_v25 = vld [vmem:[#allocation137_spill] sm:$0xff] }
 0xbf8   :  { %v7737_v41 = vpop.eup %7736  ;;  %12787 = vst [vmem:[#allocation108_spill] sm:$0xff] %v10703_v20  ;;  %v12796_v20 = vld [vmem:[#allocation140_spill] sm:$0xff] }
 0xbf9   :  { %v2306_v59 = vpop.xlane.xlu0 %2305  ;;  %v10700_v40 = vmul.f32 %v7737_v41, %v12784_v5  ;;  %v7739_v60 = vpop.eup %7738 }
 0xbfa   :  { %7748 = vrcp.f32 %v2306_v59  ;;  %v10711_v53 = vmul.f32 %v7739_v60, %v12790_v25  ;;  %v2734_v5 = vpop.xlane.xlu1 %2733 }
 0xbfb   :  { %12785 = vst [vmem:[#allocation34_spill] sm:$0xff] %v10700_v40  ;;  %7750 = vrcp.f32 %v3228_v6  ;;  %v12794_v6 = vld [vmem:[#allocation172_spill] sm:$0xff] }
 0xbfc   :  { %v7741_v11 = vpop.eup %7740  ;;  %12791 = vst [vmem:[#allocation48_spill] sm:$0xff] %v10711_v53 }
 0xbfd   :  { %v3226_v56 = vpop.xlane.xlu0 %3225  ;;  %v10708_v30 = vmul.f32 %v7741_v11, %v12788_v50  ;;  %v7743_v18 = vpop.eup %7742 }
 0xbfe   :  { %7752 = vrcp.f32 %v3226_v56  ;;  %v10719_v40 = vmul.f32 %v7743_v18, %v12794_v6  ;;  %v1818_v56 = vpop.xlane.xlu1 %1817  ;;  %v12800_v6 = vld [vmem:[#allocation169_spill] sm:$0xff] }
 0xbff   :  { %12789 = vst [vmem:[#allocation40_spill] sm:$0xff] %v10708_v30  ;;  %7754 = vrcp.f32 %v2312_v27  ;;  %v12798_v27 = vld [vmem:[#allocation142_spill] sm:$0xff] }
 0xc00   :  { %v7745_v41 = vpop.eup %7744  ;;  %12795 = vst [vmem:[#allocation32_spill] sm:$0xff] %v10719_v40 }
 0xc01   :  { %v2310_v59 = vpop.xlane.xlu0 %2309  ;;  %v10716_v52 = vmul.f32 %v7745_v41, %v12792_v43  ;;  %v7747_v11 = vpop.eup %7746 }
 0xc02   :  { %7756 = vrcp.f32 %v2310_v59  ;;  %v10727_v30 = vmul.f32 %v7747_v11, %v12798_v27  ;;  %v12806_v27 = vld [vmem:[#allocation141_spill] sm:$0xff] }
 0xc03   :  { %12793 = vst [vmem:[#allocation42_spill] sm:$0xff] %v10716_v52  ;;  %7758 = vrcp.f32 %v2734_v5  ;;  %v12802_v5 = vld [vmem:[#allocation171_spill] sm:$0xff] }
 0xc04   :  { %v7749_v50 = vpop.eup %7748  ;;  %12799 = vst [vmem:[#allocation102_spill] sm:$0xff] %v10727_v30 }
 0xc05   :  { %v2732_v25 = vpop.xlane.xlu0 %2731  ;;  %v10724_v7 = vmul.f32 %v7749_v50, %v12796_v20  ;;  %v7751_v41 = vpop.eup %7750  ;;  %v12804_v50 = vld [vmem:[#allocation139_spill] sm:$0xff] }
 0xc06   :  { %7760 = vrcp.f32 %v2732_v25  ;;  %v10735_v52 = vmul.f32 %v7751_v41, %v12802_v5  ;;  %v12810_v5 = vld [vmem:[#allocation146_spill] sm:$0xff] }
 0xc07   :  { %12797 = vst [vmem:[#allocation110_spill] sm:$0xff] %v10724_v7  ;;  %7762 = vrcp.f32 %v1818_v56  ;;  %v12808_v7 = vld [vmem:[#allocation144_spill] sm:$0xff] }
 0xc08   :  { %v7753_v43 = vpop.eup %7752  ;;  %12803 = vst [vmem:[#allocation30_spill] sm:$0xff] %v10735_v52 }
 0xc09   :  { %v1816_v59 = vpop.xlane.xlu0 %1815  ;;  %v10732_v60 = vmul.f32 %v7753_v43, %v12800_v6  ;;  %v7755_v40 = vpop.eup %7754 }
 0xc0a   :  { %7764 = vrcp.f32 %v1816_v59  ;;  %v10743_v18 = vmul.f32 %v7755_v40, %v12806_v27  ;;  %v12814_v40 = vld [vmem:[#allocation89_spill] sm:$0xff] }
 0xc0b   :  { %12801 = vst [vmem:[#allocation159_spill] sm:$0xff] %v10732_v60 }
 0xc0c   :  { %v7757_v11 = vpop.eup %7756  ;;  %12807 = vst [vmem:[#allocation105_spill] sm:$0xff] %v10743_v18 }
 0xc0d   :  { %v10740_v25 = vmul.f32 %v7757_v11, %v12804_v50  ;;  %v7759_v56 = vpop.eup %7758  ;;  %v12812_v50 = vld [vmem:[#allocation87_spill] sm:$0xff] }
 0xc0e   :  { %v10751_v59 = vmul.f32 %v7759_v56, %v12810_v5 }
 0xc0f   :  { %12805 = vst [vmem:[#allocation50_spill] sm:$0xff] %v10740_v25 }
 0xc10   :  { %v7761_v6 = vpop.eup %7760  ;;  %12811 = vst [vmem:[#allocation36_spill] sm:$0xff] %v10751_v59 }
 0xc11   :  { %v10748_v41 = vmul.f32 %v7761_v6, %v12808_v7  ;;  %v7763_v30 = vpop.eup %7762 }
 0xc12   :  { %v10759_v27 = vmul.f32 %v7763_v30, %v12814_v40 }
 0xc13   :  { %12809 = vst [vmem:[#allocation161_spill] sm:$0xff] %v10748_v41 }
 0xc14   :  { %v7765_v11 = vpop.eup %7764  ;;  %12815 = vst [vmem:[#allocation106_spill] sm:$0xff] %v10759_v27 }
 0xc15   :  { %v10756_v60 = vmul.f32 %v7765_v11, %v12812_v50 }
 0xc17   :  { %12813 = vst [vmem:[#allocation112_spill] sm:$0xff] %v10756_v60 }
 0xc2d   :  { %v10763_v52 = vpop.f32.mrb[132].mxu1 }
 0xc2e   :  { %v10765_v7 = vpop.f32.mrb[133].mxu1 }
 0xc2f   :  { %v10767_v56 = vpop.f32.mrb[134].mxu1 }
 0xc30   :  { %v10769_v6 = vpop.f32.mrb[135].mxu1 }
 0xc35   :  { %v10771_v5 = vpop.f32.mrb[136].mxu1 }
 0xc36   :  { %12816 = vst [vmem:[#allocation163_spill] sm:$0xff] %v10771_v5  ;;  %v10773_v20 = vpop.f32.mrb[137].mxu1 }
 0xc37   :  { %v10775_v11 = vpop.f32.mrb[138].mxu1 }
 0xc38   :  { %12817 = vst [vmem:[#allocation38_spill] sm:$0xff] %v10775_v11  ;;  %v10777_v50 = vpop.f32.mrb[139].mxu1  ;;  %v12825_v11 = vld [vmem:[#allocation115_spill] sm:$0xff] }
 0xc39   :  { %12818 = vst [vmem:[#allocation52_spill] sm:$0xff] %v10777_v50 }
 0xc40   :  { %v10779_v30 = vpop.f32.mrb[140].mxu1 }
 0xc41   :  { %12819 = vst [vmem:[#allocation107_spill] sm:$0xff] %v10779_v30  ;;  %v10781_v40 = vpop.f32.mrb[141].mxu1 }
 0xc42   :  { %12820 = vst [vmem:[#allocation46_spill] sm:$0xff] %v10781_v40  ;;  %v10783_v43 = vpop.f32.mrb[142].mxu1  ;;  %v12824_v40 = vld [vmem:[#allocation74_spill] sm:$0xff] }
 0xc43   :  { %12821 = vst [vmem:[#allocation44_spill] sm:$0xff] %v10783_v43  ;;  %v10785_v60 = vpop.f32.mrb[143].mxu1 }
 0xc44   :  { %12822 = vst [vmem:[#allocation73_spill] sm:$0xff] %v10785_v60 }
 0xc48   :  { %v7047_v27 = vpop.f32.mrb[144].mxu1 }
 0xc49   :  { %v10789_v41 = vsel %vm8890_vm1, %v7047_v27, -1.7014117e+38  ;;  %v4516_v59 = vpop.f32.mrb[145].mxu1 }
 0xc4a   :  { %4599 = vmax.xlane.f32.xlu0 %v10789_v41  ;;  %v7048_v25 = vpop.f32.mrb[146].mxu1  ;;  %v10799_v30 = vsel %vm8897_vm2, %v4516_v59, -1.7014117e+38  ;;  %v12823_v59 = vld [vmem:[#allocation47_spill] sm:$0xff] }
 0xc4b   :  { %v10794_v18 = vsel %vm8912_vm3, %v7048_v25, -1.7014117e+38  ;;  %v4519_v53 = vpop.f32.mrb[147].mxu1 }
 0xc4c   :  { %4601 = vmax.xlane.f32.xlu1 %v10794_v18  ;;  %v10804_v27 = vsel %vm8918_vm4, %v4519_v53, -1.7014117e+38 }
 0xc4e   :  { %4595 = vmax.xlane.f32.xlu0 %v10799_v30 }
 0xc50   :  { %4597 = vmax.xlane.f32.xlu1 %v10804_v27  ;;  %v7051_v1 = vpop.f32.mrb[148].mxu1 }
 0xc51   :  { %v4532_v43 = vpop.f32.mrb[149].mxu1 }
 0xc52   :  { %v10809_v25 = vsel %vm12664_vm10, %v4532_v43, -1.7014117e+38  ;;  %4225 = vadd.xlane.f32.xlu0 %v10424_v37  ;;  %v7052_v63 = vpop.f32.mrb[150].mxu1 }
 0xc53   :  { %v4535_v44 = vpop.f32.mrb[151].mxu1  ;;  %v10816_v53 = vsel %vm12665_vm11, %v7052_v63, -1.7014117e+38 }
 0xc54   :  { %4603 = vmax.xlane.f32.xlu1 %v10809_v25  ;;  %v10822_v37 = vsel %vm12599_vm8, %v4535_v44, -1.7014117e+38 }
 0xc56   :  { %2735 = vadd.xlane.f32.xlu0 %v12823_v59 }
 0xc58   :  { %4609 = vmax.xlane.f32.xlu1 %v10816_v53  ;;  %v7055_v23 = vpop.f32.mrb[152].mxu1 }
 0xc59   :  { %v4548_v60 = vpop.f32.mrb[153].mxu1  ;;  %v10828_v63 = vsel %vm12667_vm7, %v7055_v23, -1.7014117e+38  ;;  %v12827_v23 = vld [vmem:[#allocation119_spill] sm:$0xff] }
 0xc5a   :  { %1819 = vadd.xlane.f32.xlu0 %v12824_v40  ;;  %v7056_v43 = vpop.f32.mrb[154].mxu1 }
 0xc5b   :  { %v4551_v51 = vpop.f32.mrb[155].mxu1  ;;  %v10836_v44 = vsel %vm12602_vm15, %v7056_v43, -1.7014117e+38  ;;  %v12829_v43 = vpack.c.bf16 %v10623_v38, %v10620_v21  ;;  %v12832_v21 = vpack.c.bf16 %v10615_v46, %v10612_v24  ;;  %v12833_v38 = vld [vmem:[#allocation117_spill] sm:$0xff]  ;;  %v12837_v46 = vld [vmem:[#allocation79_spill] sm:$0xff] }
 0xc5c   :  { %4605 = vmax.xlane.f32.xlu1 %v10822_v37 }
 0xc5e   :  { %4229 = vadd.xlane.f32.xlu0 %v10431_v8  ;;  %v12826_v8 = vld [vmem:[#allocation75_spill] sm:$0xff] }
 0xc60   :  { %4615 = vmax.xlane.f32.xlu1 %v10828_v63  ;;  %v7059_v59 = vpop.f32.mrb[156].mxu1 }
 0xc61   :  { %v4564_v36 = vpop.f32.mrb[157].mxu1 }
 0xc62   :  { %2739 = vadd.xlane.f32.xlu0 %v12825_v11  ;;  %v10832_v40 = vpop.f32.mrb[158].mxu1  ;;  %v10847_v11 = vsel %vm8949_vm6, %v7051_v1, -1.7014117e+38  ;;  %v12830_v1 = vld [vmem:[#allocation64_spill] sm:$0xff] }
 0xc63   :  { %v10838_v19 = vpop.f32.mrb[159].mxu1  ;;  %vm12831_vm0 = vnez %v12830_v1 }
 0xc64   :  { %4617 = vmax.xlane.f32.xlu1 %v10836_v44 }
 0xc66   :  { %1823 = vadd.xlane.f32.xlu0 %v12826_v8  ;;  %v10856_v8 = vsel %vm12666_vm5, %v4548_v60, -1.7014117e+38  ;;  %v12834_v60 = vld [vmem:[#allocation81_spill] sm:$0xff] }
 0xc6a   :  { %4233 = vadd.xlane.f32.xlu0 %v10505_v22  ;;  %v10866_v22 = vsel %vm12831_vm0, %v7059_v59, -1.7014117e+38  ;;  %v12835_v59 = vpack.c.bf16 %v10639_v48, %v10636_v9  ;;  %v12838_v48 = vpack.c.bf16 %v10631_v32, %v10628_v54  ;;  %v12840_v32 = vld [vmem:[#allocation80_spill] sm:$0xff] }
 0xc6e   :  { %2743 = vadd.xlane.f32.xlu0 %v12827_v23 }
 0xc72   :  { %1827 = vadd.xlane.f32.xlu0 %v12828_v42  ;;  %v10861_v42 = vsel %vm12417_vm9, %v4551_v51, -1.7014117e+38  ;;  %v4228_v51 = vpop.xlane.xlu1 %4227 }
 0xc73   :  { %7766 = vrcp.f32 %v4228_v51 }
 0xc75   :  { %3414 = vrot.lane.b32.xlu1 %v12829_v43, %s8115_s2 }
 0xc76   :  { %4607 = vmax.xlane.f32.xlu0 %v10847_v11  ;;  %v2738_v23 = vpop.xlane.xlu1 %2737 }
 0xc77   :  { %7768 = vrcp.f32 %v2738_v23  ;;  %v12845_v23 = vld [vmem:[#allocation70_spill] sm:$0xff] }
 0xc78   :  { %vm12846_vm13 = vnez %v12845_v23 }
 0xc7a   :  { %4611 = vmax.xlane.f32.xlu0 %v10856_v8  ;;  %v1822_v43 = vpop.xlane.xlu1 %1821 }
 0xc7e   :  { %4613 = vmax.xlane.f32.xlu0 %v10861_v42  ;;  %v4232_v1 = vpop.xlane.xlu1 %4231 }
 0xc82   :  { %4623 = vmax.xlane.f32.xlu0 %v10866_v22  ;;  %v2742_v24 = vpop.xlane.xlu1 %2741 }
 0xc98   :  { %3438 = vrot.lane.b32.xlu0 %v12832_v21, %s8115_s2 }
 0xc99   :  { %4239 = vadd.xlane.f32.xlu1 %v10516_v45  ;;  %v10883_v45 = vpop.xlane.xlu1 %1825 }
 0xc9d   :  { %2749 = vadd.xlane.f32.xlu1 %v12833_v38  ;;  %v10885_v21 = vpop.xlane.xlu1 %4235 }
 0xca1   :  { %1833 = vadd.xlane.f32.xlu1 %v12834_v60  ;;  %v10887_v38 = vpop.xlane.xlu1 %2745 }
 0xca5   :  { %v10889_v60 = vpop.xlane.xlu1 %1829 }
 0xcb2   :  { %3416 = vrot.lane.b32.xlu1 %v12835_v59, %s8115_s2  ;;  %v12839_v59 = vld [vmem:[#allocation122_spill] sm:$0xff] }
 0xcb7   :  { %4237 = vadd.xlane.f32.xlu0 %v10511_v47 }
 0xcbb   :  { %2747 = vadd.xlane.f32.xlu0 %v12836_v15 }
 0xcbf   :  { %1831 = vadd.xlane.f32.xlu0 %v12837_v46 }
 0xcd5   :  { %3440 = vrot.lane.b32.xlu0 %v12838_v48, %s8115_s2 }
 0xcd6   :  { %4243 = vadd.xlane.f32.xlu1 %v10523_v10 }
 0xcd7   :  { %v4600_v47 = vpop.xlane.xlu0 %4599 }
 0xcd8   :  { %v4629_v46 = vsub.f32 %v10789_v41, %v4600_v47 }
 0xcd9   :  { %v4602_v15 = vpop.xlane.xlu1 %4601 }
 0xcda   :  { %v4630_v9 = vsub.f32 %v10794_v18, %v4602_v15  ;;  %2753 = vadd.xlane.f32.xlu1 %v12839_v59  ;;  %v4647_v10 = vmul.f32 1.442695, %v4629_v46  ;;  %v12841_v15 = vld [vmem:[#allocation66_spill] sm:$0xff] }
 0xcdb   :  { %v4596_v17 = vpop.xlane.xlu0 %4595  ;;  %vm12842_vm14 = vnez %v12841_v15 }
 0xcdc   :  { %v4649_v2 = vmul.f32 1.442695, %v4630_v9  ;;  %v4627_v31 = vsub.f32 %v10799_v30, %v4596_v17  ;;  %v10904_v41 = vsel %vm12842_vm14, %v4564_v36, -1.7014117e+38  ;;  %v7767_v36 = vpop.eup %7766  ;;  %v10921_v9 = vsel %vm12846_vm13, %v10838_v19, -1.7014117e+38 }
 0xcdd   :  { %v4598_v5 = vpop.xlane.xlu1 %4597  ;;  %vm12851_vm13 = vcmask 523264  }
 0xcde   :  { %v4643_v50 = vmul.f32 1.442695, %v4627_v31  ;;  %v4628_v54 = vsub.f32 %v10804_v27, %v4598_v5  ;;  %1837 = vadd.xlane.f32.xlu1 %v12840_v32  ;;  %7770 = vpow2.f32 %v4649_v2  ;;  %v12843_v31 = vld [vmem:[#allocation68_spill] sm:$0xff]  ;;  %v7769_v27 = vpop.eup %7768 }
 0xcdf   :  { %v4226_v48 = vpop.xlane.xlu0 %4225  ;;  %vm12844_vm12 = vnez %v12843_v31 }
 0xce0   :  { %7772 = vpow2.f32 %v4643_v50  ;;  %v4645_v18 = vmul.f32 1.442695, %v4628_v54  ;;  %v10910_v5 = vsel %vm12844_vm12, %v10832_v40, -1.7014117e+38  ;;  %vm12852_vm12 = vmmov %vm12851_vm13 }
 0xce1   :  { %7774 = vrcp.f32 %v4226_v48  ;;  %v4604_v47 = vpop.xlane.xlu1 %4603  ;;  %vm12880_vm14 = vmmov %vm12852_vm12 }
 0xce2   :  { %7776 = vpow2.f32 %v4645_v18  ;;  %4619 = vmax.xlane.f32.xlu1 %v10904_v41  ;;  %v4631_v2 = vsub.f32 %v10809_v25, %v4604_v47  ;;  %vm12937_vm0 = vmmov %vm12852_vm12 }
 0xce3   :  { %7778 = vpow2.f32 %v4647_v10  ;;  %v2736_v17 = vpop.xlane.xlu0 %2735  ;;  %v10930_v10 = vmul.f32 %v7767_v36, %v10687_v35  ;;  %vm12939_vm9 = vmmov %vm12937_vm0 }
 0xce4   :  { %7780 = vrcp.f32 %v2736_v17  ;;  %v4651_v40 = vmul.f32 1.442695, %v4631_v2  ;;  %v12847_v17 = vld [vmem:[#allocation143_spill] sm:$0xff] }
 0xce5   :  { %v10913_v50 = vpop.xlane.xlu1 %4609  ;;  %7782 = vrcp.f32 %v1822_v43 }
 0xce6   :  { %4625 = vmax.xlane.f32.xlu1 %v10910_v5 }
 0xce7   :  { %v1820_v30 = vpop.xlane.xlu0 %1819 }
 0xce8   :  { %7784 = vrcp.f32 %v1820_v30  ;;  %v10916_v51 = vpop.eup %7770 }
 0xce9   :  { %v4606_v59 = vpop.xlane.xlu1 %4605  ;;  %7786 = vrcp.f32 %v4232_v1 }
 0xcea   :  { %v10923_v46 = vpop.eup %7772  ;;  %v4632_v25 = vsub.f32 %v10822_v37, %v4606_v59  ;;  %4621 = vmax.xlane.f32.xlu1 %v10921_v9  ;;  %7788 = vrcp.f32 %v2742_v24 }
 0xceb   :  { %v7775_v43 = vpop.eup %7774  ;;  %v4230_v54 = vpop.xlane.xlu0 %4229 }
 0xcec   :  { %v10927_v32 = vpop.eup %7776  ;;  %v4653_v48 = vmul.f32 1.442695, %v4632_v25  ;;  %7790 = vrcp.f32 %v4230_v54  ;;  %v10933_v19 = vmul.f32 %v7775_v43, %v10677_v0  ;;  %v12849_v0 = vld [vmem:[#allocation145_spill] sm:$0xff] }
 0xced   :  { %v10935_v18 = vpop.eup %7778  ;;  %7792 = vpow2.f32 %v4651_v40  ;;  %v4707_v37 = vpack.c.bf16 %v10927_v32, %v10923_v46  ;;  %v10947_v36 = vmul.f32 %v7769_v27, %v12849_v0  ;;  %v4925_v40 = vsel %vm12851_vm13, %v10530_v13, 0  ;;  %v12853_v54 = vld [vmem:[#allocation13_spill] sm:$0xff]  ;;  %vm12858_vm13 = vmmov %vm12852_vm12 }
 0xcee   :  { %v7781_v1 = vpop.eup %7780  ;;  %7794 = vpow2.f32 %v4653_v48  ;;  %v4708_v24 = vpack.c.bf16 %v10916_v51, %v10935_v18  ;;  %v12855_v48 = vld [vmem:[#allocation88_spill] sm:$0xff] }
 0xcef   :  { %v2740_v47 = vpop.xlane.xlu0 %2739  ;;  %7077 = vmatprep.mubr.bf16.mxu0 %v4707_v37  ;;  %v10944_v2 = vmul.f32 %v7781_v1, %v12847_v17  ;;  %12850 = vst [vmem:[#allocation160_spill] sm:$0xff] %v10947_v36  ;;  %v7783_v30 = vpop.eup %7782  ;;  %v13007_v36 = vld [vmem:[#allocation108_spill] sm:$0xff] }
 0xcf0   :  { %7796 = vrcp.f32 %v2740_v47  ;;  %7078 = vmatmul.mubr.bf16.vlgmr.msra.gmra.mrb[240].mxu0 %v4708_v24  ;;  %v10960_v37 = vmul.f32 %v7783_v30, %v12855_v48 }
 0xcf1   :  { %12848 = vst [vmem:[#allocation49_spill] sm:$0xff] %v10944_v2  ;;  %7094 = vmatpush3.bf16.xpose.msra.mxu0 %v4925_v40  ;;  %7798 = vrcp.f32 %v10883_v45 }
 0xcf2   :  { %v7785_v25 = vpop.eup %7784  ;;  %7246 = vmatprep.subr.msk.bf16.mxu0 %vm12852_vm12, %v10479_v14  ;;  %12856 = vst [vmem:[#allocation109_spill] sm:$0xff] %v10960_v37 }
 0xcf3   :  { %v1824_v43 = vpop.xlane.xlu0 %1823  ;;  %v10957_v27 = vmul.f32 %v7785_v25, %v12853_v54  ;;  %v7787_v1 = vpop.eup %7786  ;;  %v4928_v25 = vsel %vm12852_vm12, %v10479_v14, 0  ;;  %v12859_v54 = vpack.c.bf16 %v10655_v39, %v10652_v55  ;;  %v12860_v14 = vld [vmem:[#allocation148_spill] sm:$0xff]  ;;  %v4634_v39 = vsub.f32 %v10816_v53, %v10913_v50 }
 0xcf4   :  { %7800 = vrcp.f32 %v1824_v43  ;;  %4241 = vadd.xlane.f32.xlu0 %v10526_v16  ;;  %v7789_v13 = vpop.eup %7788  ;;  %v10972_v30 = vmul.f32 %v7787_v1, %v10685_v26  ;;  %v12857_v16 = vld [vmem:[#allocation121_spill] sm:$0xff]  ;;  %v12862_v1 = vld [vmem:[#allocation150_spill] sm:$0xff] }
 0xcf5   :  { %12854 = vst [vmem:[#allocation53_spill] sm:$0xff] %v10957_v27  ;;  %7802 = vrcp.f32 %v10885_v21  ;;  %v4657_v50 = vmul.f32 1.442695, %v4634_v39  ;;  %v12871_v39 = vld [vmem:[#allocation149_spill] sm:$0xff] }
 0xcf6   :  { %v7791_v47 = vpop.eup %7790  ;;  %v12904_v21 = vld [vmem:[#allocation113_spill] sm:$0xff] }
 0xcf7   :  { %v10965_v45 = vpop.eup %7792  ;;  %v4234_v17 = vpop.xlane.xlu0 %4233  ;;  %v10969_v0 = vmul.f32 %v7791_v47, %v10675_v62  ;;  %v10994_v47 = vmul.f32 %v7789_v13, %v12862_v1  ;;  %v12867_v13 = vld [vmem:[#allocation93_spill] sm:$0xff] }
 0xcf8   :  { %v10974_v40 = vpop.eup %7794  ;;  %7804 = vrcp.f32 %v4234_v17  ;;  %2751 = vadd.xlane.f32.xlu0 %v12857_v16  ;;  %v12864_v16 = vld [vmem:[#allocation82_spill] sm:$0xff] }
 0xcf9   :  { %7096 = vmatpush3.bf16.xpose.msra.mxu0 %v4928_v25  ;;  %v4709_v43 = vpack.c.bf16 %v10974_v40, %v10965_v45  ;;  %7806 = vrcp.f32 %v10887_v38  ;;  %12863 = vst [vmem:[#allocation162_spill] sm:$0xff] %v10994_v47  ;;  %v4616_v38 = vpop.xlane.xlu1 %4615 }
 0xcfa   :  { %v7797_v62 = vpop.eup %7796  ;;  %7247 = vmatprep.subr.msk.bf16.mxu0 %vm12858_vm13, %v10542_v28  ;;  %vm12869_vm13 = vmmov %vm12852_vm12 }
 0xcfb   :  { %v2744_v26 = vpop.xlane.xlu0 %2743  ;;  %3418 = vrot.lane.b32.xlu1 %v12859_v54, %s8115_s2  ;;  %7081 = vmatprep.mubr.bf16.mxu0 %v4709_v43  ;;  %v10991_v48 = vmul.f32 %v7797_v62, %v12860_v14  ;;  %v7799_v17 = vpop.eup %7798  ;;  %v12865_v43 = vld [vmem:[#allocation91_spill] sm:$0xff] }
 0xcfc   :  { %7808 = vrcp.f32 %v2744_v26  ;;  %1835 = vadd.xlane.f32.xlu0 %v12864_v16  ;;  %v11006_v54 = vmul.f32 %v7799_v17, %v12867_v13  ;;  %v4931_v26 = vsel %vm12852_vm12, %v10542_v28, 0 }
 0xcfd   :  { %12861 = vst [vmem:[#allocation72_spill] sm:$0xff] %v10991_v48  ;;  %7810 = vrcp.f32 %v10889_v60 }
 0xcfe   :  { %v7801_v24 = vpop.eup %7800  ;;  %12868 = vst [vmem:[#allocation118_spill] sm:$0xff] %v11006_v54 }
 0xcff   :  { %v1828_v55 = vpop.xlane.xlu0 %1827  ;;  %v11003_v62 = vmul.f32 %v7801_v24, %v12865_v43  ;;  %v7803_v14 = vpop.eup %7802 }
 0xd00   :  { %7812 = vrcp.f32 %v1828_v55  ;;  %v11015_v53 = vmul.f32 %v7803_v14, %v10769_v6  ;;  %v4618_v24 = vpop.xlane.xlu1 %4617  ;;  %v12870_v6 = vld [vmem:[#allocation147_spill] sm:$0xff] }
 0xd01   :  { %12866 = vst [vmem:[#allocation51_spill] sm:$0xff] %v11003_v62  ;;  %7098 = vmatpush3.bf16.xpose.msra.mxu0 %v4931_v26  ;;  %v4638_v26 = vsub.f32 %v10836_v44, %v4618_v24  ;;  %7814 = vpow2.f32 %v4657_v50 }
 0xd02   :  { %v7805_v60 = vpop.eup %7804  ;;  %7248 = vmatprep.subr.msk.bf16.mxu0 %vm12869_vm13, %v10489_v57  ;;  %vm12872_vm13 = vmmov %vm12852_vm12 }
 0xd03   :  { %v4608_v17 = vpop.xlane.xlu0 %4607  ;;  %v11018_v16 = vmul.f32 %v7805_v60, %v10765_v7  ;;  %v7807_v55 = vpop.eup %7806  ;;  %v4665_v24 = vmul.f32 1.442695, %v4638_v26  ;;  %v4937_v26 = vsel %vm12852_vm12, %v10548_v61, 0 }
 0xd04   :  { %v4633_v28 = vsub.f32 %v10847_v11, %v4608_v17  ;;  %v11028_v59 = vmul.f32 %v7807_v55, %v12871_v39  ;;  %v4934_v11 = vsel %vm12852_vm12, %v10489_v57, 0  ;;  %v4637_v17 = vsub.f32 %v10828_v63, %v4616_v38 }
 0xd06   :  { %v7809_v13 = vpop.eup %7808  ;;  %v4655_v1 = vmul.f32 1.442695, %v4633_v28  ;;  %v4663_v63 = vmul.f32 1.442695, %v4637_v17 }
 0xd07   :  { %v4612_v25 = vpop.xlane.xlu0 %4611  ;;  %v11025_v14 = vmul.f32 %v7809_v13, %v12870_v6  ;;  %v7811_v7 = vpop.eup %7810  ;;  %v12873_v13 = vld [vmem:[#allocation90_spill] sm:$0xff] }
 0xd08   :  { %7816 = vpow2.f32 %v4655_v1  ;;  %v4635_v60 = vsub.f32 %v10856_v8, %v4612_v25  ;;  %v12875_v8 = vld [vmem:[#allocation92_spill] sm:$0xff] }
 0xd09   :  { %7100 = vmatpush3.bf16.xpose.msra.mxu0 %v4934_v11  ;;  %v11042_v25 = vmul.f32 %v7811_v7, %v12875_v8  ;;  %7818 = vpow2.f32 %v4665_v24  ;;  %v12884_v8 = vld [vmem:[#allocation123_spill] sm:$0xff] }
 0xd0a   :  { %v7813_v50 = vpop.eup %7812  ;;  %7249 = vmatprep.subr.msk.bf16.mxu0 %vm12872_vm13, %v10548_v61  ;;  %v4659_v55 = vmul.f32 1.442695, %v4635_v60  ;;  %vm12877_vm13 = vmmov %vm12852_vm12  ;;  %v4940_v61 = vsel %vm12852_vm12, %v10502_v33, 0 }
 0xd0b   :  { %v4614_v28 = vpop.xlane.xlu0 %4613  ;;  %v11039_v1 = vmul.f32 %v7813_v50, %v12873_v13  ;;  %12876 = vst [vmem:[#allocation77_spill] sm:$0xff] %v11042_v25  ;;  %v11049_v39 = vpop.eup %7814  ;;  %v12955_v25 = vld [vmem:[#allocation99_spill] sm:$0xff] }
 0xd0c   :  { %v4636_v57 = vsub.f32 %v10861_v42, %v4614_v28  ;;  %7820 = vpow2.f32 %v4659_v55  ;;  %v12878_v42 = vpack.c.bf16 %v10647_v4, %v10644_v58  ;;  %v12881_v55 = vld [vmem:[#allocation125_spill] sm:$0xff]  ;;  %v12882_v28 = vld [vmem:[#allocation84_spill] sm:$0xff] }
 0xd0d   :  { %12874 = vst [vmem:[#allocation164_spill] sm:$0xff] %v11039_v1  ;;  %v12953_v1 = vld [vmem:[#allocation158_spill] sm:$0xff] }
 0xd0e   :  { %v4661_v6 = vmul.f32 1.442695, %v4636_v57  ;;  %v12887_v57 = vld [vmem:[#allocation19_spill] sm:$0xff] }
 0xd10   :  { %7822 = vpow2.f32 %v4661_v6  ;;  %v12889_v6 = vld [vmem:[#allocation83_spill] sm:$0xff] }
 0xd11   :  { %7824 = vpow2.f32 %v4663_v63  ;;  %7102 = vmatpush3.bf16.xpose.msra.mxu0 %v4937_v26  ;;  %v4624_v26 = vpop.xlane.xlu0 %4623 }
 0xd12   :  { %v11051_v60 = vpop.eup %7816  ;;  %7250 = vmatprep.subr.msk.bf16.mxu0 %vm12877_vm13, %v10502_v33  ;;  %3442 = vrot.lane.b32.xlu0 %v12878_v42, %s8115_s2  ;;  %vm12879_vm13 = vmmov %vm12852_vm12  ;;  %v4943_v33 = vsel %vm12852_vm12, %v10556_v12, 0 }
 0xd13   :  { %v4710_v7 = vpack.c.bf16 %v11049_v39, %v11051_v60  ;;  %v11061_v11 = vpop.eup %7818 }
 0xd15   :  { %7082 = vmatmul.mubr.bf16.gmra.mrb[244].mxu0 %v4710_v7  ;;  %v11095_v7 = vpop.permute.xlu0 %3438 }
 0xd16   :  { %v11065_v17 = vpop.eup %7820  ;;  %12890 = vst [vmem:[#allocation58_spill] sm:$0xff] %v11095_v7 }
 0xd19   :  { %7104 = vmatpush3.bf16.xpose.msra.mxu0 %v4940_v61 }
 0xd1a   :  { %v11067_v50 = vpop.eup %7822  ;;  %7251 = vmatprep.subr.msk.bf16.mxu0 %vm12879_vm13, %v10556_v12  ;;  %vm12883_vm13 = vmmov %vm12852_vm12  ;;  %v12886_v12 = vld [vmem:[#allocation23_spill] sm:$0xff] }
 0xd1b   :  { %v11071_v24 = vpop.eup %7824  ;;  %v4711_v4 = vpack.c.bf16 %v11067_v50, %v11065_v17  ;;  %v4946_v13 = vsel %vm12883_vm13, %v10570_v29, 0  ;;  %v12888_v63 = vpack.c.bf16 %v12886_v12, %v12887_v57  ;;  %vm12926_vm13 = vmmov %vm12852_vm12 }
 0xd1c   :  { %v4712_v58 = vpack.c.bf16 %v11061_v11, %v11071_v24 }
 0xd1d   :  { %7085 = vmatprep.mubr.bf16.mxu0 %v4711_v4 }
 0xd1e   :  { %7086 = vmatmul.mubr.bf16.gmra.mrb[248].mxu0 %v4712_v58 }
 0xd1f   :  { %4247 = vadd.xlane.f32.xlu1 %v10536_v49  ;;  %v11088_v49 = vpop.permute.xlu1 %3414 }
 0xd20   :  { %12885 = vst [vmem:[#allocation111_spill] sm:$0xff] %v11088_v49 }
 0xd21   :  { %7106 = vmatpush3.bf16.xpose.msra.mxu0 %v4943_v33 }
 0xd22   :  { %7252 = vmatprep.subr.msk.bf16.mxu0 %vm12880_vm14, %v10570_v29  ;;  %vm12913_vm14 = vmmov %vm12852_vm12 }
 0xd23   :  { %2757 = vadd.xlane.f32.xlu1 %v12881_v55 }
 0xd26   :  { %v4240_v42 = vpop.xlane.xlu1 %4239 }
 0xd27   :  { %1841 = vadd.xlane.f32.xlu1 %v12882_v28  ;;  %7826 = vrcp.f32 %v4240_v42  ;;  %v12891_v28 = vld [vmem:[#allocation15_spill] sm:$0xff] }
 0xd29   :  { %7108 = vmatpush3.bf16.xpose.msra.mxu0 %v4946_v13  ;;  %v12892_v13 = vld [vmem:[#allocation45_spill] sm:$0xff] }
 0xd2a   :  { %v2750_v61 = vpop.xlane.xlu1 %2749 }
 0xd31   :  { %4245 = vadd.xlane.f32.xlu0 %v10539_v3  ;;  %v1834_v3 = vpop.xlane.xlu1 %1833  ;;  %v7827_v33 = vpop.eup %7826 }
 0xd32   :  { %v11105_v57 = vmul.f32 %v7827_v33, %v10767_v56  ;;  %v12899_v56 = vld [vmem:[#allocation97_spill] sm:$0xff] }
 0xd34   :  { %12895 = vst [vmem:[#allocation71_spill] sm:$0xff] %v11105_v57 }
 0xd35   :  { %2755 = vadd.xlane.f32.xlu0 %v12884_v8  ;;  %v12893_v8 = vpack.c.bf16 %v12891_v28, %v12892_v13 }
 0xd38   :  { %3420 = vrot.lane.b32.xlu1 %v12888_v63, %s8115_s2 }
 0xd39   :  { %1839 = vadd.xlane.f32.xlu0 %v12889_v6  ;;  %v12900_v6 = vld [vmem:[#allocation37_spill] sm:$0xff] }
 0xd44   :  { %v4238_v29 = vpop.xlane.xlu0 %4237 }
 0xd45   :  { %7828 = vrcp.f32 %v4238_v29 }
 0xd46   :  { %7830 = vrcp.f32 %v2750_v61  ;;  %v12896_v61 = vld [vmem:[#allocation152_spill] sm:$0xff] }
 0xd48   :  { %v2748_v4 = vpop.xlane.xlu0 %2747 }
 0xd49   :  { %7832 = vrcp.f32 %v2748_v4 }
 0xd4a   :  { %7834 = vrcp.f32 %v1834_v3  ;;  %v12897_v3 = vld [vmem:[#allocation154_spill] sm:$0xff] }
 0xd4c   :  { %v1832_v58 = vpop.xlane.xlu0 %1831 }
 0xd4d   :  { %7836 = vrcp.f32 %v1832_v58 }
 0xd4f   :  { %v7829_v55 = vpop.eup %7828  ;;  %3444 = vrot.lane.b32.xlu0 %v12893_v8, %s8115_s2  ;;  %v12908_v8 = vld [vmem:[#allocation86_spill] sm:$0xff] }
 0xd50   :  { %v11102_v12 = vmul.f32 %v7829_v55, %v10763_v52  ;;  %v7831_v63 = vpop.eup %7830  ;;  %v12898_v55 = vld [vmem:[#allocation95_spill] sm:$0xff] }
 0xd51   :  { %v11113_v4 = vmul.f32 %v7831_v63, %v12897_v3  ;;  %v12902_v63 = vld [vmem:[#allocation124_spill] sm:$0xff]  ;;  %v12903_v3 = vld [vmem:[#allocation85_spill] sm:$0xff] }
 0xd52   :  { %12894 = vst [vmem:[#allocation116_spill] sm:$0xff] %v11102_v12 }
 0xd53   :  { %v7833_v42 = vpop.eup %7832 }
 0xd54   :  { %v11110_v29 = vmul.f32 %v7833_v42, %v12896_v61  ;;  %v7835_v58 = vpop.eup %7834  ;;  %v11126_v42 = vpop.permute.xlu1 %3416 }
 0xd55   :  { %v11121_v33 = vmul.f32 %v7835_v58, %v12899_v56  ;;  %12901 = vst [vmem:[#allocation76_spill] sm:$0xff] %v11126_v42  ;;  %v12999_v42 = vld [vmem:[#allocation69_spill] sm:$0xff] }
 0xd57   :  { %v7837_v52 = vpop.eup %7836 }
 0xd58   :  { %v11118_v13 = vmul.f32 %v7837_v52, %v12898_v55  ;;  %v12905_v55 = vld [vmem:[#allocation126_spill] sm:$0xff] }
 0xd5c   :  { %4251 = vadd.xlane.f32.xlu1 %v12900_v6  ;;  %v4641_v6 = vsub.f32 %v10866_v22, %v4624_v26 }
 0xd60   :  { %2761 = vadd.xlane.f32.xlu1 %v12902_v63  ;;  %v12906_v63 = vld [vmem:[#allocation103_spill] sm:$0xff] }
 0xd61   :  { %v12907_v28 = vpack.c.bf16 %v10695_v34, %v12906_v63 }
 0xd63   :  { %v4244_v61 = vpop.xlane.xlu1 %4243 }
 0xd64   :  { %1845 = vadd.xlane.f32.xlu1 %v12903_v3 }
 0xd67   :  { %v2754_v38 = vpop.xlane.xlu1 %2753 }
 0xd6b   :  { %v1838_v43 = vpop.xlane.xlu1 %1837 }
 0xd6e   :  { %4249 = vadd.xlane.f32.xlu0 %v12904_v21 }
 0xd6f   :  { %v4620_v52 = vpop.xlane.xlu1 %4619 }
 0xd70   :  { %v4639_v58 = vsub.f32 %v10904_v41, %v4620_v52  ;;  %v4671_v41 = vmul.f32 1.442695, %v4641_v6 }
 0xd72   :  { %2759 = vadd.xlane.f32.xlu0 %v12905_v55  ;;  %v4667_v3 = vmul.f32 1.442695, %v4639_v58  ;;  %v12914_v55 = vld [vmem:[#allocation104_spill] sm:$0xff] }
 0xd73   :  { %v4626_v56 = vpop.xlane.xlu1 %4625 }
 0xd74   :  { %v4642_v35 = vsub.f32 %v10910_v5, %v4626_v56  ;;  %7838 = vpow2.f32 %v4667_v3  ;;  %v11141_v5 = vpop.permute.xlu0 %3440  ;;  %v12915_v56 = vld [vmem:[#allocation27_spill] sm:$0xff] }
 0xd75   :  { %3422 = vrot.lane.b32.xlu1 %v12907_v28, %s8115_s2  ;;  %12909 = vst [vmem:[#allocation16_spill] sm:$0xff] %v11141_v5  ;;  %v12916_v6 = vpack.c.bf16 %v12914_v55, %v12915_v56  ;;  %v12927_v55 = vld [vmem:[#allocation94_spill] sm:$0xff] }
 0xd76   :  { %1843 = vadd.xlane.f32.xlu0 %v12908_v8  ;;  %v4673_v44 = vmul.f32 1.442695, %v4642_v35  ;;  %v13008_v5 = vld [vmem:[#allocation34_spill] sm:$0xff] }
 0xd77   :  { %v4622_v21 = vpop.xlane.xlu1 %4621 }
 0xd78   :  { %v4640_v12 = vsub.f32 %v10921_v9, %v4622_v21  ;;  %7840 = vpow2.f32 %v4673_v44 }
 0xd7a   :  { %v4669_v52 = vmul.f32 1.442695, %v4640_v12 }
 0xd7c   :  { %7842 = vpow2.f32 %v4669_v52 }
 0xd7d   :  { %7844 = vpow2.f32 %v4671_v41 }
 0xd7e   :  { %7846 = vrcp.f32 %v4244_v61  ;;  %v11143_v34 = vpop.eup %7838 }
 0xd7f   :  { %12910 = vst [vmem:[#allocation20_spill] sm:$0xff] %v11143_v34 }
 0xd81   :  { %v4242_v22 = vpop.xlane.xlu0 %4241 }
 0xd82   :  { %7848 = vrcp.f32 %v4242_v22  ;;  %v11145_v26 = vpop.eup %7840  ;;  %v12920_v22 = vld [vmem:[#allocation151_spill] sm:$0xff] }
 0xd83   :  { %7850 = vrcp.f32 %v2754_v38  ;;  %v12912_v38 = vld [vmem:[#allocation21_spill] sm:$0xff] }
 0xd85   :  { %v2752_v35 = vpop.xlane.xlu0 %2751 }
 0xd86   :  { %v11147_v28 = vpop.eup %7842  ;;  %7852 = vrcp.f32 %v2752_v35 }
 0xd87   :  { %v11149_v9 = vpop.eup %7844  ;;  %v4713_v44 = vpack.c.bf16 %v11147_v28, %v11143_v34  ;;  %7854 = vrcp.f32 %v1838_v43  ;;  %v12918_v43 = vld [vmem:[#allocation52_spill] sm:$0xff]  ;;  %v13009_v34 = vpack.c.bf16 %v13007_v36, %v13008_v5 }
 0xd88   :  { %12911 = vst [vmem:[#allocation128_spill] sm:$0xff] %v11149_v9  ;;  %v4714_v12 = vpack.c.bf16 %v11145_v26, %v11149_v9  ;;  %v7847_v61 = vpop.eup %7846  ;;  %v12948_v9 = vpack.c.bf16 %v11028_v59, %v11025_v14  ;;  %v12956_v14 = vld [vmem:[#allocation101_spill] sm:$0xff]  ;;  %v13018_v36 = vld [vmem:[#allocation180_spill] sm:$0xff] }
 0xd89   :  { %v1836_v8 = vpop.xlane.xlu0 %1835  ;;  %7089 = vmatprep.mubr.bf16.mxu0 %v4713_v44  ;;  %v11165_v3 = vmul.f32 %v7847_v61, %v12918_v43  ;;  %v12922_v44 = vld [vmem:[#allocation153_spill] sm:$0xff] }
 0xd8a   :  { %7856 = vrcp.f32 %v1836_v8  ;;  %7090 = vmatmul.mubr.bf16.gmra.mrb[252].mxu0 %v4714_v12 }
 0xd8b   :  { %7109 = vmatprep.mubr.msk.bf16.mxu0 %vm12913_vm14, %v12912_v38  ;;  %12919 = vst [vmem:[#allocation14_spill] sm:$0xff] %v11165_v3  ;;  %v12924_v38 = vld [vmem:[#allocation17_spill] sm:$0xff]  ;;  %vm12931_vm14 = vmmov %vm12852_vm12 }
 0xd8c   :  { %v7849_v58 = vpop.eup %7848  ;;  %3446 = vrot.lane.b32.xlu0 %v12916_v6, %s8115_s2  ;;  %v12928_v6 = vld [vmem:[#allocation96_spill] sm:$0xff] }
 0xd8d   :  { %v11162_v63 = vmul.f32 %v7849_v58, %v10773_v20  ;;  %v7851_v21 = vpop.eup %7850  ;;  %v12925_v20 = vld [vmem:[#allocation35_spill] sm:$0xff] }
 0xd8e   :  { %v11173_v12 = vmul.f32 %v7851_v21, %v12922_v44  ;;  %v12932_v44 = vld [vmem:[#allocation39_spill] sm:$0xff] }
 0xd8f   :  { %12917 = vst [vmem:[#allocation130_spill] sm:$0xff] %v11162_v63  ;;  %v12944_v63 = vld [vmem:[#allocation163_spill] sm:$0xff] }
 0xd90   :  { %v7853_v52 = vpop.eup %7852  ;;  %12923 = vst [vmem:[#allocation127_spill] sm:$0xff] %v11173_v12 }
 0xd91   :  { %v11170_v35 = vmul.f32 %v7853_v52, %v12920_v22  ;;  %v7855_v8 = vpop.eup %7854  ;;  %v12929_v52 = vld [vmem:[#allocation41_spill] sm:$0xff]  ;;  %v12930_v22 = vld [vmem:[#allocation31_spill] sm:$0xff] }
 0xd92   :  { %7110 = vmatmul.mubr.msk.bf16.vlgmr.msra.gmra.mrb[0].mxu0 %vm12852_vm12, %v12924_v38  ;;  %v11185_v43 = vmul.f32 %v7855_v8, %v12928_v6  ;;  %v12933_v38 = vld [vmem:[#allocation175_spill] sm:$0xff]  ;;  %v12941_v6 = vld [vmem:[#allocation174_spill] sm:$0xff] }
 0xd93   :  { %12921 = vst [vmem:[#allocation18_spill] sm:$0xff] %v11170_v35  ;;  %7113 = vmatprep.mubr.msk.bf16.mxu0 %vm12926_vm13, %v12925_v20  ;;  %v12934_v20 = vld [vmem:[#allocation25_spill] sm:$0xff]  ;;  %vm12935_vm13 = vmmov %vm12852_vm12  ;;  %v12936_v8 = vld [vmem:[#allocation43_spill] sm:$0xff] }
 0xd94   :  { %v7857_v58 = vpop.eup %7856 }
 0xd95   :  { %v11182_v56 = vmul.f32 %v7857_v58, %v12927_v55  ;;  %v12938_v58 = vld [vmem:[#allocation29_spill] sm:$0xff] }
 0xd96   :  { %v12940_v55 = vld [vmem:[#allocation33_spill] sm:$0xff] }
 0xd99   :  { %4255 = vadd.xlane.f32.xlu1 %v12929_v52  ;;  %v11204_v52 = vpop.permute.xlu1 %3418 }
 0xd9a   :  { %7114 = vmatmul.mubr.msk.bf16.gmra.mrb[4].mxu0 %vm12931_vm14, %v12930_v22  ;;  %12942 = vst [vmem:[#allocation129_spill] sm:$0xff] %v11204_v52  ;;  %vm12971_vm14 = vmmov %vm12937_vm0 }
 0xd9b   :  { %7117 = vmatprep.mubr.msk.bf16.mxu0 %vm12852_vm12, %v12932_v44  ;;  %v11207_v44 = vpop.permute.xlu0 %3442  ;;  %vm13069_vm12 = vmmov %vm12937_vm0 }
 0xd9c   :  { %12943 = vst [vmem:[#allocation24_spill] sm:$0xff] %v11207_v44 }
 0xd9d   :  { %3761 = vadd.xlane.f32.xlu1 %v12933_v38 }
 0xda1   :  { %4677 = vadd.xlane.f32.xlu1 %v10927_v32 }
 0xda2   :  { %7118 = vmatmul.mubr.msk.bf16.gmra.mrb[8].mxu0 %vm12935_vm13, %v12934_v20  ;;  %vm13076_vm13 = vmmov %vm12937_vm0 }
 0xda3   :  { %7121 = vmatprep.mubr.msk.bf16.mxu0 %vm12937_vm0, %v12936_v8 }
 0xdaa   :  { %7122 = vmatmul.mubr.msk.bf16.gmra.mrb[12].mxu0 %vm12939_vm9, %v12938_v58  ;;  %vm12949_vm9 = vmmov %vm12937_vm0 }
 0xdab   :  { %4253 = vadd.xlane.f32.xlu0 %v12940_v55 }
 0xdac   :  { %v4248_v22 = vpop.xlane.xlu1 %4247 }
 0xdad   :  { %7858 = vrcp.f32 %v4248_v22 }
 0xdaf   :  { %3759 = vadd.xlane.f32.xlu0 %v12941_v6 }
 0xdb0   :  { %v2758_v32 = vpop.xlane.xlu1 %2757 }
 0xdb3   :  { %4675 = vadd.xlane.f32.xlu0 %v10923_v46 }
 0xdb4   :  { %v1842_v20 = vpop.xlane.xlu1 %1841 }
 0xdb7   :  { %v7859_v61 = vpop.eup %7858 }
 0xdb8   :  { %v11247_v57 = vpop.permute.xlu1 %3420 }
 0xdb9   :  { %12957 = vst [vmem:[#allocation131_spill] sm:$0xff] %v11247_v57 }
 0xdbe   :  { %v4246_v38 = vpop.xlane.xlu0 %4245 }
 0xdbf   :  { %7860 = vrcp.f32 %v4246_v38 }
 0xdc0   :  { %7862 = vrcp.f32 %v2758_v32  ;;  %v12946_v32 = vld [vmem:[#allocation38_spill] sm:$0xff] }
 0xdc1   :  { %v11221_v3 = vmul.f32 %v7859_v61, %v12946_v32 }
 0xdc2   :  { %v2756_v8 = vpop.xlane.xlu0 %2755 }
 0xdc3   :  { %7864 = vrcp.f32 %v2756_v8  ;;  %v11209_v58 = vpop.f32.mrb[240].mxu0  ;;  %12947 = vst [vmem:[#allocation132_spill] sm:$0xff] %v11221_v3 }
 0xdc4   :  { %v11211_v55 = vpop.f32.mrb[241].mxu0  ;;  %7866 = vrcp.f32 %v1842_v20 }
 0xdc5   :  { %v11213_v6 = vpop.f32.mrb[242].mxu0 }
 0xdc6   :  { %v1840_v41 = vpop.xlane.xlu0 %1839  ;;  %v11215_v46 = vpop.f32.mrb[243].mxu0 }
 0xdc7   :  { %7868 = vrcp.f32 %v1840_v41  ;;  %v12951_v41 = vld [vmem:[#allocation156_spill] sm:$0xff] }
 0xdc9   :  { %v7861_v21 = vpop.eup %7860 }
 0xdca   :  { %v3445_v22 = vpop.permute.xlu0 %3444  ;;  %v11218_v38 = vmul.f32 %v7861_v21, %v12944_v63  ;;  %v7863_v8 = vpop.eup %7862 }
 0xdcb   :  { %v11227_v20 = vsel %vm12949_vm9, %v12948_v9, %v3445_v22  ;;  %v11235_v63 = vmul.f32 %v7863_v8, %v12953_v1  ;;  %vm13081_vm9 = vmmov %vm12937_vm0 }
 0xdcc   :  { %12945 = vst [vmem:[#allocation28_spill] sm:$0xff] %v11218_v38  ;;  %12950 = vst [vmem:[#allocation134_spill] sm:$0xff] %v11227_v20  ;;  %v12963_v20 = vld [vmem:[#allocation157_spill] sm:$0xff] }
 0xdcd   :  { %v7865_v35 = vpop.eup %7864  ;;  %12954 = vst [vmem:[#allocation26_spill] sm:$0xff] %v11235_v63 }
 0xdce   :  { %v11232_v12 = vmul.f32 %v7865_v35, %v12951_v41  ;;  %v7867_v21 = vpop.eup %7866 }
 0xdcf   :  { %v11243_v9 = vmul.f32 %v7867_v21, %v12956_v14 }
 0xdd0   :  { %12952 = vst [vmem:[#allocation22_spill] sm:$0xff] %v11232_v12  ;;  %v12961_v12 = vpack.c.bf16 %v11121_v33, %v11118_v13 }
 0xdd1   :  { %v7869_v32 = vpop.eup %7868 }
 0xdd2   :  { %v11240_v59 = vmul.f32 %v7869_v32, %v12955_v25 }
 0xde8   :  { %v11249_v35 = vpop.f32.mrb[244].mxu0 }
 0xde9   :  { %v11251_v1 = vpop.f32.mrb[245].mxu0  ;;  %v4252_v8 = vpop.xlane.xlu1 %4251 }
 0xdea   :  { %v11253_v41 = vpop.f32.mrb[246].mxu0 }
 0xdeb   :  { %v11255_v61 = vpop.f32.mrb[247].mxu0 }
 0xded   :  { %v2762_v38 = vpop.xlane.xlu1 %2761 }
 0xdee   :  { %7870 = vrcp.f32 %v2762_v38 }
 0xdf1   :  { %v11257_v25 = vpop.f32.mrb[248].mxu0  ;;  %v1846_v21 = vpop.xlane.xlu1 %1845 }
 0xdf2   :  { %12958 = vst [vmem:[#allocation133_spill] sm:$0xff] %v11257_v25  ;;  %7872 = vrcp.f32 %v1846_v21  ;;  %v11259_v32 = vpop.f32.mrb[249].mxu0 }
 0xdf3   :  { %12959 = vst [vmem:[#allocation166_spill] sm:$0xff] %v11259_v32  ;;  %v11261_v14 = vpop.f32.mrb[250].mxu0  ;;  %7874 = vrcp.f32 %v4252_v8  ;;  %v12965_v32 = vld [vmem:[#allocation100_spill] sm:$0xff] }
 0xdf4   :  { %12960 = vst [vmem:[#allocation168_spill] sm:$0xff] %v11261_v14  ;;  %v11263_v22 = vpop.f32.mrb[251].mxu0  ;;  %v13019_v14 = vld [vmem:[#allocation177_spill] sm:$0xff] }
 0xdf5   :  { %v3423_v3 = vpop.permute.xlu1 %3422 }
 0xdf6   :  { %v11269_v63 = vsel %vm12937_vm0, %v12961_v12, %v3423_v3  ;;  %v12966_v3 = vld [vmem:[#allocation46_spill] sm:$0xff] }
 0xdf7   :  { %12962 = vst [vmem:[#allocation136_spill] sm:$0xff] %v11269_v63  ;;  %v12968_v63 = vld [vmem:[#allocation73_spill] sm:$0xff] }
 0xdf8   :  { %v7871_v57 = vpop.eup %7870 }
 0xdf9   :  { %v11272_v38 = vmul.f32 %v7871_v57, %v12963_v20  ;;  %v12970_v20 = vpack.c.bf16 %v11113_v4, %v11110_v29 }
 0xdfb   :  { %12964 = vst [vmem:[#allocation138_spill] sm:$0xff] %v11272_v38  ;;  %v4250_v25 = vpop.xlane.xlu0 %4249 }
 0xdfc   :  { %v7873_v21 = vpop.eup %7872  ;;  %7876 = vrcp.f32 %v4250_v25 }
 0xdfd   :  { %v11275_v62 = vmul.f32 %v7873_v21, %v12965_v32  ;;  %v7875_v48 = vpop.eup %7874  ;;  %v12973_v32 = vld [vmem:[#allocation155_spill] sm:$0xff] }
 0xdfe   :  { %v11281_v57 = vmul.f32 %v7875_v48, %v12968_v63 }
 0xdff   :  { %v2760_v54 = vpop.xlane.xlu0 %2759 }
 0xe00   :  { %7878 = vrcp.f32 %v2760_v54  ;;  %12969 = vst [vmem:[#allocation167_spill] sm:$0xff] %v11281_v57 }
 0xe03   :  { %v1844_v52 = vpop.xlane.xlu0 %1843 }
 0xe04   :  { %7880 = vrcp.f32 %v1844_v52 }
 0xe06   :  { %v7877_v13 = vpop.eup %7876 }
 0xe07   :  { %v3447_v33 = vpop.permute.xlu0 %3446  ;;  %v11278_v12 = vmul.f32 %v7877_v13, %v12966_v3  ;;  %v12975_v3 = vld [vmem:[#allocation98_spill] sm:$0xff] }
 0xe08   :  { %v11287_v8 = vsel %vm12971_vm14, %v12970_v20, %v3447_v33  ;;  %v12976_v20 = vld [vmem:[#allocation44_spill] sm:$0xff]  ;;  %vm13093_vm14 = vmmov %vm12937_vm0 }
 0xe09   :  { %12967 = vst [vmem:[#allocation165_spill] sm:$0xff] %v11278_v12  ;;  %12972 = vst [vmem:[#allocation135_spill] sm:$0xff] %v11287_v8 }
 0xe0a   :  { %v7879_v25 = vpop.eup %7878 }
 0xe0b   :  { %v11292_v52 = vmul.f32 %v7879_v25, %v12973_v32  ;;  %v12978_v32 = vld [vmem:[#allocation191_spill] sm:$0xff] }
 0xe0d   :  { %12974 = vst [vmem:[#allocation137_spill] sm:$0xff] %v11292_v52 }
 0xe0e   :  { %v7881_v13 = vpop.eup %7880 }
 0xe0f   :  { %v11297_v48 = vmul.f32 %v7881_v13, %v12975_v3 }
 0xe26   :  { %v4256_v4 = vpop.xlane.xlu1 %4255 }
 0xe27   :  { %7882 = vrcp.f32 %v4256_v4  ;;  %v12979_v4 = vld [vmem:[#allocation107_spill] sm:$0xff] }
 0xe2a   :  { %v3762_v63 = vpop.xlane.xlu1 %3761 }
 0xe2b   :  { %7884 = vrcp.f32 %v3762_v63 }
 0xe2e   :  { %v4678_v57 = vpop.xlane.xlu1 %4677 }
 0xe31   :  { %v7883_v33 = vpop.eup %7882 }
 0xe32   :  { %v11302_v54 = vmul.f32 %v7883_v33, %v12976_v20  ;;  %v12981_v20 = vld [vmem:[#allocation189_spill] sm:$0xff] }
 0xe34   :  { %12977 = vst [vmem:[#allocation170_spill] sm:$0xff] %v11302_v54 }
 0xe35   :  { %v7885_v25 = vpop.eup %7884 }
 0xe36   :  { %v11305_v12 = vmul.f32 %v7885_v25, %v12978_v32 }
 0xe38   :  { %v4254_v21 = vpop.xlane.xlu0 %4253 }
 0xe39   :  { %7886 = vrcp.f32 %v4254_v21 }
 0xe3c   :  { %v3760_v13 = vpop.xlane.xlu0 %3759 }
 0xe3d   :  { %7888 = vrcp.f32 %v3760_v13 }
 0xe3e   :  { %7890 = vrcp.f32 %v4678_v57 }
 0xe40   :  { %v4676_v3 = vpop.xlane.xlu0 %4675 }
 0xe41   :  { %7892 = vrcp.f32 %v4676_v3 }
 0xe43   :  { %v7887_v29 = vpop.eup %7886 }
 0xe44   :  { %v11308_v52 = vmul.f32 %v7887_v29, %v12979_v4 }
 0xe46   :  { %12980 = vst [vmem:[#allocation172_spill] sm:$0xff] %v11308_v52 }
 0xe47   :  { %v7889_v33 = vpop.eup %7888 }
 0xe48   :  { %v11313_v38 = vmul.f32 %v7889_v33, %v12981_v20  ;;  %v7891_v25 = vpop.eup %7890 }
 0xe49   :  { %v11321_v13 = vmul.f32 %v7891_v25, %v11215_v46 }
 0xe4b   :  { %v7893_v32 = vpop.eup %7892  ;;  %12983 = vst [vmem:[#allocation142_spill] sm:$0xff] %v11321_v13 }
 0xe4c   :  { %v11318_v57 = vmul.f32 %v7893_v32, %v11211_v55 }
 0xe4e   :  { %12982 = vst [vmem:[#allocation140_spill] sm:$0xff] %v11318_v57 }
 0xe5d   :  { %v11325_v3 = vpop.f32.mrb[252].mxu0 }
 0xe5e   :  { %12984 = vst [vmem:[#allocation169_spill] sm:$0xff] %v11325_v3  ;;  %v11327_v4 = vpop.f32.mrb[253].mxu0 }
 0xe5f   :  { %12985 = vst [vmem:[#allocation171_spill] sm:$0xff] %v11327_v4  ;;  %v11329_v33 = vpop.f32.mrb[254].mxu0 }
 0xe60   :  { %12986 = vst [vmem:[#allocation139_spill] sm:$0xff] %v11329_v33  ;;  %v11331_v20 = vpop.f32.mrb[255].mxu0 }
 0xe61   :  { %12987 = vst [vmem:[#allocation141_spill] sm:$0xff] %v11331_v20 }
 0xe65   :  { %v7111_v63 = vpop.f32.mrb[0].mxu0 }
 0xe66   :  { %v5047_v52 = vsel %vm8890_vm1, %v7111_v63, -1.7014117e+38  ;;  %v4982_v55 = vpop.f32.mrb[1].mxu0  ;;  %vm13000_vm1 = vnez %v12999_v42 }
 0xe67   :  { %v5045_v46 = vsel %vm8897_vm2, %v4982_v55, -1.7014117e+38  ;;  %5065 = vmax.xlane.f32.xlu1 %v5047_v52  ;;  %v7112_v25 = vpop.f32.mrb[2].mxu0 }
 0xe68   :  { %5061 = vmax.xlane.f32.xlu0 %v5045_v46  ;;  %v4985_v29 = vpop.f32.mrb[3].mxu0  ;;  %v5048_v13 = vsel %vm8912_vm3, %v7112_v25, -1.7014117e+38  ;;  %vm13003_vm3 = vnez %v12841_v15  ;;  %v13011_v15 = vld [vmem:[#allocation176_spill] sm:$0xff] }
 0xe69   :  { %v5046_v54 = vsel %vm8918_vm4, %v4985_v29, -1.7014117e+38  ;;  %vm13027_vm4 = vmmov %vm12937_vm0 }
 0xe6b   :  { %5067 = vmax.xlane.f32.xlu1 %v5048_v13 }
 0xe6d   :  { %v7115_v3 = vpop.f32.mrb[4].mxu0 }
 0xe6e   :  { %v4998_v4 = vpop.f32.mrb[5].mxu0  ;;  %v11348_v47 = vsel %vm8949_vm6, %v7115_v3, -1.7014117e+38  ;;  %vm13029_vm6 = vnez %v12843_v31  ;;  %v7475_v31 = vld [vmem:[#allocation7 + $0x70] ss:$8 sps:$4 sm:$0xff]  }
 0xe6f   :  { %v11343_v63 = vsel %vm12664_vm10, %v4998_v4, -1.7014117e+38  ;;  %5063 = vmax.xlane.f32.xlu1 %v5046_v54  ;;  %v7116_v21 = vpop.f32.mrb[6].mxu0  ;;  %vm13043_vm10 = vmmov %vm12937_vm0 }
 0xe70   :  { %5069 = vmax.xlane.f32.xlu0 %v11343_v63  ;;  %v5001_v55 = vpop.f32.mrb[7].mxu0  ;;  %v11353_v29 = vsel %vm12665_vm11, %v7116_v21, -1.7014117e+38  ;;  %vm13050_vm11 = vmmov %vm12937_vm0 }
 0xe71   :  { %v11363_v27 = vsel %vm12599_vm8, %v5001_v55, -1.7014117e+38  ;;  %vm13030_vm8 = vnez %v12845_v23  ;;  %v7483_v23 = vld [vmem:[#allocation7 + $0x94] ss:$8 sps:$4 sm:$0xff]  }
 0xe73   :  { %5073 = vmax.xlane.f32.xlu1 %v11348_v47 }
 0xe75   :  { %v7119_v57 = vpop.f32.mrb[8].mxu0 }
 0xe76   :  { %v11357_v8 = vsel %vm12667_vm7, %v7119_v57, -1.7014117e+38  ;;  %v5014_v4 = vpop.f32.mrb[9].mxu0  ;;  %vm13063_vm7 = vmmov %vm12937_vm0 }
 0xe77   :  { %5075 = vmax.xlane.f32.xlu1 %v11353_v29  ;;  %5081 = vmax.xlane.f32.xlu0 %v11357_v8  ;;  %v7120_v44 = vpop.f32.mrb[10].mxu0  ;;  %v11367_v25 = vsel %vm12666_vm5, %v5014_v4, -1.7014117e+38  ;;  %v13001_v4 = vld [vmem:[#allocation64_spill] sm:$0xff]  ;;  %vm13056_vm5 = vmmov %vm12937_vm0 }
 0xe78   :  { %v5017_v32 = vpop.f32.mrb[11].mxu0  ;;  %v11373_v33 = vsel %vm12602_vm15, %v7120_v44, -1.7014117e+38  ;;  %vm13002_vm2 = vnez %v13001_v4  ;;  %v13004_v44 = vld [vmem:[#allocation48_spill] sm:$0xff]  ;;  %v13013_v4 = vld [vmem:[#allocation110_spill] sm:$0xff]  ;;  %vm13037_vm15 = vmmov %vm12937_vm0 }
 0xe79   :  { %v11377_v20 = vsel %vm13000_vm1, %v5017_v32, -1.7014117e+38  ;;  %v13005_v32 = vld [vmem:[#allocation40_spill] sm:$0xff]  ;;  %vm13099_vm1 = vmmov %vm12937_vm0 }
 0xe7a   :  { %v13006_v57 = vpack.c.bf16 %v13004_v44, %v13005_v32  ;;  %v13015_v44 = vld [vmem:[#allocation32_spill] sm:$0xff]  ;;  %v13016_v32 = vld [vmem:[#allocation42_spill] sm:$0xff] }
 0xe7b   :  { %5071 = vmax.xlane.f32.xlu1 %v11363_v27  ;;  %5077 = vmax.xlane.f32.xlu0 %v11367_v25 }
 0xe7d   :  { %v7123_v21 = vpop.f32.mrb[12].mxu0 }
 0xe7e   :  { %v5030_v3 = vpop.f32.mrb[13].mxu0  ;;  %v11387_v2 = vsel %vm13002_vm2, %v7123_v21, -1.7014117e+38  ;;  %v13010_v21 = vld [vmem:[#allocation173_spill] sm:$0xff]  ;;  %vm13100_vm2 = vmmov %vm12937_vm0 }
 0xe7f   :  { %5083 = vmax.xlane.f32.xlu0 %v11373_v33  ;;  %5079 = vmax.xlane.f32.xlu1 %v11377_v20  ;;  %v11381_v37 = vpop.f32.mrb[14].mxu0  ;;  %v11392_v42 = vsel %vm13003_vm3, %v5030_v3, -1.7014117e+38  ;;  %v13012_v3 = vld [vmem:[#allocation102_spill] sm:$0xff]  ;;  %vm13105_vm3 = vmmov %vm12937_vm0 }
 0xe80   :  { %v11383_v55 = vpop.f32.mrb[15].mxu0  ;;  %v13014_v49 = vpack.c.bf16 %v13012_v3, %v13013_v4 }
 0xe83   :  { %5089 = vmax.xlane.f32.xlu0 %v11387_v2 }
 0xe87   :  { %5085 = vmax.xlane.f32.xlu0 %v11392_v42 }
 0xe90   :  { %3424 = vrot.lane.b32.xlu1 %v13006_v57, %s8115_s2  ;;  %v13017_v57 = vpack.c.bf16 %v13015_v44, %v13016_v32 }
 0xe9d   :  { %3448 = vrot.lane.b32.xlu0 %v13009_v34, %s8115_s2 }
 0xeb4   :  { %4679 = vadd.xlane.f32.xlu1 %v10935_v18 }
 0xeb8   :  { %3765 = vadd.xlane.f32.xlu1 %v13010_v21 }
 0xebc   :  { %4681 = vadd.xlane.f32.xlu0 %v10916_v51 }
 0xec0   :  { %3763 = vadd.xlane.f32.xlu0 %v13011_v15 }
 0xec9   :  { %3426 = vrot.lane.b32.xlu1 %v13014_v49, %s8115_s2 }
 0xed6   :  { %3450 = vrot.lane.b32.xlu0 %v13017_v57, %s8115_s2 }
 0xeed   :  { %4683 = vadd.xlane.f32.xlu1 %v10965_v45 }
 0xef1   :  { %3769 = vadd.xlane.f32.xlu1 %v13018_v36 }
 0xef4   :  { %v5066_v18 = vpop.xlane.xlu1 %5065 }
 0xef5   :  { %v5062_v5 = vpop.xlane.xlu0 %5061  ;;  %4685 = vadd.xlane.f32.xlu0 %v10974_v40  ;;  %v5095_v51 = vsub.f32 %v5047_v52, %v5066_v18  ;;  %v13020_v40 = vld [vmem:[#allocation105_spill] sm:$0xff]  ;;  %v13021_v52 = vld [vmem:[#allocation50_spill] sm:$0xff] }
 0xef6   :  { %v5093_v34 = vsub.f32 %v5045_v46, %v5062_v5  ;;  %v13022_v46 = vpack.c.bf16 %v13020_v40, %v13021_v52  ;;  %v7454_v52 = vld [vmem:[#allocation7] ss:$8 sps:$4 sm:$0xff]  }
 0xef7   :  { %v5113_v49 = vmul.f32 1.442695, %v5095_v51 }
 0xef8   :  { %v5068_v21 = vpop.xlane.xlu1 %5067  ;;  %v5109_v4 = vmul.f32 1.442695, %v5093_v34 }
 0xef9   :  { %v5096_v15 = vsub.f32 %v5048_v13, %v5068_v21  ;;  %3767 = vadd.xlane.f32.xlu0 %v13019_v14  ;;  %7894 = vpow2.f32 %v5113_v49 }
 0xefb   :  { %v5115_v3 = vmul.f32 1.442695, %v5096_v15 }
 0xefc   :  { %v5064_v7 = vpop.xlane.xlu1 %5063 }
 0xefd   :  { %v5094_v44 = vsub.f32 %v5046_v54, %v5064_v7  ;;  %7896 = vpow2.f32 %v5115_v3  ;;  %v5070_v32 = vpop.xlane.xlu0 %5069 }
 0xefe   :  { %7898 = vpow2.f32 %v5109_v4  ;;  %v5097_v13 = vsub.f32 %v11343_v63, %v5070_v32  ;;  %v7456_v63 = vld [vmem:[#allocation7 + $0x4] ss:$8 sps:$4 sm:$0xff]  }
 0xeff   :  { %v5111_v45 = vmul.f32 1.442695, %v5094_v44  ;;  %5666 = vmatprep.subr.bf16.mxu1 %v7456_v63 }
 0xf00   :  { %v5074_v57 = vpop.xlane.xlu1 %5073  ;;  %v5117_v5 = vmul.f32 1.442695, %v5097_v13  ;;  %v7459_v13 = vld [vmem:[#allocation7 + $0x14] ss:$8 sps:$4 sm:$0xff]  }
 0xf01   :  { %7900 = vpow2.f32 %v5111_v45  ;;  %v5099_v7 = vsub.f32 %v11348_v47, %v5074_v57 }
 0xf02   :  { %3428 = vrot.lane.b32.xlu1 %v13022_v46, %s8115_s2  ;;  %7902 = vpow2.f32 %v5117_v5  ;;  %v13024_v5 = vld [vmem:[#allocation159_spill] sm:$0xff] }
 0xf03   :  { %v11426_v54 = vpop.eup %7894 }
 0xf04   :  { %v5082_v14 = vpop.xlane.xlu0 %5081  ;;  %v5076_v36 = vpop.xlane.xlu1 %5075 }
 0xf05   :  { %v5100_v18 = vsub.f32 %v11353_v29, %v5076_v36  ;;  %v5121_v29 = vmul.f32 1.442695, %v5099_v7  ;;  %v5103_v36 = vsub.f32 %v11357_v8, %v5082_v14  ;;  %v13023_v7 = vld [vmem:[#allocation30_spill] sm:$0xff] }
 0xf07   :  { %v11428_v21 = vpop.eup %7896  ;;  %v5123_v15 = vmul.f32 1.442695, %v5100_v18  ;;  %v5129_v8 = vmul.f32 1.442695, %v5103_v36  ;;  %v7468_v36 = vld [vmem:[#allocation7 + $0x44] ss:$8 sps:$4 sm:$0xff]  }
 0xf08   :  { %v5078_v51 = vpop.xlane.xlu0 %5077  ;;  %v5072_v34 = vpop.xlane.xlu1 %5071  ;;  %v5174_v40 = vpack.c.bf16 %v11428_v21, %v11426_v54 }
 0xf09   :  { %v5101_v49 = vsub.f32 %v11367_v25, %v5078_v51  ;;  %v5098_v3 = vsub.f32 %v11363_v27, %v5072_v34  ;;  %v11432_v4 = vpop.eup %7898  ;;  %7904 = vpow2.f32 %v5123_v15  ;;  %v13025_v51 = vpack.c.bf16 %v13023_v7, %v13024_v5  ;;  %v7457_v15 = vld [vmem:[#allocation7 + $0x10] ss:$8 sps:$4 sm:$0xff]   ;;  %v7471_v7 = vld [vmem:[#allocation7 + $0x54] ss:$8 sps:$4 sm:$0xff]  }
 0xf0a   :  { %v13028_v5 = vld [vmem:[#allocation178_spill] sm:$0xff] }
 0xf0b   :  { %v11434_v44 = vpop.eup %7900  ;;  %v5119_v45 = vmul.f32 1.442695, %v5098_v3  ;;  %v5125_v27 = vmul.f32 1.442695, %v5101_v49 }
 0xf0c   :  { %v5084_v47 = vpop.xlane.xlu0 %5083  ;;  %v5080_v32 = vpop.xlane.xlu1 %5079  ;;  %v5173_v57 = vpack.c.bf16 %v11434_v44, %v11432_v4 }
 0xf0d   :  { %v5104_v25 = vsub.f32 %v11373_v33, %v5084_v47  ;;  %v5102_v46 = vsub.f32 %v11377_v20, %v5080_v32  ;;  %7906 = vpow2.f32 %v5119_v45  ;;  %v13026_v20 = vpack.c.bf16 %v11185_v43, %v11182_v56  ;;  %v11453_v14 = vpop.eup %7902 }
 0xf0e   :  { %7141 = vmatprep.mubr.bf16.mxu1 %v5173_v57  ;;  %7908 = vpow2.f32 %v5121_v29 }
 0xf0f   :  { %v5127_v18 = vmul.f32 1.442695, %v5102_v46  ;;  %3452 = vrot.lane.b32.xlu0 %v13025_v51, %s8115_s2  ;;  %7142 = vmatmul.mubr.bf16.vlgmr.msra.gmra.mrb[160].mxu1 %v5174_v40  ;;  %7910 = vpow2.f32 %v5125_v27  ;;  %v5131_v33 = vmul.f32 1.442695, %v5104_v25  ;;  %v7460_v40 = vld [vmem:[#allocation7 + $0x20] ss:$8 sps:$4 sm:$0xff]  }
 0xf10   :  { %v3425_v34 = vpop.permute.xlu1 %3424  ;;  %5667 = vmatpush1.bf16.msra.mxu1 %v7454_v52  ;;  %v7462_v52 = vld [vmem:[#allocation7 + $0x24] ss:$8 sps:$4 sm:$0xff]   ;;  %v7463_v46 = vld [vmem:[#allocation7 + $0x30] ss:$8 sps:$4 sm:$0xff]  }
 0xf11   :  { %5668 = vmatprep.subr.bf16.mxu1 %v7459_v13  ;;  %v11451_v49 = vsel %vm13027_vm4, %v13026_v20, %v3425_v34  ;;  %7912 = vpow2.f32 %v5127_v18  ;;  %v7465_v13 = vld [vmem:[#allocation7 + $0x34] ss:$8 sps:$4 sm:$0xff]   ;;  %v7466_v18 = vld [vmem:[#allocation7 + $0x40] ss:$8 sps:$4 sm:$0xff]   ;;  %v7469_v51 = vld [vmem:[#allocation7 + $0x50] ss:$8 sps:$4 sm:$0xff]  }
 0xf12   :  { %7914 = vpow2.f32 %v5131_v33  ;;  %v7474_v34 = vld [vmem:[#allocation7 + $0x64] ss:$8 sps:$4 sm:$0xff]   ;;  %v11489_v33 = vsel %vm13030_vm8, %v11383_v55, -1.7014117e+38  ;;  %v7481_v55 = vld [vmem:[#allocation7 + $0x90] ss:$8 sps:$4 sm:$0xff]   ;;  %vm13110_vm4 = vmmov %vm12937_vm0 }
 0xf13   :  { %v11455_v3 = vpop.eup %7904  ;;  %7916 = vpow2.f32 %v5129_v8  ;;  %v13031_v20 = vld [vmem:[#allocation181_spill] sm:$0xff]  ;;  %vm13142_vm8 = vmmov %vm12937_vm0 }
 0xf14   :  { %5669 = vmatpush1.bf16.msra.mxu1 %v7457_v15  ;;  %v11482_v15 = vsel %vm13029_vm6, %v11381_v37, -1.7014117e+38  ;;  %v7477_v37 = vld [vmem:[#allocation7 + $0x74] ss:$8 sps:$4 sm:$0xff]   ;;  %v7480_v8 = vld [vmem:[#allocation7 + $0x84] ss:$8 sps:$4 sm:$0xff]   ;;  %vm13116_vm6 = vmmov %vm12937_vm0 }
 0xf15   :  { %5670 = vmatprep.subr.bf16.mxu1 %v7462_v52  ;;  %v13033_v52 = vld [vmem:[#allocation183_spill] sm:$0xff] }
 0xf17   :  { %v11457_v63 = vpop.eup %7906 }
 0xf18   :  { %v11459_v29 = vpop.eup %7908  ;;  %v5175_v45 = vpack.c.bf16 %v11457_v63, %v11453_v14  ;;  %5671 = vmatpush1.bf16.msra.mxu1 %v7460_v40 }
 0xf19   :  { %v5176_v56 = vpack.c.bf16 %v11455_v3, %v11459_v29  ;;  %v11465_v43 = vpop.eup %7910  ;;  %5672 = vmatprep.subr.bf16.mxu1 %v7465_v13 }
 0xf1a   :  { %7145 = vmatprep.mubr.bf16.mxu1 %v5175_v45  ;;  %v11494_v45 = vpop.xlane.xlu0 %5089 }
 0xf1b   :  { %v11467_v47 = vpop.eup %7912  ;;  %7146 = vmatmul.mubr.bf16.gmra.mrb[164].mxu1 %v5176_v56  ;;  %v13032_v56 = vld [vmem:[#allocation182_spill] sm:$0xff] }
 0xf1c   :  { %v5177_v32 = vpack.c.bf16 %v11467_v47, %v11465_v43  ;;  %v11471_v57 = vpop.eup %7914  ;;  %5673 = vmatpush1.bf16.msra.mxu1 %v7463_v46  ;;  %v13034_v46 = vpack.c.bf16 %v10930_v10, %v10933_v19  ;;  %v13036_v10 = vpack.c.bf16 %v11243_v9, %v11240_v59  ;;  %v7496_v9 = vld [vmem:[#allocation7 + $0xe0] ss:$8 sps:$4 sm:$0xff]  }
 0xf1d   :  { %v11473_v27 = vpop.eup %7916  ;;  %5674 = vmatprep.subr.bf16.mxu1 %v7468_v36  ;;  %v7487_v36 = vld [vmem:[#allocation7 + $0xb0] ss:$8 sps:$4 sm:$0xff]  }
 0xf1e   :  { %7149 = vmatprep.mubr.bf16.mxu1 %v5177_v32  ;;  %v5178_v25 = vpack.c.bf16 %v11471_v57, %v11473_v27  ;;  %v11498_v32 = vpop.xlane.xlu0 %5085 }
 0xf20   :  { %5675 = vmatpush1.bf16.msra.mxu1 %v7466_v18  ;;  %v7489_v18 = vld [vmem:[#allocation7 + $0xb4] ss:$8 sps:$4 sm:$0xff]  }
 0xf21   :  { %5676 = vmatprep.subr.bf16.mxu1 %v7471_v7  ;;  %v7490_v7 = vld [vmem:[#allocation7 + $0xc0] ss:$8 sps:$4 sm:$0xff]  }
 0xf22   :  { %v11505_v13 = vpop.permute.xlu0 %3448 }
 0xf23   :  { %7150 = vmatmul.mubr.bf16.gmra.mrb[168].mxu1 %v5178_v25  ;;  %v7484_v25 = vld [vmem:[#allocation7 + $0xa0] ss:$8 sps:$4 sm:$0xff]  }
 0xf24   :  { %5677 = vmatpush1.bf16.msra.mxu1 %v7469_v51 }
 0xf25   :  { %5678 = vmatprep.subr.bf16.mxu1 %v7474_v34 }
 0xf26   :  { %4687 = vadd.xlane.f32.xlu1 %v11051_v60  ;;  %v7472_v60 = vld [vmem:[#allocation7 + $0x60] ss:$8 sps:$4 sm:$0xff]  }
 0xf28   :  { %5679 = vmatpush1.bf16.msra.mxu1 %v7472_v60  ;;  %v13035_v60 = vld [vmem:[#allocation185_spill] sm:$0xff] }
 0xf29   :  { %5680 = vmatprep.subr.bf16.mxu1 %v7477_v37 }
 0xf2a   :  { %3773 = vadd.xlane.f32.xlu1 %v13028_v5  ;;  %v7492_v5 = vld [vmem:[#allocation7 + $0xc4] ss:$8 sps:$4 sm:$0xff]  }
 0xf2c   :  { %5681 = vmatpush1.bf16.msra.mxu1 %v7475_v31  ;;  %v7493_v31 = vld [vmem:[#allocation7 + $0xd0] ss:$8 sps:$4 sm:$0xff]  }
 0xf2d   :  { %5682 = vmatprep.subr.bf16.mxu1 %v7480_v8 }
 0xf2e   :  { %4689 = vadd.xlane.f32.xlu0 %v11049_v39  ;;  %5091 = vmax.xlane.f32.xlu1 %v11482_v15  ;;  %v7478_v39 = vld [vmem:[#allocation7 + $0x80] ss:$8 sps:$4 sm:$0xff]  }
 0xf30   :  { %5683 = vmatpush1.bf16.msra.mxu1 %v7478_v39 }
 0xf31   :  { %5684 = vmatprep.subr.bf16.mxu1 %v7483_v23  ;;  %v13038_v23 = vld [vmem:[#allocation190_spill] sm:$0xff] }
 0xf32   :  { %3771 = vadd.xlane.f32.xlu0 %v13031_v20  ;;  %5087 = vmax.xlane.f32.xlu1 %v11489_v33 }
 0xf34   :  { %5685 = vmatpush1.bf16.msra.mxu1 %v7481_v55 }
 0xf36   :  { %4693 = vadd.xlane.f32.xlu0 %v11067_v50  ;;  %v7486_v50 = vld [vmem:[#allocation7 + $0xa4] ss:$8 sps:$4 sm:$0xff]  }
 0xf37   :  { %5686 = vmatprep.subr.bf16.mxu1 %v7486_v50  ;;  %v7501_v50 = vld [vmem:[#allocation7 + $0xf4] ss:$8 sps:$4 sm:$0xff]  }
 0xf38   :  { %5687 = vmatpush1.bf16.msra.mxu1 %v7484_v25  ;;  %v13039_v25 = vld [vmem:[#allocation114_spill] sm:$0xff] }
 0xf39   :  { %5688 = vmatprep.subr.bf16.mxu1 %v7489_v18 }
 0xf3a   :  { %3775 = vadd.xlane.f32.xlu0 %v13032_v56  ;;  %v7498_v56 = vld [vmem:[#allocation7 + $0xe4] ss:$8 sps:$4 sm:$0xff]  }
 0xf3c   :  { %5689 = vmatpush1.bf16.msra.mxu1 %v7487_v36 }
 0xf3d   :  { %5690 = vmatprep.subr.bf16.mxu1 %v7492_v5 }
 0xf3e   :  { %4697 = vadd.xlane.f32.xlu0 %v11061_v11 }
 0xf40   :  { %5691 = vmatpush1.bf16.msra.mxu1 %v7490_v7 }
 0xf41   :  { %v4680_v40 = vpop.xlane.xlu1 %4679 }
 0xf42   :  { %7918 = vrcp.f32 %v4680_v40  ;;  %3779 = vadd.xlane.f32.xlu0 %v13033_v52  ;;  %v7499_v40 = vld [vmem:[#allocation7 + $0xf0] ss:$8 sps:$4 sm:$0xff]  }
 0xf43   :  { %5358 = vrot.lane.b32.xlu1 %v13034_v46, %s8115_s2 }
 0xf45   :  { %v3766_v11 = vpop.xlane.xlu1 %3765 }
 0xf46   :  { %7920 = vrcp.f32 %v3766_v11  ;;  %4701 = vadd.xlane.f32.xlu0 %v11147_v28  ;;  %v7495_v28 = vld [vmem:[#allocation7 + $0xd4] ss:$8 sps:$4 sm:$0xff]   ;;  %v13041_v11 = vpack.c.bf16 %v10972_v30, %v10969_v0 }
 0xf47   :  { %5692 = vmatprep.subr.bf16.mxu1 %v7495_v28  ;;  %v13044_v30 = vld [vmem:[#allocation195_spill] sm:$0xff] }
 0xf48   :  { %5693 = vmatpush1.bf16.msra.mxu1 %v7493_v31  ;;  %v13046_v31 = vld [vmem:[#allocation184_spill] sm:$0xff] }
 0xf49   :  { %v4682_v51 = vpop.xlane.xlu0 %4681  ;;  %v3427_v34 = vpop.permute.xlu1 %3426  ;;  %5694 = vmatprep.subr.bf16.mxu1 %v7498_v56  ;;  %v5107_v56 = vsub.f32 %v11387_v2, %v11494_v45 }
 0xf4a   :  { %7922 = vrcp.f32 %v4682_v51  ;;  %3783 = vadd.xlane.f32.xlu0 %v13035_v60  ;;  %v11513_v19 = vsel %vm13037_vm15, %v13036_v10, %v3427_v34  ;;  %v13045_v10 = vld [vmem:[#allocation193_spill] sm:$0xff]  ;;  %vm13143_vm15 = vmmov %vm12937_vm0 }
 0xf4c   :  { %v7919_v20 = vpop.eup %7918  ;;  %5695 = vmatpush1.bf16.msra.mxu1 %v7496_v9 }
 0xf4d   :  { %v3764_v37 = vpop.xlane.xlu0 %3763  ;;  %v11516_v39 = vmul.f32 %v7919_v20, %v11209_v58  ;;  %5696 = vmatprep.subr.bf16.mxu1 %v7501_v50  ;;  %v5137_v50 = vmul.f32 1.442695, %v5107_v56 }
 0xf4e   :  { %7924 = vrcp.f32 %v3764_v37  ;;  %5145 = vadd.xlane.f32.xlu0 %v11426_v54 }
 0xf50   :  { %v7921_v8 = vpop.eup %7920  ;;  %5697 = vmatpush1.bf16.msra.mxu1 %v7499_v40 }
 0xf51   :  { %v11520_v59 = vmul.f32 %v7921_v8, %v13038_v23  ;;  %v5105_v23 = vsub.f32 %v11392_v42, %v11498_v32 }
 0xf52   :  { %5141 = vadd.xlane.f32.xlu0 %v11432_v4 }
 0xf54   :  { %v7923_v55 = vpop.eup %7922 }
 0xf55   :  { %v11524_v58 = vmul.f32 %v7923_v55, %v11213_v6  ;;  %v13040_v6 = vld [vmem:[#allocation179_spill] sm:$0xff] }
 0xf56   :  { %5149 = vadd.xlane.f32.xlu0 %v11453_v14 }
 0xf57   :  { %v4845_v54 = vpack.c.bf16 %v11524_v58, %v11516_v39 }
 0xf58   :  { %v7925_v52 = vpop.eup %7924 }
 0xf59   :  { %v11530_v46 = vmul.f32 %v7925_v52, %v13039_v25 }
 0xf5a   :  { %5155 = vadd.xlane.f32.xlu0 %v11455_v3  ;;  %v11544_v3 = vpop.permute.xlu0 %3450 }
 0xf5b   :  { %v3929_v4 = vpack.c.bf16 %v11520_v59, %v11530_v46  ;;  %v13106_v59 = vld [vmem:[#allocation199_spill] sm:$0xff] }
 0xf5e   :  { %5163 = vadd.xlane.f32.xlu0 %v11471_v57 }
 0xf62   :  { %5159 = vadd.xlane.f32.xlu0 %v11467_v47 }
 0xf66   :  { %4705 = vadd.xlane.f32.xlu0 %v11145_v26  ;;  %v13042_v26 = vpack.c.bf16 %v11275_v62, %v11297_v48 }
 0xf67   :  { %4691 = vadd.xlane.f32.xlu1 %v11065_v17 }
 0xf6b   :  { %3777 = vadd.xlane.f32.xlu1 %v13040_v6 }
 0xf7a   :  { %v4684_v14 = vpop.xlane.xlu1 %4683 }
 0xf7b   :  { %7926 = vrcp.f32 %v4684_v14 }
 0xf7c   :  { %5360 = vrot.lane.b32.xlu1 %v13041_v11, %s8115_s2 }
 0xf7e   :  { %v3770_v36 = vpop.xlane.xlu1 %3769 }
 0xf7f   :  { %7928 = vrcp.f32 %v3770_v36  ;;  %v13049_v36 = vpack.c.bf16 %v11305_v12, %v11313_v38  ;;  %v13051_v38 = vld [vmem:[#allocation192_spill] sm:$0xff] }
 0xf82   :  { %v4686_v57 = vpop.xlane.xlu0 %4685  ;;  %v3429_v18 = vpop.permute.xlu1 %3428 }
 0xf83   :  { %7930 = vrcp.f32 %v4686_v57  ;;  %v11550_v17 = vsel %vm13043_vm10, %v13042_v26, %v3429_v18  ;;  %vm13144_vm10 = vmmov %vm12937_vm0 }
 0xf85   :  { %v7927_v47 = vpop.eup %7926 }
 0xf86   :  { %v3768_v7 = vpop.xlane.xlu0 %3767  ;;  %v11553_v5 = vmul.f32 %v7927_v47, %v11251_v1 }
 0xf87   :  { %7932 = vrcp.f32 %v3768_v7 }
 0xf89   :  { %v7929_v0 = vpop.eup %7928 }
 0xf8a   :  { %v11556_v51 = vmul.f32 %v7929_v0, %v13044_v30  ;;  %v11574_v37 = vpop.permute.xlu0 %3452 }
 0xf8d   :  { %v7931_v34 = vpop.eup %7930 }
 0xf8e   :  { %v11559_v60 = vmul.f32 %v7931_v34, %v11255_v61  ;;  %v13047_v61 = vpack.c.bf16 %v11015_v53, %v11018_v16  ;;  %v5133_v53 = vmul.f32 1.442695, %v5105_v23  ;;  %v13052_v23 = vld [vmem:[#allocation58_spill] sm:$0xff] }
 0xf90   :  { %v4846_v62 = vpack.c.bf16 %v11559_v60, %v11553_v5 }
 0xf91   :  { %v7933_v48 = vpop.eup %7932 }
 0xf92   :  { %v11564_v20 = vmul.f32 %v7933_v48, %v13045_v10 }
 0xf94   :  { %v3930_v1 = vpack.c.bf16 %v11556_v51, %v11564_v20  ;;  %v13120_v51 = vld [vmem:[#allocation130_spill] sm:$0xff] }
 0xfa0   :  { %4695 = vadd.xlane.f32.xlu1 %v11071_v24 }
 0xfa4   :  { %3781 = vadd.xlane.f32.xlu1 %v13046_v31 }
 0xfb3   :  { %v4688_v28 = vpop.xlane.xlu1 %4687 }
 0xfb4   :  { %7934 = vrcp.f32 %v4688_v28 }
 0xfb5   :  { %5362 = vrot.lane.b32.xlu1 %v13047_v61, %s8115_s2 }
 0xfb7   :  { %v3774_v8 = vpop.xlane.xlu1 %3773 }
 0xfb8   :  { %7936 = vrcp.f32 %v3774_v8 }
 0xfbb   :  { %v4690_v24 = vpop.xlane.xlu0 %4689  ;;  %v5092_v9 = vpop.xlane.xlu1 %5091 }
 0xfbc   :  { %7938 = vrcp.f32 %v4690_v24  ;;  %v5108_v55 = vsub.f32 %v11482_v15, %v5092_v9  ;;  %v13048_v15 = vld [vmem:[#allocation194_spill] sm:$0xff]  ;;  %v13053_v24 = vld [vmem:[#allocation36_spill] sm:$0xff]  ;;  %v13054_v9 = vld [vmem:[#allocation161_spill] sm:$0xff] }
 0xfbe   :  { %v7935_v40 = vpop.eup %7934  ;;  %v5139_v52 = vmul.f32 1.442695, %v5108_v55  ;;  %v13055_v55 = vpack.c.bf16 %v13053_v24, %v13054_v9  ;;  %v13074_v24 = vld [vmem:[#allocation53_spill] sm:$0xff] }
 0xfbf   :  { %v3772_v16 = vpop.xlane.xlu0 %3771  ;;  %v5088_v25 = vpop.xlane.xlu1 %5087  ;;  %v11582_v6 = vmul.f32 %v7935_v40, %v11249_v35 }
 0xfc0   :  { %7940 = vpow2.f32 %v5139_v52  ;;  %v5106_v2 = vsub.f32 %v11489_v33, %v5088_v25  ;;  %v3488_v40 = vsel %vm13056_vm5, %v13055_v55, %v13052_v23  ;;  %v13057_v52 = vld [vmem:[#allocation197_spill] sm:$0xff]  ;;  %vm13146_vm5 = vmmov %vm12937_vm0 }
 0xfc1   :  { %7942 = vrcp.f32 %v3772_v16  ;;  %v13073_v23 = vld [vmem:[#allocation109_spill] sm:$0xff] }
 0xfc2   :  { %v7937_v45 = vpop.eup %7936  ;;  %7944 = vpow2.f32 %v5137_v50  ;;  %v5135_v42 = vmul.f32 1.442695, %v5106_v2  ;;  %v13058_v2 = vld [vmem:[#allocation168_spill] sm:$0xff]  ;;  %v13075_v9 = vpack.c.bf16 %v13073_v23, %v13074_v24 }
 0xfc3   :  { %7946 = vpow2.f32 %v5133_v53  ;;  %v4694_v32 = vpop.xlane.xlu0 %4693  ;;  %v5359_v14 = vpop.permute.xlu1 %5358  ;;  %v11586_v11 = vmul.f32 %v7937_v45, %v13048_v15  ;;  %v13059_v45 = vld [vmem:[#allocation111_spill] sm:$0xff] }
 0xfc4   :  { %7948 = vpow2.f32 %v5135_v42  ;;  %v11592_v35 = vsel %vm13050_vm11, %v13049_v36, %v5359_v14  ;;  %v13060_v42 = vld [vmem:[#allocation106_spill] sm:$0xff]  ;;  %v13064_v36 = vld [vmem:[#allocation20_spill] sm:$0xff]  ;;  %vm13145_vm11 = vmmov %vm12937_vm0 }
 0xfc5   :  { %7950 = vrcp.f32 %v4694_v32  ;;  %v13061_v32 = vld [vmem:[#allocation112_spill] sm:$0xff] }
 0xfc6   :  { %v7939_v57 = vpop.eup %7938  ;;  %v13062_v14 = vpack.c.bf16 %v13060_v42, %v13061_v32 }
 0xfc7   :  { %v3776_v33 = vpop.xlane.xlu0 %3775  ;;  %v11595_v18 = vmul.f32 %v7939_v57, %v11253_v41 }
 0xfc8   :  { %7952 = vrcp.f32 %v3776_v33  ;;  %v3456_v15 = vsel %vm13063_vm7, %v13062_v14, %v13059_v45  ;;  %v13065_v33 = vld [vmem:[#allocation16_spill] sm:$0xff]  ;;  %v13083_v14 = vld [vmem:[#allocation187_spill] sm:$0xff]  ;;  %vm13147_vm7 = vmmov %vm12937_vm0 }
 0xfc9   :  { %v4847_v26 = vpack.c.bf16 %v11595_v18, %v11582_v6 }
 0xfca   :  { %v7941_v47 = vpop.eup %7940 }
 0xfcb   :  { %v7943_v7 = vpop.eup %7942  ;;  %v4698_v0 = vpop.xlane.xlu0 %4697  ;;  %5171 = vadd.xlane.f32.xlu0 %v7941_v47 }
 0xfcc   :  { %v11599_v30 = vpop.eup %7944  ;;  %7954 = vrcp.f32 %v4698_v0  ;;  %v11602_v12 = vmul.f32 %v7943_v7, %v13051_v38  ;;  %v13067_v7 = vld [vmem:[#allocation49_spill] sm:$0xff] }
 0xfcd   :  { %v11604_v34 = vpop.eup %7946  ;;  %v5180_v61 = vpack.c.bf16 %v7941_v47, %v11599_v30  ;;  %v13066_v47 = vld [vmem:[#allocation160_spill] sm:$0xff] }
 0xfce   :  { %v7949_v48 = vpop.eup %7948  ;;  %v3931_v41 = vpack.c.bf16 %v11586_v11, %v11602_v12  ;;  %v13068_v0 = vpack.c.bf16 %v13066_v47, %v13067_v7 }
 0xfcf   :  { %v7951_v10 = vpop.eup %7950  ;;  %v3780_v31 = vpop.xlane.xlu0 %3779  ;;  %5167 = vadd.xlane.f32.xlu0 %v7949_v48  ;;  %v5179_v28 = vpack.c.bf16 %v7949_v48, %v11604_v34  ;;  %v13070_v48 = vld [vmem:[#allocation196_spill] sm:$0xff] }
 0xfd0   :  { %7956 = vrcp.f32 %v3780_v31  ;;  %v11611_v8 = vmul.f32 %v7951_v10, %v11263_v22  ;;  %v3492_v38 = vsel %vm13069_vm12, %v13068_v0, %v13065_v33  ;;  %v13086_v33 = vld [vmem:[#allocation51_spill] sm:$0xff]  ;;  %v13088_v0 = vld [vmem:[#allocation134_spill] sm:$0xff]  ;;  %vm13148_vm12 = vmmov %vm12937_vm0 }
 0xfd1   :  { %7153 = vmatprep.mubr.bf16.mxu1 %v5179_v28  ;;  %v13071_v28 = vld [vmem:[#allocation141_spill] sm:$0xff] }
 0xfd2   :  { %v7953_v56 = vpop.eup %7952  ;;  %7154 = vmatmul.mubr.bf16.gmra.mrb[172].mxu1 %v5180_v61 }
 0xfd3   :  { %v4702_v50 = vpop.xlane.xlu0 %4701  ;;  %5698 = vmatprep.mubr.bf16.mxu1 %v3488_v40  ;;  %v11619_v53 = vmul.f32 %v7953_v56, %v13057_v52  ;;  %v13072_v56 = vld [vmem:[#allocation76_spill] sm:$0xff] }
 0xfd4   :  { %7958 = vrcp.f32 %v4702_v50  ;;  %v3460_v55 = vsel %vm13076_vm13, %v13075_v9, %v13072_v56  ;;  %v13077_v52 = vld [vmem:[#allocation24_spill] sm:$0xff]  ;;  %vm13149_vm13 = vmmov %vm12937_vm0 }
 0xfd5   :  { %v13091_v56 = vld [vmem:[#allocation164_spill] sm:$0xff] }
 0xfd6   :  { %v7955_v16 = vpop.eup %7954 }
 0xfd7   :  { %v3784_v25 = vpop.xlane.xlu0 %3783  ;;  %v11622_v22 = vmul.f32 %v7955_v16, %v13058_v2  ;;  %v13078_v16 = vld [vmem:[#allocation162_spill] sm:$0xff] }
 0xfd8   :  { %7960 = vrcp.f32 %v3784_v25  ;;  %v13079_v25 = vld [vmem:[#allocation72_spill] sm:$0xff] }
 0xfd9   :  { %4699 = vadd.xlane.f32.xlu1 %v13064_v36  ;;  %v13084_v36 = vld [vmem:[#allocation129_spill] sm:$0xff] }
 0xfda   :  { %v7957_v57 = vpop.eup %7956  ;;  %5699 = vmatmul.mubr.bf16.vlgmr.msra.gmra.mrb[176].mxu1 %v3456_v15 }
 0xfdb   :  { %5708 = vmatprep.mubr.bf16.mxu1 %v3492_v38  ;;  %v11636_v10 = vmul.f32 %v7957_v57, %v13070_v48  ;;  %v13085_v57 = vld [vmem:[#allocation118_spill] sm:$0xff] }
 0xfdc   :  { %v13087_v47 = vpack.c.bf16 %v13085_v57, %v13086_v33  ;;  %v13101_v33 = vld [vmem:[#allocation166_spill] sm:$0xff] }
 0xfdd   :  { %5147 = vadd.xlane.f32.xlu1 %v11428_v21  ;;  %v13080_v21 = vpack.c.bf16 %v13078_v16, %v13079_v25 }
 0xfde   :  { %v7959_v31 = vpop.eup %7958  ;;  %v3464_v7 = vsel %vm12937_vm0, %v13087_v47, %v13084_v36 }
 0xfdf   :  { %v11640_v61 = vmul.f32 %v7959_v31, %v13071_v28  ;;  %v3496_v2 = vsel %vm13081_vm9, %v13080_v21, %v13077_v52  ;;  %v13090_v28 = vld [vmem:[#allocation77_spill] sm:$0xff]  ;;  %v13095_v21 = vld [vmem:[#allocation136_spill] sm:$0xff]  ;;  %vm13152_vm9 = vmmov %vm12937_vm0 }
 0xfe0   :  { %v13092_v23 = vpack.c.bf16 %v13090_v28, %v13091_v56  ;;  %v13108_v56 = vld [vmem:[#allocation137_spill] sm:$0xff] }
 0xfe1   :  { %5143 = vadd.xlane.f32.xlu1 %v11434_v44  ;;  %v13082_v44 = vld [vmem:[#allocation201_spill] sm:$0xff] }
 0xfe2   :  { %v7961_v40 = vpop.eup %7960  ;;  %v11648_v50 = vpop.f32.mrb[160].mxu1  ;;  %5709 = vmatmul.mubr.bf16.gmra.mrb[180].mxu1 %v3460_v55  ;;  %v13094_v55 = vld [vmem:[#allocation135_spill] sm:$0xff] }
 0xfe3   :  { %v11655_v45 = vpop.f32.mrb[161].mxu1  ;;  %5718 = vmatprep.mubr.bf16.mxu1 %v3496_v2  ;;  %v11658_v42 = vmul.f32 %v7961_v40, %v13082_v44  ;;  %v13096_v2 = vld [vmem:[#allocation127_spill] sm:$0xff]  ;;  %v13097_v44 = vld [vmem:[#allocation18_spill] sm:$0xff] }
 0xfe4   :  { %v11660_v32 = vpop.f32.mrb[162].mxu1 }
 0xfe5   :  { %3785 = vadd.xlane.f32.xlu1 %v13083_v14  ;;  %v11663_v15 = vpop.f32.mrb[163].mxu1  ;;  %v13098_v14 = vpack.c.bf16 %v13096_v2, %v13097_v44  ;;  %v13114_v2 = vld [vmem:[#allocation128_spill] sm:$0xff]  ;;  %v13115_v44 = vld [vmem:[#allocation186_spill] sm:$0xff] }
 0xfe9   :  { %5153 = vadd.xlane.f32.xlu1 %v11459_v29  ;;  %v13089_v29 = vld [vmem:[#allocation131_spill] sm:$0xff] }
 0xfea   :  { %5719 = vmatmul.mubr.bf16.gmra.mrb[184].mxu1 %v3464_v7  ;;  %v3468_v24 = vsel %vm13093_vm14, %v13092_v23, %v13089_v29  ;;  %v13102_v7 = vld [vmem:[#allocation26_spill] sm:$0xff]  ;;  %vm13153_vm14 = vmmov %vm12937_vm0 }
 0xfeb   :  { %5728 = vmatprep.mubr.bf16.mxu1 %v13088_v0  ;;  %v13103_v0 = vld [vmem:[#allocation22_spill] sm:$0xff] }
 0xfed   :  { %5151 = vadd.xlane.f32.xlu1 %v11457_v63 }
 0xfee   :  { %v11673_v38 = vpop.f32.mrb[164].mxu1 }
 0xfef   :  { %v11675_v48 = vpop.f32.mrb[165].mxu1 }
 0xff0   :  { %v11677_v31 = vpop.f32.mrb[166].mxu1 }
 0xff1   :  { %5161 = vadd.xlane.f32.xlu1 %v11473_v27  ;;  %v11685_v9 = vpop.f32.mrb[167].mxu1 }
 0xff2   :  { %5729 = vmatmul.mubr.bf16.gmra.mrb[188].mxu1 %v3468_v24 }
 0xff3   :  { %5738 = vmatprep.mubr.bf16.mxu1 %v13094_v55  ;;  %v13112_v55 = vld [vmem:[#allocation116_spill] sm:$0xff] }
 0xff4   :  { %v4692_v63 = vpop.xlane.xlu1 %4691 }
 0xff5   :  { %7962 = vrcp.f32 %v4692_v63  ;;  %5157 = vadd.xlane.f32.xlu1 %v11465_v43  ;;  %v3508_v43 = vsel %vm13099_vm1, %v13098_v14, %v11505_v13  ;;  %v13104_v13 = vpack.c.bf16 %v13102_v7, %v13103_v0  ;;  %vm13154_vm1 = vmmov %vm12937_vm0 }
 0xff6   :  { %v11689_v40 = vpop.f32.mrb[168].mxu1 }
 0xff7   :  { %v11691_v52 = vpop.f32.mrb[169].mxu1  ;;  %v3512_v29 = vsel %vm13105_vm3, %v13104_v13, %v11544_v3  ;;  %v13111_v3 = vld [vmem:[#allocation71_spill] sm:$0xff]  ;;  %v13119_v13 = vld [vmem:[#allocation14_spill] sm:$0xff] }
 0xff8   :  { %v3778_v27 = vpop.xlane.xlu1 %3777  ;;  %v11693_v16 = vpop.f32.mrb[170].mxu1  ;;  %v13113_v63 = vpack.c.bf16 %v13111_v3, %v13112_v55  ;;  %v13121_v20 = vpack.c.bf16 %v13119_v13, %v13120_v51  ;;  %v13122_v55 = vld [vmem:[#allocation171_spill] sm:$0xff] }
 0xff9   :  { %7964 = vrcp.f32 %v3778_v27  ;;  %5169 = vadd.xlane.f32.xlu1 %v11599_v30  ;;  %v11696_v25 = vpop.f32.mrb[171].mxu1 }
 0xffa   :  { %5739 = vmatmul.mubr.bf16.gmra.mrb[192].mxu1 %v13095_v21 }
 0xffb   :  { %5748 = vmatprep.mubr.bf16.mxu1 %v3508_v43  ;;  %v13117_v43 = vld [vmem:[#allocation133_spill] sm:$0xff] }
 0xffc   :  { %v5361_v36 = vpop.permute.xlu1 %5360 }
 0xffd   :  { %5165 = vadd.xlane.f32.xlu1 %v11604_v34  ;;  %v11709_v57 = vsel %vm13100_vm2, %v3929_v4, %v5361_v36  ;;  %vm13155_vm2 = vmmov %vm12937_vm0 }
 0xfff   :  { %v7963_v30 = vpop.eup %7962 }
0x1000   :  { %v11712_v47 = vmul.f32 %v7963_v30, %v13101_v33  ;;  %v13118_v33 = vld [vmem:[#allocation198_spill] sm:$0xff] }
0x1002   :  { %5749 = vmatmul.mubr.bf16.gmra.mrb[196].mxu1 %v11451_v49  ;;  %v4848_v34 = vpack.c.bf16 %v11611_v8, %v11712_v47  ;;  %v13107_v49 = vld [vmem:[#allocation138_spill] sm:$0xff]  ;;  %v13150_v8 = vld [vmem:[#allocation200_spill] sm:$0xff] }
0x1003   :  { %v7965_v28 = vpop.eup %7964  ;;  %5758 = vmatprep.mubr.bf16.mxu1 %v3512_v29  ;;  %v13109_v23 = vpack.c.bf16 %v13107_v49, %v13108_v56 }
0x1004   :  { %v11723_v46 = vmul.f32 %v7965_v28, %v13106_v59 }
0x1005   :  { %v3516_v24 = vsel %vm13110_vm4, %v13109_v23, %v11574_v37 }
0x1006   :  { %v3932_v4 = vpack.c.bf16 %v11723_v46, %v11619_v53 }
0x100a   :  { %5759 = vmatmul.mubr.bf16.gmra.mrb[200].mxu1 %v11513_v19 }
0x100b   :  { %5768 = vmatprep.mubr.bf16.mxu1 %v3516_v24 }
0x100e   :  { %5364 = vrot.lane.b32.xlu1 %v13113_v63, %s8115_s2 }
0x1012   :  { %5769 = vmatmul.mubr.bf16.gmra.mrb[204].mxu1 %v11550_v17 }
0x102d   :  { %v4696_v27 = vpop.xlane.xlu1 %4695 }
0x102e   :  { %7966 = vrcp.f32 %v4696_v27 }
0x1031   :  { %v3782_v21 = vpop.xlane.xlu1 %3781 }
0x1032   :  { %7968 = vrcp.f32 %v3782_v21  ;;  %4703 = vadd.xlane.f32.xlu1 %v13114_v2 }
0x1035   :  { %v5363_v19 = vpop.permute.xlu1 %5362 }
0x1036   :  { %3789 = vadd.xlane.f32.xlu1 %v13115_v44  ;;  %v11744_v37 = vsel %vm13116_vm6, %v3930_v1, %v5363_v19  ;;  %v5146_v1 = vpop.xlane.xlu0 %5145 }
0x1038   :  { %v7967_v14 = vpop.eup %7966 }
0x1039   :  { %v11747_v36 = vmul.f32 %v7967_v14, %v13117_v43 }
0x103a   :  { %v5142_v29 = vpop.xlane.xlu0 %5141 }
0x103b   :  { %v4849_v17 = vpack.c.bf16 %v11622_v22, %v11747_v36 }
0x103c   :  { %v7969_v30 = vpop.eup %7968 }
0x103d   :  { %v11752_v7 = vmul.f32 %v7969_v30, %v13118_v33 }
0x103e   :  { %v5150_v49 = vpop.xlane.xlu0 %5149 }
0x103f   :  { %v3933_v0 = vpack.c.bf16 %v11752_v7, %v11636_v10 }
0x1042   :  { %v5156_v24 = vpop.xlane.xlu0 %5155 }
0x1046   :  { %v5164_v30 = vpop.xlane.xlu0 %5163 }
0x1047   :  { %5366 = vrot.lane.b32.xlu1 %v13121_v20, %s8115_s2 }
0x1066   :  { %v4700_v28 = vpop.xlane.xlu1 %4699 }
0x1067   :  { %7970 = vrcp.f32 %v4700_v28 }
0x1068   :  { %7972 = vrcp.f32 %v5146_v1 }
0x106a   :  { %v5148_v59 = vpop.xlane.xlu1 %5147 }
0x106b   :  { %7974 = vrcp.f32 %v5148_v59  ;;  %v13123_v59 = vld [vmem:[#allocation203_spill] sm:$0xff] }
0x106c   :  { %7976 = vrcp.f32 %v5142_v29 }
0x106e   :  { %v5144_v56 = vpop.xlane.xlu1 %5143 }
0x106f   :  { %7978 = vrcp.f32 %v5144_v56 }
0x1071   :  { %v7971_v23 = vpop.eup %7970 }
0x1072   :  { %v3786_v3 = vpop.xlane.xlu1 %3785  ;;  %v11761_v63 = vmul.f32 %v7971_v23, %v13122_v55  ;;  %v7973_v27 = vpop.eup %7972 }
0x1073   :  { %7980 = vrcp.f32 %v3786_v3  ;;  %v5328_v19 = vmul.f32 %v7973_v27, %v11648_v50  ;;  %v5160_v50 = vpop.xlane.xlu0 %5159 }
0x1074   :  { %v4850_v21 = vpack.c.bf16 %v11640_v61, %v11761_v63  ;;  %7982 = vrcp.f32 %v5156_v24 }
0x1075   :  { %v7975_v2 = vpop.eup %7974 }
0x1076   :  { %v5154_v44 = vpop.xlane.xlu1 %5153  ;;  %v5329_v14 = vmul.f32 %v7975_v2, %v11660_v32  ;;  %v7977_v43 = vpop.eup %7976 }
0x1077   :  { %7984 = vrcp.f32 %v5154_v44  ;;  %v5326_v51 = vmul.f32 %v7977_v43, %v11655_v45 }
0x1078   :  { %v5343_v33 = vpack.c.bf16 %v5329_v14, %v5328_v19  ;;  %7986 = vrcp.f32 %v5150_v49 }
0x1079   :  { %v7979_v13 = vpop.eup %7978 }
0x107a   :  { %5384 = vrot.lane.b32.xlu0 %v5343_v33, %s8115_s2  ;;  %v5152_v20 = vpop.xlane.xlu1 %5151  ;;  %v5327_v1 = vmul.f32 %v7979_v13, %v11663_v15 }
0x107b   :  { %7988 = vrcp.f32 %v5152_v20 }
0x107c   :  { %v5342_v29 = vpack.c.bf16 %v5327_v1, %v5326_v51  ;;  %7990 = vrcp.f32 %v5164_v30 }
0x107d   :  { %v7981_v28 = vpop.eup %7980 }
0x107e   :  { %5382 = vrot.lane.b32.xlu0 %v5342_v29, %s8115_s2  ;;  %v5162_v32 = vpop.xlane.xlu1 %5161  ;;  %v11772_v56 = vmul.f32 %v7981_v28, %v13123_v59  ;;  %v7983_v23 = vpop.eup %7982  ;;  %v13125_v29 = vld [vmem:[#allocation28_spill] sm:$0xff] }
0x107f   :  { %7992 = vrcp.f32 %v5162_v32  ;;  %v5333_v15 = vmul.f32 %v7983_v23, %v11677_v31  ;;  %v13127_v32 = vld [vmem:[#allocation167_spill] sm:$0xff] }
0x1080   :  { %v3934_v45 = vpack.c.bf16 %v11772_v56, %v11658_v42  ;;  %7994 = vrcp.f32 %v5160_v50 }
0x1081   :  { %v7985_v49 = vpop.eup %7984 }
0x1082   :  { %v5158_v24 = vpop.xlane.xlu1 %5157  ;;  %v5332_v3 = vmul.f32 %v7985_v49, %v11673_v38  ;;  %v7987_v55 = vpop.eup %7986  ;;  %v13131_v49 = vld [vmem:[#allocation172_spill] sm:$0xff] }
0x1083   :  { %7996 = vrcp.f32 %v5158_v24  ;;  %v5330_v19 = vmul.f32 %v7987_v55, %v11675_v48 }
0x1084   :  { %v5345_v27 = vpack.c.bf16 %v5333_v15, %v5332_v3 }
0x1085   :  { %v7989_v2 = vpop.eup %7988 }
0x1086   :  { %5388 = vrot.lane.b32.xlu0 %v5345_v27, %s8115_s2  ;;  %v5331_v44 = vmul.f32 %v7989_v2, %v11685_v9  ;;  %v7991_v14 = vpop.eup %7990  ;;  %v4706_v9 = vpop.xlane.xlu0 %4705 }
0x1087   :  { %v5337_v33 = vmul.f32 %v7991_v14, %v11693_v16  ;;  %v13124_v16 = vld [vmem:[#allocation132_spill] sm:$0xff]  ;;  %v5170_v50 = vpop.xlane.xlu1 %5169 }
0x1088   :  { %v5344_v43 = vpack.c.bf16 %v5331_v44, %v5330_v19  ;;  %v13126_v28 = vpack.c.bf16 %v13124_v16, %v13125_v29  ;;  %v5494_v14 = vld [vmem:[%s11968_s4] sm:$0x3]  ;;  %s8116_s4 = smov [#allocation8]  }
0x1089   :  { %v7993_v30 = vpop.eup %7992  ;;  %s6088_s9 = sshll.u32 %s8116_s4, 4  ;;  %s6089_s9 = int_to_ptr.vmem [resolvable:$true] %s6088_s9 }
0x108a   :  { %5386 = vrot.lane.b32.xlu0 %v5344_v43, %s8115_s2  ;;  %v5336_v31 = vmul.f32 %v7993_v30, %v11689_v40  ;;  %v7995_v38 = vpop.eup %7994  ;;  %v5172_v40 = vpop.xlane.xlu0 %5171  ;;  %s8080_s10 = scalar_lea.vmem %s6089_s9, 4096  ;;  %p8085_p11 = scmp.lt.s32.totalorder %s6089_s9, %s6089_s9 }
0x108b   :  { %v11785_v20 = vmul.f32 %v7995_v38, %v11696_v25  ;;  %v13128_v25 = vld [vmem:[#allocation165_spill] sm:$0xff]  ;;  %7998 = vrcp.f32 %v5172_v40  ;;  %v5166_v24 = vpop.xlane.xlu1 %5165  ;;  %p8081_p10 = scmp.ne.s32.totalorder %s6089_s9, %s8080_s10  ;;  %p8086_p12 = scmp.lt.s32.totalorder %s8080_s10, %s8080_s10 }
0x108c   :  { %v5347_v13 = vpack.c.bf16 %v5337_v33, %v5336_v31  ;;  %v13129_v59 = vpack.c.bf16 %v13127_v32, %v13128_v25 }
0x108d   :  { %v7997_v51 = vpop.eup %7996  ;;  %p8087_p13 = por %p8086_p12, %p8085_p11 }
0x108e   :  { %5392 = vrot.lane.b32.xlu1 %v5347_v13, %s8115_s2  ;;  %v11789_v48 = vmul.f32 %v7997_v51, %v11691_v52  ;;  %v5168_v23 = vpop.xlane.xlu0 %5167  ;;  %v13130_v52 = vld [vmem:[#allocation170_spill] sm:$0xff]  ;;  %v13133_v51 = vld [vmem:[#allocation188_spill] sm:$0xff] }
0x108f   :  { %v13132_v15 = vpack.c.bf16 %v13130_v52, %v13131_v49  ;;  %8000 = vrcp.f32 %v5168_v23  ;;  %p8088_p0 = pnand %p8087_p13, %p8081_p10 }
0x1090   :  { %v5346_v1 = vpack.c.bf16 %v11785_v20, %v11789_v48  ;;  %8002 = vrcp.f32 %v5170_v50  ;;  %v13134_v48 = vld [vmem:[#allocation12_spill] sm:$0xff] }
0x1091   :  { %8004 = vrcp.f32 %v5166_v24  ;;  %v13135_v16 = vsub.s32 0, %v13134_v48  ;;  %v13136_v40 = vsub.s32 1, %v13134_v48 }
0x1092   :  { %5368 = vrot.lane.b32.xlu1 %v13126_v28, %s8115_s2  ;;  %8006 = vrcp.f32 %v4706_v9 }
0x1093   :  { %v11811_v29 = vrot.slane %v5494_v14, %v13135_v16  ;;  %v11815_v50 = vrot.slane %v5494_v14, %v13136_v40 }
0x1095   :  { %v7999_v3 = vpop.eup %7998 }
0x1096   :  { %5370 = vrot.lane.b32.xlu1 %v13129_v59, %s8115_s2 }
0x1099   :  { %v8001_v27 = vpop.eup %8000 }
0x109a   :  { %5372 = vrot.lane.b32.xlu1 %v13132_v15, %s8115_s2  ;;  %v8003_v19 = vpop.eup %8002 }
0x109b   :  { %v8005_v43 = vpop.eup %8004 }
0x10a5   :  { %v7155_v55 = vpop.f32.mrb[172].mxu1 }
0x10a6   :  { %v5295_v2 = vpop.f32.mrb[173].mxu1  ;;  %v5340_v30 = vmul.f32 %v8003_v19, %v7155_v55 }
0x10a7   :  { %v7156_v44 = vpop.f32.mrb[174].mxu1  ;;  %v5338_v38 = vmul.f32 %v8005_v43, %v5295_v2 }
0x10a8   :  { %v5341_v33 = vmul.f32 %v7999_v3, %v7156_v44  ;;  %v5298_v31 = vpop.f32.mrb[175].mxu1 }
0x10a9   :  { %v5339_v13 = vmul.f32 %v8001_v27, %v5298_v31  ;;  %3787 = vadd.xlane.f32.xlu0 %v13133_v51 }
0x10aa   :  { %v5349_v20 = vpack.c.bf16 %v5341_v33, %v5340_v30 }
0x10ab   :  { %v5348_v28 = vpack.c.bf16 %v5339_v13, %v5338_v38  ;;  %v11825_v38 = vpop.permute.xlu1 %5364 }
0x10ac   :  { %v5412_v58 = vsel %vm13146_vm5, %v3931_v41, %v11825_v38 }
0x10ad   :  { %v5700_v32 = vpop.f32.mrb[176].mxu1 }
0x10ae   :  { %v5701_v25 = vadd.f32 %v5700_v32, %v11811_v29  ;;  %v5702_v59 = vpop.f32.mrb[177].mxu1 }
0x10af   :  { %v5703_v23 = vadd.f32 %v5702_v59, %v11815_v50  ;;  %v5704_v52 = vpop.f32.mrb[178].mxu1 }
0x10b0   :  { %v5705_v49 = vadd.f32 %v5704_v52, %v11811_v29  ;;  %v5706_v15 = vpop.f32.mrb[179].mxu1 }
0x10b1   :  { %v6357_v24 = vpack.c.bf16 %v5703_v23, %v5701_v25  ;;  %v5707_v3 = vadd.f32 %v5706_v15, %v11815_v50 }
0x10b3   :  { %6051 = vst [vmem:[#allocation8] sm:$0xff] %v6357_v24  ;;  %v6358_v55 = vpack.c.bf16 %v5707_v3, %v5705_v49 }
0x10b5   :  { %6052 = vst [vmem:[#allocation8 + $0x8] sm:$0xff] %v6358_v55  ;;  %v5710_v27 = vpop.f32.mrb[180].mxu1 }
0x10b6   :  { %v5711_v2 = vadd.f32 %v5710_v27, %v11811_v29  ;;  %v5712_v19 = vpop.f32.mrb[181].mxu1  ;;  %v8007_v27 = vpop.eup %8006 }
0x10b7   :  { %v5713_v44 = vadd.f32 %v5712_v19, %v11815_v50  ;;  %v5714_v14 = vpop.f32.mrb[182].mxu1 }
0x10b8   :  { %v5715_v43 = vadd.f32 %v5714_v14, %v11811_v29  ;;  %v5716_v30 = vpop.f32.mrb[183].mxu1 }
0x10b9   :  { %v6359_v33 = vpack.c.bf16 %v5713_v44, %v5711_v2  ;;  %v5717_v31 = vadd.f32 %v5716_v30, %v11815_v50  ;;  %v13137_v30 = vld [vmem:[#allocation169_spill] sm:$0xff] }
0x10bb   :  { %6053 = vst [vmem:[#allocation8 + $0x10] sm:$0xff] %v6359_v33  ;;  %v6360_v13 = vpack.c.bf16 %v5717_v31, %v5715_v43  ;;  %v13138_v31 = vld [vmem:[#allocation139_spill] sm:$0xff] }
0x10bd   :  { %6054 = vst [vmem:[#allocation8 + $0x18] sm:$0xff] %v6360_v13  ;;  %v5720_v51 = vpop.f32.mrb[184].mxu1  ;;  %v11842_v13 = vmul.f32 %v8007_v27, %v13138_v31 }
0x10be   :  { %v5721_v48 = vadd.f32 %v5720_v51, %v11811_v29  ;;  %v5722_v16 = vpop.f32.mrb[185].mxu1 }
0x10bf   :  { %v5723_v40 = vadd.f32 %v5722_v16, %v11815_v50  ;;  %v5724_v32 = vpop.f32.mrb[186].mxu1  ;;  %5390 = vrot.lane.b32.xlu0 %v5346_v1, %s8115_s2  ;;  %v4704_v25 = vpop.xlane.xlu1 %4703 }
0x10c0   :  { %v5725_v59 = vadd.f32 %v5724_v32, %v11811_v29  ;;  %8008 = vrcp.f32 %v4704_v25  ;;  %v5726_v23 = vpop.f32.mrb[187].mxu1 }
0x10c1   :  { %v6361_v52 = vpack.c.bf16 %v5723_v40, %v5721_v48  ;;  %v5727_v49 = vadd.f32 %v5726_v23, %v11815_v50 }
0x10c3   :  { %6055 = vst [vmem:[#allocation8 + $0x20] sm:$0xff] %v6361_v52  ;;  %v6362_v15 = vpack.c.bf16 %v5727_v49, %v5725_v59  ;;  %5394 = vrot.lane.b32.xlu0 %v5348_v28, %s8115_s2 }
0x10c5   :  { %6056 = vst [vmem:[#allocation8 + $0x28] sm:$0xff] %v6362_v15  ;;  %v5730_v9 = vpop.f32.mrb[188].mxu1 }
0x10c6   :  { %v5731_v24 = vadd.f32 %v5730_v9, %v11811_v29  ;;  %v5732_v3 = vpop.f32.mrb[189].mxu1 }
0x10c7   :  { %v5733_v55 = vadd.f32 %v5732_v3, %v11815_v50  ;;  %v5734_v1 = vpop.f32.mrb[190].mxu1  ;;  %5396 = vrot.lane.b32.xlu0 %v5349_v20, %s8115_s2 }
0x10c8   :  { %v5735_v2 = vadd.f32 %v5734_v1, %v11811_v29  ;;  %v5736_v19 = vpop.f32.mrb[191].mxu1 }
0x10c9   :  { %v6363_v44 = vpack.c.bf16 %v5733_v55, %v5731_v24  ;;  %v5737_v14 = vadd.f32 %v5736_v19, %v11815_v50 }
0x10ca   :  { %v8009_v43 = vpop.eup %8008 }
0x10cb   :  { %6057 = vst [vmem:[#allocation8 + $0x30] sm:$0xff] %v6363_v44  ;;  %v6364_v28 = vpack.c.bf16 %v5737_v14, %v5735_v2  ;;  %v11839_v33 = vmul.f32 %v8009_v43, %v13137_v30 }
0x10cd   :  { %6058 = vst [vmem:[#allocation8 + $0x38] sm:$0xff] %v6364_v28  ;;  %v5740_v51 = vpop.f32.mrb[192].mxu1  ;;  %v4851_v20 = vpack.c.bf16 %v11842_v13, %v11839_v33 }
0x10ce   :  { %v5741_v48 = vadd.f32 %v5740_v51, %v11811_v29  ;;  %v5742_v16 = vpop.f32.mrb[193].mxu1 }
0x10cf   :  { %v5743_v40 = vadd.f32 %v5742_v16, %v11815_v50  ;;  %v5744_v32 = vpop.f32.mrb[194].mxu1 }
0x10d0   :  { %v5745_v25 = vadd.f32 %v5744_v32, %v11811_v29  ;;  %v5746_v59 = vpop.f32.mrb[195].mxu1 }
0x10d1   :  { %v6365_v23 = vpack.c.bf16 %v5743_v40, %v5741_v48  ;;  %v5747_v52 = vadd.f32 %v5746_v59, %v11815_v50 }
0x10d3   :  { %6059 = vst [vmem:[#allocation8 + $0x40] sm:$0xff] %v6365_v23  ;;  %v6366_v49 = vpack.c.bf16 %v5747_v52, %v5745_v25 }
0x10d5   :  { %6060 = vst [vmem:[#allocation8 + $0x48] sm:$0xff] %v6366_v49  ;;  %v5750_v15 = vpop.f32.mrb[196].mxu1 }
0x10d6   :  { %v5751_v9 = vadd.f32 %v5750_v15, %v11811_v29  ;;  %v5752_v24 = vpop.f32.mrb[197].mxu1 }
0x10d7   :  { %v5753_v3 = vadd.f32 %v5752_v24, %v11815_v50  ;;  %v5754_v55 = vpop.f32.mrb[198].mxu1 }
0x10d8   :  { %v5755_v1 = vadd.f32 %v5754_v55, %v11811_v29  ;;  %v5756_v27 = vpop.f32.mrb[199].mxu1 }
0x10d9   :  { %v6367_v2 = vpack.c.bf16 %v5753_v3, %v5751_v9  ;;  %v5757_v19 = vadd.f32 %v5756_v27, %v11815_v50 }
0x10db   :  { %6061 = vst [vmem:[#allocation8 + $0x50] sm:$0xff] %v6367_v2  ;;  %v6368_v44 = vpack.c.bf16 %v5757_v19, %v5755_v1  ;;  %v13139_v2 = vld [vmem:[#allocation142_spill] sm:$0xff]  ;;  %v13140_v19 = vld [vmem:[#allocation140_spill] sm:$0xff] }
0x10dd   :  { %6062 = vst [vmem:[#allocation8 + $0x58] sm:$0xff] %v6368_v44  ;;  %v5760_v14 = vpop.f32.mrb[200].mxu1  ;;  %v13141_v44 = vpack.c.bf16 %v13139_v2, %v13140_v19 }
0x10de   :  { %v5761_v43 = vadd.f32 %v5760_v14, %v11811_v29  ;;  %v5762_v28 = vpop.f32.mrb[201].mxu1 }
0x10df   :  { %v5763_v30 = vadd.f32 %v5762_v28, %v11815_v50  ;;  %v5764_v31 = vpop.f32.mrb[202].mxu1 }
0x10e0   :  { %v5765_v51 = vadd.f32 %v5764_v31, %v11811_v29  ;;  %v5766_v48 = vpop.f32.mrb[203].mxu1 }
0x10e1   :  { %v6369_v16 = vpack.c.bf16 %v5763_v30, %v5761_v43  ;;  %v5767_v40 = vadd.f32 %v5766_v48, %v11815_v50 }
0x10e3   :  { %6063 = vst [vmem:[#allocation8 + $0x60] sm:$0xff] %v6369_v16  ;;  %v6370_v32 = vpack.c.bf16 %v5767_v40, %v5765_v51 }
0x10e5   :  { %6064 = vst [vmem:[#allocation8 + $0x68] sm:$0xff] %v6370_v32  ;;  %v5770_v25 = vpop.f32.mrb[204].mxu1 }
0x10e6   :  { %v5771_v59 = vadd.f32 %v5770_v25, %v11811_v29  ;;  %v5772_v23 = vpop.f32.mrb[205].mxu1 }
0x10e7   :  { %v5773_v52 = vadd.f32 %v5772_v23, %v11815_v50  ;;  %v5774_v49 = vpop.f32.mrb[206].mxu1 }
0x10e8   :  { %v5775_v15 = vadd.f32 %v5774_v49, %v11811_v29  ;;  %v5776_v9 = vpop.f32.mrb[207].mxu1 }
0x10e9   :  { %v6371_v24 = vpack.c.bf16 %v5773_v52, %v5771_v59  ;;  %v5777_v3 = vadd.f32 %v5776_v9, %v11815_v50 }
0x10eb   :  { %6065 = vst [vmem:[#allocation8 + $0x70] sm:$0xff] %v6371_v24  ;;  %v6372_v55 = vpack.c.bf16 %v5777_v3, %v5775_v15 }
0x10ec   :  { %v5385_v1 = vpop.permute.xlu0 %5384 }
0x10ed   :  { %6066 = vst [vmem:[#allocation8 + $0x78] sm:$0xff] %v6372_v55  ;;  %v5436_v43 = vsel %vm13143_vm15, %v4845_v54, %v5385_v1  ;;  %v3790_v54 = vpop.xlane.xlu1 %3789 }
0x10ee   :  { %8010 = vrcp.f32 %v3790_v54 }
0x10f0   :  { %v5383_v27 = vpop.permute.xlu0 %5382 }
0x10f1   :  { %v5432_v14 = vsel %vm13142_vm8, %v13141_v44, %v5383_v27  ;;  %v5367_v5 = vpop.permute.xlu1 %5366 }
0x10f2   :  { %5778 = vmatprep.mubr.bf16.mxu1 %v5432_v14  ;;  %v5416_v11 = vsel %vm13148_vm12, %v3932_v4, %v5367_v5 }
0x10f3   :  { %5779 = vmatmul.mubr.bf16.gmra.mrb[208].mxu1 %v11592_v35 }
0x10f4   :  { %5788 = vmatprep.mubr.bf16.mxu1 %v5436_v43 }
0x10f8   :  { %v5389_v28 = vpop.permute.xlu0 %5388 }
0x10f9   :  { %v5444_v39 = vsel %vm13145_vm11, %v4847_v26, %v5389_v28  ;;  %v8011_v26 = vpop.eup %8010 }
0x10fb   :  { %5789 = vmatmul.mubr.bf16.gmra.mrb[212].mxu1 %v11709_v57 }
0x10fc   :  { %v5387_v30 = vpop.permute.xlu0 %5386 }
0x10fd   :  { %v5440_v31 = vsel %vm13144_vm10, %v4846_v62, %v5387_v30 }
0x10fe   :  { %5798 = vmatprep.mubr.bf16.mxu1 %v5440_v31 }
0x1100   :  { %v5393_v62 = vpop.permute.xlu1 %5392 }
0x1101   :  { %v5452_v18 = vsel %vm13149_vm13, %v4849_v17, %v5393_v62 }
0x1103   :  { %5799 = vmatmul.mubr.bf16.gmra.mrb[216].mxu1 %v11744_v37 }
0x1104   :  { %5808 = vmatprep.mubr.bf16.mxu1 %v5444_v39  ;;  %v5369_v41 = vpop.permute.xlu1 %5368 }
0x1105   :  { %v5420_v53 = vsel %vm13152_vm9, %v3933_v0, %v5369_v41 }
0x1108   :  { %v5371_v4 = vpop.permute.xlu1 %5370 }
0x1109   :  { %v5424_v17 = vsel %vm13153_vm14, %v3934_v45, %v5371_v4 }
0x110b   :  { %5809 = vmatmul.mubr.bf16.gmra.mrb[220].mxu1 %v5412_v58 }
0x110c   :  { %v5373_v7 = vpop.permute.xlu1 %5372 }
0x1136   :  { %v3788_v60 = vpop.xlane.xlu0 %3787 }
0x1137   :  { %8012 = vrcp.f32 %v3788_v60 }
0x113a   :  { %v5391_v35 = vpop.permute.xlu0 %5390 }
0x113b   :  { %v5448_v6 = vsel %vm13147_vm7, %v4848_v34, %v5391_v35  ;;  %v13151_v34 = vld [vmem:[#allocation202_spill] sm:$0xff] }
0x113c   :  { %5818 = vmatprep.mubr.bf16.mxu1 %v5448_v6  ;;  %v3927_v37 = vmul.f32 %v8011_v26, %v13151_v34 }
0x113d   :  { %5819 = vmatmul.mubr.bf16.gmra.mrb[224].mxu1 %v5416_v11 }
0x113e   :  { %5828 = vmatprep.mubr.bf16.mxu1 %v5452_v18  ;;  %v5395_v57 = vpop.permute.xlu0 %5394 }
0x113f   :  { %v5456_v22 = vsel %vm12937_vm0, %v4850_v21, %v5395_v57 }
0x1141   :  { %v8013_v12 = vpop.eup %8012 }
0x1142   :  { %v3926_v47 = vmul.f32 %v8013_v12, %v13150_v8  ;;  %v5397_v36 = vpop.permute.xlu0 %5396 }
0x1143   :  { %v5460_v10 = vsel %vm13154_vm1, %v4851_v20, %v5397_v36 }
0x1144   :  { %v3935_v46 = vpack.c.bf16 %v3927_v37, %v3926_v47 }
0x1145   :  { %5829 = vmatmul.mubr.bf16.gmra.mrb[228].mxu1 %v5420_v53 }
0x1146   :  { %5838 = vmatprep.mubr.bf16.mxu1 %v5456_v22  ;;  %v5428_v61 = vsel %vm13155_vm2, %v3935_v46, %v5373_v7 }
0x114d   :  { %5839 = vmatmul.mubr.bf16.gmra.mrb[232].mxu1 %v5424_v17 }
0x114e   :  { %5848 = vmatprep.mubr.bf16.mxu1 %v5460_v10 }
0x1155   :  { %5849 = vmatmul.mubr.bf16.gmra.mrb[236].mxu1 %v5428_v61 }
0x11c6   :  { %v5780_v0 = vpop.f32.mrb[208].mxu1 }
0x11c7   :  { %v5781_v63 = vadd.f32 %v5780_v0, %v11811_v29  ;;  %v5782_v21 = vpop.f32.mrb[209].mxu1 }
0x11c8   :  { %v5783_v38 = vadd.f32 %v5782_v21, %v11815_v50  ;;  %v5784_v42 = vpop.f32.mrb[210].mxu1 }
0x11c9   :  { %v5785_v56 = vadd.f32 %v5784_v42, %v11811_v29  ;;  %v5786_v45 = vpop.f32.mrb[211].mxu1 }
0x11ca   :  { %v6373_v51 = vpack.c.bf16 %v5783_v38, %v5781_v63  ;;  %v5787_v33 = vadd.f32 %v5786_v45, %v11815_v50 }
0x11cc   :  { %6067 = vst [vmem:[#allocation8 + $0x80] sm:$0xff] %v6373_v51  ;;  %v6374_v13 = vpack.c.bf16 %v5787_v33, %v5785_v56 }
0x11ce   :  { %6068 = vst [vmem:[#allocation8 + $0x88] sm:$0xff] %v6374_v13  ;;  %v5790_v20 = vpop.f32.mrb[212].mxu1 }
0x11cf   :  { %v5791_v48 = vadd.f32 %v5790_v20, %v11811_v29  ;;  %v5792_v16 = vpop.f32.mrb[213].mxu1 }
0x11d0   :  { %v5793_v40 = vadd.f32 %v5792_v16, %v11815_v50  ;;  %v5794_v32 = vpop.f32.mrb[214].mxu1 }
0x11d1   :  { %v5795_v25 = vadd.f32 %v5794_v32, %v11811_v29  ;;  %v5796_v59 = vpop.f32.mrb[215].mxu1 }
0x11d2   :  { %v6375_v23 = vpack.c.bf16 %v5793_v40, %v5791_v48  ;;  %v5797_v52 = vadd.f32 %v5796_v59, %v11815_v50 }
0x11d4   :  { %6069 = vst [vmem:[#allocation8 + $0x90] sm:$0xff] %v6375_v23  ;;  %v6376_v49 = vpack.c.bf16 %v5797_v52, %v5795_v25 }
0x11d6   :  { %6070 = vst [vmem:[#allocation8 + $0x98] sm:$0xff] %v6376_v49  ;;  %v5800_v15 = vpop.f32.mrb[216].mxu1 }
0x11d7   :  { %v5801_v9 = vadd.f32 %v5800_v15, %v11811_v29  ;;  %v5802_v24 = vpop.f32.mrb[217].mxu1 }
0x11d8   :  { %v5803_v3 = vadd.f32 %v5802_v24, %v11815_v50  ;;  %v5804_v55 = vpop.f32.mrb[218].mxu1 }
0x11d9   :  { %v5805_v1 = vadd.f32 %v5804_v55, %v11811_v29  ;;  %v5806_v27 = vpop.f32.mrb[219].mxu1 }
0x11da   :  { %v6377_v2 = vpack.c.bf16 %v5803_v3, %v5801_v9  ;;  %v5807_v19 = vadd.f32 %v5806_v27, %v11815_v50 }
0x11dc   :  { %6071 = vst [vmem:[#allocation8 + $0xa0] sm:$0xff] %v6377_v2  ;;  %v6378_v44 = vpack.c.bf16 %v5807_v19, %v5805_v1 }
0x11de   :  { %6072 = vst [vmem:[#allocation8 + $0xa8] sm:$0xff] %v6378_v44  ;;  %v5810_v14 = vpop.f32.mrb[220].mxu1 }
0x11df   :  { %v5811_v43 = vadd.f32 %v5810_v14, %v11811_v29  ;;  %v5812_v28 = vpop.f32.mrb[221].mxu1 }
0x11e0   :  { %v5813_v30 = vadd.f32 %v5812_v28, %v11815_v50  ;;  %v5814_v31 = vpop.f32.mrb[222].mxu1 }
0x11e1   :  { %v5815_v39 = vadd.f32 %v5814_v31, %v11811_v29  ;;  %v5816_v58 = vpop.f32.mrb[223].mxu1 }
0x11e2   :  { %v6379_v54 = vpack.c.bf16 %v5813_v30, %v5811_v43  ;;  %v5817_v5 = vadd.f32 %v5816_v58, %v11815_v50 }
0x11e4   :  { %6073 = vst [vmem:[#allocation8 + $0xb0] sm:$0xff] %v6379_v54  ;;  %v6380_v60 = vpack.c.bf16 %v5817_v5, %v5815_v39 }
0x11e6   :  { %6074 = vst [vmem:[#allocation8 + $0xb8] sm:$0xff] %v6380_v60 }
0x1210   :  { %v5820_v62 = vpop.f32.mrb[224].mxu1 }
0x1211   :  { %v5821_v35 = vadd.f32 %v5820_v62, %v11811_v29  ;;  %v5822_v6 = vpop.f32.mrb[225].mxu1 }
0x1212   :  { %v5823_v11 = vadd.f32 %v5822_v6, %v11815_v50  ;;  %v5824_v18 = vpop.f32.mrb[226].mxu1 }
0x1213   :  { %v5825_v26 = vadd.f32 %v5824_v18, %v11811_v29  ;;  %v5826_v12 = vpop.f32.mrb[227].mxu1 }
0x1214   :  { %v6381_v41 = vpack.c.bf16 %v5823_v11, %v5821_v35  ;;  %v5827_v57 = vadd.f32 %v5826_v12, %v11815_v50 }
0x1216   :  { %6075 = vst [vmem:[#allocation8 + $0xc0] sm:$0xff] %v6381_v41  ;;  %v6382_v8 = vpack.c.bf16 %v5827_v57, %v5825_v26 }
0x1218   :  { %6076 = vst [vmem:[#allocation8 + $0xc8] sm:$0xff] %v6382_v8  ;;  %v5830_v47 = vpop.f32.mrb[228].mxu1 }
0x1219   :  { %v5831_v34 = vadd.f32 %v5830_v47, %v11811_v29  ;;  %v5832_v37 = vpop.f32.mrb[229].mxu1 }
0x121a   :  { %v5833_v53 = vadd.f32 %v5832_v37, %v11815_v50  ;;  %v5834_v46 = vpop.f32.mrb[230].mxu1 }
0x121b   :  { %v5835_v22 = vadd.f32 %v5834_v46, %v11811_v29  ;;  %v5836_v4 = vpop.f32.mrb[231].mxu1 }
0x121c   :  { %v6383_v36 = vpack.c.bf16 %v5833_v53, %v5831_v34  ;;  %v5837_v17 = vadd.f32 %v5836_v4, %v11815_v50 }
0x121e   :  { %6077 = vst [vmem:[#allocation8 + $0xd0] sm:$0xff] %v6383_v36  ;;  %v6384_v10 = vpack.c.bf16 %v5837_v17, %v5835_v22 }
0x1220   :  { %6078 = vst [vmem:[#allocation8 + $0xd8] sm:$0xff] %v6384_v10  ;;  %v5840_v7 = vpop.f32.mrb[232].mxu1 }
0x1221   :  { %v5841_v61 = vadd.f32 %v5840_v7, %v11811_v29  ;;  %v5842_v0 = vpop.f32.mrb[233].mxu1 }
0x1222   :  { %v5843_v63 = vadd.f32 %v5842_v0, %v11815_v50  ;;  %v5844_v21 = vpop.f32.mrb[234].mxu1 }
0x1223   :  { %v5845_v38 = vadd.f32 %v5844_v21, %v11811_v29  ;;  %v5846_v42 = vpop.f32.mrb[235].mxu1 }
0x1224   :  { %v6385_v56 = vpack.c.bf16 %v5843_v63, %v5841_v61  ;;  %v5847_v45 = vadd.f32 %v5846_v42, %v11815_v50 }
0x1226   :  { %6079 = vst [vmem:[#allocation8 + $0xe0] sm:$0xff] %v6385_v56  ;;  %v6386_v51 = vpack.c.bf16 %v5847_v45, %v5845_v38 }
0x1228   :  { %6080 = vst [vmem:[#allocation8 + $0xe8] sm:$0xff] %v6386_v51  ;;  %v5850_v33 = vpop.f32.mrb[236].mxu1 }
0x1229   :  { %v5851_v13 = vadd.f32 %v5850_v33, %v11811_v29  ;;  %v5852_v20 = vpop.f32.mrb[237].mxu1 }
0x122a   :  { %v5853_v48 = vadd.f32 %v5852_v20, %v11815_v50  ;;  %v5854_v16 = vpop.f32.mrb[238].mxu1 }
0x122b   :  { %v5855_v40 = vadd.f32 %v5854_v16, %v11811_v29  ;;  %v5856_v32 = vpop.f32.mrb[239].mxu1 }
0x122c   :  { %v6387_v25 = vpack.c.bf16 %v5853_v48, %v5851_v13  ;;  %v5857_v59 = vadd.f32 %v5856_v32, %v11815_v50 }
0x122e   :  { %6081 = vst [vmem:[#allocation8 + $0xf0] sm:$0xff] %v6387_v25  ;;  %v6388_v23 = vpack.c.bf16 %v5857_v59, %v5855_v40 }
0x1230   :  { %6082 = vst [vmem:[#allocation8 + $0xf8] sm:$0xff] %v6388_v23 }
0x1231   :  { %8091 = shalt.err (!%p8088_p0)
}
0x1232   :  { %s8092_s13 = scalar_lea.hbm %s11969_s5, 4096 }
0x1233   :  { %p8093_p1 = scmp.ne.s32.totalorder %s11969_s5, %s8092_s13  ;;  %p8096_p2 = scmp.lt.u32.totalorder %s8092_s13, %s11969_s5 }
0x1235   :  { %p8098_p3 = pnand %p8096_p2, %p8093_p1 }
0x1237   :  { %8101 = shalt.err (!%p8098_p3)
}
0x1238   :  { %6094 = dma.vmem_to_hbm [thread:$0]  %s6089_s9, 4096, %s11969_s5, [#allocation4], %s8112_s1, %s8112_s1, %s8113_s17  }
0x1239   :  { %8106 = dma.done.wait [#allocation4], 4096  }
0x123a   :  { %8107 = vsyncadd [#allocation4], 4294963200 }
0x123b   :  { %6098 = vsyncpa [#allocation3], 1 }
0x123c   :  { %6099 = vsyncpa [#allocation6], 1 }
0x123d   :  { %6100 = vsyncpa [#allocation4], 1 }

</bundles_post_ra>
